<compile_context>
chip_gen: v5e
topology: v5e:2x2
jax: 0.10.0
libtpu: 0.0.40
codegen_flags: <defaults>
</compile_context>

<pallas_src>
import functools

import jax
import jax.numpy as jnp
from jax import lax
from jax.experimental import pallas as pl
from jax.experimental.pallas import tpu as pltpu


def _cutout_fix_kernel(x_ref, mask_ref, w1_ref, b1_ref, w2_ref, b2_ref,
                       o_ref, xcol_ref, midcol_ref, *, chunk, width):
    """Fused cutout + (3x3 conv + ReLU) x2 for one batch element.

    x_ref     : (1, HW, C)     f32   input, NHWC with spatial flattened (row = h*W+w)
    mask_ref  : (1, HW, C)     f32   cutout mask, pre-broadcast along C (resident)
    w1_ref    : (3, 3C, C)     bf16  conv1 weights, kw folded into the K dim
    b1_ref    : (1, C)         f32
    w2_ref    : (3, 3C, C)     bf16  conv2 weights
    b2_ref    : (1, C)         f32
    o_ref     : (1, HW, C)     f32   output
    xcol_ref  : ((H+2)*W, 3C)  bf16  width-im2col slab of the masked input (+ row halo)
    midcol_ref: ((H+2)*W, 3C)  bf16  width-im2col slab of the conv1 activation
    """
    _, HW, C = o_ref.shape
    W = width
    H = HW // W
    M = chunk * W
    n_chunks = H // chunk

    # Zero only the row-halo strips; the interiors are fully overwritten every
    # step.  Per-step (not program_id==0 gated) so it stays megacore-safe.
    halo = jnp.zeros((W, 3 * C), dtype=xcol_ref.dtype)
    xcol_ref[pl.ds(0, W), :] = halo
    xcol_ref[pl.ds((H + 1) * W, W), :] = halo
    midcol_ref[pl.ds(0, W), :] = halo
    midcol_ref[pl.ds((H + 1) * W, W), :] = halo

    def store_im2col(dst_ref, row_start, val):
        """val: (m, C) f32 in (h, w) row-major order.  Writes slab rows
        [row_start, row_start+m): channel block kw holds the value at width
        offset kw-1 (zero outside [0, W)).  Shifts use XLU sublane rotates."""
        m = val.shape[0]
        w_of_row = lax.broadcasted_iota(jnp.int32, (m, 1), 0) % W
        keep_l = (w_of_row != 0).astype(val.dtype)        # zero at w == 0
        keep_r = (w_of_row != W - 1).astype(val.dtype)    # zero at w == W-1
        left = pltpu.roll(val, shift=1, axis=0) * keep_l        # value at w-1
        right = pltpu.roll(val, shift=m - 1, axis=0) * keep_r   # value at w+1
        dst_ref[pl.ds(row_start, m), 0:C] = left.astype(dst_ref.dtype)
        dst_ref[pl.ds(row_start, m), C:2 * C] = val.astype(dst_ref.dtype)
        dst_ref[pl.ds(row_start, m), 2 * C:3 * C] = right.astype(dst_ref.dtype)

    # Cutout fused in-kernel: mask-multiply in f32, build the input im2col slab.
    x_masked = x_ref[0] * mask_ref[0]                     # (HW, C) f32
    store_im2col(xcol_ref, W, x_masked)                   # interior starts at row W

    # Hoisted bias loads (reused by every chunk; JAX does not CSE re-emitted loads).
    b1 = b1_ref[...]
    b2 = b2_ref[...]

    def conv_chunk(src_ref, w_ref, bias, r0):
        """3x3 'same' conv + bias + ReLU for output rows [r0, r0+chunk).
        Each kh tap is one aligned (M, 3C) slice -> one MXU matmul with K=3C
        (kw folded); bf16 inputs, f32 accumulate, f32 epilogue."""
        start = pl.multiple_of(r0 * W, 8)
        acc = jnp.dot(src_ref[pl.ds(start, M), :], w_ref[0],
                      preferred_element_type=jnp.float32)
        for dh in (1, 2):
            start = pl.multiple_of((r0 + dh) * W, 8)
            acc = acc + jnp.dot(src_ref[pl.ds(start, M), :], w_ref[dh],
                                preferred_element_type=jnp.float32)
        return jnp.maximum(acc + bias, 0.0)

    # ---- layer 1: xcol -> midcol interior ------------------------------------
    def body1(ci, carry):
        r0 = ci * chunk
        out = conv_chunk(xcol_ref, w1_ref, b1, r0)                     # (M, C) f32
        store_im2col(midcol_ref, pl.multiple_of((r0 + 1) * W, 8), out)
        return carry

    lax.fori_loop(0, n_chunks, body1, None, unroll=True)

    # ---- layer 2: midcol -> output -------------------------------------------
    def body2(ci, carry):
        r0 = ci * chunk
        out = conv_chunk(midcol_ref, w2_ref, b2, r0)                   # (M, C) f32
        o_ref[0, pl.ds(pl.multiple_of(r0 * W, 8), M), :] = out.astype(o_ref.dtype)
        return carry

    lax.fori_loop(0, n_chunks, body2, None, unroll=True)


def _pick_chunk(H, W):
    """Rows per matmul chunk: M = chunk*W targets 256 on v6e/v7x (256-deep MXU),
    128 on v5e/v5p/v4 (128x128 MXUs); falls back to 128 if the device kind is
    unknown.  Always a divisor of H."""
    try:
        kind = jax.devices()[0].device_kind.lower()
    except Exception:
        kind = ""
    target_m = 256 if ("v6" in kind or "v7" in kind) else 128
    chunk = max(1, min(H, target_m // max(W, 1)))
    while H % chunk:
        chunk -= 1
    return chunk


def cutout_fix_forward(x_nhwc, mask_hw, w1f, b1, w2f, b2, *, chunk=None):
    """x_nhwc: (N,H,W,C) f32; mask_hw: (H,W) f32 in {0,1}; w*f: (3,3C,C) bf16;
    b*: (C,) f32.  Returns (N,H,W,C) f32."""
    N, H, W, C = x_nhwc.shape
    if chunk is None:
        chunk = _pick_chunk(H, W)
    assert H % chunk == 0 and W % 8 == 0 and C % 128 == 0
    HW = H * W
    x_flat = x_nhwc.reshape(N, HW, C)                       # layout-preserving
    # Lane-dense resident mask: constant index_map => DMA'd once, stays in VMEM.
    mask = jnp.broadcast_to(mask_hw.reshape(HW, 1), (HW, C)).reshape(1, HW, C)
    kernel = functools.partial(_cutout_fix_kernel, chunk=chunk, width=W)

    flops = 4 * N * HW * 9 * C * C                          # 2 layers x 2*MACs
    bytes_accessed = ((2 * N * HW * C + HW * C + 2 * C) * 4
                      + (w1f.size + w2f.size) * 2)

    y_flat = pl.pallas_call(
        kernel,
        out_shape=jax.ShapeDtypeStruct((N, HW, C), x_nhwc.dtype),
        grid_spec=pltpu.PrefetchScalarGridSpec(
            num_scalar_prefetch=0,
            # TODO(synk): v7x wants a second (row-band / Cout-tile) grid axis so each
            # of its 2 TensorCores gets >=2 steps to pipeline; the real ch_=2048
            # weights additionally need Cout("parallel")/Cin("arbitrary") tiling.
            grid=(N,),
            in_specs=[
                pl.BlockSpec((1, HW, C), lambda n: (n, 0, 0)),       # x
                pl.BlockSpec((1, HW, C), lambda n: (0, 0, 0)),       # mask (resident)
                pl.BlockSpec((3, 3 * C, C), lambda n: (0, 0, 0)),    # w1 (folded)
                pl.BlockSpec((1, C), lambda n: (0, 0)),              # b1
                pl.BlockSpec((3, 3 * C, C), lambda n: (0, 0, 0)),    # w2 (folded)
                pl.BlockSpec((1, C), lambda n: (0, 0)),              # b2
            ],
            out_specs=pl.BlockSpec((1, HW, C), lambda n: (n, 0, 0)),
            scratch_shapes=[
                pltpu.VMEM(((H + 2) * W, 3 * C), jnp.bfloat16),  # input im2col slab
                pltpu.VMEM(((H + 2) * W, 3 * C), jnp.bfloat16),  # conv1 act im2col slab
            ],
        ),
        compiler_params=pltpu.CompilerParams(
            dimension_semantics=("parallel",)),
        cost_estimate=pl.CostEstimate(flops=flops, transcendentals=0,
                                      bytes_accessed=bytes_accessed),
    )(x_flat, mask, w1f, b1.reshape(1, C), w2f, b2.reshape(1, C))
    return y_flat.reshape(N, H, W, C)


def _reference_forward(x_nhwc, mask_hw, w1, b1, w2, b2):
    """Pure-JAX f32 reference: cutout + (3x3 'same' conv + ReLU) x2 (NHWC/HWIO)."""
    xm = x_nhwc * mask_hw[None, :, :, None]

    def conv(v, w, b):
        y = lax.conv_general_dilated(
            v, w, window_strides=(1, 1), padding="SAME",
            dimension_numbers=("NHWC", "HWIO", "NHWC"),
            precision=lax.Precision.HIGHEST)
        return jnp.maximum(y + b, 0.0)

    return conv(conv(xm, w1, b1), w2, b2)


class CutoutLayerPallas:
    """JAX/Pallas port of CutoutLayer (NCHW public interface, flat-NHWC inside)."""

    def __init__(self, ratio, size, channels, key):
        self.drop_num = int(ratio * size[0] * size[1])
        assert self.drop_num > 0
        self.map_size = size
        C = channels
        self.channels = C
        k1, k2 = jax.random.split(key)
        std = (2.0 / (9.0 * C)) ** 0.5  # kaiming-style, deterministic
        # (kh, kw, Cin, Cout) f32 master copies (also used by the f32 reference check).
        self.w1 = jax.random.normal(k1, (3, 3, C, C), jnp.float32) * std
        self.w2 = jax.random.normal(k2, (3, 3, C, C), jnp.float32) * std
        # Fold kw into the contraction dim and pre-cast to bf16 for the MXU.
        self.w1f = self.w1.reshape(3, 3 * C, C).astype(jnp.bfloat16)
        self.w2f = self.w2.reshape(3, 3 * C, C).astype(jnp.bfloat16)
        self.b1 = jnp.zeros((C,), jnp.float32)
        self.b2 = jnp.zeros((C,), jnp.float32)

    def drop_pos(self, key):
        H, W = self.map_size
        rand_ind = jax.random.permutation(key, H * W)[: self.drop_num]
        # TODO(synk): reference quirk: size[0] used for both // and % (square maps).
        ind_x = (rand_ind // self.map_size[0]).astype(jnp.int32)
        ind_y = (rand_ind % self.map_size[0]).astype(jnp.int32)
        return ind_x, ind_y

    def __call__(self, feat_nchw, key, drop=True):
        if not drop:
            return feat_nchw, None, None
        N, C, H, W = feat_nchw.shape
        pos_x, pos_y = self.drop_pos(key)
        pos_flat = pos_x * W + pos_y
        x_nhwc = jnp.transpose(feat_nchw, (0, 2, 3, 1))      # interface only
        x_rows = x_nhwc.reshape(N, H * W, C)
        # Original values at dropped positions (simple row gather on flat NHWC).
        drop_feat = jnp.transpose(x_rows[:, pos_flat, :], (0, 2, 1))   # (N, C, drop)
        # Cutout mask (1 = keep, 0 = drop); the zeroing itself is fused in-kernel.
        mask = jnp.ones((H, W), jnp.float32).at[pos_x, pos_y].set(0.0)
        # Fused Pallas kernel (cutout + conv+ReLU + conv+ReLU).
        y_nhwc = cutout_fix_forward(x_nhwc, mask, self.w1f, self.b1,
                                    self.w2f, self.b2)
        feat_out = jnp.transpose(y_nhwc, (0, 3, 1, 2))       # back to NCHW
        fix_feat = jnp.transpose(
            y_nhwc.reshape(N, H * W, C)[:, pos_flat, :], (0, 2, 1))     # (N, C, drop)
        return feat_out, drop_feat, fix_feat


if __name__ == "__main__":
    key = jax.random.PRNGKey(0)
    k_feat, k_params, k_drop = jax.random.split(key, 3)

    # Small shapes consistent with the module (orig ch_=2048 shrunk to 128).
    N, C, H, W = 2, 128, 16, 16
    ratio = 0.1

    layer = CutoutLayerPallas(ratio=ratio, size=(H, W), channels=C, key=k_params)
    feat = jax.random.normal(k_feat, (N, C, H, W), jnp.float32)

    feat_out, drop_feat, fix_feat = layer(feat, k_drop, drop=True)
    jax.block_until_ready((feat_out, drop_feat, fix_feat))

    assert feat_out.shape == (N, C, H, W)
    assert drop_feat.shape == (N, C, layer.drop_num)
    assert fix_feat.shape == (N, C, layer.drop_num)
    assert bool(jnp.all(feat_out >= 0.0))  # ReLU output

    # Tolerance check vs. a pure-JAX f32 reference (bf16 MXU inputs + bf16
    # intermediate activation => ~1e-2 relative error expected).
    pos_x, pos_y = layer.drop_pos(k_drop)
    mask_hw = jnp.ones((H, W), jnp.float32).at[pos_x, pos_y].set(0.0)
    x_nhwc = jnp.transpose(feat, (0, 2, 3, 1))
    y_ref = _reference_forward(x_nhwc, mask_hw, layer.w1, layer.b1,
                               layer.w2, layer.b2)
    y_pal = jnp.transpose(feat_out, (0, 3, 1, 2)).transpose(0, 2, 3, 1) \
        if False else jnp.transpose(feat_out, (0, 2, 3, 1))
    err = float(jnp.max(jnp.abs(y_pal - y_ref)) /
                jnp.maximum(1.0, jnp.max(jnp.abs(y_ref))))
    assert err < 5e-2, f"pallas vs f32 reference mismatch: rel-max err = {err}"

    print("KERNEL_OK")
</pallas_src>

<mosaic_0001>
module attributes {stable_mosaic.version = 11 : i64} {
  func.func @_cutout_fix_kernel(%arg0: i32, %arg1: memref<1x256x128xf32, #tpu.memory_space<vmem>>, %arg2: memref<1x256x128xf32, #tpu.memory_space<vmem>>, %arg3: memref<3x384x128xbf16, #tpu.memory_space<vmem>>, %arg4: memref<1x128xf32, #tpu.memory_space<vmem>>, %arg5: memref<3x384x128xbf16, #tpu.memory_space<vmem>>, %arg6: memref<1x128xf32, #tpu.memory_space<vmem>>, %arg7: memref<1x256x128xf32, #tpu.memory_space<vmem>>, %arg8: memref<288x384xbf16, #tpu.memory_space<vmem>>, %arg9: memref<288x384xbf16, #tpu.memory_space<vmem>>) attributes {dimension_semantics = [#tpu.dimension_semantics<parallel>], iteration_bounds = array<i64: 2>, scalar_prefetch = 0 : i64, scratch_operands = 2 : i64, tpu.core_type = #tpu.core_type<tc>, window_params = [{transform_indices = @transform_0, window_bounds = array<i64: 1, 256, 128>}, {pipeline_mode = #tpu.pipeline_mode<synchronous>, transform_indices = @transform_1, window_bounds = array<i64: 1, 256, 128>}, {pipeline_mode = #tpu.pipeline_mode<synchronous>, transform_indices = @transform_2, window_bounds = array<i64: 3, 384, 128>}, {pipeline_mode = #tpu.pipeline_mode<synchronous>, transform_indices = @transform_3, window_bounds = array<i64: 1, 128>}, {pipeline_mode = #tpu.pipeline_mode<synchronous>, transform_indices = @transform_4, window_bounds = array<i64: 3, 384, 128>}, {pipeline_mode = #tpu.pipeline_mode<synchronous>, transform_indices = @transform_5, window_bounds = array<i64: 1, 128>}, {transform_indices = @transform_6, window_bounds = array<i64: 1, 256, 128>}]} {
    %cst = arith.constant 0.000000e+00 : bf16
    %0 = vector.broadcast %cst : bf16 to vector<16x384xbf16>
    %c0 = arith.constant 0 : index
    %c0_0 = arith.constant 0 : index
    %1 = vector.load %arg8[%c0, %c0_0] : memref<288x384xbf16, #tpu.memory_space<vmem>>, vector<16x384xbf16>
    tpu.vector_store %arg8[%c0, %c0_0], %0 {strides = array<i32>} : memref<288x384xbf16, #tpu.memory_space<vmem>>, vector<16x384xbf16>,
    %c272 = arith.constant 272 : index
    %c0_1 = arith.constant 0 : index
    %2 = vector.load %arg8[%c272, %c0_1] : memref<288x384xbf16, #tpu.memory_space<vmem>>, vector<16x384xbf16>
    tpu.vector_store %arg8[%c272, %c0_1], %0 {strides = array<i32>} : memref<288x384xbf16, #tpu.memory_space<vmem>>, vector<16x384xbf16>,
    %c0_2 = arith.constant 0 : index
    %c0_3 = arith.constant 0 : index
    %3 = vector.load %arg9[%c0_2, %c0_3] : memref<288x384xbf16, #tpu.memory_space<vmem>>, vector<16x384xbf16>
    tpu.vector_store %arg9[%c0_2, %c0_3], %0 {strides = array<i32>} : memref<288x384xbf16, #tpu.memory_space<vmem>>, vector<16x384xbf16>,
    %c272_4 = arith.constant 272 : index
    %c0_5 = arith.constant 0 : index
    %4 = vector.load %arg9[%c272_4, %c0_5] : memref<288x384xbf16, #tpu.memory_space<vmem>>, vector<16x384xbf16>
    tpu.vector_store %arg9[%c272_4, %c0_5], %0 {strides = array<i32>} : memref<288x384xbf16, #tpu.memory_space<vmem>>, vector<16x384xbf16>,
    %c0_6 = arith.constant 0 : index
    %c0_7 = arith.constant 0 : index
    %c0_8 = arith.constant 0 : index
    %5 = vector.load %arg1[%c0_6, %c0_7, %c0_8] : memref<1x256x128xf32, #tpu.memory_space<vmem>>, vector<1x256x128xf32>
    %6 = vector.shape_cast %5 : vector<1x256x128xf32> to vector<256x128xf32>
    %c0_9 = arith.constant 0 : index
    %c0_10 = arith.constant 0 : index
    %c0_11 = arith.constant 0 : index
    %7 = vector.load %arg2[%c0_9, %c0_10, %c0_11] : memref<1x256x128xf32, #tpu.memory_space<vmem>>, vector<1x256x128xf32>
    %8 = vector.shape_cast %7 : vector<1x256x128xf32> to vector<256x128xf32>
    %9 = arith.mulf %6, %8 : vector<256x128xf32>
    %10 = tpu.iota {dimensions = array<i32: 0>} : vector<256x1xi32>
    %c16_i32 = arith.constant 16 : i32
    %c0_i32 = arith.constant 0 : i32
    %11 = arith.cmpi eq, %c16_i32, %c0_i32 : i32
    %c1_i32 = arith.constant 1 : i32
    %12 = arith.select %11, %c1_i32, %c16_i32 : i32
    %13 = vector.broadcast %12 : i32 to vector<256x1xi32>
    %14 = arith.remsi %10, %13 : vector<256x1xi32>
    %c0_i32_12 = arith.constant 0 : i32
    %15 = vector.broadcast %c0_i32_12 : i32 to vector<256x1xi32>
    %16 = arith.cmpi ne, %14, %15 : vector<256x1xi32>
    %c0_i32_13 = arith.constant 0 : i32
    %17 = vector.broadcast %c0_i32_13 : i32 to vector<256x1xi32>
    %18 = arith.cmpi slt, %14, %17 : vector<256x1xi32>
    %c0_i32_14 = arith.constant 0 : i32
    %19 = arith.cmpi slt, %12, %c0_i32_14 : i32
    %20 = vector.broadcast %19 : i1 to vector<256x1xi1>
    %21 = vector.broadcast %20 : vector<256x1xi1> to vector<256x1xi1>
    %22 = arith.xori %18, %21 : vector<256x1xi1>
    %23 = arith.andi %22, %16 : vector<256x1xi1>
    %24 = vector.broadcast %12 : i32 to vector<256x1xi32>
    %25 = arith.addi %14, %24 : vector<256x1xi32>
    %26 = arith.select %23, %25, %14 : vector<256x1xi1>, vector<256x1xi32>
    %c0_i32_15 = arith.constant 0 : i32
    %27 = vector.broadcast %c0_i32_15 : i32 to vector<256x1xi32>
    %28 = arith.cmpi ne, %26, %27 : vector<256x1xi32>
    %29 = arith.extui %28 : vector<256x1xi1> to vector<256x1xi32>
    %30 = arith.sitofp %29 : vector<256x1xi32> to vector<256x1xf32>
    %c15_i32 = arith.constant 15 : i32
    %31 = vector.broadcast %c15_i32 : i32 to vector<256x1xi32>
    %32 = arith.cmpi ne, %26, %31 : vector<256x1xi32>
    %33 = arith.extui %32 : vector<256x1xi1> to vector<256x1xi32>
    %34 = arith.sitofp %33 : vector<256x1xi32> to vector<256x1xf32>
    %c1_i32_16 = arith.constant 1 : i32
    %35 = tpu.dynamic_rotate %9 by %c1_i32_16 dim 0 : vector<256x128xf32>, i32 -> vector<256x128xf32>
    %36 = vector.broadcast %30 : vector<256x1xf32> to vector<256x128xf32>
    %37 = arith.mulf %35, %36 : vector<256x128xf32>
    %c255_i32 = arith.constant 255 : i32
    %38 = tpu.dynamic_rotate %9 by %c255_i32 dim 0 : vector<256x128xf32>, i32 -> vector<256x128xf32>
    %39 = vector.broadcast %34 : vector<256x1xf32> to vector<256x128xf32>
    %40 = arith.mulf %38, %39 : vector<256x128xf32>
    %41 = arith.truncf %37 : vector<256x128xf32> to vector<256x128xbf16>
    %c16 = arith.constant 16 : index
    %c0_17 = arith.constant 0 : index
    %42 = vector.load %arg8[%c16, %c0_17] : memref<288x384xbf16, #tpu.memory_space<vmem>>, vector<256x128xbf16>
    tpu.vector_store %arg8[%c16, %c0_17], %41 {strides = array<i32>} : memref<288x384xbf16, #tpu.memory_space<vmem>>, vector<256x128xbf16>,
    %43 = arith.truncf %9 : vector<256x128xf32> to vector<256x128xbf16>
    %c16_18 = arith.constant 16 : index
    %c128 = arith.constant 128 : index
    %44 = vector.load %arg8[%c16_18, %c128] : memref<288x384xbf16, #tpu.memory_space<vmem>>, vector<256x128xbf16>
    tpu.vector_store %arg8[%c16_18, %c128], %43 {strides = array<i32>} : memref<288x384xbf16, #tpu.memory_space<vmem>>, vector<256x128xbf16>,
    %45 = arith.truncf %40 : vector<256x128xf32> to vector<256x128xbf16>
    %c16_19 = arith.constant 16 : index
    %c256 = arith.constant 256 : index
    %46 = vector.load %arg8[%c16_19, %c256] : memref<288x384xbf16, #tpu.memory_space<vmem>>, vector<256x128xbf16>
    tpu.vector_store %arg8[%c16_19, %c256], %45 {strides = array<i32>} : memref<288x384xbf16, #tpu.memory_space<vmem>>, vector<256x128xbf16>,
    %c0_20 = arith.constant 0 : index
    %c0_21 = arith.constant 0 : index
    %47 = vector.load %arg4[%c0_20, %c0_21] : memref<1x128xf32, #tpu.memory_space<vmem>>, vector<1x128xf32>
    %c0_22 = arith.constant 0 : index
    %c0_23 = arith.constant 0 : index
    %48 = vector.load %arg6[%c0_22, %c0_23] : memref<1x128xf32, #tpu.memory_space<vmem>>, vector<1x128xf32>
    %c0_i32_24 = arith.constant 0 : i32
    %c8_i32 = arith.constant 8 : i32
    %49 = arith.muli %c0_i32_24, %c8_i32 : i32
    %c16_i32_25 = arith.constant 16 : i32
    %50 = arith.muli %49, %c16_i32_25 : i32
    %51 = tpu.assume_multiple %50, 8 : i32
    %52 = arith.index_cast %51 : i32 to index
    %c0_26 = arith.constant 0 : index
    %53 = vector.load %arg8[%52, %c0_26] : memref<288x384xbf16, #tpu.memory_space<vmem>>, vector<128x384xbf16>
    %c0_27 = arith.constant 0 : index
    %c0_28 = arith.constant 0 : index
    %c0_29 = arith.constant 0 : index
    %54 = vector.load %arg3[%c0_27, %c0_28, %c0_29] : memref<3x384x128xbf16, #tpu.memory_space<vmem>>, vector<1x384x128xbf16>
    %55 = vector.shape_cast %54 : vector<1x384x128xbf16> to vector<384x128xbf16>
    %cst_30 = arith.constant dense<0.000000e+00> : vector<128x128xf32>
    %56 = tpu.matmul %53, %55, %cst_30 {dimension_numbers = #tpu.dot_dimension_numbers<[1], [0], [0], [1], [0, 0, 1, 1], [], []>} : vector<128x384xbf16>, vector<384x128xbf16>, vector<128x128xf32> -> vector<128x128xf32>
    %c1_i32_31 = arith.constant 1 : i32
    %57 = arith.addi %49, %c1_i32_31 : i32
    %c16_i32_32 = arith.constant 16 : i32
    %58 = arith.muli %57, %c16_i32_32 : i32
    %59 = tpu.assume_multiple %58, 8 : i32
    %60 = arith.index_cast %59 : i32 to index
    %c0_33 = arith.constant 0 : index
    %61 = vector.load %arg8[%60, %c0_33] : memref<288x384xbf16, #tpu.memory_space<vmem>>, vector<128x384xbf16>
    %c1 = arith.constant 1 : index
    %c0_34 = arith.constant 0 : index
    %c0_35 = arith.constant 0 : index
    %62 = vector.load %arg3[%c1, %c0_34, %c0_35] : memref<3x384x128xbf16, #tpu.memory_space<vmem>>, vector<1x384x128xbf16>
    %63 = vector.shape_cast %62 : vector<1x384x128xbf16> to vector<384x128xbf16>
    %cst_36 = arith.constant dense<0.000000e+00> : vector<128x128xf32>
    %64 = tpu.matmul %61, %63, %cst_36 {dimension_numbers = #tpu.dot_dimension_numbers<[1], [0], [0], [1], [0, 0, 1, 1], [], []>} : vector<128x384xbf16>, vector<384x128xbf16>, vector<128x128xf32> -> vector<128x128xf32>
    %65 = arith.addf %56, %64 : vector<128x128xf32>
    %c2_i32 = arith.constant 2 : i32
    %66 = arith.addi %49, %c2_i32 : i32
    %c16_i32_37 = arith.constant 16 : i32
    %67 = arith.muli %66, %c16_i32_37 : i32
    %68 = tpu.assume_multiple %67, 8 : i32
    %69 = arith.index_cast %68 : i32 to index
    %c0_38 = arith.constant 0 : index
    %70 = vector.load %arg8[%69, %c0_38] : memref<288x384xbf16, #tpu.memory_space<vmem>>, vector<128x384xbf16>
    %c2 = arith.constant 2 : index
    %c0_39 = arith.constant 0 : index
    %c0_40 = arith.constant 0 : index
    %71 = vector.load %arg3[%c2, %c0_39, %c0_40] : memref<3x384x128xbf16, #tpu.memory_space<vmem>>, vector<1x384x128xbf16>
    %72 = vector.shape_cast %71 : vector<1x384x128xbf16> to vector<384x128xbf16>
    %cst_41 = arith.constant dense<0.000000e+00> : vector<128x128xf32>
    %73 = tpu.matmul %70, %72, %cst_41 {dimension_numbers = #tpu.dot_dimension_numbers<[1], [0], [0], [1], [0, 0, 1, 1], [], []>} : vector<128x384xbf16>, vector<384x128xbf16>, vector<128x128xf32> -> vector<128x128xf32>
    %74 = arith.addf %65, %73 : vector<128x128xf32>
    %75 = vector.broadcast %47 : vector<1x128xf32> to vector<128x128xf32>
    %76 = arith.addf %74, %75 : vector<128x128xf32>
    %cst_42 = arith.constant 0.000000e+00 : f32
    %77 = vector.broadcast %cst_42 : f32 to vector<128x128xf32>
    %78 = arith.maximumf %76, %77 : vector<128x128xf32>
    %c1_i32_43 = arith.constant 1 : i32
    %79 = arith.addi %49, %c1_i32_43 : i32
    %c16_i32_44 = arith.constant 16 : i32
    %80 = arith.muli %79, %c16_i32_44 : i32
    %81 = tpu.assume_multiple %80, 8 : i32
    %82 = tpu.iota {dimensions = array<i32: 0>} : vector<128x1xi32>
    %c16_i32_45 = arith.constant 16 : i32
    %c0_i32_46 = arith.constant 0 : i32
    %83 = arith.cmpi eq, %c16_i32_45, %c0_i32_46 : i32
    %c1_i32_47 = arith.constant 1 : i32
    %84 = arith.select %83, %c1_i32_47, %c16_i32_45 : i32
    %85 = vector.broadcast %84 : i32 to vector<128x1xi32>
    %86 = arith.remsi %82, %85 : vector<128x1xi32>
    %c0_i32_48 = arith.constant 0 : i32
    %87 = vector.broadcast %c0_i32_48 : i32 to vector<128x1xi32>
    %88 = arith.cmpi ne, %86, %87 : vector<128x1xi32>
    %c0_i32_49 = arith.constant 0 : i32
    %89 = vector.broadcast %c0_i32_49 : i32 to vector<128x1xi32>
    %90 = arith.cmpi slt, %86, %89 : vector<128x1xi32>
    %c0_i32_50 = arith.constant 0 : i32
    %91 = arith.cmpi slt, %84, %c0_i32_50 : i32
    %92 = vector.broadcast %91 : i1 to vector<128x1xi1>
    %93 = vector.broadcast %92 : vector<128x1xi1> to vector<128x1xi1>
    %94 = arith.xori %90, %93 : vector<128x1xi1>
    %95 = arith.andi %94, %88 : vector<128x1xi1>
    %96 = vector.broadcast %84 : i32 to vector<128x1xi32>
    %97 = arith.addi %86, %96 : vector<128x1xi32>
    %98 = arith.select %95, %97, %86 : vector<128x1xi1>, vector<128x1xi32>
    %c0_i32_51 = arith.constant 0 : i32
    %99 = vector.broadcast %c0_i32_51 : i32 to vector<128x1xi32>
    %100 = arith.cmpi ne, %98, %99 : vector<128x1xi32>
    %101 = arith.extui %100 : vector<128x1xi1> to vector<128x1xi32>
    %102 = arith.sitofp %101 : vector<128x1xi32> to vector<128x1xf32>
    %c15_i32_52 = arith.constant 15 : i32
    %103 = vector.broadcast %c15_i32_52 : i32 to vector<128x1xi32>
    %104 = arith.cmpi ne, %98, %103 : vector<128x1xi32>
    %105 = arith.extui %104 : vector<128x1xi1> to vector<128x1xi32>
    %106 = arith.sitofp %105 : vector<128x1xi32> to vector<128x1xf32>
    %c1_i32_53 = arith.constant 1 : i32
    %107 = tpu.dynamic_rotate %78 by %c1_i32_53 dim 0 : vector<128x128xf32>, i32 -> vector<128x128xf32>
    %108 = vector.broadcast %102 : vector<128x1xf32> to vector<128x128xf32>
    %109 = arith.mulf %107, %108 : vector<128x128xf32>
    %c127_i32 = arith.constant 127 : i32
    %110 = tpu.dynamic_rotate %78 by %c127_i32 dim 0 : vector<128x128xf32>, i32 -> vector<128x128xf32>
    %111 = vector.broadcast %106 : vector<128x1xf32> to vector<128x128xf32>
    %112 = arith.mulf %110, %111 : vector<128x128xf32>
    %113 = arith.truncf %109 : vector<128x128xf32> to vector<128x128xbf16>
    %114 = arith.index_cast %81 : i32 to index
    %c0_54 = arith.constant 0 : index
    %115 = vector.load %arg9[%114, %c0_54] : memref<288x384xbf16, #tpu.memory_space<vmem>>, vector<128x128xbf16>
    tpu.vector_store %arg9[%114, %c0_54], %113 {strides = array<i32>} : memref<288x384xbf16, #tpu.memory_space<vmem>>, vector<128x128xbf16>,
    %116 = arith.truncf %78 : vector<128x128xf32> to vector<128x128xbf16>
    %117 = arith.index_cast %81 : i32 to index
    %c128_55 = arith.constant 128 : index
    %118 = vector.load %arg9[%117, %c128_55] : memref<288x384xbf16, #tpu.memory_space<vmem>>, vector<128x128xbf16>
    tpu.vector_store %arg9[%117, %c128_55], %116 {strides = array<i32>} : memref<288x384xbf16, #tpu.memory_space<vmem>>, vector<128x128xbf16>,
    %119 = arith.truncf %112 : vector<128x128xf32> to vector<128x128xbf16>
    %120 = arith.index_cast %81 : i32 to index
    %c256_56 = arith.constant 256 : index
    %121 = vector.load %arg9[%120, %c256_56] : memref<288x384xbf16, #tpu.memory_space<vmem>>, vector<128x128xbf16>
    tpu.vector_store %arg9[%120, %c256_56], %119 {strides = array<i32>} : memref<288x384xbf16, #tpu.memory_space<vmem>>, vector<128x128xbf16>,
    %c1_i32_57 = arith.constant 1 : i32
    %c8_i32_58 = arith.constant 8 : i32
    %122 = arith.muli %c1_i32_57, %c8_i32_58 : i32
    %c16_i32_59 = arith.constant 16 : i32
    %123 = arith.muli %122, %c16_i32_59 : i32
    %124 = tpu.assume_multiple %123, 8 : i32
    %125 = arith.index_cast %124 : i32 to index
    %c0_60 = arith.constant 0 : index
    %126 = vector.load %arg8[%125, %c0_60] : memref<288x384xbf16, #tpu.memory_space<vmem>>, vector<128x384xbf16>
    %c0_61 = arith.constant 0 : index
    %c0_62 = arith.constant 0 : index
    %c0_63 = arith.constant 0 : index
    %127 = vector.load %arg3[%c0_61, %c0_62, %c0_63] : memref<3x384x128xbf16, #tpu.memory_space<vmem>>, vector<1x384x128xbf16>
    %128 = vector.shape_cast %127 : vector<1x384x128xbf16> to vector<384x128xbf16>
    %cst_64 = arith.constant dense<0.000000e+00> : vector<128x128xf32>
    %129 = tpu.matmul %126, %128, %cst_64 {dimension_numbers = #tpu.dot_dimension_numbers<[1], [0], [0], [1], [0, 0, 1, 1], [], []>} : vector<128x384xbf16>, vector<384x128xbf16>, vector<128x128xf32> -> vector<128x128xf32>
    %c1_i32_65 = arith.constant 1 : i32
    %130 = arith.addi %122, %c1_i32_65 : i32
    %c16_i32_66 = arith.constant 16 : i32
    %131 = arith.muli %130, %c16_i32_66 : i32
    %132 = tpu.assume_multiple %131, 8 : i32
    %133 = arith.index_cast %132 : i32 to index
    %c0_67 = arith.constant 0 : index
    %134 = vector.load %arg8[%133, %c0_67] : memref<288x384xbf16, #tpu.memory_space<vmem>>, vector<128x384xbf16>
    %c1_68 = arith.constant 1 : index
    %c0_69 = arith.constant 0 : index
    %c0_70 = arith.constant 0 : index
    %135 = vector.load %arg3[%c1_68, %c0_69, %c0_70] : memref<3x384x128xbf16, #tpu.memory_space<vmem>>, vector<1x384x128xbf16>
    %136 = vector.shape_cast %135 : vector<1x384x128xbf16> to vector<384x128xbf16>
    %cst_71 = arith.constant dense<0.000000e+00> : vector<128x128xf32>
    %137 = tpu.matmul %134, %136, %cst_71 {dimension_numbers = #tpu.dot_dimension_numbers<[1], [0], [0], [1], [0, 0, 1, 1], [], []>} : vector<128x384xbf16>, vector<384x128xbf16>, vector<128x128xf32> -> vector<128x128xf32>
    %138 = arith.addf %129, %137 : vector<128x128xf32>
    %c2_i32_72 = arith.constant 2 : i32
    %139 = arith.addi %122, %c2_i32_72 : i32
    %c16_i32_73 = arith.constant 16 : i32
    %140 = arith.muli %139, %c16_i32_73 : i32
    %141 = tpu.assume_multiple %140, 8 : i32
    %142 = arith.index_cast %141 : i32 to index
    %c0_74 = arith.constant 0 : index
    %143 = vector.load %arg8[%142, %c0_74] : memref<288x384xbf16, #tpu.memory_space<vmem>>, vector<128x384xbf16>
    %c2_75 = arith.constant 2 : index
    %c0_76 = arith.constant 0 : index
    %c0_77 = arith.constant 0 : index
    %144 = vector.load %arg3[%c2_75, %c0_76, %c0_77] : memref<3x384x128xbf16, #tpu.memory_space<vmem>>, vector<1x384x128xbf16>
    %145 = vector.shape_cast %144 : vector<1x384x128xbf16> to vector<384x128xbf16>
    %cst_78 = arith.constant dense<0.000000e+00> : vector<128x128xf32>
    %146 = tpu.matmul %143, %145, %cst_78 {dimension_numbers = #tpu.dot_dimension_numbers<[1], [0], [0], [1], [0, 0, 1, 1], [], []>} : vector<128x384xbf16>, vector<384x128xbf16>, vector<128x128xf32> -> vector<128x128xf32>
    %147 = arith.addf %138, %146 : vector<128x128xf32>
    %148 = vector.broadcast %47 : vector<1x128xf32> to vector<128x128xf32>
    %149 = arith.addf %147, %148 : vector<128x128xf32>
    %cst_79 = arith.constant 0.000000e+00 : f32
    %150 = vector.broadcast %cst_79 : f32 to vector<128x128xf32>
    %151 = arith.maximumf %149, %150 : vector<128x128xf32>
    %c1_i32_80 = arith.constant 1 : i32
    %152 = arith.addi %122, %c1_i32_80 : i32
    %c16_i32_81 = arith.constant 16 : i32
    %153 = arith.muli %152, %c16_i32_81 : i32
    %154 = tpu.assume_multiple %153, 8 : i32
    %155 = tpu.iota {dimensions = array<i32: 0>} : vector<128x1xi32>
    %c16_i32_82 = arith.constant 16 : i32
    %c0_i32_83 = arith.constant 0 : i32
    %156 = arith.cmpi eq, %c16_i32_82, %c0_i32_83 : i32
    %c1_i32_84 = arith.constant 1 : i32
    %157 = arith.select %156, %c1_i32_84, %c16_i32_82 : i32
    %158 = vector.broadcast %157 : i32 to vector<128x1xi32>
    %159 = arith.remsi %155, %158 : vector<128x1xi32>
    %c0_i32_85 = arith.constant 0 : i32
    %160 = vector.broadcast %c0_i32_85 : i32 to vector<128x1xi32>
    %161 = arith.cmpi ne, %159, %160 : vector<128x1xi32>
    %c0_i32_86 = arith.constant 0 : i32
    %162 = vector.broadcast %c0_i32_86 : i32 to vector<128x1xi32>
    %163 = arith.cmpi slt, %159, %162 : vector<128x1xi32>
    %c0_i32_87 = arith.constant 0 : i32
    %164 = arith.cmpi slt, %157, %c0_i32_87 : i32
    %165 = vector.broadcast %164 : i1 to vector<128x1xi1>
    %166 = vector.broadcast %165 : vector<128x1xi1> to vector<128x1xi1>
    %167 = arith.xori %163, %166 : vector<128x1xi1>
    %168 = arith.andi %167, %161 : vector<128x1xi1>
    %169 = vector.broadcast %157 : i32 to vector<128x1xi32>
    %170 = arith.addi %159, %169 : vector<128x1xi32>
    %171 = arith.select %168, %170, %159 : vector<128x1xi1>, vector<128x1xi32>
    %c0_i32_88 = arith.constant 0 : i32
    %172 = vector.broadcast %c0_i32_88 : i32 to vector<128x1xi32>
    %173 = arith.cmpi ne, %171, %172 : vector<128x1xi32>
    %174 = arith.extui %173 : vector<128x1xi1> to vector<128x1xi32>
    %175 = arith.sitofp %174 : vector<128x1xi32> to vector<128x1xf32>
    %c15_i32_89 = arith.constant 15 : i32
    %176 = vector.broadcast %c15_i32_89 : i32 to vector<128x1xi32>
    %177 = arith.cmpi ne, %171, %176 : vector<128x1xi32>
    %178 = arith.extui %177 : vector<128x1xi1> to vector<128x1xi32>
    %179 = arith.sitofp %178 : vector<128x1xi32> to vector<128x1xf32>
    %c1_i32_90 = arith.constant 1 : i32
    %180 = tpu.dynamic_rotate %151 by %c1_i32_90 dim 0 : vector<128x128xf32>, i32 -> vector<128x128xf32>
    %181 = vector.broadcast %175 : vector<128x1xf32> to vector<128x128xf32>
    %182 = arith.mulf %180, %181 : vector<128x128xf32>
    %c127_i32_91 = arith.constant 127 : i32
    %183 = tpu.dynamic_rotate %151 by %c127_i32_91 dim 0 : vector<128x128xf32>, i32 -> vector<128x128xf32>
    %184 = vector.broadcast %179 : vector<128x1xf32> to vector<128x128xf32>
    %185 = arith.mulf %183, %184 : vector<128x128xf32>
    %186 = arith.truncf %182 : vector<128x128xf32> to vector<128x128xbf16>
    %187 = arith.index_cast %154 : i32 to index
    %c0_92 = arith.constant 0 : index
    %188 = vector.load %arg9[%187, %c0_92] : memref<288x384xbf16, #tpu.memory_space<vmem>>, vector<128x128xbf16>
    tpu.vector_store %arg9[%187, %c0_92], %186 {strides = array<i32>} : memref<288x384xbf16, #tpu.memory_space<vmem>>, vector<128x128xbf16>,
    %189 = arith.truncf %151 : vector<128x128xf32> to vector<128x128xbf16>
    %190 = arith.index_cast %154 : i32 to index
    %c128_93 = arith.constant 128 : index
    %191 = vector.load %arg9[%190, %c128_93] : memref<288x384xbf16, #tpu.memory_space<vmem>>, vector<128x128xbf16>
    tpu.vector_store %arg9[%190, %c128_93], %189 {strides = array<i32>} : memref<288x384xbf16, #tpu.memory_space<vmem>>, vector<128x128xbf16>,
    %192 = arith.truncf %185 : vector<128x128xf32> to vector<128x128xbf16>
    %193 = arith.index_cast %154 : i32 to index
    %c256_94 = arith.constant 256 : index
    %194 = vector.load %arg9[%193, %c256_94] : memref<288x384xbf16, #tpu.memory_space<vmem>>, vector<128x128xbf16>
    tpu.vector_store %arg9[%193, %c256_94], %192 {strides = array<i32>} : memref<288x384xbf16, #tpu.memory_space<vmem>>, vector<128x128xbf16>,
    %c2_i32_95 = arith.constant 2 : i32
    %c0_i32_96 = arith.constant 0 : i32
    %c8_i32_97 = arith.constant 8 : i32
    %195 = arith.muli %c0_i32_96, %c8_i32_97 : i32
    %c16_i32_98 = arith.constant 16 : i32
    %196 = arith.muli %195, %c16_i32_98 : i32
    %197 = tpu.assume_multiple %196, 8 : i32
    %198 = arith.index_cast %197 : i32 to index
    %c0_99 = arith.constant 0 : index
    %199 = vector.load %arg9[%198, %c0_99] : memref<288x384xbf16, #tpu.memory_space<vmem>>, vector<128x384xbf16>
    %c0_100 = arith.constant 0 : index
    %c0_101 = arith.constant 0 : index
    %c0_102 = arith.constant 0 : index
    %200 = vector.load %arg5[%c0_100, %c0_101, %c0_102] : memref<3x384x128xbf16, #tpu.memory_space<vmem>>, vector<1x384x128xbf16>
    %201 = vector.shape_cast %200 : vector<1x384x128xbf16> to vector<384x128xbf16>
    %cst_103 = arith.constant dense<0.000000e+00> : vector<128x128xf32>
    %202 = tpu.matmul %199, %201, %cst_103 {dimension_numbers = #tpu.dot_dimension_numbers<[1], [0], [0], [1], [0, 0, 1, 1], [], []>} : vector<128x384xbf16>, vector<384x128xbf16>, vector<128x128xf32> -> vector<128x128xf32>
    %c1_i32_104 = arith.constant 1 : i32
    %203 = arith.addi %195, %c1_i32_104 : i32
    %c16_i32_105 = arith.constant 16 : i32
    %204 = arith.muli %203, %c16_i32_105 : i32
    %205 = tpu.assume_multiple %204, 8 : i32
    %206 = arith.index_cast %205 : i32 to index
    %c0_106 = arith.constant 0 : index
    %207 = vector.load %arg9[%206, %c0_106] : memref<288x384xbf16, #tpu.memory_space<vmem>>, vector<128x384xbf16>
    %c1_107 = arith.constant 1 : index
    %c0_108 = arith.constant 0 : index
    %c0_109 = arith.constant 0 : index
    %208 = vector.load %arg5[%c1_107, %c0_108, %c0_109] : memref<3x384x128xbf16, #tpu.memory_space<vmem>>, vector<1x384x128xbf16>
    %209 = vector.shape_cast %208 : vector<1x384x128xbf16> to vector<384x128xbf16>
    %cst_110 = arith.constant dense<0.000000e+00> : vector<128x128xf32>
    %210 = tpu.matmul %207, %209, %cst_110 {dimension_numbers = #tpu.dot_dimension_numbers<[1], [0], [0], [1], [0, 0, 1, 1], [], []>} : vector<128x384xbf16>, vector<384x128xbf16>, vector<128x128xf32> -> vector<128x128xf32>
    %211 = arith.addf %202, %210 : vector<128x128xf32>
    %c2_i32_111 = arith.constant 2 : i32
    %212 = arith.addi %195, %c2_i32_111 : i32
    %c16_i32_112 = arith.constant 16 : i32
    %213 = arith.muli %212, %c16_i32_112 : i32
    %214 = tpu.assume_multiple %213, 8 : i32
    %215 = arith.index_cast %214 : i32 to index
    %c0_113 = arith.constant 0 : index
    %216 = vector.load %arg9[%215, %c0_113] : memref<288x384xbf16, #tpu.memory_space<vmem>>, vector<128x384xbf16>
    %c2_114 = arith.constant 2 : index
    %c0_115 = arith.constant 0 : index
    %c0_116 = arith.constant 0 : index
    %217 = vector.load %arg5[%c2_114, %c0_115, %c0_116] : memref<3x384x128xbf16, #tpu.memory_space<vmem>>, vector<1x384x128xbf16>
    %218 = vector.shape_cast %217 : vector<1x384x128xbf16> to vector<384x128xbf16>
    %cst_117 = arith.constant dense<0.000000e+00> : vector<128x128xf32>
    %219 = tpu.matmul %216, %218, %cst_117 {dimension_numbers = #tpu.dot_dimension_numbers<[1], [0], [0], [1], [0, 0, 1, 1], [], []>} : vector<128x384xbf16>, vector<384x128xbf16>, vector<128x128xf32> -> vector<128x128xf32>
    %220 = arith.addf %211, %219 : vector<128x128xf32>
    %221 = vector.broadcast %48 : vector<1x128xf32> to vector<128x128xf32>
    %222 = arith.addf %220, %221 : vector<128x128xf32>
    %cst_118 = arith.constant 0.000000e+00 : f32
    %223 = vector.broadcast %cst_118 : f32 to vector<128x128xf32>
    %224 = arith.maximumf %222, %223 : vector<128x128xf32>
    %c16_i32_119 = arith.constant 16 : i32
    %225 = arith.muli %195, %c16_i32_119 : i32
    %226 = tpu.assume_multiple %225, 8 : i32
    %c0_120 = arith.constant 0 : index
    %227 = arith.index_cast %226 : i32 to index
    %c0_121 = arith.constant 0 : index
    %228 = vector.load %arg7[%c0_120, %227, %c0_121] : memref<1x256x128xf32, #tpu.memory_space<vmem>>, vector<1x128x128xf32>
    %229 = vector.shape_cast %228 : vector<1x128x128xf32> to vector<128x128xf32>
    %230 = vector.shape_cast %224 : vector<128x128xf32> to vector<1x128x128xf32>
    tpu.vector_store %arg7[%c0_120, %227, %c0_121], %230 {strides = array<i32>} : memref<1x256x128xf32, #tpu.memory_space<vmem>>, vector<1x128x128xf32>,
    %c1_i32_122 = arith.constant 1 : i32
    %c8_i32_123 = arith.constant 8 : i32
    %231 = arith.muli %c1_i32_122, %c8_i32_123 : i32
    %c16_i32_124 = arith.constant 16 : i32
    %232 = arith.muli %231, %c16_i32_124 : i32
    %233 = tpu.assume_multiple %232, 8 : i32
    %234 = arith.index_cast %233 : i32 to index
    %c0_125 = arith.constant 0 : index
    %235 = vector.load %arg9[%234, %c0_125] : memref<288x384xbf16, #tpu.memory_space<vmem>>, vector<128x384xbf16>
    %c0_126 = arith.constant 0 : index
    %c0_127 = arith.constant 0 : index
    %c0_128 = arith.constant 0 : index
    %236 = vector.load %arg5[%c0_126, %c0_127, %c0_128] : memref<3x384x128xbf16, #tpu.memory_space<vmem>>, vector<1x384x128xbf16>
    %237 = vector.shape_cast %236 : vector<1x384x128xbf16> to vector<384x128xbf16>
    %cst_129 = arith.constant dense<0.000000e+00> : vector<128x128xf32>
    %238 = tpu.matmul %235, %237, %cst_129 {dimension_numbers = #tpu.dot_dimension_numbers<[1], [0], [0], [1], [0, 0, 1, 1], [], []>} : vector<128x384xbf16>, vector<384x128xbf16>, vector<128x128xf32> -> vector<128x128xf32>
    %c1_i32_130 = arith.constant 1 : i32
    %239 = arith.addi %231, %c1_i32_130 : i32
    %c16_i32_131 = arith.constant 16 : i32
    %240 = arith.muli %239, %c16_i32_131 : i32
    %241 = tpu.assume_multiple %240, 8 : i32
    %242 = arith.index_cast %241 : i32 to index
    %c0_132 = arith.constant 0 : index
    %243 = vector.load %arg9[%242, %c0_132] : memref<288x384xbf16, #tpu.memory_space<vmem>>, vector<128x384xbf16>
    %c1_133 = arith.constant 1 : index
    %c0_134 = arith.constant 0 : index
    %c0_135 = arith.constant 0 : index
    %244 = vector.load %arg5[%c1_133, %c0_134, %c0_135] : memref<3x384x128xbf16, #tpu.memory_space<vmem>>, vector<1x384x128xbf16>
    %245 = vector.shape_cast %244 : vector<1x384x128xbf16> to vector<384x128xbf16>
    %cst_136 = arith.constant dense<0.000000e+00> : vector<128x128xf32>
    %246 = tpu.matmul %243, %245, %cst_136 {dimension_numbers = #tpu.dot_dimension_numbers<[1], [0], [0], [1], [0, 0, 1, 1], [], []>} : vector<128x384xbf16>, vector<384x128xbf16>, vector<128x128xf32> -> vector<128x128xf32>
    %247 = arith.addf %238, %246 : vector<128x128xf32>
    %c2_i32_137 = arith.constant 2 : i32
    %248 = arith.addi %231, %c2_i32_137 : i32
    %c16_i32_138 = arith.constant 16 : i32
    %249 = arith.muli %248, %c16_i32_138 : i32
    %250 = tpu.assume_multiple %249, 8 : i32
    %251 = arith.index_cast %250 : i32 to index
    %c0_139 = arith.constant 0 : index
    %252 = vector.load %arg9[%251, %c0_139] : memref<288x384xbf16, #tpu.memory_space<vmem>>, vector<128x384xbf16>
    %c2_140 = arith.constant 2 : index
    %c0_141 = arith.constant 0 : index
    %c0_142 = arith.constant 0 : index
    %253 = vector.load %arg5[%c2_140, %c0_141, %c0_142] : memref<3x384x128xbf16, #tpu.memory_space<vmem>>, vector<1x384x128xbf16>
    %254 = vector.shape_cast %253 : vector<1x384x128xbf16> to vector<384x128xbf16>
    %cst_143 = arith.constant dense<0.000000e+00> : vector<128x128xf32>
    %255 = tpu.matmul %252, %254, %cst_143 {dimension_numbers = #tpu.dot_dimension_numbers<[1], [0], [0], [1], [0, 0, 1, 1], [], []>} : vector<128x384xbf16>, vector<384x128xbf16>, vector<128x128xf32> -> vector<128x128xf32>
    %256 = arith.addf %247, %255 : vector<128x128xf32>
    %257 = vector.broadcast %48 : vector<1x128xf32> to vector<128x128xf32>
    %258 = arith.addf %256, %257 : vector<128x128xf32>
    %cst_144 = arith.constant 0.000000e+00 : f32
    %259 = vector.broadcast %cst_144 : f32 to vector<128x128xf32>
    %260 = arith.maximumf %258, %259 : vector<128x128xf32>
    %c16_i32_145 = arith.constant 16 : i32
    %261 = arith.muli %231, %c16_i32_145 : i32
    %262 = tpu.assume_multiple %261, 8 : i32
    %c0_146 = arith.constant 0 : index
    %263 = arith.index_cast %262 : i32 to index
    %c0_147 = arith.constant 0 : index
    %264 = vector.load %arg7[%c0_146, %263, %c0_147] : memref<1x256x128xf32, #tpu.memory_space<vmem>>, vector<1x128x128xf32>
    %265 = vector.shape_cast %264 : vector<1x128x128xf32> to vector<128x128xf32>
    %266 = vector.shape_cast %260 : vector<128x128xf32> to vector<1x128x128xf32>
    tpu.vector_store %arg7[%c0_146, %263, %c0_147], %266 {strides = array<i32>} : memref<1x256x128xf32, #tpu.memory_space<vmem>>, vector<1x128x128xf32>,
    %c2_i32_148 = arith.constant 2 : i32
    return
  }
  func.func @transform_0(%arg0: i32) -> (i32, i32, i32) {
    %c0_i32 = arith.constant 0 : i32
    %c0_i32_0 = arith.constant 0 : i32
    %c0_i32_1 = arith.constant 0 : i32
    return %arg0, %c0_i32, %c0_i32_0 : i32, i32, i32
  }
  func.func @transform_1(%arg0: i32) -> (i32, i32, i32) {
    %c0_i32 = arith.constant 0 : i32
    %c0_i32_0 = arith.constant 0 : i32
    %c0_i32_1 = arith.constant 0 : i32
    %c0_i32_2 = arith.constant 0 : i32
    return %c0_i32, %c0_i32_0, %c0_i32_1 : i32, i32, i32
  }
  func.func @transform_2(%arg0: i32) -> (i32, i32, i32) {
    %c0_i32 = arith.constant 0 : i32
    %c0_i32_0 = arith.constant 0 : i32
    %c0_i32_1 = arith.constant 0 : i32
    %c0_i32_2 = arith.constant 0 : i32
    return %c0_i32, %c0_i32_0, %c0_i32_1 : i32, i32, i32
  }
  func.func @transform_3(%arg0: i32) -> (i32, i32) {
    %c0_i32 = arith.constant 0 : i32
    %c0_i32_0 = arith.constant 0 : i32
    %c0_i32_1 = arith.constant 0 : i32
    return %c0_i32, %c0_i32_0 : i32, i32
  }
  func.func @transform_4(%arg0: i32) -> (i32, i32, i32) {
    %c0_i32 = arith.constant 0 : i32
    %c0_i32_0 = arith.constant 0 : i32
    %c0_i32_1 = arith.constant 0 : i32
    %c0_i32_2 = arith.constant 0 : i32
    return %c0_i32, %c0_i32_0, %c0_i32_1 : i32, i32, i32
  }
  func.func @transform_5(%arg0: i32) -> (i32, i32) {
    %c0_i32 = arith.constant 0 : i32
    %c0_i32_0 = arith.constant 0 : i32
    %c0_i32_1 = arith.constant 0 : i32
    return %c0_i32, %c0_i32_0 : i32, i32
  }
  func.func @transform_6(%arg0: i32) -> (i32, i32, i32) {
    %c0_i32 = arith.constant 0 : i32
    %c0_i32_0 = arith.constant 0 : i32
    %c0_i32_1 = arith.constant 0 : i32
    return %arg0, %c0_i32, %c0_i32_0 : i32, i32, i32
  }
}

</mosaic_0001>

<bundles_post_ra>
// kernel: tpu_custom_call.1
= control target key start
LH: loop header
LB: loop body
LE: loop exit
PB: predicated region body
PF: predicated region fallthrough
CT: control target
= control target key end

     0   :  { %11 = vsyncpa [#allocation5], 0  ;;  %s13066_s0 = inlined_call_operand.hbm [shape: f32[2,256,128], index: 0, kind: input, shape index: {}]   ;;  %s13067_s1 = inlined_call_operand.hbm [shape: f32[1,256,128], index: 1, kind: input, shape index: {}]   ;;  %s13068_s2 = inlined_call_operand.hbm [shape: bf16[3,384,128], index: 2, kind: input, shape index: {}]   ;;  %s13069_s3 = inlined_call_operand.vmem [shape: f32[1,128], index: 3, kind: input, shape index: {}]   ;;  %s13070_s4 = inlined_call_operand.hbm [shape: bf16[3,384,128], index: 4, kind: input, shape index: {}]   ;;  %s13071_s5 = inlined_call_operand.vmem [shape: f32[1,128], index: 5, kind: input, shape index: {}]   ;;  %s13072_s6 = inlined_call_operand.hbm [shape: f32[2,256,128], index: 6, kind: output, shape index: {}]  }
   0x1   :  { %13 = vsyncpa [#allocation5 + $0x1], 0 }
   0x2   :  { %14 = vsyncpa [#allocation8], 0 }
   0x3   :  { %15 = vsyncpa [#allocation11], 0 }
   0x4   :  { %16 = vsyncpa [#allocation6], 0 }
   0x5   :  { %18 = vsyncpa [#allocation6 + $0x1], 0  ;;  %s11478_s21 = smov 0   ;;  %s11480_s22 = smov 0  }
   0x6   :  { %s11482_s23 = smov 0   ;;  %s11484_s24 = smov 0  }
   0x7 LB: > { %s11499_s25 = sadd.s32 4294967295, %s11430_s24   ;;  %s8197_s26 = sadd.s32 4294967294, %s11430_s24   ;;  %s11430_s24 = sphi %s11484_s24, %s13192_s24   ;;  %s11426_s23 = sphi %s11482_s23, %s13191_s23   ;;  %s11422_s22 = sphi %s11480_s22, %s13190_s22   ;;  %s11418_s21 = sphi %s11478_s21, %s13189_s21  }
   0x8   : > { %p44_p0 = scmp.ne.s32.totalorder %s11422_s22, %s11418_s21  ;;  %p45_p1 = scmp.eq.s32.totalorder %s11499_s25, 0 }
   0x9   : > { %p173_p2 = scmp.eq.s32.totalorder %s11499_s25, 1  ;;  %p179_p3 = scmp.eq.s32.totalorder %s8197_s26, 1 }
   0xa   : > { %p11508_p4 = por %p45_p1, %p44_p0  ;;  %p8198_p5 = scmp.ge.s32.totalorder %s11430_s24, 1 }
   0xb   : > { %p11513_p6 = por %p179_p3, %p44_p0  ;;  %p186_p7 = scmp.lt.s32.totalorder %s11430_s24, 3 }
   0xc   : > { %s197_s7 = sshll.u32 %s13067_s1, 4  ;;  %s11432_s9 = smov [#allocation7]   ;;  %s198_s7 = int_to_ptr.hbm [resolvable:$true] %s197_s7 }
   0xd   : > { %p11521_p8 = pnand %p8198_p5, %p186_p7  ;;  %s199_s10 = sshll.u32 %s11432_s9, 4  ;;  %s200_s10 = int_to_ptr.vmem [resolvable:$true] %s199_s10 }
   0xe   : > { %s211_s14 = sshll.u32 %s13068_s2, 4  ;;  %s13073_s15 = smov 128   ;;  %s212_s14 = int_to_ptr.hbm [resolvable:$true] %s211_s14 }
   0xf   : > { %p11163_p9 = pneg %p11521_p8  ;;  %s13074_s16 = smov 8  }
  0x10   : > { %s11435_s17 = smov [#allocation9]   ;;  %s11436_s19 = smov 64  }
  0x11   : > { %p11529_p10 = pnand %p11163_p9, %p45_p1  ;;  %s213_s18 = sshll.u32 %s11435_s17, 4  ;;  %s214_s18 = int_to_ptr.vmem [resolvable:$true] %s213_s18 }
  0x12   : > { %s11437_s20 = smov 4   ;;  %s228_s30 = sshll.u32 %s13070_s4, 4  ;;  %s229_s30 = int_to_ptr.hbm [resolvable:$true] %s228_s30 }
  0x13   : > { %11166 = dma.hbm_to_vmem [thread:$0]  (!%p11529_p10), %s198_s7, 4096, %s200_s10, [#allocation8], %s13073_s15, %s13073_s15, %s13074_s16  }
  0x14   : > { %11169 = dma.hbm_to_vmem [thread:$0]  (!%p11529_p10), %s212_s14, 9216, %s214_s18, [#allocation8], %s11436_s19, %s11436_s19, %s11437_s20  }
  0x15   : > { %s11438_s7 = smov [#allocation10]   ;;  %s11550_s10 = sadd.s32 1, %s11430_s24  }
  0x16   : > { %s230_s9 = sshll.u32 %s11438_s7, 4  ;;  %s28_s12 = ssub.s32 %s11430_s24, %s11550_s10  ;;  %s231_s9 = int_to_ptr.vmem [resolvable:$true] %s230_s9 }
  0x17   : > { %11172 = dma.hbm_to_vmem [thread:$0]  (!%p11529_p10), %s229_s30, 9216, %s231_s9, [#allocation11], %s11436_s19, %s11436_s19, %s11437_s20  }
  0x18   : > { %s31_s13 = sadd.s32 1, %s11426_s23  ;;  %p29_p12 = scmp.eq.s32.totalorder %s28_s12, 0 }
  0x19   : > { %p38_p13 = scmp.ne.s32.totalorder %s11426_s23, %s11422_s22  ;;  %p39_p0 = scmp.eq.s32.totalorder %s11430_s24, 0 }
  0x1a   : > { %s11559_s14 = scalar_select %p29_p12, %s11426_s23, %s31_s13  }
  0x1b   : > { %p11563_p3 = por %p173_p2, %p38_p13  ;;  %p11184_p5 = scmp.lt.s32.totalorder %s11430_s24, 2 }
  0x1c   : > { %s247_s18 = sand.u32 1, %s11426_s23   ;;  %s10569_s26 = sshll.u32 %s11430_s24, 8 }
  0x1d   : > { %p40_p7 = por %p39_p0, %p38_p13  ;;  %s8203_s11 = sshll.u32 %s247_s18, 8 }
  0x1e   : > { %s256_s29 = scalar_lea.hbm %s13066_s0, %s10569_s26  ;;  %s251_s7 = scalar_lea.vmem [#allocation4], %s8203_s11 }
  0x1f   : > { %s257_s30 = sshll.u32 %s256_s29, 4  ;;  %s259_s9 = sshll.u32 %s251_s7, 4  ;;  %s258_s30 = int_to_ptr.hbm [resolvable:$true] %s257_s30  ;;  %s260_s9 = int_to_ptr.vmem [resolvable:$true] %s259_s9 }
  0x20   : > { %p11573_p9 = pnand %p11184_p5, %p40_p7  ;;  %s248_s13 = scalar_lea.sflag [#allocation5], %s247_s18 }
  0x21   : > { %s11326_s15 = sshra.s32 %s258_s30, 4  ;;  %s11333_s11 = scalar_lea.hbm %s13066_s0, 512  ;;  %s11327_s15 = int_to_ptr.hbm [resolvable:$true] %s11326_s15 }
  0x22   : > { %s11328_s16 = scalar_lea.hbm %s11327_s15, 256  ;;  %p11330_p10 = pneg %p11573_p9 }
  0x23   : > { %p11329_p2 = scmp.ne.s32.totalorder %s11327_s15, %s11328_s16  ;;  %p11334_p0 = scmp.lt.s32.totalorder %s11327_s15, %s13066_s0 }
  0x24   : > { %p11335_p5 = scmp.lt.s32.totalorder %s11333_s11, %s11328_s16 }
  0x25   : > { %p11331_p12 = pnand %p11330_p10, %p11329_p2 }
  0x26   : > { %p11336_p7 = por %p11335_p5, %p11334_p0 }
  0x27   : > { %p11332_p13 = pneg %p11331_p12 }
  0x29   : > { %p11337_p11 = pnand %p11336_p7, %p11332_p13 }
  0x2b   : > { %11340 = shalt.err (!%p11337_p11)
}
  0x2c   : > { %s13113_s18 = smov 8   ;;  %s13114_s7 = smov 128  }
  0x2d   : > { %11176 = dma.hbm_to_vmem [thread:$0]  (!%p11573_p9), %s258_s30, 4096, %s260_s9, %s248_s13, %s13114_s7, %s13114_s7, %s13113_s18  }
  0x2e   : > { %271 = sbr.rel (%p11521_p8) target bundleno = 1400 (0x578), region = 44 }
  0x33   : > { %s11593_s26 = sand.u32 1, %s11422_s22  }
  0x34   : > { %s8207_s15 = sshll.u32 %s11593_s26, 8  ;;  %s274_s16 = scalar_lea.sflag [#allocation5], %s11593_s26 }
  0x35   : > { %s11599_s19 = scalar_lea.vmem [#allocation4], %s8207_s15 }
  0x36   : > { %11401 = dma.done.wait (%p11508_p4), %s274_s16, 4096  }
  0x37   : > { %11403 = vsyncadd (%p11508_p4), %s274_s16, 4294963200 }
  0x38   : > { %11405 = dma.done.wait (%p45_p1), [#allocation8], 13312  }
  0x39   : > { %11407 = vsyncadd (%p45_p1), [#allocation8], 4294953984 }
  0x3a   : > { %11409 = dma.done.wait (%p45_p1), [#allocation11], 9216  }
  0x3b   : > { %11411 = vsyncadd (%p45_p1), [#allocation11], 4294958080  ;;  %v435_v0 = vlaneseq  ;;  %v11439_v1 = vmov 0   ;;  %v10649_v3 = vld [vmem:[#allocation9 + $0xf8] sm:$0xff]  ;;  %v10648_v8 = vld [vmem:[#allocation9 + $0xf0] sm:$0xff]  ;;  %v13083_v36 = vmov 0.0  }
  0x3c   : > { %323 = vst [vmem:[#allocation2] sm:$0xff] %v11439_v1  ;;  %v10657_v4 = vld [vmem:[#allocation9 + $0x138] sm:$0xff]  ;;  %1871 = vmatpush.bf16.msra.mxu0 %v10649_v3  ;;  %v10656_v9 = vld [vmem:[#allocation9 + $0x130] sm:$0xff]  ;;  %v10647_v16 = vld [vmem:[#allocation9 + $0xe8] sm:$0xff]  ;;  %s12853_s11 = scalar_lea.vmem [#allocation12], %s8207_s15  ;;  %s11146_s18 = sshll.u32 %s11499_s25, 8 }
  0x3d   : > { %325 = vst [vmem:[#allocation2 + $0xc] sm:$0xff] %v11439_v1  ;;  %v11613_v2 = vshrl.u32 %v435_v0, 7  ;;  %v10665_v5 = vld [vmem:[#allocation9 + $0x178] sm:$0xff]  ;;  %1920 = vmatpush.bf16.msra.mxu1 %v10657_v4  ;;  %v10664_v11 = vld [vmem:[#allocation9 + $0x170] sm:$0xff]  ;;  %v10655_v17 = vld [vmem:[#allocation9 + $0x128] sm:$0xff]  ;;  %s8081_s16 = scalar_lea.hbm %s13072_s6, %s11146_s18  ;;  %s8070_s25 = scalar_lea.sflag [#allocation6], %s11593_s26 }
  0x3e   : > { %324 = vst [vmem:[#allocation2 + $0x8] sm:$0xf] %v11439_v1  ;;  %v10601_v6 = vld [vmem:[#allocation9 + $0x38] sm:$0xff]  ;;  %1969 = vmatpush.bf16.msra.mxu2 %v10665_v5  ;;  %v10600_v12 = vld [vmem:[#allocation9 + $0x30] sm:$0xff]  ;;  %v10663_v19 = vld [vmem:[#allocation9 + $0x168] sm:$0xff]  ;;  %s8084_s27 = sshll.u32 %s8081_s16, 4  ;;  %s8085_s27 = int_to_ptr.hbm [resolvable:$true] %s8084_s27 }
  0x3f   : > { %326 = vst [vmem:[#allocation2 + $0x14] sm:$0xf] %v11439_v1  ;;  %v437_v7 = vadd.s32 8, %v11613_v2  ;;  %v438_v10 = vadd.s32 16, %v11613_v2  ;;  %2290 = vmatpush.bf16.msra.mxu3 %v10601_v6  ;;  %v472_v13 = vand.u32 15, %v11613_v2  ;;  %v439_v15 = vadd.s32 24, %v11613_v2 }
  0x40   : > { %327 = vst [vmem:[#allocation2 + $0x198] sm:$0xff] %v11439_v1  ;;  %1872 = vmatpush.bf16.msra.mxu0 %v10648_v8  ;;  %v10599_v20 = vld [vmem:[#allocation9 + $0x28] sm:$0xff]  ;;  %v10646_v22 = vld [vmem:[#allocation9 + $0xe0] sm:$0xff]  ;;  %v370_v31 = vld [vmem:[%s11599_s19 + $0xf8] sm:$0xff]  ;;  %vm1076_vm3 = vcmp.lt.s32.totalorder %v11613_v2, 1  ;;  %vm1173_vm4 = vcmp.lt.s32.totalorder %v11613_v2, 7 }
  0x41   : > { %328 = vst [vmem:[#allocation2 + $0x1a0] sm:$0xf] %v11439_v1  ;;  %v479_v14 = vand.u32 15, %v437_v7  ;;  %1921 = vmatpush.bf16.msra.mxu1 %v10656_v9  ;;  %v486_v18 = vand.u32 15, %v438_v10  ;;  %vm11619_vm0 = vcmp.ne.s32.totalorder %v472_v13, 0  ;;  %v10654_v23 = vld [vmem:[#allocation9 + $0x120] sm:$0xff] }
  0x42   : > { %329 = vst [vmem:[#allocation2 + $0x1a4] sm:$0xff] %v11439_v1  ;;  %1970 = vmatpush.bf16.msra.mxu2 %v10664_v11  ;;  %v493_v25 = vand.u32 15, %v439_v15  ;;  %v10662_v26 = vld [vmem:[#allocation9 + $0x160] sm:$0xff]  ;;  %v340_v30 = vld [vmem:[%s11599_s19 + $0x8] sm:$0xff]  ;;  %v402_v34 = vld [vmem:[#allocation7 + $0xf8] sm:$0xff]  ;;  %v11640_v37 = vsel %vm11619_vm0, 1.0, %v13083_v36 }
  0x43   : > { %330 = vst [vmem:[#allocation2 + $0x1ac] sm:$0xf] %v11439_v1  ;;  %2291 = vmatpush.bf16.msra.mxu3 %v10600_v12  ;;  %vm11623_vm1 = vcmp.ne.s32.totalorder %v479_v14, 15  ;;  %v10598_v27 = vld [vmem:[#allocation9 + $0x20] sm:$0xff]  ;;  %vm11628_vm2 = vcmp.ne.s32.totalorder %v486_v18, 0  ;;  %v372_v33 = vld [vmem:[#allocation7 + $0x8] sm:$0xff]  ;;  %v11649_v41 = vmul.f32 %v402_v34, %v370_v31 }
  0x44   : > { %331 = vst [vmem:[#allocation3] sm:$0xff] %v11439_v1  ;;  %1873 = vmatpush.bf16.msra.mxu0 %v10647_v16  ;;  %v339_v28 = vld [vmem:[%s11599_s19] sm:$0xff]  ;;  %v341_v38 = vld [vmem:[%s11599_s19 + $0x10] sm:$0xff]  ;;  %v11646_v39 = vsel %vm11623_vm1, 1.0, %v13083_v36  ;;  %v404_v40 = vmul.f32 %v372_v33, %v340_v30  ;;  %v11654_v43 = vsel %vm11628_vm2, 1.0, %v13083_v36  ;;  %vm11656_vm5 = vcmp.ne.s32.totalorder %v493_v25, 15 }
  0x45   : > { %332 = vst [vmem:[#allocation3 + $0x8] sm:$0xf] %v11439_v1  ;;  %1922 = vmatpush.bf16.msra.mxu1 %v10655_v17  ;;  %v371_v32 = vld [vmem:[#allocation7] sm:$0xff]  ;;  %v373_v42 = vld [vmem:[#allocation7 + $0x10] sm:$0xff]  ;;  %v10645_v45 = vld [vmem:[#allocation9 + $0xd8] sm:$0xff]  ;;  %v13075_v54 = vrot.slane %v11649_v41, 7 }
  0x46   : > { %333 = vst [vmem:[#allocation3 + $0xc] sm:$0xff] %v11439_v1  ;;  %1971 = vmatpush.bf16.msra.mxu2 %v10663_v19  ;;  %v11635_v35 = vmul.f32 %v371_v32, %v339_v28  ;;  %v10653_v46 = vld [vmem:[#allocation9 + $0x118] sm:$0xff]  ;;  %v11663_v50 = vmul.f32 %v373_v42, %v341_v38  ;;  %v1045_v53 = vrot.slane %v404_v40, 7  ;;  %v1303_v55 = vpack.c.bf16 %v404_v40, %v404_v40  ;;  %v10644_v63 = vld [vmem:[#allocation9 + $0xd0] sm:$0xff]  ;;  %v343_v12 = vld [vmem:[%s11599_s19 + $0x20] sm:$0xff]  ;;  %s11370_s8 = sshra.s32 %s8085_s27, 4  ;;  %s11371_s8 = int_to_ptr.hbm [resolvable:$true] %s11370_s8 }
  0x47   : > { %334 = vst [vmem:[#allocation3 + $0x14] sm:$0xf] %v11439_v1  ;;  %2292 = vmatpush.bf16.msra.mxu3 %v10599_v20  ;;  %v10661_v47 = vld [vmem:[#allocation9 + $0x158] sm:$0xff]  ;;  %v1142_v56 = vrot.slane %v404_v40, 1  ;;  %v11675_v62 = vsel %vm11656_vm5, 1.0, %v13083_v36  ;;  %v10652_v0 = vld [vmem:[#allocation9 + $0x110] sm:$0xff]  ;;  %p11377_p11 = scmp.lt.s32.totalorder %s11371_s8, %s13072_s6 }
  0x48   : > { %335 = vst [vmem:[#allocation3 + $0x198] sm:$0xff] %v11439_v1  ;;  %1874 = vmatpush.bf16.msra.mxu0 %v10646_v22  ;;  %v1044_v48 = vrot.slane %v11635_v35, 7  ;;  %v1302_v49 = vpack.c.bf16 %v11635_v35, %v11635_v35  ;;  %v13076_v51 = vrot.slane %v11635_v35, 1  ;;  %v10597_v52 = vld [vmem:[#allocation9 + $0x18] sm:$0xff]  ;;  %v1143_v59 = vrot.slane %v11663_v50, 1  ;;  %v10596_v7 = vld [vmem:[#allocation9 + $0x10] sm:$0xff] }
  0x49   : > { %336 = vst [vmem:[#allocation3 + $0x1a0] sm:$0xf] %v11439_v1  ;;  %1923 = vmatpush.bf16.msra.mxu1 %v10654_v23  ;;  %v342_v57 = vld [vmem:[%s11599_s19 + $0x18] sm:$0xff]  ;;  %v1046_v61 = vrot.slane %v11663_v50, 7  ;;  %v1304_v6 = vpack.c.bf16 %v11663_v50, %v11663_v50  ;;  %v375_v13 = vld [vmem:[#allocation7 + $0x20] sm:$0xff]  ;;  %v344_v17 = vld [vmem:[%s11599_s19 + $0x28] sm:$0xff] }
  0x4a   : > { %337 = vst [vmem:[#allocation3 + $0x1a4] sm:$0xff] %v11439_v1  ;;  %1972 = vmatpush.bf16.msra.mxu2 %v10662_v26  ;;  %v374_v58 = vld [vmem:[#allocation7 + $0x18] sm:$0xff]  ;;  %v1107_v3 = vsel %vm1076_vm3, %v1044_v48, %v1045_v53  ;;  %v1108_v4 = vsel %vm1076_vm3, %v13075_v54, %v1044_v48  ;;  %v1204_v5 = vsel %vm1173_vm4, %v13076_v51, %v1142_v56  ;;  %v376_v18 = vld [vmem:[#allocation7 + $0x28] sm:$0xff]  ;;  %v440_v31 = vadd.s32 32, %v11613_v2  ;;  %v10642_v44 = vld [vmem:[#allocation9 + $0xc0] sm:$0xff]  ;;  %s11372_s30 = scalar_lea.hbm %s11371_s8, 256 }
  0x4b   : > { %338 = vst [vmem:[#allocation3 + $0x1ac] sm:$0xf] %v11439_v1  ;;  %2293 = vmatpush.bf16.msra.mxu3 %v10598_v27  ;;  %v11669_v60 = vmul.f32 %v374_v58, %v342_v57  ;;  %v10660_v1 = vld [vmem:[#allocation9 + $0x150] sm:$0xff]  ;;  %v1109_v8 = vmul.f32 %v11640_v37, %v1108_v4  ;;  %v1239_v9 = vpack.c.bf16 %v1107_v3, %v1107_v3  ;;  %v10643_v27 = vld [vmem:[#allocation9 + $0xc8] sm:$0xff]  ;;  %v441_v32 = vadd.s32 40, %v11613_v2  ;;  %v10609_v4 = vld [vmem:[#allocation9 + $0x78] sm:$0xff]  ;;  %p11373_p1 = scmp.ne.s32.totalorder %s11371_s8, %s11372_s30 }
  0x4c   : > { %13121 = vst [vmem:[#allocation17_spill] sm:$0xff] %v11640_v37  ;;  %1875 = vmatpush.bf16.msra.mxu0 %v10645_v45  ;;  %v1203_v10 = vsel %vm1173_vm4, %v1142_v56, %v1143_v59  ;;  %v1366_v15 = vpack.c.bf16 %v1204_v5, %v1204_v5  ;;  %v1106_v16 = vsel %vm1076_vm3, %v1045_v53, %v1046_v61  ;;  %v10651_v28 = vld [vmem:[#allocation9 + $0x108] sm:$0xff]  ;;  %v10650_v45 = vld [vmem:[#allocation9 + $0x100] sm:$0xff]  ;;  %v345_v50 = vld [vmem:[%s11599_s19 + $0x30] sm:$0xff]  ;;  %v457_v54 = vadd.s32 168, %v11613_v2  ;;  %s11376_s13 = scalar_lea.hbm %s13072_s6, 512 }
  0x4d   : > { %13122 = vst [vmem:[#allocation18_spill] sm:$0xff] %v11646_v39  ;;  %1924 = vmatpush.bf16.msra.mxu1 %v10653_v46  ;;  %v1047_v11 = vrot.slane %v11669_v60, 7  ;;  %v1207_v14 = vmul.f32 %v11646_v39, %v1203_v10  ;;  %v1238_v19 = vpack.c.bf16 %v1109_v8, %v1109_v8  ;;  %v1111_v21 = vmul.f32 %v11654_v43, %v1106_v16  ;;  %v10659_v33 = vld [vmem:[#allocation9 + $0x148] sm:$0xff]  ;;  %v10658_v53 = vld [vmem:[#allocation9 + $0x140] sm:$0xff]  ;;  %v10617_v5 = vld [vmem:[#allocation9 + $0xb8] sm:$0xff]  ;;  %p11374_p4 = pnand %p11373_p1, %p11563_p3  ;;  %p11378_p9 = scmp.lt.s32.totalorder %s11376_s13, %s11372_s30 }
  0x4e   : > { %13123 = vst [vmem:[#allocation19_spill] sm:$0xff] %v11654_v43  ;;  %1973 = vmatpush.bf16.msra.mxu2 %v10661_v47  ;;  %v1305_v22 = vpack.c.bf16 %v11669_v60, %v11669_v60  ;;  %v11703_v25 = vmul.f32 %v375_v13, %v343_v12  ;;  %v1144_v26 = vrot.slane %v11669_v60, 1  ;;  %v11706_v30 = vmul.f32 %v376_v18, %v344_v17  ;;  %v10595_v34 = vld [vmem:[#allocation9 + $0x8] sm:$0xff]  ;;  %v8438_v57 = vld [vmem:[#allocation2] sm:$0xf] }
  0x4f   : > { %1334 = vst [vmem:[#allocation2 + $0x1c] sm:$0xf] %v1302_v49  ;;  %2294 = vmatpush.bf16.msra.mxu3 %v10597_v52  ;;  %v1105_v20 = vsel %vm1076_vm3, %v1046_v61, %v1047_v11  ;;  %v1367_v23 = vpack.c.bf16 %v1207_v14, %v1207_v14  ;;  %v1240_v29 = vpack.c.bf16 %v1111_v21, %v1111_v21  ;;  %v500_v47 = vand.u32 15, %v440_v31  ;;  %v377_v52 = vld [vmem:[#allocation7 + $0x30] sm:$0xff]  ;;  %v10571_v58 = vld [vmem:[#allocation2 + $0x8] sm:$0xf0]  ;;  %p11375_p8 = pneg %p11374_p4  ;;  %p11379_p2 = por %p11378_p9, %p11377_p11 }
  0x50   : > { %1335 = vst [vmem:[#allocation2 + $0x28] sm:$0xf] %v1303_v55  ;;  %v1241_v24 = vpack.c.bf16 %v1105_v20, %v1105_v20  ;;  %1876 = vmatpush.bf16.msra.mxu0 %v10644_v63  ;;  %v1145_v38 = vrot.slane %v11703_v25, 1  ;;  %v1202_v40 = vsel %vm1173_vm4, %v1143_v59, %v1144_v26  ;;  %v1048_v42 = vrot.slane %v11703_v25, 7  ;;  %v10594_v55 = vld [vmem:[#allocation9] sm:$0xff]  ;;  %v10697_v21 = vld [vmem:[#allocation9 + $0x1b8] sm:$0xff] }
  0x51   : > { %1336 = vst [vmem:[#allocation2 + $0x34] sm:$0xf] %v1304_v6  ;;  %1925 = vmatpush.bf16.msra.mxu1 %v10652_v0  ;;  %v1368_v46 = vpack.c.bf16 %v1202_v40, %v1202_v40  ;;  %v1049_v48 = vrot.slane %v11706_v30, 7  ;;  %v1306_v49 = vpack.c.bf16 %v11703_v25, %v11703_v25  ;;  %vm856_vm6 = vcmp.ne.s32.totalorder %v500_v47, 0  ;;  %v346_v31 = vld [vmem:[%s11599_s19 + $0x38] sm:$0xff]  ;;  %v10696_v25 = vld [vmem:[#allocation9 + $0x1b0] sm:$0xff]  ;;  %p11380_p10 = pnand %p11379_p2, %p11375_p8 }
  0x52   : > { %1271 = vst [vmem:[#allocation2 + $0x24] sm:$0xf] %v1239_v9  ;;  %1974 = vmatpush.bf16.msra.mxu2 %v10660_v1  ;;  %v1201_v59 = vsel %vm1173_vm4, %v1144_v26, %v1145_v38  ;;  %v1104_v60 = vsel %vm1076_vm3, %v1047_v11, %v1048_v42  ;;  %v507_v1 = vand.u32 15, %v441_v32  ;;  %v11731_v8 = vmul.f32 %v377_v52, %v345_v50  ;;  %v10607_v47 = vld [vmem:[#allocation9 + $0x68] sm:$0xff] }
  0x53   : > { %1398 = vst [vmem:[#allocation2 + $0x20] sm:$0xf] %v1366_v15  ;;  %2295 = vmatpush.bf16.msra.mxu3 %v10596_v7  ;;  %v1209_v63 = vmul.f32 %v11675_v62, %v1201_v59  ;;  %v1103_v0 = vsel %vm1076_vm3, %v1048_v42, %v1049_v48  ;;  %v1307_v7 = vpack.c.bf16 %v11706_v30, %v11706_v30  ;;  %v11734_v11 = vsel %vm856_vm6, 1.0, %v13083_v36  ;;  %v368_v37 = vld [vmem:[%s11599_s19 + $0xe8] sm:$0xff] }
  0x54   : > { %1270 = vst [vmem:[#allocation2 + $0x18] sm:$0xf] %v1238_v19  ;;  %1877 = vmatpush.bf16.msra.mxu0 %v10643_v27  ;;  %v1243_v6 = vpack.c.bf16 %v1103_v0, %v1103_v0  ;;  %vm11736_vm7 = vcmp.ne.s32.totalorder %v507_v1, 15  ;;  %v1113_v15 = vmul.f32 %v11734_v11, %v1104_v60  ;;  %v8439_v18 = vor.u32 %v10571_v58, %v8438_v57  ;;  %v10608_v27 = vld [vmem:[#allocation9 + $0x70] sm:$0xff] }
  0x55   : > { %1399 = vst [vmem:[#allocation2 + $0x2c] sm:$0xf] %v1367_v23  ;;  %1926 = vmatpush.bf16.msra.mxu1 %v10651_v28  ;;  %v1369_v10 = vpack.c.bf16 %v1209_v63, %v1209_v63  ;;  %v1146_v19 = vrot.slane %v11706_v30, 1  ;;  %v1147_v26 = vrot.slane %v11731_v8, 1  ;;  %v10616_v28 = vld [vmem:[#allocation9 + $0xb0] sm:$0xff]  ;;  %v442_v42 = vadd.s32 48, %v11613_v2 }
  0x56   : > { %1272 = vst [vmem:[#allocation2 + $0x30] sm:$0xf] %v1240_v29  ;;  %v10618_v56 = vld [vmem:[#allocation2 + $0x1c] sm:$0xf]  ;;  %1975 = vmatpush.bf16.msra.mxu2 %v10659_v33  ;;  %v1242_v23 = vpack.c.bf16 %v1113_v15, %v1113_v15  ;;  %v1050_v52 = vrot.slane %v11731_v8, 7  ;;  %v1308_v59 = vpack.c.bf16 %v11731_v8, %v11731_v8 }
  0x57   : > { %1273 = vst [vmem:[#allocation2 + $0x3c] sm:$0xf] %v1241_v24  ;;  %v8248_v61 = vld [vmem:[#allocation2 + $0x24] sm:$0xf0]  ;;  %2296 = vmatpush.bf16.msra.mxu3 %v10595_v34  ;;  %v11745_v24 = vsel %vm11736_vm7, 1.0, %v13083_v36  ;;  %v1200_v29 = vsel %vm1173_vm4, %v1145_v38, %v1146_v19  ;;  %v1199_v32 = vsel %vm1173_vm4, %v1146_v19, %v1147_v26  ;;  %v378_v34 = vld [vmem:[#allocation7 + $0x38] sm:$0xff] }
  0x58   : > { %1337 = vst [vmem:[#allocation2 + $0x40] sm:$0xf] %v1305_v22  ;;  %v8251_v14 = vor.u32 %v10618_v56, %v8248_v61  ;;  %1878 = vmatpush.bf16.msra.mxu0 %v10642_v44  ;;  %v10705_v22 = vld [vmem:[#allocation9 + $0x1f8] sm:$0xff]  ;;  %v1370_v33 = vpack.c.bf16 %v1200_v29, %v1200_v29  ;;  %v1211_v40 = vmul.f32 %v11745_v24, %v1199_v32  ;;  %v347_v44 = vld [vmem:[%s11599_s19 + $0x40] sm:$0xff]  ;;  %v10704_v38 = vld [vmem:[#allocation9 + $0x1f0] sm:$0xff]  ;;  %v514_v50 = vand.u32 15, %v442_v42 }
  0x59   : > { %v10619_v3 = vld [vmem:[#allocation2 + $0x20] sm:$0xf0]  ;;  %1400 = vst [vmem:[#allocation2 + $0x38] sm:$0xf] %v1368_v46  ;;  %1927 = vmatpush.bf16.msra.mxu1 %v10650_v45  ;;  %v11758_v45 = vmul.f32 %v378_v34, %v346_v31  ;;  %v1102_v58 = vsel %vm1076_vm3, %v1049_v48, %v1050_v52  ;;  %v10695_v61 = vld [vmem:[#allocation9 + $0x1a8] sm:$0xff]  ;;  %v444_v29 = vadd.s32 64, %v11613_v2 }
  0x5a   : > { %v8254_v9 = vld [vmem:[#allocation2 + $0x20] sm:$0xf]  ;;  %1338 = vst [vmem:[#allocation2 + $0x4c] sm:$0xf] %v1306_v49  ;;  %1976 = vmatpush.bf16.msra.mxu2 %v10658_v53  ;;  %v1371_v46 = vpack.c.bf16 %v1211_v40, %v1211_v40  ;;  %v10615_v49 = vld [vmem:[#allocation9 + $0xa8] sm:$0xff]  ;;  %vm858_vm8 = vcmp.ne.s32.totalorder %v514_v50, 0 }
  0x5b   : > { %v8246_v13 = vld [vmem:[#allocation2 + $0x18] sm:$0xf]  ;;  %1275 = vst [vmem:[#allocation2 + $0x54] sm:$0xf] %v1243_v6  ;;  %2297 = vmatpush.bf16.msra.mxu3 %v10594_v55  ;;  %v379_v53 = vld [vmem:[#allocation7 + $0x40] sm:$0xff]  ;;  %v443_v55 = vadd.s32 56, %v11613_v2  ;;  %v1309_v30 = vpack.c.bf16 %v11758_v45, %v11758_v45 }
  0x5c   : > { %v8247_v16 = vor.u32 %v10619_v3, %v8246_v13  ;;  %v10620_v17 = vld [vmem:[#allocation2 + $0x28] sm:$0xf0]  ;;  %1401 = vst [vmem:[#allocation2 + $0x44] sm:$0xf] %v1369_v10  ;;  %2339 = vmatpush.bf16.msrb.mxu0 %v10609_v4  ;;  %1928 = vmatmul.bf16.vlgmr.msra.gmra.mxu1 %v8251_v14  ;;  %v1051_v56 = vrot.slane %v11758_v45, 7  ;;  %v11763_v57 = vmul.f32 %v379_v53, %v347_v44  ;;  %v1148_v60 = vrot.slane %v11758_v45, 1 }
  0x5d   : > { %v8255_v20 = vor.u32 %v10620_v17, %v8254_v9  ;;  %1339 = vst [vmem:[#allocation2 + $0x58] sm:$0xf] %v1307_v7  ;;  %2388 = vmatpush.bf16.msrb.mxu1 %v10617_v5  ;;  %v11773_v63 = vsel %vm858_vm8, 1.0, %v13083_v36  ;;  %v10621_v48 = vld [vmem:[#allocation2 + $0x34] sm:$0xf]  ;;  %v521_v6 = vand.u32 15, %v443_v55 }
  0x5e   : > { %1879 = vmatmul.bf16.vlgmr.msra.gmra.mxu0 %v8247_v16  ;;  %1274 = vst [vmem:[#allocation2 + $0x48] sm:$0xf] %v1242_v23  ;;  %2298 = vmatmul.bf16.vlgmr.msra.gmra.mxu3 %v8439_v18  ;;  %v1101_v0 = vsel %vm1076_vm3, %v1050_v52, %v1051_v56  ;;  %v8450_v1 = vld [vmem:[#allocation2 + $0x18] sm:$0xf]  ;;  %v10574_v3 = vld [vmem:[#allocation2 + $0x20] sm:$0xf0]  ;;  %v1115_v4 = vmul.f32 %v11773_v63, %v1102_v58 }
  0x5f   : > { %1977 = vmatmul.bf16.vlgmr.msra.gmra.mxu2 %v8255_v20  ;;  %2842 = vmatpush.bf16.msrb.mxu3 %v10705_v22  ;;  %1402 = vst [vmem:[#allocation2 + $0x50] sm:$0xf] %v1370_v33  ;;  %v1245_v5 = vpack.c.bf16 %v1101_v0, %v1101_v0  ;;  %v1149_v7 = vrot.slane %v11763_v57, 1  ;;  %v8258_v8 = vld [vmem:[#allocation2 + $0x30] sm:$0xf]  ;;  %v1198_v10 = vsel %vm1173_vm4, %v1147_v26, %v1148_v60  ;;  %vm955_vm9 = vcmp.ne.s32.totalorder %v521_v6, 15 }
  0x60   : > { %2793 = vmatpush.bf16.msrb.mxu2 %v10697_v21  ;;  %2340 = vmatpush.bf16.msrb.mxu0 %v10608_v27  ;;  %1403 = vst [vmem:[#allocation2 + $0x5c] sm:$0xf] %v1371_v46  ;;  %v10622_v9 = vld [vmem:[#allocation2 + $0x38] sm:$0xf0]  ;;  %v8260_v12 = vld [vmem:[#allocation2 + $0x3c] sm:$0xf0]  ;;  %v1244_v13 = vpack.c.bf16 %v1115_v4, %v1115_v4  ;;  %v1372_v15 = vpack.c.bf16 %v1198_v10, %v1198_v10 }
  0x61   : > { %2389 = vmatpush.bf16.msrb.mxu1 %v10616_v28  ;;  %1340 = vst [vmem:[#allocation2 + $0x64] sm:$0xf] %v1308_v59  ;;  %v1197_v14 = vsel %vm1173_vm4, %v1148_v60, %v1149_v7  ;;  %v8266_v16 = vld [vmem:[#allocation2 + $0x38] sm:$0xf]  ;;  %v11788_v18 = vsel %vm955_vm9, 1.0, %v13083_v36  ;;  %v8259_v20 = vor.u32 %v10622_v9, %v8258_v8  ;;  %v8263_v21 = vor.u32 %v10621_v48, %v8260_v12  ;;  %v348_v27 = vld [vmem:[%s11599_s19 + $0x48] sm:$0xff] }
  0x62   : > { %1341 = vst [vmem:[#allocation2 + $0x70] sm:$0xf] %v1309_v30  ;;  %v1213_v19 = vmul.f32 %v11788_v18, %v1197_v14  ;;  %v8451_v22 = vor.u32 %v10574_v3, %v8450_v1  ;;  %v380_v28 = vld [vmem:[#allocation7 + $0x48] sm:$0xff]  ;;  %v349_v31 = vld [vmem:[%s11599_s19 + $0x50] sm:$0xff]  ;;  %v445_v32 = vadd.s32 72, %v11613_v2  ;;  %v528_v34 = vand.u32 15, %v444_v29 }
  0x63   : > { %2843 = vmatpush.bf16.msrb.mxu3 %v10704_v38  ;;  %1277 = vst [vmem:[#allocation2 + $0x6c] sm:$0xf] %v1245_v5  ;;  %v10623_v17 = vld [vmem:[#allocation2 + $0x40] sm:$0xf0]  ;;  %v11795_v33 = vmul.f32 %v380_v28, %v348_v27  ;;  %v381_v40 = vld [vmem:[#allocation7 + $0x50] sm:$0xff]  ;;  %v1052_v42 = vrot.slane %v11763_v57, 7  ;;  %v1310_v48 = vpack.c.bf16 %v11763_v57, %v11763_v57 }
  0x64   : > { %2794 = vmatpush.bf16.msrb.mxu2 %v10696_v25  ;;  %2341 = vmatpush.bf16.msrb.mxu0 %v10607_v47  ;;  %1276 = vst [vmem:[#allocation2 + $0x60] sm:$0xf] %v1244_v13  ;;  %v8267_v23 = vor.u32 %v10623_v17, %v8266_v16  ;;  %v1373_v26 = vpack.c.bf16 %v1213_v19, %v1213_v19  ;;  %v535_v25 = vand.u32 15, %v445_v32  ;;  %v10606_v38 = vld [vmem:[#allocation9 + $0x60] sm:$0xff]  ;;  %v10703_v46 = vld [vmem:[#allocation9 + $0x1e8] sm:$0xff]  ;;  %vm860_vm10 = vcmp.ne.s32.totalorder %v528_v34, 0 }
  0x65   : > { %2390 = vmatpush.bf16.msrb.mxu1 %v10615_v49  ;;  %1404 = vst [vmem:[#allocation2 + $0x68] sm:$0xf] %v1372_v15  ;;  %v11798_v44 = vmul.f32 %v381_v40, %v349_v31  ;;  %v10614_v47 = vld [vmem:[#allocation9 + $0xa0] sm:$0xff]  ;;  %v1053_v49 = vrot.slane %v11795_v33, 7  ;;  %v1150_v50 = vrot.slane %v11795_v33, 1  ;;  %v11803_v53 = vsel %vm860_vm10, 1.0, %v13083_v36 }
  0x66   : > { %1405 = vst [vmem:[#allocation2 + $0x74] sm:$0xf] %v1373_v26  ;;  %v10694_v52 = vld [vmem:[#allocation9 + $0x1a0] sm:$0xff]  ;;  %v1100_v55 = vsel %vm1076_vm3, %v1051_v56, %v1052_v42  ;;  %vm957_vm11 = vcmp.ne.s32.totalorder %v535_v25, 15  ;;  %v1311_v1 = vpack.c.bf16 %v11795_v33, %v11795_v33  ;;  %v10625_v6 = vld [vmem:[#allocation2 + $0x50] sm:$0xf0] }
  0x67   : > { %v1151_v58 = vrot.slane %v11798_v44, 1  ;;  %2844 = vmatpush.bf16.msrb.mxu3 %v10703_v46  ;;  %v1099_v59 = vsel %vm1076_vm3, %v1052_v42, %v1053_v49  ;;  %v1117_v60 = vmul.f32 %v11803_v53, %v1100_v55  ;;  %v1196_v0 = vsel %vm1173_vm4, %v1149_v7, %v1150_v50  ;;  %v10624_v8 = vld [vmem:[#allocation2 + $0x4c] sm:$0xf]  ;;  %v8462_v9 = vld [vmem:[#allocation2 + $0x30] sm:$0xf]  ;;  %v350_v19 = vld [vmem:[%s11599_s19 + $0x58] sm:$0xff] }
  0x68   : > { %2795 = vmatpush.bf16.msrb.mxu2 %v10695_v61  ;;  %2342 = vmatpush.bf16.msrb.mxu0 %v10606_v38  ;;  %v11816_v61 = vsel %vm957_vm11, 1.0, %v13083_v36  ;;  %v1247_v45 = vpack.c.bf16 %v1099_v59, %v1099_v59  ;;  %v1374_v4 = vpack.c.bf16 %v1196_v0, %v1196_v0  ;;  %v10577_v10 = vld [vmem:[#allocation2 + $0x38] sm:$0xf0]  ;;  %1342 = vst [vmem:[#allocation2 + $0x7c] sm:$0xf] %v1310_v48  ;;  %v351_v27 = vld [vmem:[%s11599_s19 + $0x60] sm:$0xff] }
  0x69   : > { %2391 = vmatpush.bf16.msrb.mxu1 %v10614_v47  ;;  %v1195_v56 = vsel %vm1173_vm4, %v1150_v50, %v1151_v58  ;;  %v1246_v30 = vpack.c.bf16 %v1117_v60, %v1117_v60  ;;  %v8270_v7 = vld [vmem:[#allocation2 + $0x48] sm:$0xf]  ;;  %v8272_v12 = vld [vmem:[#allocation2 + $0x54] sm:$0xf0]  ;;  %1343 = vst [vmem:[#allocation2 + $0x88] sm:$0xf] %v1311_v1  ;;  %v8463_v17 = vor.u32 %v10577_v10, %v8462_v9 }
  0x6a   : > { %v1215_v3 = vmul.f32 %v11816_v61, %v1195_v56  ;;  %1279 = vst [vmem:[#allocation2 + $0x84] sm:$0xf] %v1247_v45  ;;  %v8278_v57 = vld [vmem:[#allocation2 + $0x50] sm:$0xf]  ;;  %v10626_v13 = vld [vmem:[#allocation2 + $0x58] sm:$0xf0]  ;;  %v8271_v14 = vor.u32 %v10625_v6, %v8270_v7  ;;  %v8275_v15 = vor.u32 %v10624_v8, %v8272_v12  ;;  %v1312_v56 = vpack.c.bf16 %v11798_v44, %v11798_v44 }
  0x6b   : > { %1278 = vst [vmem:[#allocation2 + $0x78] sm:$0xf] %v1246_v30  ;;  %v8279_v16 = vor.u32 %v10626_v13, %v8278_v57  ;;  %v383_v28 = vld [vmem:[#allocation7 + $0x60] sm:$0xff]  ;;  %v1054_v31 = vrot.slane %v11798_v44, 7  ;;  %v10605_v34 = vld [vmem:[#allocation9 + $0x58] sm:$0xff] }
  0x6c   : > { %1933 = vmatmul.bf16.gmra.mxu1 %v8263_v21  ;;  %2796 = vmatpush.bf16.msrb.mxu2 %v10694_v52  ;;  %v1375_v5 = vpack.c.bf16 %v1215_v3, %v1215_v3  ;;  %1406 = vst [vmem:[#allocation2 + $0x80] sm:$0xf] %v1374_v4  ;;  %v446_v21 = vadd.s32 80, %v11613_v2  ;;  %v11836_v32 = vmul.f32 %v383_v28, %v351_v27  ;;  %v10702_v40 = vld [vmem:[#allocation9 + $0x1e0] sm:$0xff]  ;;  %v10613_v25 = vld [vmem:[#allocation9 + $0x98] sm:$0xff] }
  0x6d   : > { %v10693_v38 = vld [vmem:[#allocation9 + $0x198] sm:$0xff]  ;;  %v1098_v47 = vsel %vm1076_vm3, %v1053_v49, %v1054_v31  ;;  %2343 = vmatpush.bf16.msrb.mxu0 %v10605_v34  ;;  %2845 = vmatpush.bf16.msrb.mxu3 %v10702_v40  ;;  %v10627_v1 = vld [vmem:[#allocation2 + $0x64] sm:$0xf]  ;;  %v8284_v4 = vld [vmem:[#allocation2 + $0x6c] sm:$0xf0] }
  0x6e   : > { %1884 = vmatmul.bf16.gmra.mxu0 %v8259_v20  ;;  %2303 = vmatmul.bf16.gmra.mxu3 %v8451_v22  ;;  %1407 = vst [vmem:[#allocation2 + $0x8c] sm:$0xf] %v1375_v5  ;;  %v382_v20 = vld [vmem:[#allocation7 + $0x58] sm:$0xff]  ;;  %v447_v22 = vadd.s32 88, %v11613_v2  ;;  %v542_v26 = vand.u32 15, %v446_v21  ;;  %v1153_v49 = vrot.slane %v11836_v32, 1  ;;  %v8287_v12 = vor.u32 %v10627_v1, %v8284_v4 }
  0x6f   : > { %1982 = vmatmul.bf16.gmra.mxu2 %v8267_v23  ;;  %v11832_v23 = vmul.f32 %v382_v20, %v350_v19  ;;  %2392 = vmatpush.bf16.msrb.mxu1 %v10613_v25  ;;  %v8474_v5 = vld [vmem:[#allocation2 + $0x48] sm:$0xf]  ;;  %1344 = vst [vmem:[#allocation2 + $0x94] sm:$0xf] %v1312_v56  ;;  %v8282_v6 = vld [vmem:[#allocation2 + $0x60] sm:$0xf]  ;;  %v1314_v56 = vpack.c.bf16 %v11836_v32, %v11836_v32 }
  0x70   : > { %v549_v29 = vand.u32 15, %v447_v22  ;;  %vm862_vm12 = vcmp.ne.s32.totalorder %v542_v26, 0  ;;  %2797 = vmatpush.bf16.msrb.mxu2 %v10693_v38  ;;  %v10628_v8 = vld [vmem:[#allocation2 + $0x68] sm:$0xf0]  ;;  %v8290_v9 = vld [vmem:[#allocation2 + $0x68] sm:$0xf] }
  0x71   : > { %v1055_v42 = vrot.slane %v11832_v23, 7  ;;  %v11840_v46 = vsel %vm862_vm12, 1.0, %v13083_v36  ;;  %v1152_v50 = vrot.slane %v11832_v23, 1  ;;  %v1313_v0 = vpack.c.bf16 %v11832_v23, %v11832_v23  ;;  %v10629_v10 = vld [vmem:[#allocation2 + $0x70] sm:$0xf0] }
  0x72   : > { %vm959_vm13 = vcmp.ne.s32.totalorder %v549_v29, 15  ;;  %v1119_v55 = vmul.f32 %v11840_v46, %v1098_v47  ;;  %v8283_v7 = vor.u32 %v10628_v8, %v8282_v6  ;;  %v8291_v57 = vor.u32 %v10629_v10, %v8290_v9  ;;  %v353_v21 = vld [vmem:[%s11599_s19 + $0x70] sm:$0xff]  ;;  %v8294_v1 = vld [vmem:[#allocation2 + $0x78] sm:$0xf]  ;;  %1346 = vst [vmem:[#allocation2 + $0xac] sm:$0xf] %v1314_v56 }
  0x73   : > { %v1097_v52 = vsel %vm1076_vm3, %v1054_v31, %v1055_v42  ;;  %v11853_v33 = vsel %vm959_vm13, 1.0, %v13083_v36  ;;  %v1194_v60 = vsel %vm1173_vm4, %v1151_v58, %v1152_v50  ;;  %v1193_v30 = vsel %vm1173_vm4, %v1152_v50, %v1153_v49  ;;  %v10580_v58 = vld [vmem:[#allocation2 + $0x50] sm:$0xf0]  ;;  %1345 = vst [vmem:[#allocation2 + $0xa0] sm:$0xf] %v1313_v0  ;;  %v10701_v31 = vld [vmem:[#allocation9 + $0x1d8] sm:$0xff] }
  0x74   : > { %v1249_v59 = vpack.c.bf16 %v1097_v52, %v1097_v52  ;;  %13128 = vst [vmem:[#allocation20_spill] sm:$0xff] %v11853_v33  ;;  %v1248_v45 = vpack.c.bf16 %v1119_v55, %v1119_v55  ;;  %v1376_v48 = vpack.c.bf16 %v1194_v60, %v1194_v60  ;;  %v1217_v3 = vmul.f32 %v11853_v33, %v1193_v30  ;;  %v385_v22 = vld [vmem:[#allocation7 + $0x70] sm:$0xff]  ;;  %v8296_v6 = vld [vmem:[#allocation2 + $0x84] sm:$0xf0]  ;;  %v8302_v8 = vld [vmem:[#allocation2 + $0x80] sm:$0xf] }
  0x75   : > { %v8475_v13 = vor.u32 %v10580_v58, %v8474_v5  ;;  %v1056_v27 = vrot.slane %v11836_v32, 7  ;;  %v11874_v28 = vmul.f32 %v385_v22, %v353_v21  ;;  %v10604_v29 = vld [vmem:[#allocation9 + $0x50] sm:$0xff]  ;;  %2846 = vmatpush.bf16.msrb.mxu3 %v10701_v31  ;;  %v8486_v5 = vld [vmem:[#allocation2 + $0x60] sm:$0xf]  ;;  %v10630_v58 = vld [vmem:[#allocation2 + $0x7c] sm:$0xf] }
  0x76   : > { %1281 = vst [vmem:[#allocation2 + $0x9c] sm:$0xf] %v1249_v59  ;;  %v1377_v44 = vpack.c.bf16 %v1217_v3, %v1217_v3  ;;  %v10612_v40 = vld [vmem:[#allocation9 + $0x90] sm:$0xff]  ;;  %2344 = vmatpush.bf16.msrb.mxu0 %v10604_v29  ;;  %v10631_v3 = vld [vmem:[#allocation2 + $0x80] sm:$0xf0]  ;;  %v8299_v10 = vor.u32 %v10630_v58, %v8296_v6  ;;  %v10603_v29 = vld [vmem:[#allocation9 + $0x48] sm:$0xff] }
  0x77   : > { %1280 = vst [vmem:[#allocation2 + $0x90] sm:$0xf] %v1248_v45  ;;  %v10692_v25 = vld [vmem:[#allocation9 + $0x190] sm:$0xff]  ;;  %v1096_v47 = vsel %vm1076_vm3, %v1055_v42, %v1056_v27  ;;  %2393 = vmatpush.bf16.msrb.mxu1 %v10612_v40  ;;  %v1155_v42 = vrot.slane %v11874_v28, 1  ;;  %v8295_v9 = vor.u32 %v10631_v3, %v8294_v1  ;;  %v387_v21 = vld [vmem:[#allocation7 + $0x80] sm:$0xff] }
  0x78   : > { %1408 = vst [vmem:[#allocation2 + $0x98] sm:$0xf] %v1376_v48  ;;  %2798 = vmatpush.bf16.msrb.mxu2 %v10692_v25  ;;  %v10700_v31 = vld [vmem:[#allocation9 + $0x1d0] sm:$0xff]  ;;  %v10611_v25 = vld [vmem:[#allocation9 + $0x88] sm:$0xff]  ;;  %v10586_v58 = vld [vmem:[#allocation2 + $0x80] sm:$0xf0] }
  0x79   : > { %1409 = vst [vmem:[#allocation2 + $0xa4] sm:$0xf] %v1377_v44  ;;  %v10632_v44 = vld [vmem:[#allocation2 + $0x88] sm:$0xf0]  ;;  %2847 = vmatpush.bf16.msrb.mxu3 %v10700_v31  ;;  %v10633_v6 = vld [vmem:[#allocation2 + $0x94] sm:$0xf] }
  0x7a   : > { %2345 = vmatpush.bf16.msrb.mxu0 %v10603_v29 }
  0x7b   : > { %2394 = vmatpush.bf16.msrb.mxu1 %v10611_v25 }
  0x7c   : > { %1938 = vmatmul.bf16.gmra.mxu1 %v8275_v15  ;;  %v384_v15 = vld [vmem:[#allocation7 + $0x68] sm:$0xff] }
  0x7d   : > { %v10589_v31 = vld [vmem:[#allocation2 + $0x98] sm:$0xf0] }
  0x7e   : > { %1889 = vmatmul.bf16.gmra.mxu0 %v8271_v14  ;;  %2308 = vmatmul.bf16.gmra.mxu3 %v8463_v17  ;;  %v352_v14 = vld [vmem:[%s11599_s19 + $0x68] sm:$0xff]  ;;  %v449_v17 = vadd.s32 104, %v11613_v2 }
  0x7f   : > { %1987 = vmatmul.bf16.gmra.mxu2 %v8279_v16  ;;  %v448_v16 = vadd.s32 96, %v11613_v2  ;;  %v11870_v19 = vmul.f32 %v384_v15, %v352_v14  ;;  %v450_v14 = vadd.s32 112, %v11613_v2  ;;  %v451_v15 = vadd.s32 120, %v11613_v2 }
  0x80   : > { %v563_v26 = vand.u32 15, %v449_v17 }
  0x81   : > { %v556_v20 = vand.u32 15, %v448_v16  ;;  %v1057_v34 = vrot.slane %v11870_v19, 7  ;;  %v1154_v50 = vrot.slane %v11870_v19, 1  ;;  %v1315_v0 = vpack.c.bf16 %v11870_v19, %v11870_v19 }
  0x82   : > { %vm961_vm15 = vcmp.ne.s32.totalorder %v563_v26, 15  ;;  %v570_v17 = vand.u32 15, %v450_v14  ;;  %v577_v22 = vand.u32 15, %v451_v15  ;;  %v1058_v26 = vrot.slane %v11874_v28, 7  ;;  %v10610_v14 = vld [vmem:[#allocation9 + $0x80] sm:$0xff] }
  0x83   : > { %vm864_vm14 = vcmp.ne.s32.totalorder %v556_v20, 0  ;;  %v1095_v52 = vsel %vm1076_vm3, %v1056_v27, %v1057_v34  ;;  %v11891_v23 = vsel %vm961_vm15, 1.0, %v13083_v36  ;;  %v1192_v60 = vsel %vm1173_vm4, %v1153_v49, %v1154_v50  ;;  %v10583_v49 = vld [vmem:[#allocation2 + $0x68] sm:$0xf0]  ;;  %1347 = vst [vmem:[#allocation2 + $0xb8] sm:$0xf] %v1315_v0  ;;  %2395 = vmatpush.bf16.msrb.mxu1 %v10610_v14 }
  0x84   : > { %v11878_v38 = vsel %vm864_vm14, 1.0, %v13083_v36  ;;  %v1251_v59 = vpack.c.bf16 %v1095_v52, %v1095_v52  ;;  %13130 = vst [vmem:[#allocation22_spill] sm:$0xff] %v11891_v23  ;;  %v1191_v30 = vsel %vm1173_vm4, %v1154_v50, %v1155_v42  ;;  %v1378_v48 = vpack.c.bf16 %v1192_v60, %v1192_v60  ;;  %v355_v20 = vld [vmem:[%s11599_s19 + $0x80] sm:$0xff]  ;;  %v10667_v14 = vld [vmem:[#allocation2 + $0x38] sm:$0xf0] }
  0x85   : > { %13129 = vst [vmem:[#allocation21_spill] sm:$0xff] %v11878_v38  ;;  %v1121_v55 = vmul.f32 %v11878_v38, %v1096_v47  ;;  %v1219_v4 = vmul.f32 %v11891_v23, %v1191_v30  ;;  %v11910_v27 = vmul.f32 %v387_v21, %v355_v20  ;;  %vm866_vm0 = vcmp.ne.s32.totalorder %v570_v17, 0  ;;  %v10691_v47 = vld [vmem:[#allocation9 + $0x188] sm:$0xff]  ;;  %v369_v23 = vld [vmem:[%s11599_s19 + $0xf0] sm:$0xff] }
  0x86   : > { %1283 = vst [vmem:[#allocation2 + $0xb4] sm:$0xf] %v1251_v59  ;;  %v11914_v50 = vsel %vm866_vm0, 1.0, %v13083_v36  ;;  %v1094_v52 = vsel %vm1076_vm3, %v1057_v34, %v1058_v26  ;;  %vm963_vm1 = vcmp.ne.s32.totalorder %v577_v22, 15  ;;  %2799 = vmatpush.bf16.msrb.mxu2 %v10691_v47  ;;  %v1316_v30 = vpack.c.bf16 %v11874_v28, %v11874_v28  ;;  %v8308_v28 = vld [vmem:[#allocation2 + $0x9c] sm:$0xf0] }
  0x87   : > { %v1250_v45 = vpack.c.bf16 %v1121_v55, %v1121_v55  ;;  %v1379_v32 = vpack.c.bf16 %v1219_v4, %v1219_v4  ;;  %1410 = vst [vmem:[#allocation2 + $0xb0] sm:$0xf] %v1378_v48  ;;  %v1123_v60 = vmul.f32 %v11914_v50, %v1094_v52  ;;  %v11927_v19 = vsel %vm963_vm1, 1.0, %v13083_v36  ;;  %v8306_v4 = vld [vmem:[#allocation2 + $0x90] sm:$0xf]  ;;  %v10690_v52 = vld [vmem:[#allocation9 + $0x180] sm:$0xff] }
  0x88   : > { %13131 = vst [vmem:[#allocation23_spill] sm:$0xff] %v11914_v50  ;;  %v1157_v34 = vrot.slane %v11910_v27, 1  ;;  %v10636_v20 = vld [vmem:[#allocation2 + $0xac] sm:$0xf]  ;;  %v8510_v22 = vld [vmem:[#allocation2 + $0x90] sm:$0xf] }
  0x89   : > { %1282 = vst [vmem:[#allocation2 + $0xa8] sm:$0xf] %v1250_v45  ;;  %v1252_v0 = vpack.c.bf16 %v1123_v60, %v1123_v60  ;;  %v8511_v60 = vor.u32 %v10589_v31, %v8510_v22  ;;  %v465_v50 = vadd.s32 232, %v11613_v2  ;;  %v10936_v38 = vld [vmem:[#allocation10 + $0xf0] sm:$0xff] }
  0x8a   : > { %1411 = vst [vmem:[#allocation2 + $0xbc] sm:$0xf] %v1379_v32  ;;  %v8320_v21 = vld [vmem:[#allocation2 + $0xb4] sm:$0xf0]  ;;  %2800 = vmatpush.bf16.msrb.mxu2 %v10690_v52  ;;  %v10711_v52 = vld [vmem:[#allocation9 + $0x228] sm:$0xff] }
  0x8b   : > { %13132 = vst [vmem:[#allocation24_spill] sm:$0xff] %v11927_v19  ;;  %v8323_v47 = vor.u32 %v10636_v20, %v8320_v21 }
  0x8c   : > { %1943 = vmatmul.bf16.gmra.mxu1 %v8287_v12  ;;  %v8487_v12 = vor.u32 %v10583_v49, %v8486_v5  ;;  %v10634_v5 = vld [vmem:[#allocation2 + $0x98] sm:$0xf0]  ;;  %1284 = vst [vmem:[#allocation2 + $0xc0] sm:$0xf] %v1252_v0 }
  0x8d   : > { %1348 = vst [vmem:[#allocation2 + $0xc4] sm:$0xf] %v1316_v30  ;;  %v10637_v17 = vld [vmem:[#allocation2 + $0xb0] sm:$0xf0] }
  0x8e   : > { %1894 = vmatmul.bf16.gmra.mxu0 %v8283_v7  ;;  %2313 = vmatmul.bf16.gmra.mxu3 %v8475_v13  ;;  %v8303_v7 = vor.u32 %v10632_v44, %v8302_v8  ;;  %v386_v13 = vld [vmem:[#allocation7 + $0x78] sm:$0xff]  ;;  %v10635_v44 = vld [vmem:[#allocation2 + $0xa0] sm:$0xf0] }
  0x8f   : > { %1992 = vmatmul.bf16.gmra.mxu2 %v8291_v57  ;;  %v354_v57 = vld [vmem:[%s11599_s19 + $0x78] sm:$0xff] }
  0x90   : > { %v11906_v16 = vmul.f32 %v386_v13, %v354_v57  ;;  %v8314_v8 = vld [vmem:[#allocation2 + $0x98] sm:$0xf]  ;;  %v10602_v57 = vld [vmem:[#allocation9 + $0x40] sm:$0xff]  ;;  %v10699_v13 = vld [vmem:[#allocation9 + $0x1c8] sm:$0xff] }
  0x91   : > { %2346 = vmatpush.bf16.msrb.mxu0 %v10602_v57  ;;  %2848 = vmatpush.bf16.msrb.mxu3 %v10699_v13  ;;  %v8318_v15 = vld [vmem:[#allocation2 + $0xa8] sm:$0xf]  ;;  %v10638_v29 = vld [vmem:[#allocation2 + $0xb8] sm:$0xf0]  ;;  %v10572_v57 = vld [vmem:[#allocation2 + $0x10] sm:$0xf0] }
  0x92   : > { %v1059_v40 = vrot.slane %v11906_v16, 7  ;;  %v1156_v55 = vrot.slane %v11906_v16, 1  ;;  %v1317_v48 = vpack.c.bf16 %v11906_v16, %v11906_v16  ;;  %v8319_v25 = vor.u32 %v10637_v17, %v8318_v15  ;;  %v8630_v13 = vld [vmem:[#allocation2 + $0x30] sm:$0xf]  ;;  %v10666_v15 = vld [vmem:[#allocation2 + $0x34] sm:$0xf] }
  0x93   : > { %v8330_v0 = vld [vmem:[#allocation2 + $0xc0] sm:$0xf] }
  0x94   : > { %v1093_v59 = vsel %vm1076_vm3, %v1058_v26, %v1059_v40  ;;  %v1190_v56 = vsel %vm1173_vm4, %v1155_v42, %v1156_v55  ;;  %v1189_v1 = vsel %vm1173_vm4, %v1156_v55, %v1157_v34  ;;  %v8498_v42 = vld [vmem:[#allocation2 + $0x78] sm:$0xf]  ;;  %1349 = vst [vmem:[#allocation2 + $0xd0] sm:$0xf] %v1317_v48  ;;  %v8326_v26 = vld [vmem:[#allocation2 + $0xb0] sm:$0xf] }
  0x95   : > { %v1253_v45 = vpack.c.bf16 %v1093_v59, %v1093_v59  ;;  %v1380_v3 = vpack.c.bf16 %v1190_v56, %v1190_v56  ;;  %v1221_v49 = vmul.f32 %v11927_v19, %v1189_v1  ;;  %v10698_v55 = vld [vmem:[#allocation9 + $0x1c0] sm:$0xff]  ;;  %v8327_v59 = vor.u32 %v10638_v29, %v8326_v26  ;;  %v10793_v56 = vld [vmem:[#allocation9 + $0xf8] sm:$0xff] }
  0x96   : > { %2849 = vmatpush.bf16.msrb.mxu3 %v10698_v55  ;;  %3623 = vmatpush.bf16.msra.mxu1 %v10793_v56  ;;  %v10639_v48 = vld [vmem:[#allocation2 + $0xc4] sm:$0xf]  ;;  %v8632_v17 = vld [vmem:[#allocation2 + $0x3c] sm:$0xf0]  ;;  %v8631_v29 = vor.u32 %v10667_v14, %v8630_v13  ;;  %v10808_v55 = vld [vmem:[#allocation9 + $0x170] sm:$0xff]  ;;  %v463_v19 = vadd.s32 216, %v11613_v2 }
  0x97   : > { %1285 = vst [vmem:[#allocation2 + $0xcc] sm:$0xf] %v1253_v45  ;;  %v1381_v32 = vpack.c.bf16 %v1221_v49, %v1221_v49  ;;  %v10713_v45 = vld [vmem:[#allocation9 + $0x238] sm:$0xff]  ;;  %v10592_v49 = vld [vmem:[#allocation2 + $0xb0] sm:$0xf0]  ;;  %v8635_v31 = vor.u32 %v10666_v15, %v8632_v17  ;;  %v10799_v17 = vld [vmem:[#allocation9 + $0x128] sm:$0xff] }
  0x98   : > { %1412 = vst [vmem:[#allocation2 + $0xc8] sm:$0xf] %v1380_v3  ;;  %2891 = vmatpush.bf16.msra.mxu0 %v10713_v45  ;;  %v8522_v3 = vld [vmem:[#allocation2 + $0xa8] sm:$0xf] }
  0x99   : > { %1413 = vst [vmem:[#allocation2 + $0xd4] sm:$0xf] %v1381_v32  ;;  %v10801_v32 = vld [vmem:[#allocation9 + $0x138] sm:$0xff] }
  0x9a   : > { %3672 = vmatpush.bf16.msra.mxu2 %v10801_v32 }
  0x9b   : > { %v8332_v1 = vld [vmem:[#allocation2 + $0xcc] sm:$0xf0] }
  0x9c   : > { %1948 = vmatmul.bf16.gmra.mxu1 %v8299_v10  ;;  %v8311_v10 = vor.u32 %v10633_v6, %v8308_v28  ;;  %v8523_v28 = vor.u32 %v10592_v49, %v8522_v3  ;;  %v10573_v3 = vld [vmem:[#allocation2 + $0x1c] sm:$0xf]  ;;  %v10575_v49 = vld [vmem:[#allocation2 + $0x28] sm:$0xf0] }
  0x9e   : > { %1899 = vmatmul.bf16.gmra.mxu0 %v8295_v9  ;;  %2318 = vmatmul.bf16.gmra.mxu3 %v8487_v12  ;;  %v8307_v9 = vor.u32 %v10634_v5, %v8306_v4  ;;  %v8499_v12 = vor.u32 %v10586_v58, %v8498_v42  ;;  %v10640_v30 = vld [vmem:[#allocation2 + $0xc8] sm:$0xf0]  ;;  %v8335_v58 = vor.u32 %v10639_v48, %v8332_v1 }
  0x9f   : > { %1997 = vmatmul.bf16.gmra.mxu2 %v8303_v7  ;;  %v8315_v7 = vor.u32 %v10635_v44, %v8314_v8  ;;  %v8338_v4 = vld [vmem:[#allocation2 + $0xc8] sm:$0xf]  ;;  %v8331_v42 = vor.u32 %v10640_v30, %v8330_v0  ;;  %v10712_v8 = vld [vmem:[#allocation9 + $0x230] sm:$0xff]  ;;  %v10809_v44 = vld [vmem:[#allocation9 + $0x178] sm:$0xff] }
  0xa0   : > { %v10641_v5 = vld [vmem:[#allocation2 + $0xd0] sm:$0xf0]  ;;  %2892 = vmatpush.bf16.msra.mxu0 %v10712_v8  ;;  %3721 = vmatpush.bf16.msra.mxu3 %v10809_v44 }
  0xa1   : > { %v8339_v6 = vor.u32 %v10641_v5, %v8338_v4  ;;  %v8452_v4 = vld [vmem:[#allocation2 + $0x24] sm:$0xf0]  ;;  %v8458_v5 = vld [vmem:[#allocation2 + $0x20] sm:$0xf] }
  0xa2   : > { %v8455_v44 = vor.u32 %v10573_v3, %v8452_v4  ;;  %v8656_v3 = vld [vmem:[#allocation2 + $0x6c] sm:$0xf0] }
  0xa4   : > { %2893 = vmatpush.bf16.msra.mxu0 %v10711_v52  ;;  %3722 = vmatpush.bf16.msra.mxu3 %v10808_v55 }
  0xac   : > { %1953 = vmatmul.bf16.gmra.mxu1 %v8311_v10  ;;  %v10570_v10 = vld [vmem:[#allocation2 + $0x4] sm:$0xf] }
  0xae   : > { %1904 = vmatmul.bf16.gmra.mxu0 %v8307_v9  ;;  %2323 = vmatmul.bf16.gmra.mxu3 %v8499_v12  ;;  %v10792_v9 = vld [vmem:[#allocation9 + $0xf0] sm:$0xff]  ;;  %v8446_v12 = vld [vmem:[#allocation2 + $0x8] sm:$0xf] }
  0xaf   : > { %2002 = vmatmul.bf16.gmra.mxu2 %v8315_v7  ;;  %3624 = vmatpush.bf16.msra.mxu1 %v10792_v9  ;;  %v8440_v7 = vld [vmem:[#allocation2 + $0xc] sm:$0xf0]  ;;  %v8447_v21 = vor.u32 %v10572_v57, %v8446_v12  ;;  %v8459_v9 = vor.u32 %v10575_v49, %v8458_v5 }
  0xb0   : > { %v8443_v20 = vor.u32 %v10570_v10, %v8440_v7 }
  0xbc   : > { %1958 = vmatmul.bf16.gmra.mxu1 %v8323_v47  ;;  %v10800_v47 = vld [vmem:[#allocation9 + $0x130] sm:$0xff] }
  0xbd   : > { %3673 = vmatpush.bf16.msra.mxu2 %v10800_v47 }
  0xbe   : > { %1909 = vmatmul.bf16.gmra.mxu0 %v8319_v25  ;;  %2328 = vmatmul.bf16.gmra.mxu3 %v8511_v60 }
  0xbf   : > { %2007 = vmatmul.bf16.gmra.mxu2 %v8327_v59  ;;  %v10791_v59 = vld [vmem:[#allocation9 + $0xe8] sm:$0xff] }
  0xc0   : > { %3625 = vmatpush.bf16.msra.mxu1 %v10791_v59  ;;  %v10576_v59 = vld [vmem:[#allocation2 + $0x34] sm:$0xf] }
  0xc1   : > { %3674 = vmatpush.bf16.msra.mxu2 %v10799_v17 }
  0xcc   : > { %1963 = vmatmul.bf16.gmra.mxu1 %v8335_v58  ;;  %v10670_v58 = vld [vmem:[#allocation2 + $0x50] sm:$0xf0] }
  0xce   : > { %1914 = vmatmul.bf16.gmra.mxu0 %v8331_v42  ;;  %2333 = vmatmul.bf16.gmra.mxu3 %v8523_v28  ;;  %v8642_v42 = vld [vmem:[#allocation2 + $0x48] sm:$0xf]  ;;  %v8644_v28 = vld [vmem:[#allocation2 + $0x54] sm:$0xf0] }
  0xcf   : > { %2012 = vmatmul.bf16.gmra.mxu2 %v8339_v6  ;;  %v10669_v6 = vld [vmem:[#allocation2 + $0x4c] sm:$0xf]  ;;  %v8643_v57 = vor.u32 %v10670_v58, %v8642_v42 }
  0xd0   : > { %v8647_v13 = vor.u32 %v10669_v6, %v8644_v28 }
  0xd9   : > { %v1929_v26 = vpop.f32.mrf.mxu1 }
  0xdb   : > { %v1880_v22 = vpop.f32.mrf.mxu0 }
  0xdc   : > { %v1930_v25 = vadd.f32 %v1929_v26, %v1880_v22  ;;  %2396 = vmatmul.bf16.vlgmr.msrb.gmra.mxu1 %v8447_v21  ;;  %v10807_v21 = vld [vmem:[#allocation9 + $0x168] sm:$0xff]  ;;  %v10790_v22 = vld [vmem:[#allocation9 + $0xe0] sm:$0xff] }
  0xdd   : > { %3723 = vmatpush.bf16.msra.mxu3 %v10807_v21  ;;  %3626 = vmatpush.bf16.msra.mxu1 %v10790_v22 }
  0xde   : > { %2347 = vmatmul.bf16.vlgmr.msrb.gmra.mxu0 %v8443_v20  ;;  %2850 = vmatmul.bf16.vlgmr.msrb.gmra.mxu3 %v8635_v31  ;;  %v10710_v20 = vld [vmem:[#allocation9 + $0x220] sm:$0xff] }
  0xdf   : > { %2801 = vmatmul.bf16.vlgmr.msrb.gmra.mxu2 %v8631_v29  ;;  %2894 = vmatpush.bf16.msra.mxu0 %v10710_v20 }
  0xe1   : > { %v2299_v45 = vpop.f32.mrf.mxu3  ;;  %v1931_v30 = vpop.f32.mrf.mxu1 }
  0xe2   : > { %v1978_v60 = vpop.f32.mrf.mxu2 }
  0xe3   : > { %v1979_v56 = vadd.f32 %v1978_v60, %v1930_v25  ;;  %v1882_v0 = vpop.f32.mrf.mxu0  ;;  %v8464_v60 = vld [vmem:[#allocation2 + $0x3c] sm:$0xf0] }
  0xe4   : > { %v1932_v48 = vadd.f32 %v1931_v30, %v1882_v0  ;;  %v8654_v0 = vld [vmem:[#allocation2 + $0x60] sm:$0xf]  ;;  %v10673_v30 = vld [vmem:[#allocation2 + $0x68] sm:$0xf0]  ;;  %v8467_v49 = vor.u32 %v10576_v59, %v8464_v60  ;;  %v10676_v59 = vld [vmem:[#allocation2 + $0x80] sm:$0xf0] }
  0xe5   : > { %v11941_v1 = vadd.f32 %v2299_v45, %v1979_v56  ;;  %v8470_v45 = vld [vmem:[#allocation2 + $0x38] sm:$0xf]  ;;  %v10578_v56 = vld [vmem:[#allocation2 + $0x40] sm:$0xf0]  ;;  %v10675_v60 = vld [vmem:[#allocation2 + $0x7c] sm:$0xf] }
  0xe6   : > { %v8471_v42 = vor.u32 %v10578_v56, %v8470_v45  ;;  %v8668_v45 = vld [vmem:[#allocation2 + $0x84] sm:$0xf0] }
  0xe9   : > { %v2301_v8 = vpop.f32.mrf.mxu3  ;;  %v1934_v12 = vpop.f32.mrf.mxu1 }
  0xea   : > { %v1980_v32 = vpop.f32.mrf.mxu2 }
  0xeb   : > { %v1981_v10 = vadd.f32 %v1980_v32, %v1932_v48  ;;  %v1885_v7 = vpop.f32.mrf.mxu0  ;;  %v10672_v48 = vld [vmem:[#allocation2 + $0x64] sm:$0xf]  ;;  %v8655_v32 = vor.u32 %v10673_v30, %v8654_v0 }
  0xec   : > { %v1935_v14 = vadd.f32 %v1934_v12, %v1885_v7  ;;  %2401 = vmatmul.bf16.gmra.mxu1 %v8459_v9  ;;  %v10709_v7 = vld [vmem:[#allocation9 + $0x218] sm:$0xff]  ;;  %v10806_v12 = vld [vmem:[#allocation9 + $0x160] sm:$0xff] }
  0xed   : > { %v11943_v15 = vadd.f32 %v2301_v8, %v1981_v10  ;;  %v8659_v8 = vor.u32 %v10672_v48, %v8656_v3  ;;  %v10798_v10 = vld [vmem:[#allocation9 + $0x120] sm:$0xff]  ;;  %2895 = vmatpush.bf16.msra.mxu0 %v10709_v7  ;;  %3724 = vmatpush.bf16.msra.mxu3 %v10806_v12 }
  0xee   : > { %2352 = vmatmul.bf16.gmra.mxu0 %v8455_v44  ;;  %2855 = vmatmul.bf16.gmra.mxu3 %v8647_v13 }
  0xef   : > { %2806 = vmatmul.bf16.gmra.mxu2 %v8643_v57  ;;  %v10789_v57 = vld [vmem:[#allocation9 + $0xd8] sm:$0xff] }
  0xf0   : > { %3675 = vmatpush.bf16.msra.mxu2 %v10798_v10  ;;  %3627 = vmatpush.bf16.msra.mxu1 %v10789_v57 }
  0xf1   : > { %v2304_v29 = vpop.f32.mrf.mxu3  ;;  %v1936_v47 = vpop.f32.mrf.mxu1 }
  0xf2   : > { %v1983_v26 = vpop.f32.mrf.mxu2 }
  0xf3   : > { %v1984_v31 = vadd.f32 %v1983_v26, %v1935_v14  ;;  %v1887_v25 = vpop.f32.mrf.mxu0 }
  0xf4   : > { %v1937_v52 = vadd.f32 %v1936_v47, %v1887_v25  ;;  %v8482_v25 = vld [vmem:[#allocation2 + $0x50] sm:$0xf]  ;;  %v10581_v47 = vld [vmem:[#allocation2 + $0x58] sm:$0xf0] }
  0xf5   : > { %v11945_v55 = vadd.f32 %v2304_v29, %v1984_v31  ;;  %v10579_v29 = vld [vmem:[#allocation2 + $0x4c] sm:$0xf]  ;;  %v8476_v31 = vld [vmem:[#allocation2 + $0x54] sm:$0xf0]  ;;  %v8483_v48 = vor.u32 %v10581_v47, %v8482_v25  ;;  %v10679_v25 = vld [vmem:[#allocation2 + $0x98] sm:$0xf0] }
  0xf6   : > { %v8479_v30 = vor.u32 %v10579_v29, %v8476_v31  ;;  %v10584_v29 = vld [vmem:[#allocation2 + $0x70] sm:$0xf0]  ;;  %v8678_v31 = vld [vmem:[#allocation2 + $0x90] sm:$0xf] }
  0xf7   : > { %v10678_v47 = vld [vmem:[#allocation2 + $0x94] sm:$0xf] }
  0xf9   : > { %v2306_v5 = vpop.f32.mrf.mxu3  ;;  %v1939_v28 = vpop.f32.mrf.mxu1 }
  0xfa   : > { %v1985_v4 = vpop.f32.mrf.mxu2 }
  0xfb   : > { %v1986_v58 = vadd.f32 %v1985_v4, %v1937_v52  ;;  %v1890_v6 = vpop.f32.mrf.mxu0  ;;  %v8666_v52 = vld [vmem:[#allocation2 + $0x78] sm:$0xf] }
  0xfc   : > { %v1940_v44 = vadd.f32 %v1939_v28, %v1890_v6  ;;  %2406 = vmatmul.bf16.gmra.mxu1 %v8471_v42  ;;  %v8671_v42 = vor.u32 %v10675_v60, %v8668_v45  ;;  %v10797_v28 = vld [vmem:[#allocation9 + $0x118] sm:$0xff]  ;;  %v388_v60 = vld [vmem:[#allocation7 + $0x88] sm:$0xff] }
  0xfd   : > { %v11947_v9 = vadd.f32 %v2306_v5, %v1986_v58  ;;  %3676 = vmatpush.bf16.msra.mxu2 %v10797_v28 }
  0xfe   : > { %2357 = vmatmul.bf16.gmra.mxu0 %v8467_v49  ;;  %2860 = vmatmul.bf16.gmra.mxu3 %v8659_v8  ;;  %v8667_v49 = vor.u32 %v10676_v59, %v8666_v52  ;;  %v10805_v8 = vld [vmem:[#allocation9 + $0x158] sm:$0xff]  ;;  %v8680_v52 = vld [vmem:[#allocation2 + $0x9c] sm:$0xf0]  ;;  %v356_v59 = vld [vmem:[%s11599_s19 + $0x88] sm:$0xff] }
  0xff   : > { %2811 = vmatmul.bf16.gmra.mxu2 %v8655_v32  ;;  %v10708_v32 = vld [vmem:[#allocation9 + $0x210] sm:$0xff]  ;;  %3725 = vmatpush.bf16.msra.mxu3 %v10805_v8 }
 0x100   : > { %2896 = vmatpush.bf16.msra.mxu0 %v10708_v32  ;;  %v10796_v8 = vld [vmem:[#allocation9 + $0x110] sm:$0xff] }
 0x101   : > { %v2309_v14 = vpop.f32.mrf.mxu3  ;;  %v1941_v21 = vpop.f32.mrf.mxu1  ;;  %3677 = vmatpush.bf16.msra.mxu2 %v10796_v8 }
 0x102   : > { %v1988_v13 = vpop.f32.mrf.mxu2 }
 0x103   : > { %v1989_v17 = vadd.f32 %v1988_v13, %v1940_v44  ;;  %v1892_v20 = vpop.f32.mrf.mxu0  ;;  %v10788_v44 = vld [vmem:[#allocation9 + $0xd0] sm:$0xff] }
 0x104   : > { %v1942_v22 = vadd.f32 %v1941_v21, %v1892_v20  ;;  %3628 = vmatpush.bf16.msra.mxu1 %v10788_v44  ;;  %v10582_v20 = vld [vmem:[#allocation2 + $0x64] sm:$0xf]  ;;  %v8488_v21 = vld [vmem:[#allocation2 + $0x6c] sm:$0xf0] }
 0x105   : > { %v11949_v26 = vadd.f32 %v2309_v14, %v1989_v17 }
 0x109   : > { %v2311_v0 = vpop.f32.mrf.mxu3  ;;  %v1944_v5 = vpop.f32.mrf.mxu1 }
 0x10a   : > { %v1990_v56 = vpop.f32.mrf.mxu2 }
 0x10b   : > { %v1991_v3 = vadd.f32 %v1990_v56, %v1942_v22  ;;  %v1895_v4 = vpop.f32.mrf.mxu0  ;;  %v8494_v22 = vld [vmem:[#allocation2 + $0x68] sm:$0xf] }
 0x10c   : > { %v1945_v58 = vadd.f32 %v1944_v5, %v1895_v4  ;;  %2411 = vmatmul.bf16.gmra.mxu1 %v8483_v48  ;;  %v8679_v5 = vor.u32 %v10679_v25, %v8678_v31 }
 0x10d   : > { %v11951_v6 = vadd.f32 %v2311_v0, %v1991_v3  ;;  %v8491_v0 = vor.u32 %v10582_v20, %v8488_v21 }
 0x10e   : > { %2362 = vmatmul.bf16.gmra.mxu0 %v8479_v30  ;;  %2865 = vmatmul.bf16.gmra.mxu3 %v8671_v42  ;;  %v8495_v30 = vor.u32 %v10584_v29, %v8494_v22  ;;  %v452_v42 = vadd.s32 128, %v11613_v2 }
 0x10f   : > { %2816 = vmatmul.bf16.gmra.mxu2 %v8667_v49  ;;  %v8683_v49 = vor.u32 %v10678_v47, %v8680_v52 }
 0x110   : > { %v584_v44 = vand.u32 15, %v452_v42  ;;  %v8692_v42 = vld [vmem:[#allocation2 + $0xb4] sm:$0xf0] }
 0x111   : > { %v2314_v7 = vpop.f32.mrf.mxu3  ;;  %v1946_v13 = vpop.f32.mrf.mxu1 }
 0x112   : > { %v1993_v10 = vpop.f32.mrf.mxu2  ;;  %vm868_vm2 = vcmp.ne.s32.totalorder %v584_v44, 0 }
 0x113   : > { %v1994_v12 = vadd.f32 %v1993_v10, %v1945_v58  ;;  %v1897_v57 = vpop.f32.mrf.mxu0  ;;  %v11957_v58 = vmul.f32 %v388_v60, %v356_v59  ;;  %v10707_v10 = vld [vmem:[#allocation9 + $0x208] sm:$0xff]  ;;  %v1318_v60 = vpack.c.bf16 %v11910_v27, %v11910_v27 }
 0x114   : > { %v1947_v14 = vadd.f32 %v1946_v13, %v1897_v57  ;;  %v1060_v57 = vrot.slane %v11910_v27, 7  ;;  %v8220_v13 = vsel %vm868_vm2, 1.0, %v13083_v36  ;;  %2897 = vmatpush.bf16.msra.mxu0 %v10707_v10 }
 0x115   : > { %v11953_v17 = vadd.f32 %v2314_v7, %v1994_v12  ;;  %v10804_v7 = vld [vmem:[#allocation9 + $0x150] sm:$0xff]  ;;  %v10787_v12 = vld [vmem:[#allocation9 + $0xc8] sm:$0xff]  ;;  %1350 = vst [vmem:[#allocation2 + $0xdc] sm:$0xf] %v1318_v60 }
 0x116   : > { %3726 = vmatpush.bf16.msra.mxu3 %v10804_v7  ;;  %v1092_v20 = vsel %vm1076_vm3, %v1059_v40, %v1060_v57  ;;  %3629 = vmatpush.bf16.msra.mxu1 %v10787_v12  ;;  %v1319_v40 = vpack.c.bf16 %v11957_v58, %v11957_v58 }
 0x117   : > { %v1125_v31 = vmul.f32 %v8220_v13, %v1092_v20 }
 0x118   : > { %1351 = vst [vmem:[#allocation2 + $0xe8] sm:$0xf] %v1319_v40  ;;  %v10803_v40 = vld [vmem:[#allocation9 + $0x148] sm:$0xff] }
 0x119   : > { %v2316_v56 = vpop.f32.mrf.mxu3  ;;  %v1949_v4 = vpop.f32.mrf.mxu1 }
 0x11a   : > { %v1995_v45 = vpop.f32.mrf.mxu2  ;;  %3727 = vmatpush.bf16.msra.mxu3 %v10803_v40  ;;  %v10794_v40 = vld [vmem:[#allocation9 + $0x100] sm:$0xff] }
 0x11b   : > { %v1996_v48 = vadd.f32 %v1995_v45, %v1947_v14  ;;  %v1900_v3 = vpop.f32.mrf.mxu0  ;;  %v1061_v14 = vrot.slane %v11957_v58, 7  ;;  %v1254_v45 = vpack.c.bf16 %v1125_v31, %v1125_v31  ;;  %v1158_v31 = vrot.slane %v11957_v58, 1 }
 0x11c   : > { %v1950_v28 = vadd.f32 %v1949_v4, %v1900_v3  ;;  %2416 = vmatmul.bf16.gmra.mxu1 %v8495_v30  ;;  %v8500_v30 = vld [vmem:[#allocation2 + $0x84] sm:$0xf0]  ;;  %v10587_v3 = vld [vmem:[#allocation2 + $0x88] sm:$0xf0] }
 0x11d   : > { %v11959_v32 = vadd.f32 %v2316_v56, %v1996_v48  ;;  %v1091_v29 = vsel %vm1076_vm3, %v1060_v57, %v1061_v14  ;;  %v8506_v48 = vld [vmem:[#allocation2 + $0x80] sm:$0xf]  ;;  %1286 = vst [vmem:[#allocation2 + $0xd8] sm:$0xf] %v1254_v45  ;;  %v8690_v4 = vld [vmem:[#allocation2 + $0xa8] sm:$0xf] }
 0x11e   : > { %2367 = vmatmul.bf16.gmra.mxu0 %v8491_v0  ;;  %2870 = vmatmul.bf16.gmra.mxu3 %v8683_v49  ;;  %v1255_v59 = vpack.c.bf16 %v1091_v29, %v1091_v29  ;;  %v10585_v0 = vld [vmem:[#allocation2 + $0x7c] sm:$0xf]  ;;  %v10681_v49 = vld [vmem:[#allocation2 + $0xac] sm:$0xf]  ;;  %v8507_v10 = vor.u32 %v10587_v3, %v8506_v48  ;;  %v453_v29 = vadd.s32 136, %v11613_v2  ;;  %v10706_v45 = vld [vmem:[#allocation9 + $0x200] sm:$0xff] }
 0x11f   : > { %2821 = vmatmul.bf16.gmra.mxu2 %v8679_v5  ;;  %v10682_v5 = vld [vmem:[#allocation2 + $0xb0] sm:$0xf0]  ;;  %v8503_v44 = vor.u32 %v10585_v0, %v8500_v30  ;;  %v8695_v20 = vor.u32 %v10681_v49, %v8692_v42  ;;  %v1188_v0 = vsel %vm1173_vm4, %v1157_v34, %v1158_v31  ;;  %v10786_v30 = vld [vmem:[#allocation9 + $0xc0] sm:$0xff]  ;;  %2898 = vmatpush.bf16.msra.mxu0 %v10706_v45 }
 0x120   : > { %1287 = vst [vmem:[#allocation2 + $0xe4] sm:$0xf] %v1255_v59  ;;  %v8691_v13 = vor.u32 %v10682_v5, %v8690_v4  ;;  %v10795_v59 = vld [vmem:[#allocation9 + $0x108] sm:$0xff]  ;;  %v591_v60 = vand.u32 15, %v453_v29  ;;  %3630 = vmatpush.bf16.msra.mxu1 %v10786_v30  ;;  %v8704_v29 = vld [vmem:[#allocation2 + $0xcc] sm:$0xf0] }
 0x121   : > { %v2319_v22 = vpop.f32.mrf.mxu3  ;;  %v1951_v52 = vpop.f32.mrf.mxu1  ;;  %3678 = vmatpush.bf16.msra.mxu2 %v10795_v59 }
 0x122   : > { %v1998_v21 = vpop.f32.mrf.mxu2  ;;  %vm965_vm5 = vcmp.ne.s32.totalorder %v591_v60, 15 }
 0x123   : > { %v1999_v25 = vadd.f32 %v1998_v21, %v1950_v28  ;;  %v1902_v47 = vpop.f32.mrf.mxu0  ;;  %v357_v21 = vld [vmem:[%s11599_s19 + $0x90] sm:$0xff]  ;;  %v8236_v48 = vsel %vm965_vm5, 1.0, %v13083_v36 }
 0x124   : > { %v1952_v16 = vadd.f32 %v1951_v52, %v1902_v47 }
 0x125   : > { %v11976_v56 = vadd.f32 %v2319_v22, %v1999_v25  ;;  %v389_v22 = vld [vmem:[#allocation7 + $0x90] sm:$0xff]  ;;  %3679 = vmatpush.bf16.msra.mxu2 %v10794_v40 }
 0x126   : > { %v11981_v47 = vmul.f32 %v389_v22, %v357_v21  ;;  %v10685_v21 = vld [vmem:[#allocation2 + $0xc8] sm:$0xf0]  ;;  %v10684_v22 = vld [vmem:[#allocation2 + $0xc4] sm:$0xf] }
 0x129   : > { %v2321_v8 = vpop.f32.mrf.mxu3  ;;  %v1954_v57 = vpop.f32.mrf.mxu1 }
 0x12a   : > { %v2000_v28 = vpop.f32.mrf.mxu2 }
 0x12b   : > { %v2001_v7 = vadd.f32 %v2000_v28, %v1952_v16  ;;  %v1905_v12 = vpop.f32.mrf.mxu0  ;;  %v1159_v16 = vrot.slane %v11981_v47, 1 }
 0x12c   : > { %v1955_v25 = vadd.f32 %v1954_v57, %v1905_v12  ;;  %2421 = vmatmul.bf16.gmra.mxu1 %v8507_v10  ;;  %v8512_v12 = vld [vmem:[#allocation2 + $0x9c] sm:$0xf0]  ;;  %v8518_v57 = vld [vmem:[#allocation2 + $0x98] sm:$0xf] }
 0x12d   : > { %v11983_v52 = vadd.f32 %v2321_v8, %v2001_v7  ;;  %v1187_v3 = vsel %vm1173_vm4, %v1158_v31, %v1159_v16  ;;  %v1382_v8 = vpack.c.bf16 %v1188_v0, %v1188_v0  ;;  %v10588_v7 = vld [vmem:[#allocation2 + $0x94] sm:$0xf]  ;;  %v10802_v0 = vld [vmem:[#allocation9 + $0x140] sm:$0xff] }
 0x12e   : > { %2372 = vmatmul.bf16.gmra.mxu0 %v8503_v44  ;;  %2875 = vmatmul.bf16.gmra.mxu3 %v8695_v20  ;;  %v1223_v4 = vmul.f32 %v8236_v48, %v1187_v3  ;;  %v8702_v20 = vld [vmem:[#allocation2 + $0xc0] sm:$0xf]  ;;  %v8515_v59 = vor.u32 %v10588_v7, %v8512_v12  ;;  %v1062_v12 = vrot.slane %v11981_v47, 7 }
 0x12f   : > { %2826 = vmatmul.bf16.gmra.mxu2 %v8691_v13  ;;  %1414 = vst [vmem:[#allocation2 + $0xe0] sm:$0xf] %v1382_v8  ;;  %v10590_v13 = vld [vmem:[#allocation2 + $0xa0] sm:$0xf0]  ;;  %v8703_v45 = vor.u32 %v10685_v21, %v8702_v20  ;;  %3728 = vmatpush.bf16.msra.mxu3 %v10802_v0 }
 0x130   : > { %v1383_v34 = vpack.c.bf16 %v1223_v4, %v1223_v4  ;;  %v8519_v60 = vor.u32 %v10590_v13, %v8518_v57  ;;  %v8707_v4 = vor.u32 %v10684_v22, %v8704_v29  ;;  %v359_v7 = vld [vmem:[%s11599_s19 + $0xa0] sm:$0xff]  ;;  %v10745_v57 = vld [vmem:[#allocation9 + $0x38] sm:$0xff] }
 0x131   : > { %v2324_v49 = vpop.f32.mrf.mxu3  ;;  %v1956_v28 = vpop.f32.mrf.mxu1  ;;  %v10753_v13 = vld [vmem:[#allocation9 + $0x78] sm:$0xff]  ;;  %v391_v20 = vld [vmem:[#allocation7 + $0xa0] sm:$0xff]  ;;  %4042 = vmatpush.bf16.msrb.mxu0 %v10745_v57 }
 0x132   : > { %v2003_v5 = vpop.f32.mrf.mxu2  ;;  %1415 = vst [vmem:[#allocation2 + $0xec] sm:$0xf] %v1383_v34  ;;  %4091 = vmatpush.bf16.msrb.mxu1 %v10753_v13  ;;  %v8524_v57 = vld [vmem:[#allocation2 + $0xb4] sm:$0xf0] }
 0x133   : > { %v2004_v42 = vadd.f32 %v2003_v5, %v1955_v25  ;;  %v1907_v27 = vpop.f32.mrf.mxu0  ;;  %v358_v5 = vld [vmem:[%s11599_s19 + $0x98] sm:$0xff] }
 0x134   : > { %v1957_v44 = vadd.f32 %v1956_v28, %v1907_v27  ;;  %v455_v27 = vadd.s32 152, %v11613_v2 }
 0x135   : > { %v11995_v10 = vadd.f32 %v2324_v49, %v2004_v42  ;;  %v390_v49 = vld [vmem:[#allocation7 + $0x98] sm:$0xff]  ;;  %v454_v42 = vadd.s32 144, %v11613_v2 }
 0x136   : > { %v12000_v8 = vmul.f32 %v390_v49, %v358_v5  ;;  %v605_v21 = vand.u32 15, %v455_v27  ;;  %v1320_v5 = vpack.c.bf16 %v11981_v47, %v11981_v47  ;;  %v8716_v47 = vld [vmem:[#allocation2 + $0xe4] sm:$0xf0] }
 0x138   : > { %v1160_v22 = vrot.slane %v12000_v8, 1  ;;  %v1063_v29 = vrot.slane %v12000_v8, 7  ;;  %vm967_vm7 = vcmp.ne.s32.totalorder %v605_v21, 15  ;;  %v1321_v49 = vpack.c.bf16 %v12000_v8, %v12000_v8  ;;  %v8530_v21 = vld [vmem:[#allocation2 + $0xb0] sm:$0xf] }
 0x139   : > { %v2326_v25 = vpop.f32.mrf.mxu3  ;;  %v1959_v3 = vpop.f32.mrf.mxu1  ;;  %v8237_v58 = vsel %vm967_vm7, 1.0, %v13083_v36  ;;  %1352 = vst [vmem:[#allocation2 + $0xf4] sm:$0xf] %v1320_v5  ;;  %v456_v5 = vadd.s32 160, %v11613_v2 }
 0x13a   : > { %v2005_v31 = vpop.f32.mrf.mxu2  ;;  %v1089_v40 = vsel %vm1076_vm3, %v1062_v12, %v1063_v29  ;;  %1353 = vst [vmem:[#allocation2 + $0x100] sm:$0xf] %v1321_v49 }
 0x13b   : > { %v2006_v30 = vadd.f32 %v2005_v31, %v1957_v44  ;;  %v1910_v48 = vpop.f32.mrf.mxu0  ;;  %v598_v44 = vand.u32 15, %v454_v42  ;;  %v1090_v31 = vsel %vm1076_vm3, %v1061_v14, %v1062_v12  ;;  %v10591_v12 = vld [vmem:[#allocation2 + $0xac] sm:$0xf] }
 0x13c   : > { %v1960_v28 = vadd.f32 %v1959_v3, %v1910_v48  ;;  %2426 = vmatmul.bf16.gmra.mxu1 %v8519_v60 }
 0x13d   : > { %v12002_v34 = vadd.f32 %v2326_v25, %v2006_v30  ;;  %vm870_vm6 = vcmp.ne.s32.totalorder %v598_v44, 0  ;;  %v12012_v25 = vmul.f32 %v391_v20, %v359_v7 }
 0x13e   : > { %2377 = vmatmul.bf16.gmra.mxu0 %v8515_v59  ;;  %2880 = vmatmul.bf16.gmra.mxu3 %v8707_v4  ;;  %v8221_v59 = vsel %vm870_vm6, 1.0, %v13083_v36  ;;  %v1257_v4 = vpack.c.bf16 %v1089_v40, %v1089_v40 }
 0x13f   : > { %2831 = vmatmul.bf16.gmra.mxu2 %v8703_v45  ;;  %v1127_v0 = vmul.f32 %v8221_v59, %v1090_v31  ;;  %v1161_v30 = vrot.slane %v12012_v25, 1  ;;  %v10593_v31 = vld [vmem:[#allocation2 + $0xb8] sm:$0xf0]  ;;  %v8714_v59 = vld [vmem:[#allocation2 + $0xd8] sm:$0xf] }
 0x140   : > { %1289 = vst [vmem:[#allocation2 + $0xfc] sm:$0xf] %v1257_v4 }
 0x141   : > { %v2329_v45 = vpop.f32.mrf.mxu3  ;;  %v1961_v3 = vpop.f32.mrf.mxu1  ;;  %v1256_v27 = vpack.c.bf16 %v1127_v0, %v1127_v0  ;;  %v1185_v7 = vsel %vm1173_vm4, %v1160_v22, %v1161_v30  ;;  %v10687_v0 = vld [vmem:[#allocation2 + $0xdc] sm:$0xf] }
 0x142   : > { %v2008_v60 = vpop.f32.mrf.mxu2  ;;  %v1225_v13 = vmul.f32 %v8237_v58, %v1185_v7  ;;  %v360_v7 = vld [vmem:[%s11599_s19 + $0xa8] sm:$0xff] }
 0x143   : > { %v2009_v14 = vadd.f32 %v2008_v60, %v1960_v28  ;;  %v1912_v48 = vpop.f32.mrf.mxu0  ;;  %v1186_v28 = vsel %vm1173_vm4, %v1159_v16, %v1160_v22  ;;  %1288 = vst [vmem:[#allocation2 + $0xf0] sm:$0xf] %v1256_v27  ;;  %v10688_v60 = vld [vmem:[#allocation2 + $0xe0] sm:$0xf0]  ;;  %v8719_v27 = vor.u32 %v10687_v0, %v8716_v47  ;;  %v10752_v0 = vld [vmem:[#allocation9 + $0x70] sm:$0xff] }
 0x144   : > { %v1962_v42 = vadd.f32 %v1961_v3, %v1912_v48  ;;  %v1384_v20 = vpack.c.bf16 %v1186_v28, %v1186_v28  ;;  %v1385_v40 = vpack.c.bf16 %v1225_v13, %v1225_v13  ;;  %v8715_v48 = vor.u32 %v10688_v60, %v8714_v59  ;;  %v392_v28 = vld [vmem:[#allocation7 + $0xa8] sm:$0xff]  ;;  %v361_v13 = vld [vmem:[%s11599_s19 + $0xb0] sm:$0xff]  ;;  %4092 = vmatpush.bf16.msrb.mxu1 %v10752_v0  ;;  %v10763_v0 = vld [vmem:[#allocation2 + $0xe0] sm:$0xf0] }
 0x145   : > { %v12033_v44 = vadd.f32 %v2329_v45, %v2009_v14  ;;  %v8527_v45 = vor.u32 %v10591_v12, %v8524_v57  ;;  %v8531_v14 = vor.u32 %v10593_v31, %v8530_v21  ;;  %v12039_v49 = vmul.f32 %v392_v28, %v360_v7  ;;  %v393_v57 = vld [vmem:[#allocation7 + $0xb0] sm:$0xff] }
 0x146   : > { %1416 = vst [vmem:[#allocation2 + $0xf8] sm:$0xf] %v1384_v20  ;;  %v612_v12 = vand.u32 15, %v456_v5  ;;  %v619_v21 = vand.u32 15, %v457_v54  ;;  %v1064_v31 = vrot.slane %v12012_v25, 7  ;;  %v12044_v59 = vmul.f32 %v393_v57, %v361_v13  ;;  %v10744_v60 = vld [vmem:[#allocation9 + $0x30] sm:$0xff] }
 0x147   : > { %1417 = vst [vmem:[#allocation2 + $0x104] sm:$0xf] %v1385_v40  ;;  %v10841_v40 = vld [vmem:[#allocation9 + $0x1b8] sm:$0xff]  ;;  %4043 = vmatpush.bf16.msrb.mxu0 %v10744_v60  ;;  %v1322_v13 = vpack.c.bf16 %v12012_v25, %v12012_v25  ;;  %v1323_v57 = vpack.c.bf16 %v12039_v49, %v12039_v49 }
 0x148   : > { %vm872_vm8 = vcmp.ne.s32.totalorder %v612_v12, 0  ;;  %vm969_vm9 = vcmp.ne.s32.totalorder %v619_v21, 15  ;;  %v1088_v54 = vsel %vm1076_vm3, %v1063_v29, %v1064_v31  ;;  %4544 = vmatpush.bf16.msrb.mxu3 %v10841_v40  ;;  %v8822_v40 = vld [vmem:[#allocation2 + $0xd8] sm:$0xf]  ;;  %v10762_v25 = vld [vmem:[#allocation2 + $0xdc] sm:$0xf] }
 0x149   : > { %v2331_v22 = vpop.f32.mrf.mxu3  ;;  %v1964_v4 = vpop.f32.mrf.mxu1  ;;  %v8222_v47 = vsel %vm872_vm8, 1.0, %v13083_v36  ;;  %v8238_v8 = vsel %vm969_vm9, 1.0, %v13083_v36  ;;  %1354 = vst [vmem:[#allocation2 + $0x10c] sm:$0xf] %v1322_v13  ;;  %v458_v13 = vadd.s32 176, %v11613_v2 }
 0x14a   : > { %v2010_v16 = vpop.f32.mrf.mxu2  ;;  %1355 = vst [vmem:[#allocation2 + $0x118] sm:$0xf] %v1323_v57 }
 0x14b   : > { %v2011_v58 = vadd.f32 %v2010_v16, %v1962_v42  ;;  %v1915_v3 = vpop.f32.mrf.mxu0  ;;  %v10761_v42 = vld [vmem:[#allocation9 + $0xb8] sm:$0xff]  ;;  %v13078_v16 = vrot.slane %v12039_v49, 7 }
 0x14c   : > { %v1965_v51 = vadd.f32 %v1964_v4, %v1915_v3  ;;  %2431 = vmatmul.bf16.gmra.mxu1 %v8531_v14  ;;  %4140 = vmatpush.bf16.msrb.mxu2 %v10761_v42  ;;  %v13077_v14 = vrot.slane %v12044_v59, 1 }
 0x14d   : > { %v12041_v20 = vadd.f32 %v2331_v22, %v2011_v58  ;;  %v1162_v22 = vrot.slane %v12039_v49, 1  ;;  %v1087_v3 = vsel %vm1076_vm3, %v1064_v31, %v13078_v16 }
 0x14e   : > { %2382 = vmatmul.bf16.gmra.mxu0 %v8527_v45  ;;  %2885 = vmatmul.bf16.gmra.mxu3 %v8719_v27  ;;  %v1129_v45 = vmul.f32 %v8222_v47, %v1088_v54  ;;  %v1259_v5 = vpack.c.bf16 %v1087_v3, %v1087_v3  ;;  %v8824_v47 = vld [vmem:[#allocation2 + $0xe4] sm:$0xf0] }
 0x14f   : > { %2836 = vmatmul.bf16.gmra.mxu2 %v8715_v48  ;;  %v1184_v29 = vsel %vm1173_vm4, %v1161_v30, %v1162_v22  ;;  %v1183_v21 = vsel %vm1173_vm4, %v1162_v22, %v13077_v14  ;;  %v8638_v30 = vld [vmem:[#allocation2 + $0x38] sm:$0xf]  ;;  %v459_v14 = vadd.s32 184, %v11613_v2 }
 0x150   : > { %v1258_v28 = vpack.c.bf16 %v1129_v45, %v1129_v45  ;;  %v1227_v31 = vmul.f32 %v8238_v8, %v1183_v21  ;;  %v1386_v60 = vpack.c.bf16 %v1184_v29, %v1184_v29  ;;  %1291 = vst [vmem:[#allocation2 + $0x114] sm:$0xf] %v1259_v5  ;;  %v8830_v45 = vld [vmem:[#allocation2 + $0xe0] sm:$0xf]  ;;  %v362_v5 = vld [vmem:[%s11599_s19 + $0xb8] sm:$0xff] }
 0x151   : > { %v2334_v58 = vpop.f32.mrf.mxu3  ;;  %v1966_v7 = vpop.f32.mrf.mxu1  ;;  %v394_v21 = vld [vmem:[#allocation7 + $0xb8] sm:$0xff] }
 0x152   : > { %v2013_v48 = vpop.f32.mrf.mxu2  ;;  %1290 = vst [vmem:[#allocation2 + $0x108] sm:$0xf] %v1258_v28  ;;  %v1387_v54 = vpack.c.bf16 %v1227_v31, %v1227_v31  ;;  %v363_v31 = vld [vmem:[%s11599_s19 + $0xc0] sm:$0xff]  ;;  %v12080_v16 = vmul.f32 %v394_v21, %v362_v5 }
 0x153   : > { %v2014_v4 = vadd.f32 %v2013_v48, %v1965_v51  ;;  %v1917_v27 = vpop.f32.mrf.mxu0  ;;  %v10668_v51 = vld [vmem:[#allocation2 + $0x40] sm:$0xf0]  ;;  %v10764_v48 = vld [vmem:[#allocation2 + $0xe8] sm:$0xf0]  ;;  %1418 = vst [vmem:[#allocation2 + $0x110] sm:$0xf] %v1386_v60 }
 0x154   : > { %v1967_v12 = vadd.f32 %v1966_v7, %v1917_v27  ;;  %v8639_v3 = vor.u32 %v10668_v51, %v8638_v30  ;;  %v8827_v27 = vor.u32 %v10762_v25, %v8824_v47  ;;  %1419 = vst [vmem:[#allocation2 + $0x11c] sm:$0xf] %v1387_v54  ;;  %v8831_v28 = vor.u32 %v10764_v48, %v8830_v45  ;;  %v395_v51 = vld [vmem:[#allocation7 + $0xc0] sm:$0xff]  ;;  %v10743_v54 = vld [vmem:[#allocation9 + $0x28] sm:$0xff] }
 0x155   : > { %v12071_v42 = vadd.f32 %v2334_v58, %v2014_v4  ;;  %v8823_v4 = vor.u32 %v10763_v0, %v8822_v40  ;;  %v626_v30 = vand.u32 15, %v458_v13  ;;  %v633_v40 = vand.u32 15, %v459_v14  ;;  %v10760_v0 = vld [vmem:[#allocation9 + $0xb0] sm:$0xff]  ;;  %v10751_v45 = vld [vmem:[#allocation9 + $0x68] sm:$0xff]  ;;  %4044 = vmatpush.bf16.msrb.mxu0 %v10743_v54 }
 0x156   : > { %v1066_v25 = vrot.slane %v12044_v59, 7  ;;  %v12085_v47 = vmul.f32 %v395_v51, %v363_v31  ;;  %4141 = vmatpush.bf16.msrb.mxu2 %v10760_v0  ;;  %v13080_v14 = vrot.slane %v12080_v16, 7  ;;  %4093 = vmatpush.bf16.msrb.mxu1 %v10751_v45  ;;  %v1325_v51 = vpack.c.bf16 %v12080_v16, %v12080_v16  ;;  %v8650_v54 = vld [vmem:[#allocation2 + $0x50] sm:$0xf] }
 0x157   : > { %vm874_vm10 = vcmp.ne.s32.totalorder %v626_v30, 0  ;;  %vm971_vm11 = vcmp.ne.s32.totalorder %v633_v40, 15  ;;  %v13134_v0 = vrot.slane %v12044_v59, 1 }
 0x158   : > { %v8223_v48 = vsel %vm874_vm10, 1.0, %v13083_v36  ;;  %1357 = vst [vmem:[#allocation2 + $0x130] sm:$0xf] %v1325_v51 }
 0x159   : > { %v2336_v58 = vpop.f32.mrf.mxu3  ;;  %v2397_v7 = vpop.f32.mrf.mxu1 }
 0x15a   : > { %v2015_v22 = vpop.f32.mrf.mxu2 }
 0x15b   : > { %v2016_v8 = vadd.f32 %v2015_v22, %v1967_v12  ;;  %v2348_v29 = vpop.f32.mrf.mxu0  ;;  %v13133_v22 = vrot.slane %v12039_v49, 7  ;;  %v8239_v49 = vsel %vm971_vm11, 1.0, %v13083_v36 }
 0x15c   : > { %v2349_v57 = vadd.f32 %v2348_v29, %v11941_v1  ;;  %3631 = vmatmul.bf16.vlgmr.msra.gmra.mxu1 %v8823_v4  ;;  %v10840_v1 = vld [vmem:[#allocation9 + $0x1b0] sm:$0xff]  ;;  %v1164_v4 = vrot.slane %v12080_v16, 1 }
 0x15d   : > { %v12078_v60 = vadd.f32 %v2336_v58, %v2016_v8  ;;  %v1086_v58 = vsel %vm1076_vm3, %v13133_v22, %v1066_v25  ;;  %4545 = vmatpush.bf16.msrb.mxu3 %v10840_v1  ;;  %v10671_v1 = vld [vmem:[#allocation2 + $0x58] sm:$0xf0] }
 0x15e   : > { %v12082_v12 = vadd.f32 %v2397_v7, %v2349_v57  ;;  %2899 = vmatmul.bf16.vlgmr.msra.gmra.mxu0 %v8639_v3  ;;  %3729 = vmatmul.bf16.vlgmr.msra.gmra.mxu3 %v8831_v28  ;;  %v1131_v3 = vmul.f32 %v8223_v48, %v1086_v58  ;;  %v1085_v7 = vsel %vm1076_vm3, %v1066_v25, %v13080_v14  ;;  %v10766_v58 = vld [vmem:[#allocation2 + $0xf8] sm:$0xf0]  ;;  %v461_v14 = vadd.s32 200, %v11613_v2 }
 0x15f   : > { %3680 = vmatmul.bf16.vlgmr.msra.gmra.mxu2 %v8827_v27  ;;  %v13079_v27 = vrot.slane %v12085_v47, 1  ;;  %v1261_v31 = vpack.c.bf16 %v1085_v7, %v1085_v7  ;;  %v1324_v57 = vpack.c.bf16 %v12044_v59, %v12044_v59  ;;  %v1182_v25 = vsel %vm1173_vm4, %v13134_v0, %v1164_v4  ;;  %v8842_v7 = vld [vmem:[#allocation2 + $0xf8] sm:$0xf]  ;;  %v10767_v59 = vld [vmem:[#allocation2 + $0x100] sm:$0xf0] }
 0x160   : > { %v1260_v13 = vpack.c.bf16 %v1131_v3, %v1131_v3  ;;  %v1388_v48 = vpack.c.bf16 %v1182_v25, %v1182_v25  ;;  %v10765_v3 = vld [vmem:[#allocation2 + $0xf4] sm:$0xf]  ;;  %v8843_v0 = vor.u32 %v10767_v59, %v8842_v7  ;;  %v364_v25 = vld [vmem:[%s11599_s19 + $0xc8] sm:$0xff]  ;;  %v10742_v7 = vld [vmem:[#allocation9 + $0x20] sm:$0xff] }
 0x161   : > { %v2851_v29 = vpop.f32.mrf.mxu3  ;;  %v2399_v21 = vpop.f32.mrf.mxu1  ;;  %v1181_v40 = vsel %vm1173_vm4, %v1164_v4, %v13079_v27  ;;  %1293 = vst [vmem:[#allocation2 + $0x12c] sm:$0xf] %v1261_v31  ;;  %v365_v27 = vld [vmem:[%s11599_s19 + $0xd0] sm:$0xff]  ;;  %v10839_v59 = vld [vmem:[#allocation9 + $0x1a8] sm:$0xff]  ;;  %4045 = vmatpush.bf16.msrb.mxu0 %v10742_v7  ;;  %v13136_v7 = vrot.slane %v12085_v47, 1 }
 0x162   : > { %v2802_v8 = vpop.f32.mrf.mxu2  ;;  %1292 = vst [vmem:[#allocation2 + $0x120] sm:$0xf] %v1260_v13  ;;  %v1229_v45 = vmul.f32 %v8239_v49, %v1181_v40  ;;  %v8651_v13 = vor.u32 %v10671_v1, %v8650_v54  ;;  %v397_v1 = vld [vmem:[#allocation7 + $0xd0] sm:$0xff]  ;;  %4546 = vmatpush.bf16.msrb.mxu3 %v10839_v59 }
 0x163   : > { %v12100_v28 = vadd.f32 %v2851_v29, %v2802_v8  ;;  %v2350_v5 = vpop.f32.mrf.mxu0  ;;  %v8836_v8 = vld [vmem:[#allocation2 + $0xfc] sm:$0xf0]  ;;  %1356 = vst [vmem:[#allocation2 + $0x124] sm:$0xf] %v1324_v57  ;;  %v396_v57 = vld [vmem:[#allocation7 + $0xc8] sm:$0xff] }
 0x164   : > { %v2351_v30 = vadd.f32 %v2350_v5, %v11943_v15  ;;  %v8834_v15 = vld [vmem:[#allocation2 + $0xf0] sm:$0xf]  ;;  %v1389_v29 = vpack.c.bf16 %v1229_v45, %v1229_v45  ;;  %1420 = vst [vmem:[#allocation2 + $0x128] sm:$0xf] %v1388_v48  ;;  %v8839_v40 = vor.u32 %v10765_v3, %v8836_v8  ;;  %v460_v45 = vadd.s32 192, %v11613_v2  ;;  %v10759_v3 = vld [vmem:[#allocation9 + $0xa8] sm:$0xff] }
 0x165   : > { %v8835_v49 = vor.u32 %v10766_v58, %v8834_v15  ;;  %v12124_v48 = vmul.f32 %v396_v57, %v364_v25  ;;  %v647_v15 = vand.u32 15, %v461_v14  ;;  %v1068_v8 = vrot.slane %v12085_v47, 7  ;;  %4142 = vmatpush.bf16.msrb.mxu2 %v10759_v3 }
 0x166   : > { %v12115_v22 = vadd.f32 %v2399_v21, %v2351_v30  ;;  %1421 = vst [vmem:[#allocation2 + $0x134] sm:$0xf] %v1389_v29  ;;  %v640_v54 = vand.u32 15, %v460_v45  ;;  %v12129_v29 = vmul.f32 %v397_v1, %v365_v27  ;;  %v1326_v1 = vpack.c.bf16 %v12085_v47, %v12085_v47  ;;  %v10770_v47 = vld [vmem:[#allocation2 + $0x118] sm:$0xf0] }
 0x167   : > { %vm973_vm13 = vcmp.ne.s32.totalorder %v647_v15, 15  ;;  %v13082_v14 = vrot.slane %v12124_v48, 7  ;;  %v1327_v3 = vpack.c.bf16 %v12124_v48, %v12124_v48 }
 0x168   : > { %vm876_vm12 = vcmp.ne.s32.totalorder %v640_v54, 0  ;;  %1358 = vst [vmem:[#allocation2 + $0x13c] sm:$0xf] %v1326_v1  ;;  %v398_v1 = vld [vmem:[#allocation7 + $0xd8] sm:$0xff] }
 0x169   : > { %v2853_v5 = vpop.f32.mrf.mxu3  ;;  %v2402_v31 = vpop.f32.mrf.mxu1  ;;  %1359 = vst [vmem:[#allocation2 + $0x148] sm:$0xf] %v1327_v3 }
 0x16a   : > { %v2804_v4 = vpop.f32.mrf.mxu2 }
 0x16b   : > { %v12117_v21 = vadd.f32 %v2853_v5, %v2804_v4  ;;  %v2353_v30 = vpop.f32.mrf.mxu0  ;;  %v8224_v4 = vsel %vm876_vm12, 1.0, %v13083_v36  ;;  %v13135_v5 = vrot.slane %v12080_v16, 7  ;;  %v8240_v16 = vsel %vm973_vm13, 1.0, %v13083_v36  ;;  %v367_v36 = vld [vmem:[%s11599_s19 + $0xe0] sm:$0xff] }
 0x16c   : > { %v2354_v51 = vadd.f32 %v2353_v30, %v11945_v55  ;;  %3636 = vmatmul.bf16.gmra.mxu1 %v8835_v49  ;;  %v10750_v55 = vld [vmem:[#allocation9 + $0x60] sm:$0xff]  ;;  %v1166_v49 = vrot.slane %v12124_v48, 1 }
 0x16d   : > { %4094 = vmatpush.bf16.msrb.mxu1 %v10750_v55  ;;  %v8662_v55 = vld [vmem:[#allocation2 + $0x68] sm:$0xf] }
 0x16e   : > { %v12126_v58 = vadd.f32 %v2402_v31, %v2354_v51  ;;  %2904 = vmatmul.bf16.gmra.mxu0 %v8651_v13  ;;  %3734 = vmatmul.bf16.gmra.mxu3 %v8843_v0  ;;  %v1084_v13 = vsel %vm1076_vm3, %v13135_v5, %v1068_v8  ;;  %v1083_v0 = vsel %vm1076_vm3, %v1068_v8, %v13082_v14  ;;  %v366_v14 = vld [vmem:[%s11599_s19 + $0xd8] sm:$0xff]  ;;  %s8082_s19 = sshll.u32 %s12853_s11, 4  ;;  %s8083_s19 = int_to_ptr.vmem [resolvable:$true] %s8082_s19 }
 0x16f   : > { %3685 = vmatmul.bf16.gmra.mxu2 %v8839_v40  ;;  %v1133_v27 = vmul.f32 %v8224_v4, %v1084_v13  ;;  %v13081_v40 = vrot.slane %v12129_v29, 1  ;;  %v1263_v54 = vpack.c.bf16 %v1083_v0, %v1083_v0  ;;  %v1180_v59 = vsel %vm1173_vm4, %v13136_v7, %v1166_v49  ;;  %v10674_v4 = vld [vmem:[#allocation2 + $0x70] sm:$0xf0]  ;;  %v8848_v0 = vld [vmem:[#allocation2 + $0x114] sm:$0xf0] }
 0x170   : > { %v1390_v13 = vpack.c.bf16 %v1180_v59, %v1180_v59 }
 0x171   : > { %v2856_v31 = vpop.f32.mrf.mxu3  ;;  %v2404_v45 = vpop.f32.mrf.mxu1  ;;  %v1262_v51 = vpack.c.bf16 %v1133_v27, %v1133_v27  ;;  %v1179_v8 = vsel %vm1173_vm4, %v1166_v49, %v13081_v40  ;;  %1295 = vst [vmem:[#allocation2 + $0x144] sm:$0xf] %v1263_v54  ;;  %v8854_v40 = vld [vmem:[#allocation2 + $0x110] sm:$0xf] }
 0x172   : > { %v2807_v30 = vpop.f32.mrf.mxu2  ;;  %v1231_v5 = vmul.f32 %v8240_v16, %v1179_v8  ;;  %1422 = vst [vmem:[#allocation2 + $0x140] sm:$0xf] %v1390_v13  ;;  %v8855_v59 = vor.u32 %v10770_v47, %v8854_v40  ;;  %v12168_v13 = vmul.f32 %v398_v1, %v366_v14  ;;  %v1070_v40 = vrot.slane %v12129_v29, 7  ;;  %v10838_v47 = vld [vmem:[#allocation9 + $0x1a0] sm:$0xff] }
 0x173   : > { %v12144_v25 = vadd.f32 %v2856_v31, %v2807_v30  ;;  %v2355_v57 = vpop.f32.mrf.mxu0  ;;  %1294 = vst [vmem:[#allocation2 + $0x138] sm:$0xf] %v1262_v51  ;;  %v10769_v30 = vld [vmem:[#allocation2 + $0x110] sm:$0xf0]  ;;  %v10768_v31 = vld [vmem:[#allocation2 + $0x10c] sm:$0xf]  ;;  %v8663_v51 = vor.u32 %v10674_v4, %v8662_v55  ;;  %4547 = vmatpush.bf16.msrb.mxu3 %v10838_v47 }
 0x174   : > { %v2356_v15 = vadd.f32 %v2355_v57, %v11947_v9  ;;  %v8846_v9 = vld [vmem:[#allocation2 + $0x108] sm:$0xf]  ;;  %v1391_v57 = vpack.c.bf16 %v1231_v5, %v1231_v5  ;;  %v8851_v8 = vor.u32 %v10768_v31, %v8848_v0  ;;  %v462_v5 = vadd.s32 208, %v11613_v2  ;;  %v399_v4 = vld [vmem:[#allocation7 + $0xe0] sm:$0xff] }
 0x175   : > { %v8847_v16 = vor.u32 %v10769_v30, %v8846_v9  ;;  %v661_v9 = vand.u32 15, %v463_v19  ;;  %v10758_v31 = vld [vmem:[#allocation9 + $0xa0] sm:$0xff]  ;;  %v12173_v0 = vmul.f32 %v399_v4, %v367_v36  ;;  %v13137_v14 = vmov 0.0  }
 0x176   : > { %v12159_v27 = vadd.f32 %v2404_v45, %v2356_v15  ;;  %1423 = vst [vmem:[#allocation2 + $0x14c] sm:$0xf] %v1391_v57  ;;  %v654_v55 = vand.u32 15, %v462_v5  ;;  %v10741_v57 = vld [vmem:[#allocation9 + $0x18] sm:$0xff]  ;;  %4143 = vmatpush.bf16.msrb.mxu2 %v10758_v31  ;;  %v13088_v19 = vrot.slane %v12168_v13, 7  ;;  %v13139_v47 = vrot.slane %v12129_v29, 1 }
 0x177   : > { %vm975_vm15 = vcmp.ne.s32.totalorder %v661_v9, 15  ;;  %4046 = vmatpush.bf16.msrb.mxu0 %v10741_v57  ;;  %v1328_v9 = vpack.c.bf16 %v12129_v29, %v12129_v29  ;;  %v1329_v57 = vpack.c.bf16 %v12168_v13, %v12168_v13  ;;  %v10773_v29 = vld [vmem:[#allocation2 + $0x130] sm:$0xf0] }
 0x178   : > { %vm878_vm14 = vcmp.ne.s32.totalorder %v654_v55, 0 }
 0x179   : > { %v2858_v7 = vpop.f32.mrf.mxu3  ;;  %v2407_v54 = vpop.f32.mrf.mxu1  ;;  %1360 = vst [vmem:[#allocation2 + $0x154] sm:$0xf] %v1328_v9  ;;  %v400_v9 = vld [vmem:[#allocation7 + $0xe8] sm:$0xff] }
 0x17a   : > { %v2809_v49 = vpop.f32.mrf.mxu2  ;;  %1361 = vst [vmem:[#allocation2 + $0x160] sm:$0xf] %v1329_v57 }
 0x17b   : > { %v12161_v45 = vadd.f32 %v2858_v7, %v2809_v49  ;;  %v2358_v15 = vpop.f32.mrf.mxu0  ;;  %v8225_v49 = vsel %vm878_vm14, 1.0, %v13137_v14  ;;  %v13138_v7 = vrot.slane %v12124_v48, 7  ;;  %v8241_v48 = vsel %vm975_vm15, 1.0, %v13137_v14 }
 0x17c   : > { %v2359_v3 = vadd.f32 %v2358_v15, %v11949_v26  ;;  %3641 = vmatmul.bf16.gmra.mxu1 %v8847_v16  ;;  %v10749_v26 = vld [vmem:[#allocation9 + $0x58] sm:$0xff]  ;;  %v1168_v16 = vrot.slane %v12168_v13, 1 }
 0x17d   : > { %4095 = vmatpush.bf16.msrb.mxu1 %v10749_v26 }
 0x17e   : > { %v12170_v30 = vadd.f32 %v2407_v54, %v2359_v3  ;;  %2909 = vmatmul.bf16.gmra.mxu0 %v8663_v51  ;;  %3739 = vmatmul.bf16.gmra.mxu3 %v8855_v59  ;;  %v1082_v51 = vsel %vm1076_vm3, %v13138_v7, %v1070_v40  ;;  %v1081_v59 = vsel %vm1076_vm3, %v1070_v40, %v13088_v19  ;;  %v10677_v7 = vld [vmem:[#allocation2 + $0x88] sm:$0xf0]  ;;  %v8866_v19 = vld [vmem:[#allocation2 + $0x128] sm:$0xf] }
 0x17f   : > { %3690 = vmatmul.bf16.gmra.mxu2 %v8851_v8  ;;  %v1135_v36 = vmul.f32 %v8225_v49, %v1082_v51  ;;  %v13087_v8 = vrot.slane %v12173_v0, 1  ;;  %v1265_v4 = vpack.c.bf16 %v1081_v59, %v1081_v59  ;;  %v1178_v26 = vsel %vm1173_vm4, %v13139_v47, %v1168_v16  ;;  %v8674_v49 = vld [vmem:[#allocation2 + $0x80] sm:$0xf]  ;;  %v10771_v59 = vld [vmem:[#allocation2 + $0x124] sm:$0xf] }
 0x181   : > { %v2861_v54 = vpop.f32.mrf.mxu3  ;;  %v2409_v3 = vpop.f32.mrf.mxu1  ;;  %v1264_v55 = vpack.c.bf16 %v1135_v36, %v1135_v36  ;;  %v1177_v40 = vsel %vm1173_vm4, %v1168_v16, %v13087_v8  ;;  %v1392_v36 = vpack.c.bf16 %v1178_v26, %v1178_v26  ;;  %1297 = vst [vmem:[#allocation2 + $0x15c] sm:$0xf] %v1265_v4  ;;  %v8867_v26 = vor.u32 %v10773_v29, %v8866_v19  ;;  %v10837_v29 = vld [vmem:[#allocation9 + $0x198] sm:$0xff] }
 0x182   : > { %v2812_v15 = vpop.f32.mrf.mxu2  ;;  %v1233_v51 = vmul.f32 %v8241_v48, %v1177_v40  ;;  %v1072_v19 = vrot.slane %v12173_v0, 7  ;;  %4548 = vmatpush.bf16.msrb.mxu3 %v10837_v29 }
 0x183   : > { %v12188_v1 = vadd.f32 %v2861_v54, %v2812_v15  ;;  %v2360_v5 = vpop.f32.mrf.mxu0  ;;  %1296 = vst [vmem:[#allocation2 + $0x150] sm:$0xf] %v1264_v55  ;;  %v10772_v54 = vld [vmem:[#allocation2 + $0x128] sm:$0xf0]  ;;  %v8675_v55 = vor.u32 %v10677_v7, %v8674_v49  ;;  %v401_v7 = vld [vmem:[#allocation7 + $0xf0] sm:$0xff] }
 0x184   : > { %v2361_v31 = vadd.f32 %v2360_v5, %v11951_v6  ;;  %v8858_v6 = vld [vmem:[#allocation2 + $0x120] sm:$0xf]  ;;  %v8860_v5 = vld [vmem:[#allocation2 + $0x12c] sm:$0xf0]  ;;  %v1393_v8 = vpack.c.bf16 %v1233_v51, %v1233_v51  ;;  %1424 = vst [vmem:[#allocation2 + $0x158] sm:$0xf] %v1392_v36  ;;  %v12212_v36 = vmul.f32 %v400_v9, %v368_v37 }
 0x185   : > { %v8859_v48 = vor.u32 %v10772_v54, %v8858_v6  ;;  %v8863_v40 = vor.u32 %v10771_v59, %v8860_v5  ;;  %v464_v51 = vadd.s32 224, %v11613_v2  ;;  %v675_v6 = vand.u32 15, %v465_v50  ;;  %v10757_v54 = vld [vmem:[#allocation9 + $0x98] sm:$0xff]  ;;  %v10740_v5 = vld [vmem:[#allocation9 + $0x10] sm:$0xff] }
 0x186   : > { %v12203_v15 = vadd.f32 %v2409_v3, %v2361_v31  ;;  %1425 = vst [vmem:[#allocation2 + $0x164] sm:$0xf] %v1393_v8  ;;  %v12217_v59 = vmul.f32 %v401_v7, %v369_v23  ;;  %4144 = vmatpush.bf16.msrb.mxu2 %v10757_v54  ;;  %v10748_v37 = vld [vmem:[#allocation9 + $0x50] sm:$0xff]  ;;  %v13096_v50 = vrot.slane %v12212_v36, 7  ;;  %4047 = vmatpush.bf16.msrb.mxu0 %v10740_v5  ;;  %v13141_v5 = vrot.slane %v12173_v0, 1 }
 0x187   : > { %v668_v49 = vand.u32 15, %v464_v51  ;;  %vm977_vm1 = vcmp.ne.s32.totalorder %v675_v6, 15  ;;  %4096 = vmatpush.bf16.msrb.mxu1 %v10748_v37  ;;  %v1330_v7 = vpack.c.bf16 %v12173_v0, %v12173_v0  ;;  %v1331_v54 = vpack.c.bf16 %v12212_v36, %v12212_v36  ;;  %v8686_v37 = vld [vmem:[#allocation2 + $0x98] sm:$0xf] }
 0x189   : > { %v2863_v47 = vpop.f32.mrf.mxu3  ;;  %v2412_v4 = vpop.f32.mrf.mxu1  ;;  %vm880_vm0 = vcmp.ne.s32.totalorder %v668_v49, 0  ;;  %1362 = vst [vmem:[#allocation2 + $0x16c] sm:$0xf] %v1330_v7  ;;  %v467_v7 = vadd.s32 248, %v11613_v2 }
 0x18a   : > { %v2814_v16 = vpop.f32.mrf.mxu2  ;;  %1363 = vst [vmem:[#allocation2 + $0x178] sm:$0xf] %v1331_v54 }
 0x18b   : > { %v12205_v3 = vadd.f32 %v2863_v47, %v2814_v16  ;;  %v2363_v31 = vpop.f32.mrf.mxu0  ;;  %v13140_v16 = vrot.slane %v12168_v13, 7  ;;  %v8242_v13 = vsel %vm977_vm1, 1.0, %v13137_v14  ;;  %v689_v54 = vand.u32 15, %v467_v7 }
 0x18c   : > { %v2364_v57 = vadd.f32 %v2363_v31, %v11953_v17  ;;  %3646 = vmatmul.bf16.gmra.mxu1 %v8859_v48  ;;  %v8226_v17 = vsel %vm880_vm0, 1.0, %v13137_v14  ;;  %v13095_v48 = vrot.slane %v12217_v59, 1 }
 0x18d   : > { %v1080_v47 = vsel %vm1076_vm3, %v13140_v16, %v1072_v19  ;;  %vm979_vm5 = vcmp.ne.s32.totalorder %v689_v54, 15  ;;  %v1332_v54 = vpack.c.bf16 %v12217_v59, %v12217_v59 }
 0x18e   : > { %v12214_v8 = vadd.f32 %v2412_v4, %v2364_v57  ;;  %2914 = vmatmul.bf16.gmra.mxu0 %v8675_v55  ;;  %3744 = vmatmul.bf16.gmra.mxu3 %v8867_v26  ;;  %v1137_v23 = vmul.f32 %v8226_v17, %v1080_v47  ;;  %v1170_v55 = vrot.slane %v12212_v36, 1  ;;  %v1079_v4 = vsel %vm1076_vm3, %v1072_v19, %v13096_v50  ;;  %v10680_v17 = vld [vmem:[#allocation2 + $0xa0] sm:$0xf0]  ;;  %v10776_v50 = vld [vmem:[#allocation2 + $0x148] sm:$0xf0] }
 0x18f   : > { %3695 = vmatmul.bf16.gmra.mxu2 %v8863_v40  ;;  %v1267_v49 = vpack.c.bf16 %v1079_v4, %v1079_v4  ;;  %v8872_v4 = vld [vmem:[#allocation2 + $0x144] sm:$0xf0]  ;;  %1364 = vst [vmem:[#allocation2 + $0x184] sm:$0xf] %v1332_v54  ;;  %v10746_v54 = vld [vmem:[#allocation9 + $0x40] sm:$0xff] }
 0x190   : > { %v1266_v57 = vpack.c.bf16 %v1137_v23, %v1137_v23  ;;  %v1175_v19 = vsel %vm1173_vm4, %v1170_v55, %v13095_v48  ;;  %v1176_v29 = vsel %vm1173_vm4, %v13141_v5, %v1170_v55  ;;  %v8878_v48 = vld [vmem:[#allocation2 + $0x140] sm:$0xf]  ;;  %v8687_v5 = vor.u32 %v10680_v17, %v8686_v37  ;;  %v10756_v37 = vld [vmem:[#allocation9 + $0x90] sm:$0xff] }
 0x191   : > { %v2866_v31 = vpop.f32.mrf.mxu3  ;;  %v2414_v51 = vpop.f32.mrf.mxu1  ;;  %v1235_v16 = vmul.f32 %v8242_v13, %v1175_v19  ;;  %v1394_v47 = vpack.c.bf16 %v1176_v29, %v1176_v29  ;;  %1299 = vst [vmem:[#allocation2 + $0x174] sm:$0xf] %v1267_v49  ;;  %v8879_v19 = vor.u32 %v10776_v50, %v8878_v48  ;;  %v466_v49 = vadd.s32 240, %v11613_v2  ;;  %v10739_v50 = vld [vmem:[#allocation9 + $0x8] sm:$0xff]  ;;  %v10836_v48 = vld [vmem:[#allocation9 + $0x190] sm:$0xff]  ;;  %4145 = vmatpush.bf16.msrb.mxu2 %v10756_v37 }
 0x192   : > { %v2817_v40 = vpop.f32.mrf.mxu2  ;;  %1298 = vst [vmem:[#allocation2 + $0x168] sm:$0xf] %v1266_v57  ;;  %v1074_v17 = vrot.slane %v12217_v59, 7  ;;  %4048 = vmatpush.bf16.msrb.mxu0 %v10739_v50  ;;  %4549 = vmatpush.bf16.msrb.mxu3 %v10836_v48  ;;  %v8698_v50 = vld [vmem:[#allocation2 + $0xb0] sm:$0xf] }
 0x193   : > { %v12232_v26 = vadd.f32 %v2866_v31, %v2817_v40  ;;  %v2365_v9 = vpop.f32.mrf.mxu0  ;;  %v10775_v40 = vld [vmem:[#allocation2 + $0x140] sm:$0xf0]  ;;  %v10774_v31 = vld [vmem:[#allocation2 + $0x13c] sm:$0xf]  ;;  %1426 = vst [vmem:[#allocation2 + $0x170] sm:$0xf] %v1394_v47 }
 0x194   : > { %v2366_v6 = vadd.f32 %v2365_v9, %v11959_v32  ;;  %v8870_v32 = vld [vmem:[#allocation2 + $0x138] sm:$0xf]  ;;  %v1395_v9 = vpack.c.bf16 %v1235_v16, %v1235_v16  ;;  %v8875_v57 = vor.u32 %v10774_v31, %v8872_v4  ;;  %v682_v16 = vand.u32 15, %v466_v49  ;;  %v10683_v48 = vld [vmem:[#allocation2 + $0xb8] sm:$0xf0] }
 0x195   : > { %v8871_v33 = vor.u32 %v10775_v40, %v8870_v32  ;;  %v1172_v32 = vrot.slane %v11649_v41, 1  ;;  %v10747_v40 = vld [vmem:[#allocation9 + $0x48] sm:$0xff]  ;;  %v13142_v31 = vrot.slane %v12212_v36, 7  ;;  %v8243_v4 = vsel %vm979_vm5, 1.0, %v13137_v14 }
 0x196   : > { %v12247_v23 = vadd.f32 %v2414_v51, %v2366_v6  ;;  %1427 = vst [vmem:[#allocation2 + $0x17c] sm:$0xf] %v1395_v9  ;;  %vm882_vm2 = vcmp.ne.s32.totalorder %v682_v16, 0  ;;  %4097 = vmatpush.bf16.msrb.mxu1 %v10747_v40 }
 0x199   : > { %v2868_v55 = vpop.f32.mrf.mxu3  ;;  %v2417_v6 = vpop.f32.mrf.mxu1 }
 0x19a   : > { %v2819_v0 = vpop.f32.mrf.mxu2  ;;  %4098 = vmatpush.bf16.msrb.mxu1 %v10746_v54 }
 0x19b   : > { %v12249_v13 = vadd.f32 %v2868_v55, %v2819_v0  ;;  %v2368_v51 = vpop.f32.mrf.mxu0  ;;  %v13143_v0 = vrot.slane %v11635_v35, 1 }
 0x19c   : > { %v2369_v29 = vadd.f32 %v2368_v51, %v11976_v56  ;;  %3651 = vmatmul.bf16.gmra.mxu1 %v8871_v33  ;;  %v8227_v56 = vsel %vm882_vm2, 1.0, %v13137_v14  ;;  %v1078_v33 = vsel %vm1076_vm3, %v13142_v31, %v1074_v17  ;;  %v13144_v51 = vrot.slane %v11649_v41, 7  ;;  %v10778_v31 = vld [vmem:[#allocation2 + $0x158] sm:$0xf0] }
 0x19d   : > { %v1139_v9 = vmul.f32 %v8227_v56, %v1078_v33  ;;  %v1205_v55 = vsel %vm1173_vm4, %v1172_v32, %v13143_v0  ;;  %v8882_v56 = vld [vmem:[#allocation2 + $0x150] sm:$0xf]  ;;  %v8890_v0 = vld [vmem:[#allocation2 + $0x158] sm:$0xf] }
 0x19e   : > { %v12254_v47 = vadd.f32 %v2417_v6, %v2369_v29  ;;  %2919 = vmatmul.bf16.gmra.mxu0 %v8687_v5  ;;  %3749 = vmatmul.bf16.gmra.mxu3 %v8879_v19  ;;  %v1077_v36 = vsel %vm1076_vm3, %v1074_v17, %v13144_v51  ;;  %v13145_v6 = vrot.slane %v12217_v59, 1  ;;  %v1237_v19 = vmul.f32 %v8243_v4, %v1205_v55  ;;  %v10777_v4 = vld [vmem:[#allocation2 + $0x154] sm:$0xf]  ;;  %v10779_v59 = vld [vmem:[#allocation2 + $0x160] sm:$0xf0] }
 0x19f   : > { %3700 = vmatmul.bf16.gmra.mxu2 %v8875_v57  ;;  %v1268_v29 = vpack.c.bf16 %v1139_v9, %v1139_v9  ;;  %v1269_v16 = vpack.c.bf16 %v1077_v36, %v1077_v36  ;;  %v1333_v17 = vpack.c.bf16 %v11649_v41, %v11649_v41  ;;  %v8884_v9 = vld [vmem:[#allocation2 + $0x15c] sm:$0xf0]  ;;  %v8699_v41 = vor.u32 %v10683_v48, %v8698_v50 }
 0x1a0   : > { %v1174_v14 = vsel %vm1173_vm4, %v13145_v6, %v1172_v32  ;;  %v1397_v33 = vpack.c.bf16 %v1237_v19, %v1237_v19  ;;  %v8887_v6 = vor.u32 %v10777_v4, %v8884_v9  ;;  %v8894_v4 = vld [vmem:[#allocation2 + $0x168] sm:$0xf]  ;;  %v10781_v9 = vld [vmem:[#allocation2 + $0x170] sm:$0xf0] }
 0x1a1   : > { %v2871_v57 = vpop.f32.mrf.mxu3  ;;  %v2419_v7 = vpop.f32.mrf.mxu1  ;;  %1300 = vst [vmem:[#allocation2 + $0x180] sm:$0xf] %v1268_v29  ;;  %v1396_v40 = vpack.c.bf16 %v1174_v14, %v1174_v14  ;;  %v8891_v14 = vor.u32 %v10779_v59, %v8890_v0  ;;  %v10738_v29 = vld [vmem:[#allocation9] sm:$0xff]  ;;  %v10780_v0 = vld [vmem:[#allocation2 + $0x16c] sm:$0xf] }
 0x1a2   : > { %v2822_v5 = vpop.f32.mrf.mxu2  ;;  %1301 = vst [vmem:[#allocation2 + $0x18c] sm:$0xf] %v1269_v16  ;;  %v10835_v16 = vld [vmem:[#allocation9 + $0x188] sm:$0xff]  ;;  %4049 = vmatpush.bf16.msrb.mxu0 %v10738_v29  ;;  %v8896_v59 = vld [vmem:[#allocation2 + $0x174] sm:$0xf0] }
 0x1a3   : > { %v12276_v49 = vadd.f32 %v2871_v57, %v2822_v5  ;;  %v2370_v35 = vpop.f32.mrf.mxu0  ;;  %1365 = vst [vmem:[#allocation2 + $0x190] sm:$0xf] %v1333_v17  ;;  %v8883_v5 = vor.u32 %v10778_v31, %v8882_v56  ;;  %4550 = vmatpush.bf16.msrb.mxu3 %v10835_v16  ;;  %v8710_v31 = vld [vmem:[#allocation2 + $0xc8] sm:$0xf]  ;;  %v8899_v29 = vor.u32 %v10780_v0, %v8896_v59  ;;  %v10849_v0 = vld [vmem:[#allocation9 + $0x1f8] sm:$0xff] }
 0x1a4   : > { %v2371_v37 = vadd.f32 %v2370_v35, %v11983_v52  ;;  %1428 = vst [vmem:[#allocation2 + $0x188] sm:$0xf] %v1396_v40  ;;  %v10857_v59 = vld [vmem:[#allocation9 + $0x238] sm:$0xff] }
 0x1a5   : > { %1429 = vst [vmem:[#allocation2 + $0x194] sm:$0xf] %v1397_v33  ;;  %v10686_v33 = vld [vmem:[#allocation2 + $0xd0] sm:$0xf0]  ;;  %4642 = vmatpush.bf16.msra.mxu1 %v10857_v59 }
 0x1a6   : > { %v12283_v32 = vadd.f32 %v2419_v7, %v2371_v37  ;;  %v10755_v7 = vld [vmem:[#allocation9 + $0x88] sm:$0xff]  ;;  %4593 = vmatpush.bf16.msra.mxu0 %v10849_v0 }
 0x1a7   : > { %4146 = vmatpush.bf16.msrb.mxu2 %v10755_v7 }
 0x1a9   : > { %v2873_v55 = vpop.f32.mrf.mxu3  ;;  %v2422_v36 = vpop.f32.mrf.mxu1 }
 0x1aa   : > { %v2824_v52 = vpop.f32.mrf.mxu2 }
 0x1ab   : > { %v12285_v57 = vadd.f32 %v2873_v55, %v2824_v52  ;;  %v2373_v51 = vpop.f32.mrf.mxu0  ;;  %v8902_v52 = vld [vmem:[#allocation2 + $0x170] sm:$0xf]  ;;  %v10782_v55 = vld [vmem:[#allocation2 + $0x178] sm:$0xf0] }
 0x1ac   : > { %v2374_v19 = vadd.f32 %v2373_v51, %v11995_v10  ;;  %3656 = vmatmul.bf16.gmra.mxu1 %v8883_v5  ;;  %v8711_v51 = vor.u32 %v10686_v33, %v8710_v31  ;;  %v8903_v16 = vor.u32 %v10782_v55, %v8902_v52  ;;  %v8906_v52 = vld [vmem:[#allocation2 + $0x180] sm:$0xf]  ;;  %v10784_v55 = vld [vmem:[#allocation2 + $0x188] sm:$0xf0] }
 0x1ae   : > { %v12288_v35 = vadd.f32 %v2422_v36, %v2374_v19  ;;  %2924 = vmatmul.bf16.gmra.mxu0 %v8699_v41  ;;  %3754 = vmatmul.bf16.gmra.mxu3 %v8891_v14  ;;  %v8895_v36 = vor.u32 %v10781_v9, %v8894_v4  ;;  %v10834_v14 = vld [vmem:[#allocation9 + $0x180] sm:$0xff] }
 0x1af   : > { %3705 = vmatmul.bf16.gmra.mxu2 %v8887_v6  ;;  %v10754_v6 = vld [vmem:[#allocation9 + $0x80] sm:$0xff]  ;;  %4551 = vmatpush.bf16.msrb.mxu3 %v10834_v14 }
 0x1b0   : > { %4147 = vmatpush.bf16.msrb.mxu2 %v10754_v6  ;;  %v8722_v4 = vld [vmem:[#allocation2 + $0xe0] sm:$0xf] }
 0x1b1   : > { %v2876_v17 = vpop.f32.mrf.mxu3  ;;  %v2424_v10 = vpop.f32.mrf.mxu1 }
 0x1b2   : > { %v2827_v37 = vpop.f32.mrf.mxu2 }
 0x1b3   : > { %v12290_v50 = vadd.f32 %v2876_v17, %v2827_v37  ;;  %v2375_v48 = vpop.f32.mrf.mxu0 }
 0x1b4   : > { %v2376_v40 = vadd.f32 %v2375_v48, %v12002_v34 }
 0x1b6   : > { %v12293_v56 = vadd.f32 %v2424_v10, %v2376_v40 }
 0x1b9   : > { %v2878_v5 = vpop.f32.mrf.mxu3  ;;  %v2427_v34 = vpop.f32.mrf.mxu1 }
 0x1ba   : > { %v2829_v41 = vpop.f32.mrf.mxu2 }
 0x1bb   : > { %v12295_v19 = vadd.f32 %v2878_v5, %v2829_v41  ;;  %v2378_v7 = vpop.f32.mrf.mxu0  ;;  %v10783_v41 = vld [vmem:[#allocation2 + $0x184] sm:$0xf]  ;;  %v8908_v5 = vld [vmem:[#allocation2 + $0x18c] sm:$0xf0] }
 0x1bc   : > { %v2379_v54 = vadd.f32 %v2378_v7, %v12033_v44  ;;  %3661 = vmatmul.bf16.gmra.mxu1 %v8895_v36  ;;  %v10689_v44 = vld [vmem:[#allocation2 + $0xe8] sm:$0xf0]  ;;  %v10785_v36 = vld [vmem:[#allocation2 + $0x190] sm:$0xf0] }
 0x1bd   : > { %v8723_v7 = vor.u32 %v10689_v44, %v8722_v4 }
 0x1be   : > { %v12298_v37 = vadd.f32 %v2427_v34, %v2379_v54  ;;  %2929 = vmatmul.bf16.gmra.mxu0 %v8711_v51  ;;  %3759 = vmatmul.bf16.gmra.mxu3 %v8903_v16  ;;  %v8914_v51 = vld [vmem:[#allocation2 + $0x188] sm:$0xf]  ;;  %v8907_v34 = vor.u32 %v10784_v55, %v8906_v52  ;;  %v8911_v54 = vor.u32 %v10783_v41, %v8908_v5  ;;  %v9014_v55 = vld [vmem:[#allocation2 + $0xc0] sm:$0xf]  ;;  %v10715_v41 = vld [vmem:[#allocation2 + $0xc8] sm:$0xf0] }
 0x1bf   : > { %3710 = vmatmul.bf16.gmra.mxu2 %v8899_v29  ;;  %v10714_v5 = vld [vmem:[#allocation2 + $0xc4] sm:$0xf] }
 0x1c1   : > { %v2881_v48 = vpop.f32.mrf.mxu3  ;;  %v2429_v31 = vpop.f32.mrf.mxu1 }
 0x1c2   : > { %v2832_v17 = vpop.f32.mrf.mxu2 }
 0x1c3   : > { %v12300_v10 = vadd.f32 %v2881_v48, %v2832_v17  ;;  %v2380_v40 = vpop.f32.mrf.mxu0  ;;  %v8915_v17 = vor.u32 %v10785_v36, %v8914_v51  ;;  %v9022_v51 = vld [vmem:[#allocation2 + $0xc8] sm:$0xf]  ;;  %v10716_v36 = vld [vmem:[#allocation2 + $0xd0] sm:$0xf0] }
 0x1c4   : > { %v2381_v33 = vadd.f32 %v2380_v40, %v12041_v20 }
 0x1c6   : > { %v12303_v9 = vadd.f32 %v2429_v31, %v2381_v33 }
 0x1c8   : > { %13146 = vst [vmem:[#allocation25_spill] sm:$0xff] %v12303_v9 }
 0x1c9   : > { %v2883_v14 = vpop.f32.mrf.mxu3  ;;  %v2432_v16 = vpop.f32.mrf.mxu1 }
 0x1ca   : > { %v2834_v6 = vpop.f32.mrf.mxu2 }
 0x1cb   : > { %v12305_v29 = vadd.f32 %v2883_v14, %v2834_v6  ;;  %v2383_v20 = vpop.f32.mrf.mxu0  ;;  %v9206_v6 = vld [vmem:[#allocation2 + $0xf0] sm:$0xf]  ;;  %v10811_v14 = vld [vmem:[#allocation2 + $0xf8] sm:$0xf0] }
 0x1cc   : > { %v2384_v48 = vadd.f32 %v2383_v20, %v12071_v42  ;;  %3666 = vmatmul.bf16.gmra.mxu1 %v8907_v34  ;;  %v9016_v42 = vld [vmem:[#allocation2 + $0xcc] sm:$0xf0]  ;;  %v9015_v20 = vor.u32 %v10715_v41, %v9014_v55 }
 0x1ce   : > { %v12308_v40 = vadd.f32 %v2432_v16, %v2384_v48  ;;  %2934 = vmatmul.bf16.gmra.mxu0 %v8723_v7  ;;  %3764 = vmatmul.bf16.gmra.mxu3 %v8915_v17  ;;  %v9019_v16 = vor.u32 %v10714_v5, %v9016_v42 }
 0x1cf   : > { %3715 = vmatmul.bf16.gmra.mxu2 %v8911_v54 }
 0x1d0   : > { %13147 = vst [vmem:[#allocation26_spill] sm:$0xff] %v12308_v40  ;;  %v10856_v40 = vld [vmem:[#allocation9 + $0x230] sm:$0xff] }
 0x1d1   : > { %v2886_v33 = vpop.f32.mrf.mxu3  ;;  %v2434_v44 = vpop.f32.mrf.mxu1  ;;  %4643 = vmatpush.bf16.msra.mxu1 %v10856_v40  ;;  %v10717_v40 = vld [vmem:[#allocation2 + $0xdc] sm:$0xf] }
 0x1d2   : > { %v2837_v31 = vpop.f32.mrf.mxu2 }
 0x1d3   : > { %v12310_v0 = vadd.f32 %v2886_v33, %v2837_v31  ;;  %v2385_v4 = vpop.f32.mrf.mxu0  ;;  %v9023_v31 = vor.u32 %v10716_v36, %v9022_v51 }
 0x1d4   : > { %v2386_v59 = vadd.f32 %v2385_v4, %v12078_v60  ;;  %v9207_v60 = vor.u32 %v10811_v14, %v9206_v6  ;;  %v12321_v4 = vld [vmem:[%s13069_s3] ss:$0 sm:$0xff] }
 0x1d5   : > { %13148 = vst [vmem:[#allocation27_spill] sm:$0xff] %v12310_v0 }
 0x1d6   : > { %v12313_v52 = vadd.f32 %v2434_v44, %v2386_v59  ;;  %v10937_v44 = vld [vmem:[#allocation10 + $0xf8] sm:$0xff]  ;;  %v10848_v59 = vld [vmem:[#allocation9 + $0x1f0] sm:$0xff] }
 0x1d7   : > { %5368 = vmatpush.bf16.msra.mxu2 %v10937_v44  ;;  %4594 = vmatpush.bf16.msra.mxu0 %v10848_v59 }
 0x1d8   : > { %13149 = vst [vmem:[#allocation28_spill] sm:$0xff] %v12313_v52  ;;  %v10945_v52 = vld [vmem:[#allocation10 + $0x138] sm:$0xff] }
 0x1d9   : > { %v2888_v34 = vpop.f32.mrf.mxu3  ;;  %v3632_v48 = vpop.f32.mrf.mxu1  ;;  %5417 = vmatpush.bf16.msra.mxu3 %v10945_v52  ;;  %v10718_v52 = vld [vmem:[#allocation2 + $0xe0] sm:$0xf0] }
 0x1da   : > { %v2839_v7 = vpop.f32.mrf.mxu2 }
 0x1db   : > { %v12315_v54 = vadd.f32 %v2888_v34, %v2839_v7  ;;  %v2900_v17 = vpop.f32.mrf.mxu0  ;;  %v9026_v34 = vld [vmem:[#allocation2 + $0xd8] sm:$0xf]  ;;  %5369 = vmatpush.bf16.msra.mxu2 %v10936_v38 }
 0x1dc   : > { %v2901_v33 = vadd.f32 %v2900_v17, %v12100_v28  ;;  %4099 = vmatmul.bf16.vlgmr.msrb.gmra.mxu1 %v9019_v16  ;;  %v9028_v16 = vld [vmem:[#allocation2 + $0xe4] sm:$0xf0]  ;;  %v9034_v17 = vld [vmem:[#allocation2 + $0xe0] sm:$0xf] }
 0x1dd   : > { %13150 = vst [vmem:[#allocation29_spill] sm:$0xff] %v12315_v54 }
 0x1de   : > { %v2940_v55 = vadd.f32 %v2901_v33, %v12082_v12  ;;  %4050 = vmatmul.bf16.vlgmr.msrb.gmra.mxu0 %v9015_v20  ;;  %4552 = vmatmul.bf16.vlgmr.msrb.gmra.mxu3 %v9207_v60  ;;  %v9218_v60 = vld [vmem:[#allocation2 + $0x108] sm:$0xf]  ;;  %v10814_v33 = vld [vmem:[#allocation2 + $0x110] sm:$0xf0] }
 0x1df   : > { %4148 = vmatmul.bf16.vlgmr.msrb.gmra.mxu2 %v9023_v31  ;;  %v10719_v31 = vld [vmem:[#allocation2 + $0xe8] sm:$0xf0] }
 0x1e0   : > { %v2959_v41 = vadd.f32 %v12321_v4, %v2940_v55 }
 0x1e1   : > { %v3730_v42 = vpop.f32.mrf.mxu3  ;;  %v3634_v6 = vpop.f32.mrf.mxu1 }
 0x1e2   : > { %v12325_v28 = vmax.f32 %v2959_v41, 0.0  ;;  %v3681_v5 = vpop.f32.mrf.mxu2  ;;  %v9027_v41 = vor.u32 %v10718_v52, %v9026_v34  ;;  %v10944_v34 = vld [vmem:[#allocation10 + $0x130] sm:$0xff]  ;;  %v10855_v52 = vld [vmem:[#allocation9 + $0x228] sm:$0xff] }
 0x1e3   : > { %v3682_v51 = vadd.f32 %v3681_v5, %v3632_v48  ;;  %v2902_v36 = vpop.f32.mrf.mxu0  ;;  %v9035_v5 = vor.u32 %v10719_v31, %v9034_v17  ;;  %5418 = vmatpush.bf16.msra.mxu3 %v10944_v34  ;;  %4644 = vmatpush.bf16.msra.mxu1 %v10855_v52  ;;  %v10720_v52 = vld [vmem:[#allocation2 + $0xf4] sm:$0xf] }
 0x1e4   : > { %v3121_v12 = vpack.c.bf16 %v12325_v28, %v12325_v28  ;;  %v2903_v14 = vadd.f32 %v2902_v36, %v12117_v21  ;;  %v9031_v21 = vor.u32 %v10717_v40, %v9028_v16 }
 0x1e5   : > { %v12330_v7 = vadd.f32 %v3730_v42, %v3682_v51  ;;  %v13102_v42 = vrot.slane %v12325_v28, 7  ;;  %v13101_v51 = vrot.slane %v12325_v28, 1 }
 0x1e6   : > { %3137 = vst [vmem:[#allocation3 + $0x1c] sm:$0xf] %v3121_v12  ;;  %v2941_v20 = vadd.f32 %v2903_v14, %v12115_v22  ;;  %v9219_v14 = vor.u32 %v10814_v33, %v9218_v60 }
 0x1e7   : > { %13151 = vst [vmem:[#allocation30_spill] sm:$0xff] %v12330_v7 }
 0x1e8   : > { %v2960_v48 = vadd.f32 %v12321_v4, %v2941_v20 }
 0x1e9   : > { %v3732_v55 = vpop.f32.mrf.mxu3  ;;  %v3637_v12 = vpop.f32.mrf.mxu1 }
 0x1ea   : > { %v2976_v44 = vmax.f32 %v2960_v48, 0.0  ;;  %v3683_v59 = vpop.f32.mrf.mxu2  ;;  %v10847_v48 = vld [vmem:[#allocation9 + $0x1e8] sm:$0xff] }
 0x1eb   : > { %v3684_v22 = vadd.f32 %v3683_v59, %v3634_v6  ;;  %v2905_v36 = vpop.f32.mrf.mxu0  ;;  %4595 = vmatpush.bf16.msra.mxu0 %v10847_v48 }
 0x1ec   : > { %v2992_v7 = vrot.slane %v2976_v44, 7  ;;  %v3040_v54 = vrot.slane %v2976_v44, 1  ;;  %v3122_v0 = vpack.c.bf16 %v2976_v44, %v2976_v44  ;;  %v2906_v20 = vadd.f32 %v2905_v36, %v12144_v25  ;;  %4104 = vmatmul.bf16.gmra.mxu1 %v9031_v21 }
 0x1ed   : > { %v12337_v9 = vadd.f32 %v3732_v55, %v3684_v22 }
 0x1ee   : > { %v3021_v40 = vsel %vm1076_vm3, %v13102_v42, %v2992_v7  ;;  %v3069_v6 = vsel %vm1173_vm4, %v13101_v51, %v3040_v54  ;;  %3138 = vst [vmem:[#allocation3 + $0x28] sm:$0xf] %v3122_v0  ;;  %v2942_v16 = vadd.f32 %v2906_v20, %v12126_v58  ;;  %4055 = vmatmul.bf16.gmra.mxu0 %v9027_v41  ;;  %v9038_v20 = vld [vmem:[#allocation2 + $0xf0] sm:$0xf] }
 0x1ef   : > { %v3088_v25 = vpack.c.bf16 %v3021_v40, %v3021_v40  ;;  %v3153_v17 = vpack.c.bf16 %v3069_v6, %v3069_v6  ;;  %4153 = vmatmul.bf16.gmra.mxu2 %v9035_v5  ;;  %4557 = vmatmul.bf16.gmra.mxu3 %v9219_v14  ;;  %v9040_v40 = vld [vmem:[#allocation2 + $0xfc] sm:$0xf0] }
 0x1f0   : > { %v2961_v31 = vadd.f32 %v12321_v4, %v2942_v16  ;;  %v10722_v16 = vld [vmem:[#allocation2 + $0x100] sm:$0xf0] }
 0x1f1   : > { %3106 = vst [vmem:[#allocation3 + $0x24] sm:$0xf] %v3088_v25  ;;  %v3735_v44 = vpop.f32.mrf.mxu3  ;;  %v3639_v58 = vpop.f32.mrf.mxu1  ;;  %v9230_v25 = vld [vmem:[#allocation2 + $0x120] sm:$0xf] }
 0x1f2   : > { %3169 = vst [vmem:[#allocation3 + $0x20] sm:$0xf] %v3153_v17  ;;  %v2977_v60 = vmax.f32 %v2961_v31, 0.0  ;;  %v3686_v33 = vpop.f32.mrf.mxu2 }
 0x1f3   : > { %v3687_v0 = vadd.f32 %v3686_v33, %v3637_v12  ;;  %v2907_v59 = vpop.f32.mrf.mxu0  ;;  %v10721_v12 = vld [vmem:[#allocation2 + $0xf8] sm:$0xf0] }
 0x1f4   : > { %v2993_v55 = vrot.slane %v2977_v60, 7  ;;  %v3041_v41 = vrot.slane %v2977_v60, 1  ;;  %v3123_v21 = vpack.c.bf16 %v2977_v60, %v2977_v60  ;;  %v2908_v5 = vadd.f32 %v2907_v59, %v12161_v45  ;;  %v9046_v45 = vld [vmem:[#allocation2 + $0xf8] sm:$0xf] }
 0x1f5   : > { %v12350_v22 = vadd.f32 %v3735_v44, %v3687_v0  ;;  %v9043_v44 = vor.u32 %v10720_v52, %v9040_v40 }
 0x1f6   : > { %v3020_v38 = vsel %vm1076_vm3, %v2992_v7, %v2993_v55  ;;  %v3068_v36 = vsel %vm1173_vm4, %v3040_v54, %v3041_v41  ;;  %3139 = vst [vmem:[#allocation3 + $0x34] sm:$0xf] %v3123_v21  ;;  %v2943_v14 = vadd.f32 %v2908_v5, %v12159_v27  ;;  %v10817_v7 = vld [vmem:[#allocation2 + $0x128] sm:$0xf0]  ;;  %v9039_v27 = vor.u32 %v10721_v12, %v9038_v20 }
 0x1f7   : > { %v3025_v48 = vmul.f32 %v11654_v43, %v3020_v38  ;;  %v3072_v34 = vmul.f32 %v11646_v39, %v3068_v36  ;;  %v9047_v5 = vor.u32 %v10722_v16, %v9046_v45  ;;  %v9231_v38 = vor.u32 %v10817_v7, %v9230_v25  ;;  %v10935_v39 = vld [vmem:[#allocation10 + $0xe8] sm:$0xff]  ;;  %v10854_v43 = vld [vmem:[#allocation9 + $0x220] sm:$0xff] }
 0x1f8   : > { %v2962_v6 = vadd.f32 %v12321_v4, %v2943_v14  ;;  %5370 = vmatpush.bf16.msra.mxu2 %v10935_v39  ;;  %4645 = vmatpush.bf16.msra.mxu1 %v10854_v43 }
 0x1f9   : > { %v3089_v17 = vpack.c.bf16 %v3025_v48, %v3025_v48  ;;  %v3154_v31 = vpack.c.bf16 %v3072_v34, %v3072_v34  ;;  %v3737_v33 = vpop.f32.mrf.mxu3  ;;  %v3642_v21 = vpop.f32.mrf.mxu1  ;;  %v10846_v48 = vld [vmem:[#allocation9 + $0x1e0] sm:$0xff] }
 0x1fa   : > { %v2978_v54 = vmax.f32 %v2962_v6, 0.0  ;;  %v3688_v60 = vpop.f32.mrf.mxu2  ;;  %v10943_v6 = vld [vmem:[#allocation10 + $0x128] sm:$0xff]  ;;  %4596 = vmatpush.bf16.msra.mxu0 %v10846_v48 }
 0x1fb   : > { %3107 = vst [vmem:[#allocation3 + $0x30] sm:$0xf] %v3089_v17  ;;  %v3689_v0 = vadd.f32 %v3688_v60, %v3639_v58  ;;  %v2910_v59 = vpop.f32.mrf.mxu0  ;;  %5419 = vmatpush.bf16.msra.mxu3 %v10943_v6 }
 0x1fc   : > { %3170 = vst [vmem:[#allocation3 + $0x2c] sm:$0xf] %v3154_v31  ;;  %v2994_v36 = vrot.slane %v2978_v54, 7  ;;  %v3042_v51 = vrot.slane %v2978_v54, 1  ;;  %v3124_v14 = vpack.c.bf16 %v2978_v54, %v2978_v54  ;;  %v2911_v42 = vadd.f32 %v2910_v59, %v12188_v1  ;;  %4109 = vmatmul.bf16.gmra.mxu1 %v9043_v44  ;;  %v10723_v59 = vld [vmem:[#allocation2 + $0x10c] sm:$0xf] }
 0x1fd   : > { %v12361_v34 = vadd.f32 %v3737_v33, %v3689_v0  ;;  %v9050_v33 = vld [vmem:[#allocation2 + $0x108] sm:$0xf] }
 0x1fe   : > { %v3019_v20 = vsel %vm1076_vm3, %v2993_v55, %v2994_v36  ;;  %v3067_v58 = vsel %vm1173_vm4, %v3041_v41, %v3042_v51  ;;  %3140 = vst [vmem:[#allocation3 + $0x40] sm:$0xf] %v3124_v14  ;;  %v2944_v12 = vadd.f32 %v2911_v42, %v12170_v30  ;;  %4060 = vmatmul.bf16.gmra.mxu0 %v9039_v27  ;;  %v10724_v27 = vld [vmem:[#allocation2 + $0x110] sm:$0xf0]  ;;  %v9242_v14 = vld [vmem:[#allocation2 + $0x138] sm:$0xf] }
 0x1ff   : > { %v3090_v52 = vpack.c.bf16 %v3019_v20, %v3019_v20  ;;  %v3155_v40 = vpack.c.bf16 %v3067_v58, %v3067_v58  ;;  %4158 = vmatmul.bf16.gmra.mxu2 %v9047_v5  ;;  %4562 = vmatmul.bf16.gmra.mxu3 %v9231_v38  ;;  %v10725_v38 = vld [vmem:[#allocation2 + $0x118] sm:$0xf0] }
 0x200   : > { %v2963_v1 = vadd.f32 %v12321_v4, %v2944_v12 }
 0x201   : > { %3108 = vst [vmem:[#allocation3 + $0x3c] sm:$0xf] %v3090_v52  ;;  %v3740_v41 = vpop.f32.mrf.mxu3  ;;  %v3644_v30 = vpop.f32.mrf.mxu1 }
 0x202   : > { %3171 = vst [vmem:[#allocation3 + $0x38] sm:$0xf] %v3155_v40  ;;  %v2979_v55 = vmax.f32 %v2963_v1, 0.0  ;;  %v3691_v45 = vpop.f32.mrf.mxu2 }
 0x203   : > { %v3692_v16 = vadd.f32 %v3691_v45, %v3642_v21  ;;  %v2912_v25 = vpop.f32.mrf.mxu0  ;;  %v9052_v21 = vld [vmem:[#allocation2 + $0x114] sm:$0xf0] }
 0x204   : > { %v2995_v42 = vrot.slane %v2979_v55, 7  ;;  %v3043_v7 = vrot.slane %v2979_v55, 1  ;;  %v3125_v17 = vpack.c.bf16 %v2979_v55, %v2979_v55  ;;  %v2913_v31 = vadd.f32 %v2912_v25, %v12205_v3  ;;  %v9058_v3 = vld [vmem:[#allocation2 + $0x110] sm:$0xf] }
 0x205   : > { %v12370_v54 = vadd.f32 %v3740_v41, %v3692_v16  ;;  %v9055_v12 = vor.u32 %v10723_v59, %v9052_v21  ;;  %v9059_v55 = vor.u32 %v10725_v38, %v9058_v3 }
 0x206   : > { %v3018_v39 = vsel %vm1076_vm3, %v2994_v36, %v2995_v42  ;;  %v3066_v43 = vsel %vm1173_vm4, %v3042_v51, %v3043_v7  ;;  %3141 = vst [vmem:[#allocation3 + $0x4c] sm:$0xf] %v3125_v17  ;;  %v2945_v60 = vadd.f32 %v2913_v31, %v12203_v15  ;;  %v10820_v36 = vld [vmem:[#allocation2 + $0x140] sm:$0xf0]  ;;  %v9051_v15 = vor.u32 %v10724_v27, %v9050_v33 }
 0x207   : > { %v3027_v44 = vmul.f32 %v11734_v11, %v3018_v39  ;;  %v3074_v0 = vmul.f32 %v11675_v62, %v3066_v43  ;;  %v9243_v45 = vor.u32 %v10820_v36, %v9242_v14  ;;  %v10934_v31 = vld [vmem:[#allocation10 + $0xe0] sm:$0xff]  ;;  %v10845_v39 = vld [vmem:[#allocation9 + $0x1d8] sm:$0xff] }
 0x208   : > { %v2964_v5 = vadd.f32 %v12321_v4, %v2945_v60  ;;  %v10942_v60 = vld [vmem:[#allocation10 + $0x120] sm:$0xff]  ;;  %5371 = vmatpush.bf16.msra.mxu2 %v10934_v31  ;;  %4597 = vmatpush.bf16.msra.mxu0 %v10845_v39 }
 0x209   : > { %v3091_v48 = vpack.c.bf16 %v3027_v44, %v3027_v44  ;;  %v3156_v6 = vpack.c.bf16 %v3074_v0, %v3074_v0  ;;  %v3742_v58 = vpop.f32.mrf.mxu3  ;;  %v3647_v1 = vpop.f32.mrf.mxu1  ;;  %v10853_v44 = vld [vmem:[#allocation9 + $0x218] sm:$0xff]  ;;  %5420 = vmatpush.bf16.msra.mxu3 %v10942_v60 }
 0x20a   : > { %v2980_v51 = vmax.f32 %v2964_v5, 0.0  ;;  %v3693_v20 = vpop.f32.mrf.mxu2  ;;  %4646 = vmatpush.bf16.msra.mxu1 %v10853_v44 }
 0x20b   : > { %3109 = vst [vmem:[#allocation3 + $0x48] sm:$0xf] %v3091_v48  ;;  %v3694_v52 = vadd.f32 %v3693_v20, %v3644_v30  ;;  %v2915_v40 = vpop.f32.mrf.mxu0 }
 0x20c   : > { %3172 = vst [vmem:[#allocation3 + $0x44] sm:$0xf] %v3156_v6  ;;  %v2996_v41 = vrot.slane %v2980_v51, 7  ;;  %v3044_v16 = vrot.slane %v2980_v51, 1  ;;  %v3126_v25 = vpack.c.bf16 %v2980_v51, %v2980_v51  ;;  %v2916_v17 = vadd.f32 %v2915_v40, %v12232_v26  ;;  %4114 = vmatmul.bf16.gmra.mxu1 %v9055_v12  ;;  %v10727_v12 = vld [vmem:[#allocation2 + $0x128] sm:$0xf0] }
 0x20d   : > { %v12381_v43 = vadd.f32 %v3742_v58, %v3694_v52 }
 0x20e   : > { %v3017_v33 = vsel %vm1076_vm3, %v2995_v42, %v2996_v41  ;;  %v3065_v30 = vsel %vm1173_vm4, %v3043_v7, %v3044_v16  ;;  %3142 = vst [vmem:[#allocation3 + $0x58] sm:$0xf] %v3126_v25  ;;  %v2946_v27 = vadd.f32 %v2916_v17, %v12214_v8  ;;  %4065 = vmatmul.bf16.gmra.mxu0 %v9051_v15  ;;  %v9062_v15 = vld [vmem:[#allocation2 + $0x120] sm:$0xf]  ;;  %v10728_v25 = vld [vmem:[#allocation2 + $0x130] sm:$0xf0] }
 0x20f   : > { %v3092_v0 = vpack.c.bf16 %v3017_v33, %v3017_v33  ;;  %v3157_v59 = vpack.c.bf16 %v3065_v30, %v3065_v30  ;;  %4163 = vmatmul.bf16.gmra.mxu2 %v9059_v55  ;;  %4567 = vmatmul.bf16.gmra.mxu3 %v9243_v45  ;;  %v9064_v55 = vld [vmem:[#allocation2 + $0x12c] sm:$0xf0] }
 0x210   : > { %v2965_v26 = vadd.f32 %v12321_v4, %v2946_v27  ;;  %v9254_v17 = vld [vmem:[#allocation2 + $0x150] sm:$0xf] }
 0x211   : > { %3110 = vst [vmem:[#allocation3 + $0x54] sm:$0xf] %v3092_v0  ;;  %v3745_v7 = vpop.f32.mrf.mxu3  ;;  %v3649_v8 = vpop.f32.mrf.mxu1 }
 0x212   : > { %3173 = vst [vmem:[#allocation3 + $0x50] sm:$0xf] %v3157_v59  ;;  %v2981_v42 = vmax.f32 %v2965_v26, 0.0  ;;  %v3696_v21 = vpop.f32.mrf.mxu2 }
 0x213   : > { %v3697_v3 = vadd.f32 %v3696_v21, %v3647_v1  ;;  %v2917_v5 = vpop.f32.mrf.mxu0  ;;  %v10726_v1 = vld [vmem:[#allocation2 + $0x124] sm:$0xf] }
 0x214   : > { %v2997_v38 = vrot.slane %v2981_v42, 7  ;;  %v3045_v14 = vrot.slane %v2981_v42, 1  ;;  %v3127_v36 = vpack.c.bf16 %v2981_v42, %v2981_v42  ;;  %v2918_v48 = vadd.f32 %v2917_v5, %v12249_v13  ;;  %v9070_v13 = vld [vmem:[#allocation2 + $0x128] sm:$0xf]  ;;  %v10933_v5 = vld [vmem:[#allocation10 + $0xd8] sm:$0xff] }
 0x215   : > { %v12390_v6 = vadd.f32 %v3745_v7, %v3697_v3  ;;  %v9067_v33 = vor.u32 %v10726_v1, %v9064_v55  ;;  %v9071_v59 = vor.u32 %v10728_v25, %v9070_v13  ;;  %5372 = vmatpush.bf16.msra.mxu2 %v10933_v5 }
 0x216   : > { %v3016_v51 = vsel %vm1076_vm3, %v2996_v41, %v2997_v38  ;;  %v3064_v20 = vsel %vm1173_vm4, %v3044_v16, %v3045_v14  ;;  %3143 = vst [vmem:[#allocation3 + $0x64] sm:$0xf] %v3127_v36  ;;  %v2947_v58 = vadd.f32 %v2918_v48, %v12247_v23  ;;  %v10823_v41 = vld [vmem:[#allocation2 + $0x158] sm:$0xf0]  ;;  %v9063_v23 = vor.u32 %v10727_v12, %v9062_v15  ;;  %v10844_v36 = vld [vmem:[#allocation9 + $0x1d0] sm:$0xff] }
 0x217   : > { %v3029_v52 = vmul.f32 %v11773_v63, %v3016_v51  ;;  %v3076_v40 = vmul.f32 %v11745_v24, %v3064_v20  ;;  %v9255_v26 = vor.u32 %v10823_v41, %v9254_v17  ;;  %v10941_v51 = vld [vmem:[#allocation10 + $0x118] sm:$0xff]  ;;  %v10852_v20 = vld [vmem:[#allocation9 + $0x210] sm:$0xff]  ;;  %4598 = vmatpush.bf16.msra.mxu0 %v10844_v36 }
 0x218   : > { %v2966_v45 = vadd.f32 %v12321_v4, %v2947_v58  ;;  %5421 = vmatpush.bf16.msra.mxu3 %v10941_v51  ;;  %4647 = vmatpush.bf16.msra.mxu1 %v10852_v20 }
 0x219   : > { %v3093_v31 = vpack.c.bf16 %v3029_v52, %v3029_v52  ;;  %v3158_v39 = vpack.c.bf16 %v3076_v40, %v3076_v40  ;;  %v3747_v44 = vpop.f32.mrf.mxu3  ;;  %v3652_v0 = vpop.f32.mrf.mxu1 }
 0x21a   : > { %v2982_v16 = vmax.f32 %v2966_v45, 0.0  ;;  %v3698_v60 = vpop.f32.mrf.mxu2 }
 0x21b   : > { %3111 = vst [vmem:[#allocation3 + $0x60] sm:$0xf] %v3093_v31  ;;  %v3699_v30 = vadd.f32 %v3698_v60, %v3649_v8  ;;  %v2920_v27 = vpop.f32.mrf.mxu0  ;;  %v9074_v60 = vld [vmem:[#allocation2 + $0x138] sm:$0xf] }
 0x21c   : > { %3174 = vst [vmem:[#allocation3 + $0x5c] sm:$0xf] %v3158_v39  ;;  %v2998_v42 = vrot.slane %v2982_v16, 7  ;;  %v3046_v21 = vrot.slane %v2982_v16, 1  ;;  %v3128_v7 = vpack.c.bf16 %v2982_v16, %v2982_v16  ;;  %v2921_v3 = vadd.f32 %v2920_v27, %v12276_v49  ;;  %4119 = vmatmul.bf16.gmra.mxu1 %v9067_v33  ;;  %v9076_v27 = vld [vmem:[#allocation2 + $0x144] sm:$0xf0] }
 0x21d   : > { %v12401_v48 = vadd.f32 %v3747_v44, %v3699_v30  ;;  %v10730_v44 = vld [vmem:[#allocation2 + $0x140] sm:$0xf0]  ;;  %v10729_v30 = vld [vmem:[#allocation2 + $0x13c] sm:$0xf] }
 0x21e   : > { %v3015_v58 = vsel %vm1076_vm3, %v2997_v38, %v2998_v42  ;;  %v3063_v8 = vsel %vm1173_vm4, %v3045_v14, %v3046_v21  ;;  %3144 = vst [vmem:[#allocation3 + $0x70] sm:$0xf] %v3128_v7  ;;  %v2948_v15 = vadd.f32 %v2921_v3, %v12254_v47  ;;  %4070 = vmatmul.bf16.gmra.mxu0 %v9063_v23 }
 0x21f   : > { %v3094_v12 = vpack.c.bf16 %v3015_v58, %v3015_v58  ;;  %v3159_v52 = vpack.c.bf16 %v3063_v8, %v3063_v8  ;;  %4168 = vmatmul.bf16.gmra.mxu2 %v9071_v59  ;;  %4572 = vmatmul.bf16.gmra.mxu3 %v9255_v26  ;;  %v10731_v59 = vld [vmem:[#allocation2 + $0x148] sm:$0xf0]  ;;  %v9266_v26 = vld [vmem:[#allocation2 + $0x168] sm:$0xf]  ;;  %v9079_v51 = vor.u32 %v10729_v30, %v9076_v27 }
 0x220   : > { %v2967_v49 = vadd.f32 %v12321_v4, %v2948_v15 }
 0x221   : > { %3112 = vst [vmem:[#allocation3 + $0x6c] sm:$0xf] %v3094_v12  ;;  %v3750_v14 = vpop.f32.mrf.mxu3  ;;  %v3654_v47 = vpop.f32.mrf.mxu1 }
 0x222   : > { %3175 = vst [vmem:[#allocation3 + $0x68] sm:$0xf] %v3159_v52  ;;  %v2983_v38 = vmax.f32 %v2967_v49, 0.0  ;;  %v3701_v40 = vpop.f32.mrf.mxu2 }
 0x223   : > { %v3702_v1 = vadd.f32 %v3701_v40, %v3652_v0  ;;  %v2922_v55 = vpop.f32.mrf.mxu0 }
 0x224   : > { %v2999_v13 = vrot.slane %v2983_v38, 7  ;;  %v3047_v45 = vrot.slane %v2983_v38, 1  ;;  %v3129_v25 = vpack.c.bf16 %v2983_v38, %v2983_v38  ;;  %v2923_v17 = vadd.f32 %v2922_v55, %v12285_v57  ;;  %v9082_v57 = vld [vmem:[#allocation2 + $0x140] sm:$0xf] }
 0x225   : > { %v12410_v41 = vadd.f32 %v3750_v14, %v3702_v1  ;;  %v9083_v15 = vor.u32 %v10731_v59, %v9082_v57  ;;  %v10932_v14 = vld [vmem:[#allocation10 + $0xd0] sm:$0xff]  ;;  %v10843_v1 = vld [vmem:[#allocation9 + $0x1c8] sm:$0xff] }
 0x226   : > { %v3014_v31 = vsel %vm1076_vm3, %v2998_v42, %v2999_v13  ;;  %v3062_v39 = vsel %vm1173_vm4, %v3046_v21, %v3047_v45  ;;  %3145 = vst [vmem:[#allocation3 + $0x7c] sm:$0xf] %v3129_v25  ;;  %v2949_v16 = vadd.f32 %v2923_v17, %v12283_v32  ;;  %v10826_v42 = vld [vmem:[#allocation2 + $0x170] sm:$0xf0]  ;;  %v9075_v32 = vor.u32 %v10730_v44, %v9074_v60  ;;  %v10851_v17 = vld [vmem:[#allocation9 + $0x208] sm:$0xff] }
 0x227   : > { %v3031_v23 = vmul.f32 %v11803_v53, %v3014_v31  ;;  %v3078_v33 = vmul.f32 %v11788_v18, %v3062_v39  ;;  %v9267_v12 = vor.u32 %v10826_v42, %v9266_v26  ;;  %v10940_v25 = vld [vmem:[#allocation10 + $0x110] sm:$0xff]  ;;  %5373 = vmatpush.bf16.msra.mxu2 %v10932_v14  ;;  %4599 = vmatpush.bf16.msra.mxu0 %v10843_v1 }
 0x228   : > { %v2968_v0 = vadd.f32 %v12321_v4, %v2949_v16  ;;  %5422 = vmatpush.bf16.msra.mxu3 %v10940_v25  ;;  %4648 = vmatpush.bf16.msra.mxu1 %v10851_v17  ;;  %v9086_v26 = vld [vmem:[#allocation2 + $0x150] sm:$0xf]  ;;  %v10842_v25 = vld [vmem:[#allocation9 + $0x1c0] sm:$0xff] }
 0x229   : > { %v3095_v7 = vpack.c.bf16 %v3031_v23, %v3031_v23  ;;  %v3160_v3 = vpack.c.bf16 %v3078_v33, %v3078_v33  ;;  %v3752_v36 = vpop.f32.mrf.mxu3  ;;  %v3657_v8 = vpop.f32.mrf.mxu1  ;;  %v10850_v17 = vld [vmem:[#allocation9 + $0x200] sm:$0xff] }
 0x22a   : > { %v2984_v21 = vmax.f32 %v2968_v0, 0.0  ;;  %v3703_v5 = vpop.f32.mrf.mxu2 }
 0x22b   : > { %3113 = vst [vmem:[#allocation3 + $0x78] sm:$0xf] %v3095_v7  ;;  %v3704_v20 = vadd.f32 %v3703_v5, %v3654_v47  ;;  %v2925_v58 = vpop.f32.mrf.mxu0  ;;  %v10939_v5 = vld [vmem:[#allocation10 + $0x108] sm:$0xff]  ;;  %4600 = vmatpush.bf16.msra.mxu0 %v10842_v25  ;;  %v9100_v25 = vld [vmem:[#allocation2 + $0x174] sm:$0xf0] }
 0x22c   : > { %3176 = vst [vmem:[#allocation3 + $0x74] sm:$0xf] %v3160_v3  ;;  %v3000_v52 = vrot.slane %v2984_v21, 7  ;;  %v3048_v49 = vrot.slane %v2984_v21, 1  ;;  %v3130_v38 = vpack.c.bf16 %v2984_v21, %v2984_v21  ;;  %v2926_v40 = vadd.f32 %v2925_v58, %v12290_v50  ;;  %4124 = vmatmul.bf16.gmra.mxu1 %v9079_v51  ;;  %v10733_v21 = vld [vmem:[#allocation2 + $0x158] sm:$0xf0]  ;;  %5423 = vmatpush.bf16.msra.mxu3 %v10939_v5 }
 0x22d   : > { %v12421_v55 = vadd.f32 %v3752_v36, %v3704_v20  ;;  %v10732_v51 = vld [vmem:[#allocation2 + $0x154] sm:$0xf]  ;;  %v9094_v20 = vld [vmem:[#allocation2 + $0x158] sm:$0xf]  ;;  %v9087_v14 = vor.u32 %v10733_v21, %v9086_v26  ;;  %4649 = vmatpush.bf16.msra.mxu1 %v10850_v17  ;;  %v9106_v17 = vld [vmem:[#allocation2 + $0x170] sm:$0xf] }
 0x22e   : > { %v3013_v31 = vsel %vm1076_vm3, %v2999_v13, %v3000_v52  ;;  %v3061_v47 = vsel %vm1173_vm4, %v3047_v45, %v3048_v49  ;;  %3146 = vst [vmem:[#allocation3 + $0x88] sm:$0xf] %v3130_v38  ;;  %v2950_v39 = vadd.f32 %v2926_v40, %v12288_v35  ;;  %4075 = vmatmul.bf16.gmra.mxu0 %v9075_v32 }
 0x22f   : > { %v3096_v16 = vpack.c.bf16 %v3013_v31, %v3013_v31  ;;  %v3161_v60 = vpack.c.bf16 %v3061_v47, %v3061_v47  ;;  %4173 = vmatmul.bf16.gmra.mxu2 %v9083_v15  ;;  %4577 = vmatmul.bf16.gmra.mxu3 %v9267_v12  ;;  %v9278_v15 = vld [vmem:[#allocation2 + $0x180] sm:$0xf]  ;;  %v10829_v12 = vld [vmem:[#allocation2 + $0x188] sm:$0xf0] }
 0x230   : > { %v2969_v50 = vadd.f32 %v12321_v4, %v2950_v39 }
 0x231   : > { %3114 = vst [vmem:[#allocation3 + $0x84] sm:$0xf] %v3096_v16  ;;  %v3755_v45 = vpop.f32.mrf.mxu3  ;;  %v3659_v35 = vpop.f32.mrf.mxu1 }
 0x232   : > { %3177 = vst [vmem:[#allocation3 + $0x80] sm:$0xf] %v3161_v60  ;;  %v2985_v13 = vmax.f32 %v2969_v50, 0.0  ;;  %v3706_v44 = vpop.f32.mrf.mxu2  ;;  %v9279_v60 = vor.u32 %v10829_v12, %v9278_v15  ;;  %v10938_v50 = vld [vmem:[#allocation10 + $0x100] sm:$0xff] }
 0x233   : > { %v3707_v23 = vadd.f32 %v3706_v44, %v3657_v8  ;;  %v2927_v33 = vpop.f32.mrf.mxu0  ;;  %v10734_v8 = vld [vmem:[#allocation2 + $0x160] sm:$0xf0]  ;;  %5424 = vmatpush.bf16.msra.mxu3 %v10938_v50 }
 0x234   : > { %v3001_v30 = vrot.slane %v2985_v13, 7  ;;  %v3049_v27 = vrot.slane %v2985_v13, 1  ;;  %v3131_v57 = vpack.c.bf16 %v2985_v13, %v2985_v13  ;;  %v2928_v0 = vadd.f32 %v2927_v33, %v12295_v19  ;;  %v9088_v19 = vld [vmem:[#allocation2 + $0x15c] sm:$0xf0]  ;;  %v10931_v33 = vld [vmem:[#allocation10 + $0xc8] sm:$0xff] }
 0x235   : > { %v12430_v59 = vadd.f32 %v3755_v45, %v3707_v23  ;;  %v9091_v1 = vor.u32 %v10732_v51, %v9088_v19  ;;  %v9095_v16 = vor.u32 %v10734_v8, %v9094_v20  ;;  %5374 = vmatpush.bf16.msra.mxu2 %v10931_v33  ;;  %v10930_v20 = vld [vmem:[#allocation10 + $0xc0] sm:$0xff] }
 0x236   : > { %v3012_v42 = vsel %vm1076_vm3, %v3000_v52, %v3001_v30  ;;  %v3060_v7 = vsel %vm1173_vm4, %v3048_v49, %v3049_v27  ;;  %3147 = vst [vmem:[#allocation3 + $0x94] sm:$0xf] %v3131_v57  ;;  %v2951_v3 = vadd.f32 %v2928_v0, %v12293_v56  ;;  %v13152_v12 = vld [vmem:[#allocation25_spill] sm:$0xff] }
 0x237   : > { %v3033_v36 = vmul.f32 %v11840_v46, %v3012_v42  ;;  %v3080_v32 = vmul.f32 %v11816_v61, %v3060_v7 }
 0x238   : > { %v2970_v58 = vadd.f32 %v12321_v4, %v2951_v3 }
 0x239   : > { %v3097_v52 = vpack.c.bf16 %v3033_v36, %v3033_v36  ;;  %v3162_v49 = vpack.c.bf16 %v3080_v32, %v3080_v32  ;;  %v3757_v56 = vpop.f32.mrf.mxu3  ;;  %v3662_v39 = vpop.f32.mrf.mxu1  ;;  %5375 = vmatpush.bf16.msra.mxu2 %v10930_v20 }
 0x23a   : > { %v2986_v38 = vmax.f32 %v2970_v58, 0.0  ;;  %v3708_v40 = vpop.f32.mrf.mxu2 }
 0x23b   : > { %3115 = vst [vmem:[#allocation3 + $0x90] sm:$0xf] %v3097_v52  ;;  %v3709_v31 = vadd.f32 %v3708_v40, %v3659_v35  ;;  %v2930_v47 = vpop.f32.mrf.mxu0  ;;  %v13153_v40 = vld [vmem:[#allocation21_spill] sm:$0xff] }
 0x23c   : > { %3178 = vst [vmem:[#allocation3 + $0x8c] sm:$0xf] %v3162_v49  ;;  %v3002_v13 = vrot.slane %v2986_v38, 7  ;;  %v3050_v44 = vrot.slane %v2986_v38, 1  ;;  %v3132_v45 = vpack.c.bf16 %v2986_v38, %v2986_v38  ;;  %v2931_v23 = vadd.f32 %v2930_v47, %v12300_v10  ;;  %4129 = vmatmul.bf16.gmra.mxu1 %v9091_v1  ;;  %v9098_v49 = vld [vmem:[#allocation2 + $0x168] sm:$0xf] }
 0x23d   : > { %v12441_v57 = vadd.f32 %v3757_v56, %v3709_v31  ;;  %v10736_v38 = vld [vmem:[#allocation2 + $0x170] sm:$0xf0]  ;;  %v10737_v47 = vld [vmem:[#allocation2 + $0x178] sm:$0xf0] }
 0x23e   : > { %v3011_v35 = vsel %vm1076_vm3, %v3001_v30, %v3002_v13  ;;  %v3059_v0 = vsel %vm1173_vm4, %v3049_v27, %v3050_v44  ;;  %3148 = vst [vmem:[#allocation3 + $0xa0] sm:$0xf] %v3132_v45  ;;  %v2952_v26 = vadd.f32 %v2931_v23, %v12298_v37  ;;  %4080 = vmatmul.bf16.gmra.mxu0 %v9087_v14  ;;  %v13154_v14 = vld [vmem:[#allocation20_spill] sm:$0xff] }
 0x23f   : > { %v3098_v42 = vpack.c.bf16 %v3011_v35, %v3011_v35  ;;  %v3163_v7 = vpack.c.bf16 %v3059_v0, %v3059_v0  ;;  %4178 = vmatmul.bf16.gmra.mxu2 %v9095_v16  ;;  %4582 = vmatmul.bf16.gmra.mxu3 %v9279_v60  ;;  %v10832_v16 = vld [vmem:[#allocation2 + $0x1a0] sm:$0xf0]  ;;  %v9099_v23 = vor.u32 %v10736_v38, %v9098_v49  ;;  %v10905_v49 = vld [vmem:[#allocation10 + $0xb8] sm:$0xff] }
 0x240   : > { %v2971_v10 = vadd.f32 %v12321_v4, %v2952_v26  ;;  %5885 = vmatpush.bf16.msrb.mxu3 %v10905_v49 }
 0x241   : > { %3116 = vst [vmem:[#allocation3 + $0x9c] sm:$0xf] %v3098_v42  ;;  %v3760_v30 = vpop.f32.mrf.mxu3  ;;  %v3664_v27 = vpop.f32.mrf.mxu1  ;;  %v9107_v42 = vor.u32 %v10737_v47, %v9106_v17  ;;  %v13157_v47 = vld [vmem:[#allocation29_spill] sm:$0xff] }
 0x242   : > { %3179 = vst [vmem:[#allocation3 + $0x98] sm:$0xf] %v3163_v7  ;;  %v2987_v3 = vmax.f32 %v2971_v10, 0.0  ;;  %v3711_v21 = vpop.f32.mrf.mxu2 }
 0x243   : > { %v3712_v5 = vadd.f32 %v3711_v21, %v3662_v39  ;;  %v2932_v36 = vpop.f32.mrf.mxu0  ;;  %v9290_v39 = vld [vmem:[#allocation2 + $0x198] sm:$0xf] }
 0x244   : > { %v3003_v32 = vrot.slane %v2987_v3, 7  ;;  %v3051_v51 = vrot.slane %v2987_v3, 1  ;;  %v3133_v37 = vpack.c.bf16 %v2987_v3, %v2987_v3  ;;  %v2933_v19 = vadd.f32 %v2932_v36, %v12305_v29  ;;  %v10735_v29 = vld [vmem:[#allocation2 + $0x16c] sm:$0xf] }
 0x245   : > { %v12450_v58 = vadd.f32 %v3760_v30, %v3712_v5  ;;  %v9103_v33 = vor.u32 %v10735_v29, %v9100_v25  ;;  %v9291_v7 = vor.u32 %v10832_v16, %v9290_v39  ;;  %v13155_v30 = vld [vmem:[#allocation27_spill] sm:$0xff] }
 0x246   : > { %v3010_v8 = vsel %vm1076_vm3, %v3002_v13, %v3003_v32  ;;  %v3058_v15 = vsel %vm1173_vm4, %v3050_v44, %v3051_v51  ;;  %3149 = vst [vmem:[#allocation3 + $0xac] sm:$0xf] %v3133_v37  ;;  %v2953_v52 = vadd.f32 %v2933_v19, %v13152_v12 }
 0x247   : > { %v3035_v56 = vmul.f32 %v13153_v40, %v3010_v8  ;;  %v3082_v1 = vmul.f32 %v13154_v14, %v3058_v15  ;;  %v10897_v8 = vld [vmem:[#allocation10 + $0x78] sm:$0xff] }
 0x248   : > { %v2972_v31 = vadd.f32 %v12321_v4, %v2953_v52  ;;  %5836 = vmatpush.bf16.msrb.mxu2 %v10897_v8 }
 0x249   : > { %v3099_v60 = vpack.c.bf16 %v3035_v56, %v3035_v56  ;;  %v3164_v50 = vpack.c.bf16 %v3082_v1, %v3082_v1  ;;  %v3762_v45 = vpop.f32.mrf.mxu3  ;;  %v3667_v26 = vpop.f32.mrf.mxu1 }
 0x24a   : > { %v2988_v13 = vmax.f32 %v2972_v31, 0.0  ;;  %v3713_v44 = vpop.f32.mrf.mxu2 }
 0x24b   : > { %3117 = vst [vmem:[#allocation3 + $0xa8] sm:$0xf] %v3099_v60  ;;  %v3714_v35 = vadd.f32 %v3713_v44, %v3664_v27  ;;  %v2935_v0 = vpop.f32.mrf.mxu0  ;;  %v13156_v27 = vld [vmem:[#allocation26_spill] sm:$0xff] }
 0x24c   : > { %3180 = vst [vmem:[#allocation3 + $0xa4] sm:$0xf] %v3164_v50  ;;  %v3004_v10 = vrot.slane %v2988_v13, 7  ;;  %v3052_v3 = vrot.slane %v2988_v13, 1  ;;  %v3134_v21 = vpack.c.bf16 %v2988_v13, %v2988_v13  ;;  %v2936_v5 = vadd.f32 %v2935_v0, %v13155_v30  ;;  %4134 = vmatmul.bf16.gmra.mxu1 %v9103_v33  ;;  %v13158_v13 = vld [vmem:[#allocation28_spill] sm:$0xff]  ;;  %v13159_v33 = vld [vmem:[#allocation23_spill] sm:$0xff] }
 0x24d   : > { %v12461_v36 = vadd.f32 %v3762_v45, %v3714_v35  ;;  %v10889_v45 = vld [vmem:[#allocation10 + $0x38] sm:$0xff]  ;;  %v13160_v0 = vld [vmem:[#allocation22_spill] sm:$0xff] }
 0x24e   : > { %v3009_v37 = vsel %vm1076_vm3, %v3003_v32, %v3004_v10  ;;  %v3057_v19 = vsel %vm1173_vm4, %v3051_v51, %v3052_v3  ;;  %3150 = vst [vmem:[#allocation3 + $0xb8] sm:$0xf] %v3134_v21  ;;  %v2954_v20 = vadd.f32 %v2936_v5, %v13156_v27  ;;  %4085 = vmatmul.bf16.gmra.mxu0 %v9099_v23  ;;  %v10953_v23 = vld [vmem:[#allocation10 + $0x178] sm:$0xff]  ;;  %v9208_v21 = vld [vmem:[#allocation2 + $0xfc] sm:$0xf0] }
 0x24f   : > { %v3100_v15 = vpack.c.bf16 %v3009_v37, %v3009_v37  ;;  %v3165_v12 = vpack.c.bf16 %v3057_v19, %v3057_v19  ;;  %4183 = vmatmul.bf16.gmra.mxu2 %v9107_v42  ;;  %4587 = vmatmul.bf16.gmra.mxu3 %v9291_v7  ;;  %v10810_v42 = vld [vmem:[#allocation2 + $0xf4] sm:$0xf]  ;;  %v9214_v30 = vld [vmem:[#allocation2 + $0xf8] sm:$0xf]  ;;  %v10812_v5 = vld [vmem:[#allocation2 + $0x100] sm:$0xf0] }
 0x250   : > { %v2973_v52 = vadd.f32 %v12321_v4, %v2954_v20  ;;  %5787 = vmatpush.bf16.msrb.mxu1 %v10889_v45  ;;  %5466 = vmatpush.bf16.msrb.mxu0 %v10953_v23  ;;  %v9400_v20 = vld [vmem:[#allocation3 + $0x24] sm:$0xf0]  ;;  %v9215_v49 = vor.u32 %v10812_v5, %v9214_v30  ;;  %v10896_v45 = vld [vmem:[#allocation10 + $0x70] sm:$0xff]  ;;  %v13164_v23 = vld [vmem:[#allocation17_spill] sm:$0xff] }
 0x251   : > { %3118 = vst [vmem:[#allocation3 + $0xb4] sm:$0xf] %v3100_v15  ;;  %v3765_v56 = vpop.f32.mrf.mxu3  ;;  %v3669_v29 = vpop.f32.mrf.mxu1  ;;  %v10904_v30 = vld [vmem:[#allocation10 + $0xb0] sm:$0xff]  ;;  %5837 = vmatpush.bf16.msrb.mxu2 %v10896_v45 }
 0x252   : > { %3181 = vst [vmem:[#allocation3 + $0xb0] sm:$0xf] %v3165_v12  ;;  %v2989_v32 = vmax.f32 %v2973_v52, 0.0  ;;  %v3716_v38 = vpop.f32.mrf.mxu2  ;;  %v9211_v52 = vor.u32 %v10810_v42, %v9208_v21  ;;  %5886 = vmatpush.bf16.msrb.mxu3 %v10904_v30 }
 0x253   : > { %v3717_v51 = vadd.f32 %v3716_v38, %v3667_v26  ;;  %v2937_v1 = vpop.f32.mrf.mxu0 }
 0x254   : > { %v3005_v25 = vrot.slane %v2989_v32, 7  ;;  %v3053_v17 = vrot.slane %v2989_v32, 1  ;;  %v3135_v31 = vpack.c.bf16 %v2989_v32, %v2989_v32  ;;  %v2938_v39 = vadd.f32 %v2937_v1, %v13157_v47  ;;  %v10906_v1 = vld [vmem:[#allocation3 + $0x1c] sm:$0xf] }
 0x255   : > { %v12470_v16 = vadd.f32 %v3765_v56, %v3717_v51  ;;  %v13161_v56 = vld [vmem:[#allocation30_spill] sm:$0xff]  ;;  %v9403_v47 = vor.u32 %v10906_v1, %v9400_v20 }
 0x256   : > { %v3008_v60 = vsel %vm1076_vm3, %v3004_v10, %v3005_v25  ;;  %v3056_v50 = vsel %vm1173_vm4, %v3052_v3, %v3053_v17  ;;  %3151 = vst [vmem:[#allocation3 + $0xc4] sm:$0xf] %v3135_v31  ;;  %v2955_v44 = vadd.f32 %v2938_v39, %v13158_v13  ;;  %v13163_v13 = vrot.slane %v12325_v28, 1 }
 0x257   : > { %v3037_v35 = vmul.f32 %v13159_v33, %v3008_v60  ;;  %v3084_v26 = vmul.f32 %v13160_v0, %v3056_v50  ;;  %v13162_v60 = vrot.slane %v12325_v28, 7  ;;  %v10898_v0 = vld [vmem:[#allocation10 + $0x80] sm:$0xff] }
 0x258   : > { %v2974_v7 = vadd.f32 %v12321_v4, %v2955_v44 }
 0x259   : > { %v3101_v10 = vpack.c.bf16 %v3037_v35, %v3037_v35  ;;  %v3166_v37 = vpack.c.bf16 %v3084_v26, %v3084_v26  ;;  %v3767_v27 = vpop.f32.mrf.mxu3  ;;  %v4100_v12 = vpop.f32.mrf.mxu1  ;;  %v13165_v26 = vld [vmem:[#allocation24_spill] sm:$0xff] }
 0x25a   : > { %v2990_v3 = vmax.f32 %v2974_v7, 0.0  ;;  %v3718_v19 = vpop.f32.mrf.mxu2 }
 0x25b   : > { %3119 = vst [vmem:[#allocation3 + $0xc0] sm:$0xf] %v3101_v10  ;;  %v3719_v8 = vadd.f32 %v3718_v19, %v3669_v29  ;;  %v4051_v15 = vpop.f32.mrf.mxu0 }
 0x25c   : > { %3182 = vst [vmem:[#allocation3 + $0xbc] sm:$0xf] %v3166_v37  ;;  %v3006_v32 = vrot.slane %v2990_v3, 7  ;;  %v3054_v4 = vrot.slane %v2990_v3, 1  ;;  %v3136_v38 = vpack.c.bf16 %v2990_v3, %v2990_v3  ;;  %v4052_v51 = vadd.f32 %v4051_v15, %v13161_v56  ;;  %4650 = vmatmul.bf16.vlgmr.msra.gmra.mxu1 %v9215_v49  ;;  %v10952_v15 = vld [vmem:[#allocation10 + $0x170] sm:$0xff] }
 0x25d   : > { %v12481_v31 = vadd.f32 %v3767_v27, %v3719_v8  ;;  %v10888_v8 = vld [vmem:[#allocation10 + $0x30] sm:$0xff]  ;;  %5467 = vmatpush.bf16.msrb.mxu0 %v10952_v15  ;;  %v9238_v15 = vld [vmem:[#allocation2 + $0x128] sm:$0xf] }
 0x25e   : > { %v3007_v39 = vsel %vm1076_vm3, %v3005_v25, %v3006_v32  ;;  %v3022_v29 = vsel %vm1076_vm3, %v3006_v32, %v13162_v60  ;;  %v3055_v50 = vsel %vm1173_vm4, %v3053_v17, %v3054_v4  ;;  %v3070_v44 = vsel %vm1173_vm4, %v3054_v4, %v13163_v13  ;;  %3152 = vst [vmem:[#allocation3 + $0xd0] sm:$0xf] %v3136_v38  ;;  %v9226_v49 = vld [vmem:[#allocation2 + $0x110] sm:$0xf]  ;;  %v10815_v32 = vld [vmem:[#allocation2 + $0x118] sm:$0xf0] }
 0x25f   : > { %v3023_v35 = vmul.f32 %v13164_v23, %v3022_v29  ;;  %v3086_v42 = vmul.f32 %v13165_v26, %v3070_v44  ;;  %v3102_v25 = vpack.c.bf16 %v3007_v39, %v3007_v39  ;;  %v3167_v7 = vpack.c.bf16 %v3055_v50, %v3055_v50  ;;  %4601 = vmatmul.bf16.vlgmr.msra.gmra.mxu0 %v9211_v52  ;;  %v9220_v52 = vld [vmem:[#allocation2 + $0x114] sm:$0xf0]  ;;  %v9412_v60 = vld [vmem:[#allocation3 + $0x3c] sm:$0xf0]  ;;  %v10909_v13 = vld [vmem:[#allocation3 + $0x34] sm:$0xf] }
 0x260   : > { %v4101_v21 = vadd.f32 %v4100_v12, %v4052_v51  ;;  %5425 = vmatmul.bf16.vlgmr.msra.gmra.mxu3 %v9403_v47  ;;  %v10813_v12 = vld [vmem:[#allocation2 + $0x10c] sm:$0xf]  ;;  %5788 = vmatpush.bf16.msrb.mxu1 %v10888_v8  ;;  %v10907_v51 = vld [vmem:[#allocation3 + $0x20] sm:$0xf0]  ;;  %v9227_v50 = vor.u32 %v10815_v32, %v9226_v49  ;;  %v9415_v45 = vor.u32 %v10909_v13, %v9412_v60  ;;  %v9232_v8 = vld [vmem:[#allocation2 + $0x12c] sm:$0xf0] }
 0x261   : > { %v3087_v5 = vpack.c.bf16 %v3023_v35, %v3023_v35  ;;  %3120 = vst [vmem:[#allocation3 + $0xcc] sm:$0xf] %v3102_v25  ;;  %v3168_v17 = vpack.c.bf16 %v3086_v42, %v3086_v42  ;;  %v12497_v10 = vpop.f32.mrf.mxu3  ;;  %v4102_v19 = vpop.f32.mrf.mxu1  ;;  %v10895_v35 = vld [vmem:[#allocation10 + $0x68] sm:$0xff]  ;;  %v9410_v32 = vld [vmem:[#allocation3 + $0x30] sm:$0xf] }
 0x262   : > { %3183 = vst [vmem:[#allocation3 + $0xc8] sm:$0xf] %v3167_v7  ;;  %v4149_v28 = vpop.f32.mrf.mxu2  ;;  %v10903_v42 = vld [vmem:[#allocation10 + $0xa8] sm:$0xff]  ;;  %5838 = vmatpush.bf16.msrb.mxu2 %v10895_v35  ;;  %v10912_v60 = vld [vmem:[#allocation3 + $0x4c] sm:$0xf]  ;;  %v10894_v13 = vld [vmem:[#allocation10 + $0x60] sm:$0xff] }
 0x263   : > { %3105 = vst [vmem:[#allocation3 + $0x18] sm:$0xf] %v3087_v5  ;;  %v12499_v37 = vadd.f32 %v4149_v28, %v4101_v21  ;;  %v4053_v3 = vpop.f32.mrf.mxu0  ;;  %5887 = vmatpush.bf16.msrb.mxu3 %v10903_v42  ;;  %v10887_v28 = vld [vmem:[#allocation10 + $0x28] sm:$0xff] }
 0x264   : > { %3184 = vst [vmem:[#allocation3 + $0xd4] sm:$0xf] %v3168_v17  ;;  %v4054_v27 = vadd.f32 %v4053_v3, %v12337_v9  ;;  %v9223_v9 = vor.u32 %v10813_v12, %v9220_v52  ;;  %v10951_v3 = vld [vmem:[#allocation10 + $0x168] sm:$0xff]  ;;  %5789 = vmatpush.bf16.msrb.mxu1 %v10887_v28  ;;  %v10818_v12 = vld [vmem:[#allocation2 + $0x130] sm:$0xf0]  ;;  %v10950_v28 = vld [vmem:[#allocation10 + $0x160] sm:$0xff] }
 0x265   : > { %5468 = vmatpush.bf16.msrb.mxu0 %v10951_v3  ;;  %v10913_v3 = vld [vmem:[#allocation3 + $0x50] sm:$0xf0] }
 0x266   : > { %v12502_v20 = vadd.f32 %v4102_v19, %v4054_v27  ;;  %v10910_v19 = vld [vmem:[#allocation3 + $0x38] sm:$0xf0]  ;;  %v10816_v27 = vld [vmem:[#allocation2 + $0x124] sm:$0xf]  ;;  %5839 = vmatpush.bf16.msrb.mxu2 %v10894_v13  ;;  %v10893_v13 = vld [vmem:[#allocation10 + $0x58] sm:$0xff] }
 0x269   : > { %v12506_v38 = vpop.f32.mrf.mxu3  ;;  %v4105_v47 = vpop.f32.mrf.mxu1  ;;  %5469 = vmatpush.bf16.msrb.mxu0 %v10950_v28 }
 0x26a   : > { %v12504_v4 = vpop.f32.mrf.mxu2  ;;  %v9398_v56 = vld [vmem:[#allocation3 + $0x18] sm:$0xf]  ;;  %5840 = vmatpush.bf16.msrb.mxu2 %v10893_v13  ;;  %v10918_v13 = vld [vmem:[#allocation3 + $0x7c] sm:$0xf] }
 0x26b   : > { %v4056_v1 = vpop.f32.mrf.mxu0  ;;  %v9399_v39 = vor.u32 %v10907_v51, %v9398_v56 }
 0x26c   : > { %v4057_v29 = vadd.f32 %v4056_v1, %v12350_v22  ;;  %4655 = vmatmul.bf16.gmra.mxu1 %v9227_v50  ;;  %v9411_v1 = vor.u32 %v10910_v19, %v9410_v32  ;;  %v10819_v19 = vld [vmem:[#allocation2 + $0x13c] sm:$0xf] }
 0x26d   : > { %5376 = vmatmul.bf16.vlgmr.msra.gmra.mxu2 %v9399_v39 }
 0x26e   : > { %v4106_v44 = vadd.f32 %v4105_v47, %v4057_v29  ;;  %v9424_v47 = vld [vmem:[#allocation3 + $0x54] sm:$0xf0] }
 0x26f   : > { %4606 = vmatmul.bf16.gmra.mxu0 %v9223_v9  ;;  %v9239_v9 = vor.u32 %v10818_v12, %v9238_v15  ;;  %v9427_v50 = vor.u32 %v10912_v60, %v9424_v47  ;;  %v10821_v15 = vld [vmem:[#allocation2 + $0x148] sm:$0xf0]  ;;  %v9436_v47 = vld [vmem:[#allocation3 + $0x6c] sm:$0xf0]  ;;  %v10915_v60 = vld [vmem:[#allocation3 + $0x64] sm:$0xf] }
 0x270   : > { %5430 = vmatmul.bf16.gmra.mxu3 %v9415_v45 }
 0x271   : > { %v4107_v5 = vpop.f32.mrf.mxu1 }
 0x272   : > { %v4154_v25 = vpop.f32.mrf.mxu2  ;;  %v12509_v7 = vpop.f32.mrf.mxu3 }
 0x273   : > { %v12511_v21 = vadd.f32 %v4154_v25, %v4106_v44  ;;  %v4058_v30 = vpop.f32.mrf.mxu0  ;;  %v10902_v44 = vld [vmem:[#allocation10 + $0xa0] sm:$0xff] }
 0x274   : > { %v4059_v22 = vadd.f32 %v4058_v30, %v12361_v34  ;;  %v9235_v34 = vor.u32 %v10816_v27, %v9232_v8  ;;  %5888 = vmatpush.bf16.msrb.mxu3 %v10902_v44  ;;  %v9244_v27 = vld [vmem:[#allocation2 + $0x144] sm:$0xf0]  ;;  %v9250_v8 = vld [vmem:[#allocation2 + $0x140] sm:$0xf]  ;;  %v10901_v44 = vld [vmem:[#allocation10 + $0x98] sm:$0xff] }
 0x276   : > { %v12514_v17 = vadd.f32 %v4107_v5, %v4059_v22  ;;  %v10886_v22 = vld [vmem:[#allocation10 + $0x20] sm:$0xff] }
 0x277   : > { %5790 = vmatpush.bf16.msrb.mxu1 %v10886_v22 }
 0x278   : > { %5889 = vmatpush.bf16.msrb.mxu3 %v10901_v44 }
 0x279   : > { %v4110_v51 = vpop.f32.mrf.mxu1 }
 0x27a   : > { %v12516_v52 = vpop.f32.mrf.mxu2  ;;  %v12518_v49 = vpop.f32.mrf.mxu3 }
 0x27b   : > { %v4061_v56 = vpop.f32.mrf.mxu0 }
 0x27c   : > { %v4062_v39 = vadd.f32 %v4061_v56, %v12370_v54  ;;  %4660 = vmatmul.bf16.gmra.mxu1 %v9239_v9  ;;  %v9422_v56 = vld [vmem:[#allocation3 + $0x48] sm:$0xf]  ;;  %v9251_v9 = vor.u32 %v10821_v15, %v9250_v8  ;;  %v10822_v8 = vld [vmem:[#allocation2 + $0x154] sm:$0xf]  ;;  %v9256_v15 = vld [vmem:[#allocation2 + $0x15c] sm:$0xf0] }
 0x27d   : > { %5381 = vmatmul.bf16.gmra.mxu2 %v9411_v1 }
 0x27e   : > { %v4111_v29 = vadd.f32 %v4110_v51, %v4062_v39 }
 0x27f   : > { %4611 = vmatmul.bf16.gmra.mxu0 %v9235_v34  ;;  %v9423_v34 = vor.u32 %v10913_v3, %v9422_v56  ;;  %v10885_v3 = vld [vmem:[#allocation10 + $0x18] sm:$0xff] }
 0x280   : > { %5435 = vmatmul.bf16.gmra.mxu3 %v9427_v50  ;;  %v9439_v50 = vor.u32 %v10915_v60, %v9436_v47  ;;  %5791 = vmatpush.bf16.msrb.mxu1 %v10885_v3  ;;  %v9262_v56 = vld [vmem:[#allocation2 + $0x158] sm:$0xf] }
 0x281   : > { %v4112_v30 = vpop.f32.mrf.mxu1  ;;  %v9448_v60 = vld [vmem:[#allocation3 + $0x84] sm:$0xf0] }
 0x282   : > { %v4159_v45 = vpop.f32.mrf.mxu2  ;;  %v12521_v35 = vpop.f32.mrf.mxu3 }
 0x283   : > { %v12523_v42 = vadd.f32 %v4159_v45, %v4111_v29  ;;  %v4063_v25 = vpop.f32.mrf.mxu0 }
 0x284   : > { %v4064_v54 = vadd.f32 %v4063_v25, %v12381_v43  ;;  %v9247_v43 = vor.u32 %v10819_v19, %v9244_v27  ;;  %v10949_v19 = vld [vmem:[#allocation10 + $0x158] sm:$0xff] }
 0x285   : > { %v10916_v27 = vld [vmem:[#allocation3 + $0x68] sm:$0xf0]  ;;  %5470 = vmatpush.bf16.msrb.mxu0 %v10949_v19 }
 0x286   : > { %v12526_v5 = vadd.f32 %v4112_v30, %v4064_v54 }
 0x289   : > { %v4115_v1 = vpop.f32.mrf.mxu1 }
 0x28a   : > { %v12528_v12 = vpop.f32.mrf.mxu2  ;;  %v12530_v32 = vpop.f32.mrf.mxu3 }
 0x28b   : > { %v4066_v51 = vpop.f32.mrf.mxu0 }
 0x28c   : > { %v4067_v39 = vadd.f32 %v4066_v51, %v12390_v6  ;;  %4665 = vmatmul.bf16.gmra.mxu1 %v9251_v9  ;;  %v10824_v51 = vld [vmem:[#allocation2 + $0x160] sm:$0xf0] }
 0x28d   : > { %5386 = vmatmul.bf16.gmra.mxu2 %v9423_v34 }
 0x28e   : > { %v4116_v29 = vadd.f32 %v4115_v1, %v4067_v39 }
 0x28f   : > { %4616 = vmatmul.bf16.gmra.mxu0 %v9247_v43  ;;  %v9434_v43 = vld [vmem:[#allocation3 + $0x60] sm:$0xf] }
 0x290   : > { %5440 = vmatmul.bf16.gmra.mxu3 %v9439_v50  ;;  %v9435_v9 = vor.u32 %v10916_v27, %v9434_v43  ;;  %v9263_v50 = vor.u32 %v10824_v51, %v9262_v56  ;;  %v10884_v56 = vld [vmem:[#allocation10 + $0x10] sm:$0xff] }
 0x291   : > { %v4117_v22 = vpop.f32.mrf.mxu1  ;;  %v10948_v51 = vld [vmem:[#allocation10 + $0x150] sm:$0xff]  ;;  %5792 = vmatpush.bf16.msrb.mxu1 %v10884_v56  ;;  %v10891_v56 = vld [vmem:[#allocation10 + $0x48] sm:$0xff] }
 0x292   : > { %v4164_v45 = vpop.f32.mrf.mxu2  ;;  %v12533_v25 = vpop.f32.mrf.mxu3  ;;  %v10919_v43 = vld [vmem:[#allocation3 + $0x80] sm:$0xf0]  ;;  %5471 = vmatpush.bf16.msrb.mxu0 %v10948_v51  ;;  %v10899_v51 = vld [vmem:[#allocation10 + $0x88] sm:$0xff] }
 0x293   : > { %v12535_v30 = vadd.f32 %v4164_v45, %v4116_v29  ;;  %v4068_v54 = vpop.f32.mrf.mxu0  ;;  %v9451_v45 = vor.u32 %v10918_v13, %v9448_v60 }
 0x294   : > { %v4069_v6 = vadd.f32 %v4068_v54, %v12401_v48  ;;  %v9259_v48 = vor.u32 %v10822_v8, %v9256_v15  ;;  %v10892_v54 = vld [vmem:[#allocation10 + $0x50] sm:$0xff] }
 0x295   : > { %5841 = vmatpush.bf16.msrb.mxu2 %v10892_v54  ;;  %v9460_v54 = vld [vmem:[#allocation3 + $0x9c] sm:$0xf0] }
 0x296   : > { %v12538_v28 = vadd.f32 %v4117_v22, %v4069_v6  ;;  %v10900_v22 = vld [vmem:[#allocation10 + $0x90] sm:$0xff] }
 0x297   : > { %5890 = vmatpush.bf16.msrb.mxu3 %v10900_v22 }
 0x299   : > { %v4120_v39 = vpop.f32.mrf.mxu1  ;;  %5842 = vmatpush.bf16.msrb.mxu2 %v10891_v56  ;;  %v9472_v56 = vld [vmem:[#allocation3 + $0xb4] sm:$0xf0] }
 0x29a   : > { %v12540_v1 = vpop.f32.mrf.mxu2  ;;  %v12542_v34 = vpop.f32.mrf.mxu3 }
 0x29b   : > { %v4071_v47 = vpop.f32.mrf.mxu0  ;;  %5891 = vmatpush.bf16.msrb.mxu3 %v10899_v51 }
 0x29c   : > { %v4072_v29 = vadd.f32 %v4071_v47, %v12410_v41  ;;  %4670 = vmatmul.bf16.gmra.mxu1 %v9263_v50  ;;  %v10825_v47 = vld [vmem:[#allocation2 + $0x16c] sm:$0xf]  ;;  %v9446_v50 = vld [vmem:[#allocation3 + $0x78] sm:$0xf] }
 0x29d   : > { %5391 = vmatmul.bf16.gmra.mxu2 %v9435_v9  ;;  %v9274_v9 = vld [vmem:[#allocation2 + $0x170] sm:$0xf] }
 0x29e   : > { %v4121_v44 = vadd.f32 %v4120_v39, %v4072_v29  ;;  %v9268_v39 = vld [vmem:[#allocation2 + $0x174] sm:$0xf0] }
 0x29f   : > { %4621 = vmatmul.bf16.gmra.mxu0 %v9259_v48  ;;  %v10827_v48 = vld [vmem:[#allocation2 + $0x178] sm:$0xf0]  ;;  %5892 = vmatpush.bf16.msrb.mxu3 %v10898_v0 }
 0x2a0   : > { %5445 = vmatmul.bf16.gmra.mxu3 %v9451_v45  ;;  %v9447_v45 = vor.u32 %v10919_v43, %v9446_v50  ;;  %v10947_v50 = vld [vmem:[#allocation10 + $0x148] sm:$0xff] }
 0x2a1   : > { %v4122_v8 = vpop.f32.mrf.mxu1  ;;  %5472 = vmatpush.bf16.msrb.mxu0 %v10947_v50 }
 0x2a2   : > { %v4169_v6 = vpop.f32.mrf.mxu2  ;;  %v12545_v3 = vpop.f32.mrf.mxu3 }
 0x2a3   : > { %v12547_v19 = vadd.f32 %v4169_v6, %v4121_v44  ;;  %v4073_v27 = vpop.f32.mrf.mxu0  ;;  %v9275_v6 = vor.u32 %v10827_v48, %v9274_v9  ;;  %v10883_v48 = vld [vmem:[#allocation10 + $0x8] sm:$0xff] }
 0x2a4   : > { %v4074_v41 = vadd.f32 %v4073_v27, %v12421_v55  ;;  %v9271_v55 = vor.u32 %v10825_v47, %v9268_v39  ;;  %v10921_v27 = vld [vmem:[#allocation3 + $0x94] sm:$0xf]  ;;  %5793 = vmatpush.bf16.msrb.mxu1 %v10883_v48  ;;  %v10924_v48 = vld [vmem:[#allocation3 + $0xac] sm:$0xf] }
 0x2a5   : > { %v9475_v33 = vor.u32 %v10924_v48, %v9472_v56  ;;  %v10833_v56 = vld [vmem:[#allocation2 + $0x1a8] sm:$0xf0]  ;;  %v9484_v48 = vld [vmem:[#allocation3 + $0xcc] sm:$0xf0] }
 0x2a6   : > { %v12550_v15 = vadd.f32 %v4122_v8, %v4074_v41  ;;  %v9463_v41 = vor.u32 %v10921_v27, %v9460_v54  ;;  %v10830_v54 = vld [vmem:[#allocation2 + $0x190] sm:$0xf0] }
 0x2a9   : > { %v4125_v44 = vpop.f32.mrf.mxu1 }
 0x2aa   : > { %v12552_v60 = vpop.f32.mrf.mxu2  ;;  %v12554_v29 = vpop.f32.mrf.mxu3 }
 0x2ab   : > { %v4076_v13 = vpop.f32.mrf.mxu0 }
 0x2ac   : > { %v4077_v22 = vadd.f32 %v4076_v13, %v12430_v59  ;;  %4675 = vmatmul.bf16.gmra.mxu1 %v9275_v6  ;;  %v10922_v13 = vld [vmem:[#allocation3 + $0x98] sm:$0xf0] }
 0x2ad   : > { %5396 = vmatmul.bf16.gmra.mxu2 %v9447_v45  ;;  %v9280_v45 = vld [vmem:[#allocation2 + $0x18c] sm:$0xf0] }
 0x2ae   : > { %v4126_v8 = vadd.f32 %v4125_v44, %v4077_v22  ;;  %v10828_v44 = vld [vmem:[#allocation2 + $0x184] sm:$0xf] }
 0x2af   : > { %4626 = vmatmul.bf16.gmra.mxu0 %v9271_v55  ;;  %v9286_v55 = vld [vmem:[#allocation2 + $0x188] sm:$0xf] }
 0x2b0   : > { %5450 = vmatmul.bf16.gmra.mxu3 %v9463_v41 }
 0x2b1   : > { %v4127_v39 = vpop.f32.mrf.mxu1 }
 0x2b2   : > { %v4174_v26 = vpop.f32.mrf.mxu2  ;;  %v12557_v23 = vpop.f32.mrf.mxu3 }
 0x2b3   : > { %v12559_v43 = vadd.f32 %v4174_v26, %v4126_v8  ;;  %v4078_v47 = vpop.f32.mrf.mxu0  ;;  %v9458_v26 = vld [vmem:[#allocation3 + $0x90] sm:$0xf] }
 0x2b4   : > { %v4079_v59 = vadd.f32 %v4078_v47, %v12441_v57  ;;  %v9459_v41 = vor.u32 %v10922_v13, %v9458_v26  ;;  %v9283_v57 = vor.u32 %v10828_v44, %v9280_v45  ;;  %v9287_v47 = vor.u32 %v10830_v54, %v9286_v55  ;;  %v10925_v26 = vld [vmem:[#allocation3 + $0xb0] sm:$0xf0] }
 0x2b6   : > { %v12562_v9 = vadd.f32 %v4127_v39, %v4079_v59  ;;  %v10946_v39 = vld [vmem:[#allocation10 + $0x140] sm:$0xff] }
 0x2b7   : > { %v10882_v59 = vld [vmem:[#allocation10] sm:$0xff]  ;;  %5473 = vmatpush.bf16.msrb.mxu0 %v10946_v39 }
 0x2b8   : > { %5794 = vmatpush.bf16.msrb.mxu1 %v10882_v59 }
 0x2b9   : > { %v4130_v8 = vpop.f32.mrf.mxu1 }
 0x2ba   : > { %v12564_v22 = vpop.f32.mrf.mxu2  ;;  %v12566_v6 = vpop.f32.mrf.mxu3 }
 0x2bb   : > { %v4081_v27 = vpop.f32.mrf.mxu0 }
 0x2bc   : > { %v4082_v51 = vadd.f32 %v4081_v27, %v12450_v58  ;;  %4680 = vmatmul.bf16.gmra.mxu1 %v9287_v47  ;;  %v10831_v27 = vld [vmem:[#allocation2 + $0x19c] sm:$0xf] }
 0x2bd   : > { %5401 = vmatmul.bf16.gmra.mxu2 %v9459_v41  ;;  %v9298_v41 = vld [vmem:[#allocation2 + $0x1a0] sm:$0xf] }
 0x2be   : > { %v4131_v50 = vadd.f32 %v4130_v8, %v4082_v51  ;;  %v9292_v8 = vld [vmem:[#allocation2 + $0x1a4] sm:$0xf0]  ;;  %v9470_v51 = vld [vmem:[#allocation3 + $0xa8] sm:$0xf] }
 0x2bf   : > { %4631 = vmatmul.bf16.gmra.mxu0 %v9283_v57  ;;  %v10890_v57 = vld [vmem:[#allocation10 + $0x40] sm:$0xff]  ;;  %v9471_v39 = vor.u32 %v10925_v26, %v9470_v51  ;;  %v9295_v59 = vor.u32 %v10831_v27, %v9292_v8 }
 0x2c0   : > { %5455 = vmatmul.bf16.gmra.mxu3 %v9475_v33  ;;  %5843 = vmatpush.bf16.msrb.mxu2 %v10890_v57  ;;  %v9598_v57 = vld [vmem:[#allocation3 + $0x8] sm:$0xf]  ;;  %v10860_v51 = vld [vmem:[#allocation3 + $0x10] sm:$0xf0] }
 0x2c1   : > { %v4132_v45 = vpop.f32.mrf.mxu1 }
 0x2c2   : > { %v4179_v14 = vpop.f32.mrf.mxu2  ;;  %v12569_v13 = vpop.f32.mrf.mxu3 }
 0x2c3   : > { %v12571_v44 = vadd.f32 %v4179_v14, %v4131_v50  ;;  %v4083_v58 = vpop.f32.mrf.mxu0  ;;  %v9299_v50 = vor.u32 %v10833_v56, %v9298_v41  ;;  %v9590_v41 = vld [vmem:[#allocation3] sm:$0xf]  ;;  %v10859_v56 = vld [vmem:[#allocation3 + $0x8] sm:$0xf0] }
 0x2c4   : > { %v4084_v55 = vadd.f32 %v4083_v58, %v12461_v36  ;;  %v10927_v58 = vld [vmem:[#allocation3 + $0xc4] sm:$0xf] }
 0x2c6   : > { %v12574_v54 = vadd.f32 %v4132_v45, %v4084_v55  ;;  %v9487_v55 = vor.u32 %v10927_v58, %v9484_v48 }
 0x2c8   : > { %13166 = vst [vmem:[#allocation25_spill] sm:$0xff] %v12574_v54 }
 0x2c9   : > { %v4135_v14 = vpop.f32.mrf.mxu1 }
 0x2ca   : > { %v12576_v0 = vpop.f32.mrf.mxu2  ;;  %v12578_v33 = vpop.f32.mrf.mxu3 }
 0x2cb   : > { %13167 = vst [vmem:[#allocation27_spill] sm:$0xff] %v12576_v0  ;;  %v4086_v47 = vpop.f32.mrf.mxu0 }
 0x2cc   : > { %13168 = vst [vmem:[#allocation26_spill] sm:$0xff] %v12578_v33  ;;  %v4087_v36 = vadd.f32 %v4086_v47, %v12470_v16  ;;  %4685 = vmatmul.bf16.gmra.mxu1 %v9299_v50  ;;  %v10928_v16 = vld [vmem:[#allocation3 + $0xc8] sm:$0xf0]  ;;  %v9599_v50 = vor.u32 %v10860_v51, %v9598_v57 }
 0x2cd   : > { %5406 = vmatmul.bf16.gmra.mxu2 %v9471_v39  ;;  %v10908_v39 = vld [vmem:[#allocation3 + $0x28] sm:$0xf0] }
 0x2ce   : > { %v4136_v45 = vadd.f32 %v4135_v14, %v4087_v36  ;;  %v9482_v14 = vld [vmem:[#allocation3 + $0xc0] sm:$0xf] }
 0x2cf   : > { %4636 = vmatmul.bf16.gmra.mxu0 %v9295_v59  ;;  %v9483_v59 = vor.u32 %v10928_v16, %v9482_v14  ;;  %v9406_v36 = vld [vmem:[#allocation3 + $0x20] sm:$0xf]  ;;  %v12595_v16 = vld [vmem:[%s13069_s3] ss:$0 sm:$0xff] }
 0x2d0   : > { %5460 = vmatmul.bf16.gmra.mxu3 %v9487_v55  ;;  %v11001_v55 = vld [vmem:[#allocation10 + $0x238] sm:$0xff] }
 0x2d1   : > { %v4137_v26 = vpop.f32.mrf.mxu1  ;;  %6387 = vmatpush.bf16.msra.mxu2 %v11001_v55 }
 0x2d2   : > { %v4184_v40 = vpop.f32.mrf.mxu2  ;;  %v12581_v0 = vpop.f32.mrf.mxu3 }
 0x2d3   : > { %v12583_v54 = vadd.f32 %v4184_v40, %v4136_v45  ;;  %v4088_v33 = vpop.f32.mrf.mxu0  ;;  %v9591_v40 = vor.u32 %v10859_v56, %v9590_v41 }
 0x2d4   : > { %v4089_v27 = vadd.f32 %v4088_v33, %v12481_v31  ;;  %v9407_v31 = vor.u32 %v10908_v39, %v9406_v36  ;;  %v10993_v39 = vld [vmem:[#allocation10 + $0x1f8] sm:$0xff]  ;;  %v4152_v36 = vadd.f32 %v12504_v4, %v12502_v20 }
 0x2d5   : > { %6338 = vmatpush.bf16.msra.mxu1 %v10993_v39  ;;  %v9610_v39 = vld [vmem:[#allocation3 + $0x20] sm:$0xf] }
 0x2d6   : > { %v12586_v8 = vadd.f32 %v4137_v26, %v4089_v27  ;;  %v11081_v26 = vld [vmem:[#allocation10 + $0xf8] sm:$0xff] }
 0x2d7   : > { %6937 = vmatpush.bf16.msra.mxu3 %v11081_v26  ;;  %v9602_v26 = vld [vmem:[#allocation3 + $0x18] sm:$0xf] }
 0x2d8   : > { %13169 = vst [vmem:[#allocation29_spill] sm:$0xff] %v12586_v8 }
 0x2d9   : > { %v4651_v45 = vpop.f32.mrf.mxu1 }
 0x2da   : > { %v12588_v47 = vpop.f32.mrf.mxu3 }
 0x2db   : > { %13170 = vst [vmem:[#allocation28_spill] sm:$0xff] %v12588_v47  ;;  %v11000_v47 = vld [vmem:[#allocation10 + $0x230] sm:$0xff] }
 0x2dc   : > { %v4602_v48 = vpop.f32.mrf.mxu0  ;;  %5795 = vmatmul.bf16.vlgmr.msrb.gmra.mxu1 %v9591_v40  ;;  %6388 = vmatpush.bf16.msra.mxu2 %v11000_v47 }
 0x2dd   : > { %v4603_v58 = vadd.f32 %v4602_v48, %v12497_v10  ;;  %5411 = vmatmul.bf16.gmra.mxu2 %v9483_v59  ;;  %v10985_v59 = vld [vmem:[#allocation10 + $0x1b8] sm:$0xff]  ;;  %v10858_v48 = vld [vmem:[#allocation3 + $0x4] sm:$0xf] }
 0x2de   : > { %6289 = vmatpush.bf16.msra.mxu0 %v10985_v59 }
 0x2df   : > { %v4652_v33 = vadd.f32 %v4651_v45, %v4603_v58  ;;  %5474 = vmatmul.bf16.vlgmr.msrb.gmra.mxu0 %v9407_v31  ;;  %v12605_v58 = vpop.f32.mrf.mxu2 }
 0x2e0   : > { %5893 = vmatmul.bf16.vlgmr.msrb.gmra.mxu3 %v9599_v50  ;;  %13171 = vst [vmem:[#allocation30_spill] sm:$0xff] %v12605_v58 }
 0x2e1   : > { %v4691_v27 = vadd.f32 %v4652_v33, %v12499_v37  ;;  %v4653_v14 = vpop.f32.mrf.mxu1  ;;  %v9592_v37 = vld [vmem:[#allocation3 + $0xc] sm:$0xf0] }
 0x2e2   : > { %v9595_v31 = vor.u32 %v10858_v48, %v9592_v37 }
 0x2e3   : > { %v4707_v10 = vadd.f32 %v12595_v16, %v4691_v27  ;;  %v5426_v41 = vpop.f32.mrf.mxu3  ;;  %v10863_v27 = vld [vmem:[#allocation3 + $0x28] sm:$0xf0] }
 0x2e4   : > { %v4604_v56 = vpop.f32.mrf.mxu0 }
 0x2e5   : > { %v12598_v57 = vmax.f32 %v4707_v10, 0.0  ;;  %v4605_v51 = vadd.f32 %v4604_v56, %v12506_v38  ;;  %v10911_v38 = vld [vmem:[#allocation3 + $0x40] sm:$0xf0]  ;;  %v9418_v56 = vld [vmem:[#allocation3 + $0x38] sm:$0xf] }
 0x2e7   : > { %v4869_v40 = vpack.c.bf16 %v12598_v57, %v12598_v57  ;;  %v4654_v50 = vadd.f32 %v4653_v14, %v4605_v51  ;;  %v9419_v51 = vor.u32 %v10911_v38, %v9418_v56  ;;  %v10862_v14 = vld [vmem:[#allocation3 + $0x20] sm:$0xf0]  ;;  %v13106_v59 = vrot.slane %v12598_v57, 7 }
 0x2e8   : > { %v13105_v48 = vrot.slane %v12598_v57, 1  ;;  %v9603_v37 = vor.u32 %v10862_v14, %v9602_v26 }
 0x2e9   : > { %4885 = vst [vmem:[#allocation3 + $0xdc] sm:$0xf] %v4869_v40  ;;  %v4692_v45 = vadd.f32 %v4654_v50, %v4152_v36  ;;  %v4656_v8 = vpop.f32.mrf.mxu1  ;;  %v9611_v36 = vor.u32 %v10863_v27, %v9610_v39 }
 0x2eb   : > { %v4708_v33 = vadd.f32 %v12595_v16, %v4692_v45  ;;  %v5428_v55 = vpop.f32.mrf.mxu3 }
 0x2ec   : > { %v4607_v10 = vpop.f32.mrf.mxu0  ;;  %5800 = vmatmul.bf16.gmra.mxu1 %v9603_v37  ;;  %v10992_v37 = vld [vmem:[#allocation10 + $0x1f0] sm:$0xff] }
 0x2ed   : > { %v4724_v20 = vmax.f32 %v4708_v33, 0.0  ;;  %v4608_v4 = vadd.f32 %v4607_v10, %v12509_v7  ;;  %5844 = vmatmul.bf16.vlgmr.msrb.gmra.mxu2 %v9595_v31  ;;  %v11080_v33 = vld [vmem:[#allocation10 + $0xf0] sm:$0xff]  ;;  %6339 = vmatpush.bf16.msra.mxu1 %v10992_v37  ;;  %v10865_v37 = vld [vmem:[#allocation3 + $0x38] sm:$0xf0] }
 0x2ee   : > { %6938 = vmatpush.bf16.msra.mxu3 %v11080_v33 }
 0x2ef   : > { %v4740_v40 = vrot.slane %v4724_v20, 7  ;;  %v4788_v50 = vrot.slane %v4724_v20, 1  ;;  %v4870_v45 = vpack.c.bf16 %v4724_v20, %v4724_v20  ;;  %v4657_v58 = vadd.f32 %v4656_v8, %v4608_v4  ;;  %5479 = vmatmul.bf16.gmra.mxu0 %v9419_v51 }
 0x2f0   : > { %5898 = vmatmul.bf16.gmra.mxu3 %v9611_v36  ;;  %v5377_v7 = vpop.f32.mrf.mxu2  ;;  %v10984_v36 = vld [vmem:[#allocation10 + $0x1b0] sm:$0xff] }
 0x2f1   : > { %v4769_v31 = vsel %vm1076_vm3, %v13106_v59, %v4740_v40  ;;  %v4817_v38 = vsel %vm1173_vm4, %v13105_v48, %v4788_v50  ;;  %4886 = vst [vmem:[#allocation3 + $0xe8] sm:$0xf] %v4870_v45  ;;  %v4693_v26 = vadd.f32 %v4657_v58, %v12511_v21  ;;  %v12620_v8 = vadd.f32 %v5426_v41, %v5377_v7  ;;  %v4658_v39 = vpop.f32.mrf.mxu1  ;;  %v9604_v7 = vld [vmem:[#allocation3 + $0x24] sm:$0xf0] }
 0x2f2   : > { %v4836_v27 = vpack.c.bf16 %v4769_v31, %v4769_v31  ;;  %v4901_v10 = vpack.c.bf16 %v4817_v38, %v4817_v38  ;;  %v4157_v21 = vadd.f32 %v12516_v52, %v12514_v17  ;;  %6290 = vmatpush.bf16.msra.mxu0 %v10984_v36  ;;  %v13173_v52 = vld [vmem:[#allocation18_spill] sm:$0xff]  ;;  %v10866_v36 = vld [vmem:[#allocation3 + $0x40] sm:$0xf0] }
 0x2f3   : > { %v4709_v56 = vadd.f32 %v12595_v16, %v4693_v26  ;;  %v5431_v20 = vpop.f32.mrf.mxu3 }
 0x2f4   : > { %4854 = vst [vmem:[#allocation3 + $0xe4] sm:$0xf] %v4836_v27  ;;  %v4609_v4 = vpop.f32.mrf.mxu0  ;;  %v13172_v27 = vld [vmem:[#allocation19_spill] sm:$0xff] }
 0x2f5   : > { %4917 = vst [vmem:[#allocation3 + $0xe0] sm:$0xf] %v4901_v10  ;;  %v4725_v51 = vmax.f32 %v4709_v56, 0.0  ;;  %v4610_v14 = vadd.f32 %v4609_v4, %v12518_v49  ;;  %v10861_v56 = vld [vmem:[#allocation3 + $0x1c] sm:$0xf] }
 0x2f6   : > { %v10914_v4 = vld [vmem:[#allocation3 + $0x58] sm:$0xf0] }
 0x2f7   : > { %v4741_v41 = vrot.slane %v4725_v51, 7  ;;  %v4789_v58 = vrot.slane %v4725_v51, 1  ;;  %v4871_v45 = vpack.c.bf16 %v4725_v51, %v4725_v51  ;;  %v4659_v47 = vadd.f32 %v4658_v39, %v4610_v14 }
 0x2f8   : > { %v5379_v33 = vpop.f32.mrf.mxu2  ;;  %v9607_v39 = vor.u32 %v10861_v56, %v9604_v7 }
 0x2f9   : > { %v4768_v31 = vsel %vm1076_vm3, %v4740_v40, %v4741_v41  ;;  %v4816_v49 = vsel %vm1173_vm4, %v4788_v50, %v4789_v58  ;;  %4887 = vst [vmem:[#allocation3 + $0xf4] sm:$0xf] %v4871_v45  ;;  %v4694_v38 = vadd.f32 %v4659_v47, %v4157_v21  ;;  %v12630_v26 = vadd.f32 %v5428_v55, %v5379_v33  ;;  %v9430_v50 = vld [vmem:[#allocation3 + $0x50] sm:$0xf]  ;;  %v4661_v21 = vpop.f32.mrf.mxu1 }
 0x2fa   : > { %v4773_v17 = vmul.f32 %v13172_v27, %v4768_v31  ;;  %v4820_v10 = vmul.f32 %v13173_v52, %v4816_v49  ;;  %v9431_v47 = vor.u32 %v10914_v4, %v9430_v50  ;;  %v9614_v33 = vld [vmem:[#allocation3 + $0x30] sm:$0xf]  ;;  %v9622_v31 = vld [vmem:[#allocation3 + $0x38] sm:$0xf] }
 0x2fb   : > { %v4710_v51 = vadd.f32 %v12595_v16, %v4694_v38  ;;  %v5433_v14 = vpop.f32.mrf.mxu3  ;;  %v9615_v49 = vor.u32 %v10865_v37, %v9614_v33  ;;  %v9623_v27 = vor.u32 %v10866_v36, %v9622_v31 }
 0x2fc   : > { %v4837_v40 = vpack.c.bf16 %v4773_v17, %v4773_v17  ;;  %v4902_v48 = vpack.c.bf16 %v4820_v10, %v4820_v10  ;;  %v4612_v59 = vpop.f32.mrf.mxu0  ;;  %v10999_v17 = vld [vmem:[#allocation10 + $0x228] sm:$0xff] }
 0x2fd   : > { %v4726_v45 = vmax.f32 %v4710_v51, 0.0  ;;  %v4613_v55 = vadd.f32 %v4612_v59, %v12521_v35  ;;  %5849 = vmatmul.bf16.gmra.mxu2 %v9607_v39  ;;  %v11079_v10 = vld [vmem:[#allocation10 + $0xe8] sm:$0xff]  ;;  %5805 = vmatmul.bf16.gmra.mxu1 %v9615_v49 }
 0x2fe   : > { %4855 = vst [vmem:[#allocation3 + $0xf0] sm:$0xf] %v4837_v40  ;;  %6389 = vmatpush.bf16.msra.mxu2 %v10999_v17  ;;  %6939 = vmatpush.bf16.msra.mxu3 %v11079_v10  ;;  %v10864_v10 = vld [vmem:[#allocation3 + $0x34] sm:$0xf] }
 0x2ff   : > { %4918 = vst [vmem:[#allocation3 + $0xec] sm:$0xf] %v4902_v48  ;;  %v4742_v38 = vrot.slane %v4726_v45, 7  ;;  %v4790_v7 = vrot.slane %v4726_v45, 1  ;;  %v4872_v52 = vpack.c.bf16 %v4726_v45, %v4726_v45  ;;  %v4662_v56 = vadd.f32 %v4661_v21, %v4613_v55  ;;  %5484 = vmatmul.bf16.gmra.mxu0 %v9431_v47  ;;  %v10983_v21 = vld [vmem:[#allocation10 + $0x1a8] sm:$0xff] }
 0x300   : > { %5903 = vmatmul.bf16.gmra.mxu3 %v9623_v27  ;;  %v5382_v51 = vpop.f32.mrf.mxu2  ;;  %6291 = vmatpush.bf16.msra.mxu0 %v10983_v21  ;;  %v9616_v27 = vld [vmem:[#allocation3 + $0x3c] sm:$0xf0] }
 0x301   : > { %v4767_v35 = vsel %vm1076_vm3, %v4741_v41, %v4742_v38  ;;  %v4815_v59 = vsel %vm1173_vm4, %v4789_v58, %v4790_v7  ;;  %4888 = vst [vmem:[#allocation3 + $0x100] sm:$0xf] %v4872_v52  ;;  %v4695_v4 = vadd.f32 %v4662_v56, %v12523_v42  ;;  %v12641_v48 = vadd.f32 %v5431_v20, %v5382_v51  ;;  %v4663_v55 = vpop.f32.mrf.mxu1  ;;  %v10991_v58 = vld [vmem:[#allocation10 + $0x1e8] sm:$0xff]  ;;  %v10917_v51 = vld [vmem:[#allocation3 + $0x70] sm:$0xf0] }
 0x302   : > { %v4838_v39 = vpack.c.bf16 %v4767_v35, %v4767_v35  ;;  %v4903_v37 = vpack.c.bf16 %v4815_v59, %v4815_v59  ;;  %v4162_v42 = vadd.f32 %v12528_v12, %v12526_v5  ;;  %6340 = vmatpush.bf16.msra.mxu1 %v10991_v58 }
 0x303   : > { %v4711_v36 = vadd.f32 %v12595_v16, %v4695_v4  ;;  %v5436_v40 = vpop.f32.mrf.mxu3  ;;  %v9619_v4 = vor.u32 %v10864_v10, %v9616_v27  ;;  %v10998_v27 = vld [vmem:[#allocation10 + $0x220] sm:$0xff] }
 0x304   : > { %4856 = vst [vmem:[#allocation3 + $0xfc] sm:$0xf] %v4838_v39  ;;  %v4614_v50 = vpop.f32.mrf.mxu0  ;;  %v10868_v39 = vld [vmem:[#allocation3 + $0x50] sm:$0xf0]  ;;  %6390 = vmatpush.bf16.msra.mxu2 %v10998_v27 }
 0x305   : > { %4919 = vst [vmem:[#allocation3 + $0xf8] sm:$0xf] %v4903_v37  ;;  %v4727_v45 = vmax.f32 %v4711_v36, 0.0  ;;  %v4615_v41 = vadd.f32 %v4614_v50, %v12530_v32  ;;  %v10869_v37 = vld [vmem:[#allocation3 + $0x58] sm:$0xf0] }
 0x307   : > { %v4743_v20 = vrot.slane %v4727_v45, 7  ;;  %v4791_v47 = vrot.slane %v4727_v45, 1  ;;  %v4873_v33 = vpack.c.bf16 %v4727_v45, %v4727_v45  ;;  %v4664_v31 = vadd.f32 %v4663_v55, %v4615_v41  ;;  %v9626_v55 = vld [vmem:[#allocation3 + $0x48] sm:$0xf] }
 0x308   : > { %v5384_v49 = vpop.f32.mrf.mxu2  ;;  %v9627_v58 = vor.u32 %v10868_v39, %v9626_v55 }
 0x309   : > { %v4766_v52 = vsel %vm1076_vm3, %v4742_v38, %v4743_v20  ;;  %v4814_v32 = vsel %vm1173_vm4, %v4790_v7, %v4791_v47  ;;  %4889 = vst [vmem:[#allocation3 + $0x10c] sm:$0xf] %v4873_v33  ;;  %v4696_v56 = vadd.f32 %v4664_v31, %v4162_v42  ;;  %v12651_v17 = vadd.f32 %v5433_v14, %v5384_v49  ;;  %v9442_v7 = vld [vmem:[#allocation3 + $0x68] sm:$0xf]  ;;  %v4666_v41 = vpop.f32.mrf.mxu1 }
 0x30a   : > { %v4775_v5 = vmul.f32 %v11734_v11, %v4766_v52  ;;  %v4822_v12 = vmul.f32 %v11675_v62, %v4814_v32  ;;  %v9443_v11 = vor.u32 %v10917_v51, %v9442_v7  ;;  %v9634_v62 = vld [vmem:[#allocation3 + $0x50] sm:$0xf] }
 0x30b   : > { %v4712_v35 = vadd.f32 %v12595_v16, %v4696_v56  ;;  %v5438_v59 = vpop.f32.mrf.mxu3  ;;  %v9635_v21 = vor.u32 %v10869_v37, %v9634_v62  ;;  %v11078_v52 = vld [vmem:[#allocation10 + $0xe0] sm:$0xff] }
 0x30c   : > { %v4839_v38 = vpack.c.bf16 %v4775_v5, %v4775_v5  ;;  %v4904_v36 = vpack.c.bf16 %v4822_v12, %v4822_v12  ;;  %v4617_v50 = vpop.f32.mrf.mxu0  ;;  %6940 = vmatpush.bf16.msra.mxu3 %v11078_v52  ;;  %v10871_v52 = vld [vmem:[#allocation3 + $0x68] sm:$0xf0] }
 0x30d   : > { %v4728_v45 = vmax.f32 %v4712_v35, 0.0  ;;  %v4618_v14 = vadd.f32 %v4617_v50, %v12533_v25  ;;  %5854 = vmatmul.bf16.gmra.mxu2 %v9619_v4  ;;  %5810 = vmatmul.bf16.gmra.mxu1 %v9627_v58  ;;  %v10867_v58 = vld [vmem:[#allocation3 + $0x4c] sm:$0xf] }
 0x30e   : > { %4857 = vst [vmem:[#allocation3 + $0x108] sm:$0xf] %v4839_v38 }
 0x30f   : > { %4920 = vst [vmem:[#allocation3 + $0x104] sm:$0xf] %v4904_v36  ;;  %v4744_v42 = vrot.slane %v4728_v45, 7  ;;  %v4792_v33 = vrot.slane %v4728_v45, 1  ;;  %v4874_v31 = vpack.c.bf16 %v4728_v45, %v4728_v45  ;;  %v4667_v49 = vadd.f32 %v4666_v41, %v4618_v14  ;;  %5489 = vmatmul.bf16.gmra.mxu0 %v9443_v11  ;;  %v10982_v36 = vld [vmem:[#allocation10 + $0x1a0] sm:$0xff] }
 0x310   : > { %5908 = vmatmul.bf16.gmra.mxu3 %v9635_v21  ;;  %v5387_v32 = vpop.f32.mrf.mxu2  ;;  %6292 = vmatpush.bf16.msra.mxu0 %v10982_v36  ;;  %v9628_v41 = vld [vmem:[#allocation3 + $0x54] sm:$0xf0]  ;;  %v10920_v21 = vld [vmem:[#allocation3 + $0x88] sm:$0xf0] }
 0x311   : > { %v4765_v25 = vsel %vm1076_vm3, %v4743_v20, %v4744_v42  ;;  %v4813_v56 = vsel %vm1173_vm4, %v4791_v47, %v4792_v33  ;;  %4890 = vst [vmem:[#allocation3 + $0x118] sm:$0xf] %v4874_v31  ;;  %v4697_v5 = vadd.f32 %v4667_v49, %v12535_v30  ;;  %v12662_v12 = vadd.f32 %v5436_v40, %v5387_v32  ;;  %v4668_v38 = vpop.f32.mrf.mxu1  ;;  %v10990_v47 = vld [vmem:[#allocation10 + $0x1e0] sm:$0xff]  ;;  %v10997_v36 = vld [vmem:[#allocation10 + $0x218] sm:$0xff] }
 0x312   : > { %v4840_v10 = vpack.c.bf16 %v4765_v25, %v4765_v25  ;;  %v4905_v51 = vpack.c.bf16 %v4813_v56, %v4813_v56  ;;  %v4167_v30 = vadd.f32 %v12540_v1, %v12538_v28  ;;  %6341 = vmatpush.bf16.msra.mxu1 %v10990_v47  ;;  %v9631_v27 = vor.u32 %v10867_v58, %v9628_v41  ;;  %v10872_v32 = vld [vmem:[#allocation3 + $0x70] sm:$0xf0] }
 0x313   : > { %v4713_v35 = vadd.f32 %v12595_v16, %v4697_v5  ;;  %v5441_v4 = vpop.f32.mrf.mxu3  ;;  %6391 = vmatpush.bf16.msra.mxu2 %v10997_v36 }
 0x314   : > { %4858 = vst [vmem:[#allocation3 + $0x114] sm:$0xf] %v4840_v10  ;;  %v4619_v39 = vpop.f32.mrf.mxu0 }
 0x315   : > { %4921 = vst [vmem:[#allocation3 + $0x110] sm:$0xf] %v4905_v51  ;;  %v4729_v37 = vmax.f32 %v4713_v35, 0.0  ;;  %v4620_v20 = vadd.f32 %v4619_v39, %v12542_v34  ;;  %v9638_v51 = vld [vmem:[#allocation3 + $0x60] sm:$0xf] }
 0x316   : > { %v9639_v35 = vor.u32 %v10871_v52, %v9638_v51 }
 0x317   : > { %v4745_v40 = vrot.slane %v4729_v37, 7  ;;  %v4793_v50 = vrot.slane %v4729_v37, 1  ;;  %v4875_v7 = vpack.c.bf16 %v4729_v37, %v4729_v37  ;;  %v4669_v45 = vadd.f32 %v4668_v38, %v4620_v20 }
 0x318   : > { %v5389_v14 = vpop.f32.mrf.mxu2 }
 0x319   : > { %v4764_v11 = vsel %vm1076_vm3, %v4744_v42, %v4745_v40  ;;  %v4812_v34 = vsel %vm1173_vm4, %v4792_v33, %v4793_v50  ;;  %4891 = vst [vmem:[#allocation3 + $0x124] sm:$0xf] %v4875_v7  ;;  %v4698_v55 = vadd.f32 %v4669_v45, %v4167_v30  ;;  %v12672_v62 = vadd.f32 %v5438_v59, %v5389_v14  ;;  %v9454_v33 = vld [vmem:[#allocation3 + $0x80] sm:$0xf]  ;;  %v4671_v10 = vpop.f32.mrf.mxu1  ;;  %v11077_v30 = vld [vmem:[#allocation10 + $0xd8] sm:$0xff] }
 0x31a   : > { %v4777_v28 = vmul.f32 %v11773_v63, %v4764_v11  ;;  %v4824_v1 = vmul.f32 %v11745_v24, %v4812_v34  ;;  %v9455_v63 = vor.u32 %v10920_v21, %v9454_v33  ;;  %v9646_v24 = vld [vmem:[#allocation3 + $0x68] sm:$0xf]  ;;  %6941 = vmatpush.bf16.msra.mxu3 %v11077_v30 }
 0x31b   : > { %v4714_v31 = vadd.f32 %v12595_v16, %v4698_v55  ;;  %v5443_v49 = vpop.f32.mrf.mxu3  ;;  %v9647_v39 = vor.u32 %v10872_v32, %v9646_v24 }
 0x31c   : > { %v4841_v42 = vpack.c.bf16 %v4777_v28, %v4777_v28  ;;  %v4906_v25 = vpack.c.bf16 %v4824_v1, %v4824_v1  ;;  %v4622_v56 = vpop.f32.mrf.mxu0 }
 0x31d   : > { %v4730_v5 = vmax.f32 %v4714_v31, 0.0  ;;  %v4623_v59 = vadd.f32 %v4622_v56, %v12545_v3  ;;  %5859 = vmatmul.bf16.gmra.mxu2 %v9631_v27  ;;  %5815 = vmatmul.bf16.gmra.mxu1 %v9639_v35  ;;  %v10981_v31 = vld [vmem:[#allocation10 + $0x198] sm:$0xff]  ;;  %v10874_v35 = vld [vmem:[#allocation3 + $0x80] sm:$0xf0] }
 0x31e   : > { %4859 = vst [vmem:[#allocation3 + $0x120] sm:$0xf] %v4841_v42  ;;  %6293 = vmatpush.bf16.msra.mxu0 %v10981_v31 }
 0x31f   : > { %4922 = vst [vmem:[#allocation3 + $0x11c] sm:$0xf] %v4906_v25  ;;  %v4746_v37 = vrot.slane %v4730_v5, 7  ;;  %v4794_v20 = vrot.slane %v4730_v5, 1  ;;  %v4876_v38 = vpack.c.bf16 %v4730_v5, %v4730_v5  ;;  %v4672_v47 = vadd.f32 %v4671_v10, %v4623_v59  ;;  %5494 = vmatmul.bf16.gmra.mxu0 %v9455_v63  ;;  %v9640_v25 = vld [vmem:[#allocation3 + $0x6c] sm:$0xf0] }
 0x320   : > { %5913 = vmatmul.bf16.gmra.mxu3 %v9647_v39  ;;  %v5392_v7 = vpop.f32.mrf.mxu2  ;;  %v10870_v59 = vld [vmem:[#allocation3 + $0x64] sm:$0xf]  ;;  %v10875_v39 = vld [vmem:[#allocation3 + $0x88] sm:$0xf0] }
 0x321   : > { %v4763_v3 = vsel %vm1076_vm3, %v4745_v40, %v4746_v37  ;;  %v4811_v45 = vsel %vm1173_vm4, %v4793_v50, %v4794_v20  ;;  %4892 = vst [vmem:[#allocation3 + $0x130] sm:$0xf] %v4876_v38  ;;  %v4699_v14 = vadd.f32 %v4672_v47, %v12547_v19  ;;  %v12683_v41 = vadd.f32 %v5441_v4, %v5392_v7  ;;  %v4673_v21 = vpop.f32.mrf.mxu1  ;;  %v10989_v50 = vld [vmem:[#allocation10 + $0x1d8] sm:$0xff]  ;;  %v10923_v10 = vld [vmem:[#allocation3 + $0xa0] sm:$0xf0] }
 0x322   : > { %v4842_v11 = vpack.c.bf16 %v4763_v3, %v4763_v3  ;;  %v4907_v34 = vpack.c.bf16 %v4811_v45, %v4811_v45  ;;  %v4172_v19 = vadd.f32 %v12552_v60, %v12550_v15  ;;  %6342 = vmatpush.bf16.msra.mxu1 %v10989_v50  ;;  %v9643_v24 = vor.u32 %v10870_v59, %v9640_v25  ;;  %v9650_v7 = vld [vmem:[#allocation3 + $0x78] sm:$0xf] }
 0x323   : > { %v4715_v55 = vadd.f32 %v12595_v16, %v4699_v14  ;;  %v5446_v28 = vpop.f32.mrf.mxu3  ;;  %v9651_v3 = vor.u32 %v10874_v35, %v9650_v7  ;;  %v10987_v35 = vld [vmem:[#allocation10 + $0x1c8] sm:$0xff]  ;;  %v10878_v7 = vld [vmem:[#allocation3 + $0xa0] sm:$0xf0] }
 0x324   : > { %4860 = vst [vmem:[#allocation3 + $0x12c] sm:$0xf] %v4842_v11  ;;  %v4624_v1 = vpop.f32.mrf.mxu0 }
 0x325   : > { %4923 = vst [vmem:[#allocation3 + $0x128] sm:$0xf] %v4907_v34  ;;  %v4731_v58 = vmax.f32 %v4715_v55, 0.0  ;;  %v4625_v40 = vadd.f32 %v4624_v1, %v12554_v29  ;;  %v10996_v1 = vld [vmem:[#allocation10 + $0x210] sm:$0xff] }
 0x326   : > { %6392 = vmatpush.bf16.msra.mxu2 %v10996_v1  ;;  %v10986_v1 = vld [vmem:[#allocation10 + $0x1c0] sm:$0xff] }
 0x327   : > { %v4747_v4 = vrot.slane %v4731_v58, 7  ;;  %v4795_v27 = vrot.slane %v4731_v58, 1  ;;  %v4877_v52 = vpack.c.bf16 %v4731_v58, %v4731_v58  ;;  %v4674_v32 = vadd.f32 %v4673_v21, %v4625_v40  ;;  %v11076_v58 = vld [vmem:[#allocation10 + $0xd0] sm:$0xff] }
 0x328   : > { %v5394_v42 = vpop.f32.mrf.mxu2  ;;  %6942 = vmatpush.bf16.msra.mxu3 %v11076_v58 }
 0x329   : > { %v4762_v56 = vsel %vm1076_vm3, %v4746_v37, %v4747_v4  ;;  %v4810_v29 = vsel %vm1173_vm4, %v4794_v20, %v4795_v27  ;;  %4893 = vst [vmem:[#allocation3 + $0x13c] sm:$0xf] %v4877_v52  ;;  %v4700_v33 = vadd.f32 %v4674_v32, %v4172_v19  ;;  %v12693_v5 = vadd.f32 %v5443_v49, %v5394_v42  ;;  %v9466_v20 = vld [vmem:[#allocation3 + $0x98] sm:$0xf]  ;;  %v4676_v30 = vpop.f32.mrf.mxu1 }
 0x32a   : > { %v4779_v15 = vmul.f32 %v11803_v53, %v4762_v56  ;;  %v4826_v60 = vmul.f32 %v11788_v18, %v4810_v29  ;;  %v9467_v53 = vor.u32 %v10923_v10, %v9466_v20  ;;  %v9658_v18 = vld [vmem:[#allocation3 + $0x80] sm:$0xf]  ;;  %v10926_v20 = vld [vmem:[#allocation3 + $0xb8] sm:$0xf0] }
 0x32b   : > { %v4716_v63 = vadd.f32 %v12595_v16, %v4700_v33  ;;  %v5448_v51 = vpop.f32.mrf.mxu3  ;;  %v9659_v45 = vor.u32 %v10875_v39, %v9658_v18  ;;  %v10988_v29 = vld [vmem:[#allocation10 + $0x1d0] sm:$0xff]  ;;  %v10979_v39 = vld [vmem:[#allocation10 + $0x188] sm:$0xff] }
 0x32c   : > { %v4843_v37 = vpack.c.bf16 %v4779_v15, %v4779_v15  ;;  %v4908_v38 = vpack.c.bf16 %v4826_v60, %v4826_v60  ;;  %v4627_v47 = vpop.f32.mrf.mxu0  ;;  %6343 = vmatpush.bf16.msra.mxu1 %v10988_v29 }
 0x32d   : > { %v4732_v36 = vmax.f32 %v4716_v63, 0.0  ;;  %v4628_v49 = vadd.f32 %v4627_v47, %v12557_v23  ;;  %5864 = vmatmul.bf16.gmra.mxu2 %v9643_v24  ;;  %5820 = vmatmul.bf16.gmra.mxu1 %v9651_v3  ;;  %v9652_v63 = vld [vmem:[#allocation3 + $0x84] sm:$0xf0]  ;;  %v10873_v47 = vld [vmem:[#allocation3 + $0x7c] sm:$0xf] }
 0x32e   : > { %4861 = vst [vmem:[#allocation3 + $0x138] sm:$0xf] %v4843_v37 }
 0x32f   : > { %4924 = vst [vmem:[#allocation3 + $0x134] sm:$0xf] %v4908_v38  ;;  %v4748_v14 = vrot.slane %v4732_v36, 7  ;;  %v4796_v11 = vrot.slane %v4732_v36, 1  ;;  %v4878_v34 = vpack.c.bf16 %v4732_v36, %v4732_v36  ;;  %v4677_v55 = vadd.f32 %v4676_v30, %v4628_v49  ;;  %5499 = vmatmul.bf16.gmra.mxu0 %v9467_v53  ;;  %v10877_v53 = vld [vmem:[#allocation3 + $0x98] sm:$0xf0] }
 0x330   : > { %5918 = vmatmul.bf16.gmra.mxu3 %v9659_v45  ;;  %v5397_v40 = vpop.f32.mrf.mxu2  ;;  %v9655_v30 = vor.u32 %v10873_v47, %v9652_v63  ;;  %6344 = vmatpush.bf16.msra.mxu1 %v10987_v35  ;;  %v9478_v45 = vld [vmem:[#allocation3 + $0xb0] sm:$0xf]  ;;  %v13174_v63 = vld [vmem:[#allocation26_spill] sm:$0xff] }
 0x331   : > { %v4761_v23 = vsel %vm1076_vm3, %v4747_v4, %v4748_v14  ;;  %v4809_v21 = vsel %vm1173_vm4, %v4795_v27, %v4796_v11  ;;  %4894 = vst [vmem:[#allocation3 + $0x148] sm:$0xf] %v4878_v34  ;;  %v4701_v50 = vadd.f32 %v4677_v55, %v12559_v43  ;;  %v12704_v31 = vadd.f32 %v5446_v28, %v5397_v40  ;;  %v4678_v56 = vpop.f32.mrf.mxu1  ;;  %v10980_v43 = vld [vmem:[#allocation10 + $0x190] sm:$0xff]  ;;  %v9662_v34 = vld [vmem:[#allocation3 + $0x90] sm:$0xf] }
 0x332   : > { %v4844_v19 = vpack.c.bf16 %v4761_v23, %v4761_v23  ;;  %v4909_v52 = vpack.c.bf16 %v4809_v21, %v4809_v21  ;;  %v4177_v28 = vadd.f32 %v12564_v22, %v12562_v9  ;;  %6294 = vmatpush.bf16.msra.mxu0 %v10980_v43  ;;  %v9670_v55 = vld [vmem:[#allocation3 + $0x98] sm:$0xf]  ;;  %v9663_v58 = vor.u32 %v10877_v53, %v9662_v34  ;;  %v10978_v23 = vld [vmem:[#allocation10 + $0x180] sm:$0xff] }
 0x333   : > { %v4717_v32 = vadd.f32 %v12595_v16, %v4701_v50  ;;  %v12707_v42 = vpop.f32.mrf.mxu3  ;;  %v9671_v40 = vor.u32 %v10878_v7, %v9670_v55  ;;  %v11074_v47 = vld [vmem:[#allocation10 + $0xc0] sm:$0xff] }
 0x334   : > { %4862 = vst [vmem:[#allocation3 + $0x144] sm:$0xf] %v4844_v19  ;;  %v4629_v25 = vpop.f32.mrf.mxu0  ;;  %6345 = vmatpush.bf16.msra.mxu1 %v10986_v1  ;;  %v10880_v1 = vld [vmem:[#allocation3 + $0xb0] sm:$0xf0] }
 0x335   : > { %4925 = vst [vmem:[#allocation3 + $0x140] sm:$0xf] %v4909_v52  ;;  %v12709_v4 = vmax.f32 %v4717_v32, 0.0  ;;  %v4630_v27 = vadd.f32 %v4629_v25, %v12566_v6  ;;  %v10995_v32 = vld [vmem:[#allocation10 + $0x208] sm:$0xff] }
 0x336   : > { %6295 = vmatpush.bf16.msra.mxu0 %v10979_v39  ;;  %v11075_v25 = vld [vmem:[#allocation10 + $0xc8] sm:$0xff]  ;;  %6393 = vmatpush.bf16.msra.mxu2 %v10995_v32 }
 0x337   : > { %v4749_v33 = vrot.slane %v12709_v4, 7  ;;  %v4797_v15 = vrot.slane %v12709_v4, 1  ;;  %v4879_v60 = vpack.c.bf16 %v12709_v4, %v12709_v4  ;;  %v4679_v59 = vadd.f32 %v4678_v56, %v4630_v27  ;;  %6943 = vmatpush.bf16.msra.mxu3 %v11075_v25  ;;  %v9674_v25 = vld [vmem:[#allocation3 + $0xa8] sm:$0xf] }
 0x338   : > { %v5399_v10 = vpop.f32.mrf.mxu2 }
 0x339   : > { %v4760_v6 = vsel %vm1076_vm3, %v4748_v14, %v4749_v33  ;;  %v4808_v24 = vsel %vm1173_vm4, %v4796_v11, %v4797_v15  ;;  %4895 = vst [vmem:[#allocation3 + $0x154] sm:$0xf] %v4879_v60  ;;  %v4702_v9 = vadd.f32 %v4679_v59, %v4177_v28  ;;  %v12722_v22 = vadd.f32 %v5448_v51, %v5399_v10  ;;  %v4681_v11 = vpop.f32.mrf.mxu1 }
 0x33a   : > { %v4781_v37 = vmul.f32 %v11840_v46, %v4760_v6  ;;  %v4828_v38 = vmul.f32 %v11816_v61, %v4808_v24  ;;  %v9479_v61 = vor.u32 %v10926_v20, %v9478_v45  ;;  %6296 = vmatpush.bf16.msra.mxu0 %v10978_v23  ;;  %v13175_v24 = vld [vmem:[#allocation25_spill] sm:$0xff]  ;;  %v13178_v45 = vld [vmem:[#allocation20_spill] sm:$0xff] }
 0x33b   : > { %v4718_v36 = vadd.f32 %v12595_v16, %v4702_v9  ;;  %v12727_v49 = vpop.f32.mrf.mxu3  ;;  %6944 = vmatpush.bf16.msra.mxu3 %v11074_v47  ;;  %v13179_v47 = vld [vmem:[#allocation28_spill] sm:$0xff] }
 0x33c   : > { %v4845_v18 = vpack.c.bf16 %v4781_v37, %v4781_v37  ;;  %v4910_v51 = vpack.c.bf16 %v4828_v38, %v4828_v38  ;;  %v4632_v3 = vpop.f32.mrf.mxu0  ;;  %v10994_v38 = vld [vmem:[#allocation10 + $0x200] sm:$0xff] }
 0x33d   : > { %v4734_v14 = vmax.f32 %v4718_v36, 0.0  ;;  %v4633_v46 = vadd.f32 %v4632_v3, %v12569_v13  ;;  %5869 = vmatmul.bf16.gmra.mxu2 %v9655_v30  ;;  %5825 = vmatmul.bf16.gmra.mxu1 %v9663_v58  ;;  %v9664_v36 = vld [vmem:[#allocation3 + $0x9c] sm:$0xf0]  ;;  %v10881_v58 = vld [vmem:[#allocation3 + $0xb8] sm:$0xf0] }
 0x33e   : > { %4863 = vst [vmem:[#allocation3 + $0x150] sm:$0xf] %v4845_v18  ;;  %6394 = vmatpush.bf16.msra.mxu2 %v10994_v38 }
 0x33f   : > { %4926 = vst [vmem:[#allocation3 + $0x14c] sm:$0xf] %v4910_v51  ;;  %v4750_v21 = vrot.slane %v4734_v14, 7  ;;  %v4798_v50 = vrot.slane %v4734_v14, 1  ;;  %v4880_v19 = vpack.c.bf16 %v4734_v14, %v4734_v14  ;;  %v4682_v52 = vadd.f32 %v4681_v11, %v4633_v46  ;;  %5504 = vmatmul.bf16.gmra.mxu0 %v9479_v61  ;;  %v13177_v51 = vld [vmem:[#allocation21_spill] sm:$0xff] }
 0x340   : > { %5923 = vmatmul.bf16.gmra.mxu3 %v9671_v40  ;;  %v5402_v13 = vpop.f32.mrf.mxu2  ;;  %v10876_v46 = vld [vmem:[#allocation3 + $0x94] sm:$0xf] }
 0x341   : > { %v4759_v4 = vsel %vm1076_vm3, %v4749_v33, %v4750_v21  ;;  %v4807_v27 = vsel %vm1173_vm4, %v4797_v15, %v4798_v50  ;;  %4896 = vst [vmem:[#allocation3 + $0x160] sm:$0xf] %v4880_v19  ;;  %v4703_v56 = vadd.f32 %v4682_v52, %v12571_v44  ;;  %v12736_v29 = vadd.f32 %v12707_v42, %v5402_v13  ;;  %v4683_v6 = vpop.f32.mrf.mxu1  ;;  %v13176_v44 = vld [vmem:[#allocation27_spill] sm:$0xff]  ;;  %v10929_v11 = vld [vmem:[#allocation3 + $0xd0] sm:$0xf0] }
 0x342   : > { %v4846_v43 = vpack.c.bf16 %v4759_v4, %v4759_v4  ;;  %v4911_v28 = vpack.c.bf16 %v4807_v27, %v4807_v27  ;;  %v4182_v9 = vadd.f32 %v13176_v44, %v13175_v24  ;;  %v9667_v55 = vor.u32 %v10876_v46, %v9664_v36  ;;  %v9682_v13 = vld [vmem:[#allocation3 + $0xb0] sm:$0xf]  ;;  %v9676_v46 = vld [vmem:[#allocation3 + $0xb4] sm:$0xf0] }
 0x343   : > { %v4719_v60 = vadd.f32 %v12595_v16, %v4703_v56  ;;  %v5456_v59 = vpop.f32.mrf.mxu3  ;;  %v9675_v4 = vor.u32 %v10880_v1, %v9674_v25  ;;  %v9683_v27 = vor.u32 %v10881_v58, %v9682_v13  ;;  %v13180_v36 = vld [vmem:[#allocation29_spill] sm:$0xff]  ;;  %v13182_v58 = vld [vmem:[#allocation23_spill] sm:$0xff] }
 0x344   : > { %4864 = vst [vmem:[#allocation3 + $0x15c] sm:$0xf] %v4846_v43  ;;  %v4634_v10 = vpop.f32.mrf.mxu0  ;;  %v9784_v25 = vld [vmem:[#allocation3 + $0x3c] sm:$0xf0] }
 0x345   : > { %4927 = vst [vmem:[#allocation3 + $0x158] sm:$0xf] %v4911_v28  ;;  %v4735_v33 = vmax.f32 %v4719_v60, 0.0  ;;  %v4635_v15 = vadd.f32 %v4634_v10, %v13174_v63  ;;  %v11033_v10 = vld [vmem:[#allocation10 + $0x38] sm:$0xff] }
 0x346   : > { %v11041_v63 = vld [vmem:[#allocation10 + $0x78] sm:$0xff]  ;;  %7356 = vmatpush.bf16.msrb.mxu2 %v11033_v10  ;;  %v10954_v10 = vld [vmem:[#allocation3 + $0x34] sm:$0xf] }
 0x347   : > { %v4751_v42 = vrot.slane %v4735_v33, 7  ;;  %v4799_v35 = vrot.slane %v4735_v33, 1  ;;  %v4881_v39 = vpack.c.bf16 %v4735_v33, %v4735_v33  ;;  %v4684_v37 = vadd.f32 %v4683_v6, %v4635_v15  ;;  %7405 = vmatpush.bf16.msrb.mxu3 %v11041_v63 }
 0x348   : > { %v5404_v20 = vpop.f32.mrf.mxu2 }
 0x349   : > { %v4758_v30 = vsel %vm1076_vm3, %v4750_v21, %v4751_v42  ;;  %v4806_v53 = vsel %vm1173_vm4, %v4798_v50, %v4799_v35  ;;  %4897 = vst [vmem:[#allocation3 + $0x16c] sm:$0xf] %v4881_v39  ;;  %v4704_v7 = vadd.f32 %v4684_v37, %v4182_v9  ;;  %v12747_v18 = vadd.f32 %v12727_v49, %v5404_v20  ;;  %v9490_v50 = vld [vmem:[#allocation3 + $0xc8] sm:$0xf]  ;;  %v4686_v52 = vpop.f32.mrf.mxu1 }
 0x34a   : > { %v4783_v3 = vmul.f32 %v13177_v51, %v4758_v30  ;;  %v4830_v14 = vmul.f32 %v13178_v45, %v4806_v53  ;;  %v9491_v32 = vor.u32 %v10929_v11, %v9490_v50  ;;  %v13181_v30 = vld [vmem:[#allocation30_spill] sm:$0xff]  ;;  %v11089_v45 = vld [vmem:[#allocation10 + $0x138] sm:$0xff] }
 0x34b   : > { %v4720_v61 = vadd.f32 %v12595_v16, %v4704_v7  ;;  %v5458_v34 = vpop.f32.mrf.mxu3  ;;  %v10879_v50 = vld [vmem:[#allocation3 + $0xac] sm:$0xf]  ;;  %6986 = vmatpush.bf16.msrb.mxu0 %v11089_v45 }
 0x34c   : > { %v4847_v40 = vpack.c.bf16 %v4783_v3, %v4783_v3  ;;  %v4912_v23 = vpack.c.bf16 %v4830_v14, %v4830_v14  ;;  %v4637_v21 = vpop.f32.mrf.mxu0  ;;  %v11097_v3 = vld [vmem:[#allocation10 + $0x178] sm:$0xff] }
 0x34d   : > { %v4736_v49 = vmax.f32 %v4720_v61, 0.0  ;;  %v4638_v19 = vadd.f32 %v4637_v21, %v12581_v0  ;;  %5874 = vmatmul.bf16.gmra.mxu2 %v9667_v55  ;;  %5830 = vmatmul.bf16.gmra.mxu1 %v9675_v4 }
 0x34e   : > { %4865 = vst [vmem:[#allocation3 + $0x168] sm:$0xf] %v4847_v40  ;;  %7035 = vmatpush.bf16.msrb.mxu1 %v11097_v3 }
 0x34f   : > { %4928 = vst [vmem:[#allocation3 + $0x164] sm:$0xf] %v4912_v23  ;;  %v4752_v56 = vrot.slane %v4736_v49, 7  ;;  %v4800_v43 = vrot.slane %v4736_v49, 1  ;;  %v4882_v28 = vpack.c.bf16 %v4736_v49, %v4736_v49  ;;  %v4687_v60 = vadd.f32 %v4686_v52, %v4638_v19  ;;  %5509 = vmatmul.bf16.gmra.mxu0 %v9491_v32  ;;  %v13183_v23 = vld [vmem:[#allocation22_spill] sm:$0xff] }
 0x350   : > { %5928 = vmatmul.bf16.gmra.mxu3 %v9683_v27  ;;  %v5407_v33 = vpop.f32.mrf.mxu2  ;;  %v10955_v49 = vld [vmem:[#allocation3 + $0x38] sm:$0xf0]  ;;  %v9679_v32 = vor.u32 %v10879_v50, %v9676_v46 }
 0x351   : > { %v4757_v0 = vsel %vm1076_vm3, %v4751_v42, %v4752_v56  ;;  %v4805_v15 = vsel %vm1173_vm4, %v4799_v35, %v4800_v43  ;;  %4898 = vst [vmem:[#allocation3 + $0x178] sm:$0xf] %v4882_v28  ;;  %v4705_v6 = vadd.f32 %v4687_v60, %v12583_v54  ;;  %v12758_v24 = vadd.f32 %v5456_v59, %v5407_v33  ;;  %v4688_v35 = vpop.f32.mrf.mxu1 }
 0x352   : > { %v4848_v44 = vpack.c.bf16 %v4757_v0, %v4757_v0  ;;  %v4913_v9 = vpack.c.bf16 %v4805_v15, %v4805_v15  ;;  %v4187_v54 = vadd.f32 %v13181_v30, %v13180_v36  ;;  %v9787_v33 = vor.u32 %v10954_v10, %v9784_v25  ;;  %v13187_v30 = vld [vmem:[#allocation24_spill] sm:$0xff]  ;;  %v11039_v10 = vld [vmem:[#allocation10 + $0x68] sm:$0xff] }
 0x353   : > { %v4721_v39 = vadd.f32 %v12595_v16, %v4705_v6  ;;  %v12761_v37 = vpop.f32.mrf.mxu3  ;;  %v11032_v6 = vld [vmem:[#allocation10 + $0x30] sm:$0xff] }
 0x354   : > { %4866 = vst [vmem:[#allocation3 + $0x174] sm:$0xf] %v4848_v44  ;;  %v4639_v38 = vpop.f32.mrf.mxu0  ;;  %7357 = vmatpush.bf16.msrb.mxu2 %v11032_v6 }
 0x355   : > { %4929 = vst [vmem:[#allocation3 + $0x170] sm:$0xf] %v4913_v9  ;;  %v4737_v42 = vmax.f32 %v4721_v39, 0.0  ;;  %v4640_v20 = vadd.f32 %v4639_v38, %v13179_v47  ;;  %v11040_v9 = vld [vmem:[#allocation10 + $0x70] sm:$0xff]  ;;  %v13185_v47 = vrot.slane %v12598_v57, 1 }
 0x356   : > { %7406 = vmatpush.bf16.msrb.mxu3 %v11040_v9  ;;  %v11095_v9 = vld [vmem:[#allocation10 + $0x168] sm:$0xff] }
 0x357   : > { %v4753_v59 = vrot.slane %v4737_v42, 7  ;;  %v4801_v53 = vrot.slane %v4737_v42, 1  ;;  %v4883_v7 = vpack.c.bf16 %v4737_v42, %v4737_v42  ;;  %v4689_v51 = vadd.f32 %v4688_v35, %v4640_v20  ;;  %v13186_v35 = vld [vmem:[#allocation17_spill] sm:$0xff] }
 0x358   : > { %v5409_v14 = vpop.f32.mrf.mxu2 }
 0x359   : > { %v4756_v11 = vsel %vm1076_vm3, %v4752_v56, %v4753_v59  ;;  %v4804_v61 = vsel %vm1173_vm4, %v4800_v43, %v4801_v53  ;;  %4899 = vst [vmem:[#allocation3 + $0x184] sm:$0xf] %v4883_v7  ;;  %v4706_v55 = vadd.f32 %v4689_v51, %v4187_v54  ;;  %v12770_v1 = vadd.f32 %v5458_v34, %v5409_v14  ;;  %v9782_v56 = vld [vmem:[#allocation3 + $0x30] sm:$0xf]  ;;  %v5796_v28 = vpop.f32.mrf.mxu1 }
 0x35a   : > { %v4785_v40 = vmul.f32 %v13182_v58, %v4756_v11  ;;  %v4832_v21 = vmul.f32 %v13183_v23, %v4804_v61  ;;  %v9783_v60 = vor.u32 %v10955_v49, %v9782_v56  ;;  %v11096_v11 = vld [vmem:[#allocation10 + $0x170] sm:$0xff]  ;;  %v10958_v23 = vld [vmem:[#allocation3 + $0x50] sm:$0xf0]  ;;  %v9796_v49 = vld [vmem:[#allocation3 + $0x54] sm:$0xf0]  ;;  %7407 = vmatpush.bf16.msrb.mxu3 %v11039_v10 }
 0x35b   : > { %v4722_v19 = vadd.f32 %v12595_v16, %v4706_v55  ;;  %v5463_v52 = vpop.f32.mrf.mxu3  ;;  %v11088_v61 = vld [vmem:[#allocation10 + $0x130] sm:$0xff]  ;;  %7036 = vmatpush.bf16.msrb.mxu1 %v11096_v11  ;;  %v11030_v11 = vld [vmem:[#allocation10 + $0x20] sm:$0xff]  ;;  %v9818_v10 = vld [vmem:[#allocation3 + $0x78] sm:$0xf] }
 0x35c   : > { %v4849_v13 = vpack.c.bf16 %v4785_v40, %v4785_v40  ;;  %v4914_v4 = vpack.c.bf16 %v4832_v21, %v4832_v21  ;;  %v5475_v27 = vpop.f32.mrf.mxu0  ;;  %v10956_v58 = vld [vmem:[#allocation3 + $0x40] sm:$0xf0]  ;;  %6987 = vmatpush.bf16.msrb.mxu0 %v11088_v61 }
 0x35d   : > { %v4738_v43 = vmax.f32 %v4722_v19, 0.0  ;;  %v5476_v34 = vadd.f32 %v5475_v27, %v12620_v8  ;;  %5879 = vmatmul.bf16.gmra.mxu2 %v9679_v32  ;;  %6346 = vmatmul.bf16.vlgmr.msra.gmra.mxu1 %v9787_v33  ;;  %v13184_v8 = vrot.slane %v12598_v57, 7  ;;  %v9794_v32 = vld [vmem:[#allocation3 + $0x48] sm:$0xf]  ;;  %v11051_v56 = vld [vmem:[#allocation3 + $0xe0] sm:$0xf0] }
 0x35e   : > { %4867 = vst [vmem:[#allocation3 + $0x180] sm:$0xf] %v4849_v13  ;;  %v9795_v13 = vor.u32 %v10958_v23, %v9794_v32  ;;  %v11086_v32 = vld [vmem:[#allocation10 + $0x120] sm:$0xff] }
 0x35f   : > { %4930 = vst [vmem:[#allocation3 + $0x17c] sm:$0xf] %v4914_v4  ;;  %v4754_v63 = vrot.slane %v4738_v43, 7  ;;  %v4802_v0 = vrot.slane %v4738_v43, 1  ;;  %v4884_v16 = vpack.c.bf16 %v4738_v43, %v4738_v43  ;;  %v5797_v15 = vadd.f32 %v5796_v28, %v5476_v34  ;;  %6297 = vmatmul.bf16.vlgmr.msra.gmra.mxu0 %v9783_v60  ;;  %v10957_v4 = vld [vmem:[#allocation3 + $0x4c] sm:$0xf]  ;;  %7037 = vmatpush.bf16.msrb.mxu1 %v11095_v9 }
 0x360   : > { %v5412_v44 = vpop.f32.mrf.mxu2  ;;  %v9799_v43 = vor.u32 %v10957_v4, %v9796_v49  ;;  %v11031_v28 = vld [vmem:[#allocation10 + $0x28] sm:$0xff]  ;;  %v9814_v4 = vld [vmem:[#allocation3 + $0x68] sm:$0xf] }
 0x361   : > { %v4755_v39 = vsel %vm1076_vm3, %v4753_v59, %v4754_v63  ;;  %v4770_v38 = vsel %vm1076_vm3, %v4754_v63, %v13184_v8  ;;  %v4803_v42 = vsel %vm1173_vm4, %v4801_v53, %v4802_v0  ;;  %v4818_v20 = vsel %vm1173_vm4, %v4802_v0, %v13185_v47  ;;  %4900 = vst [vmem:[#allocation3 + $0x190] sm:$0xf] %v4884_v16  ;;  %v5798_v14 = vpop.f32.mrf.mxu1  ;;  %v9802_v47 = vld [vmem:[#allocation3 + $0x50] sm:$0xf] }
 0x362   : > { %v4771_v36 = vmul.f32 %v13186_v35, %v4770_v38  ;;  %v4834_v54 = vmul.f32 %v13187_v30, %v4818_v20  ;;  %v4850_v7 = vpack.c.bf16 %v4755_v39, %v4755_v39  ;;  %v4915_v59 = vpack.c.bf16 %v4803_v42, %v4803_v42  ;;  %7358 = vmatpush.bf16.msrb.mxu2 %v11031_v28  ;;  %v11087_v39 = vld [vmem:[#allocation10 + $0x128] sm:$0xff]  ;;  %v10961_v20 = vld [vmem:[#allocation3 + $0x68] sm:$0xf0]  ;;  %v9808_v30 = vld [vmem:[#allocation3 + $0x6c] sm:$0xf0] }
 0x363   : > { %v12791_v51 = vadd.f32 %v12761_v37, %v5412_v44  ;;  %v5894_v3 = vpop.f32.mrf.mxu3  ;;  %v9790_v37 = vld [vmem:[#allocation3 + $0x38] sm:$0xf]  ;;  %v10959_v38 = vld [vmem:[#allocation3 + $0x58] sm:$0xf0]  ;;  %6988 = vmatpush.bf16.msrb.mxu0 %v11087_v39  ;;  %v11057_v28 = vld [vmem:[#allocation3 + $0x110] sm:$0xf0] }
 0x364   : > { %v4835_v45 = vpack.c.bf16 %v4771_v36, %v4771_v36  ;;  %4868 = vst [vmem:[#allocation3 + $0x18c] sm:$0xf] %v4850_v7  ;;  %v4916_v53 = vpack.c.bf16 %v4834_v54, %v4834_v54  ;;  %v5477_v57 = vpop.f32.mrf.mxu0  ;;  %v9791_v50 = vor.u32 %v10956_v58, %v9790_v37  ;;  %v9803_v36 = vor.u32 %v10959_v38, %v9802_v47  ;;  %v11054_v54 = vld [vmem:[#allocation3 + $0xf8] sm:$0xf0]  ;;  %v11029_v39 = vld [vmem:[#allocation10 + $0x18] sm:$0xff] }
 0x365   : > { %4931 = vst [vmem:[#allocation3 + $0x188] sm:$0xf] %v4915_v59  ;;  %v5478_v2 = vadd.f32 %v5477_v57, %v12630_v26  ;;  %v9806_v59 = vld [vmem:[#allocation3 + $0x60] sm:$0xf]  ;;  %v9986_v57 = vld [vmem:[#allocation3 + $0xf0] sm:$0xf] }
 0x366   : > { %4853 = vst [vmem:[#allocation3 + $0xd8] sm:$0xf] %v4835_v45  ;;  %v9807_v45 = vor.u32 %v10961_v20, %v9806_v59  ;;  %7359 = vmatpush.bf16.msrb.mxu2 %v11030_v11  ;;  %v11037_v38 = vld [vmem:[#allocation10 + $0x58] sm:$0xff] }
 0x367   : > { %4932 = vst [vmem:[#allocation3 + $0x194] sm:$0xf] %v4916_v53  ;;  %v5799_v46 = vadd.f32 %v5798_v14, %v5478_v2  ;;  %v10960_v53 = vld [vmem:[#allocation3 + $0x64] sm:$0xf]  ;;  %v9987_v14 = vor.u32 %v11054_v54, %v9986_v57  ;;  %6989 = vmatpush.bf16.msrb.mxu0 %v11086_v32  ;;  %v11093_v54 = vld [vmem:[#allocation10 + $0x158] sm:$0xff] }
 0x368   : > { %v5414_v55 = vpop.f32.mrf.mxu2  ;;  %v9811_v2 = vor.u32 %v10960_v53, %v9808_v30  ;;  %v10967_v53 = vld [vmem:[#allocation3 + $0x98] sm:$0xf0]  ;;  %v11060_v11 = vld [vmem:[#allocation3 + $0x128] sm:$0xf0]  ;;  %v11028_v32 = vld [vmem:[#allocation10 + $0x10] sm:$0xff] }
 0x369   : > { %v12794_v40 = vadd.f32 %v5463_v52, %v5414_v55  ;;  %v5801_v25 = vpop.f32.mrf.mxu1  ;;  %v11038_v55 = vld [vmem:[#allocation10 + $0x60] sm:$0xff] }
 0x36a   : > { %7408 = vmatpush.bf16.msrb.mxu3 %v11038_v55  ;;  %7360 = vmatpush.bf16.msrb.mxu2 %v11029_v39  ;;  %v9830_v55 = vld [vmem:[#allocation3 + $0x90] sm:$0xf] }
 0x36b   : > { %v5896_v21 = vpop.f32.mrf.mxu3 }
 0x36c   : > { %v5480_v19 = vpop.f32.mrf.mxu0 }
 0x36d   : > { %v5481_v26 = vadd.f32 %v5480_v19, %v12641_v48  ;;  %6395 = vmatmul.bf16.vlgmr.msra.gmra.mxu2 %v9791_v50  ;;  %v9974_v27 = vld [vmem:[#allocation3 + $0xd8] sm:$0xf]  ;;  %6351 = vmatmul.bf16.gmra.mxu1 %v9799_v43  ;;  %v11094_v19 = vld [vmem:[#allocation10 + $0x160] sm:$0xff] }
 0x36e   : > { %v9975_v52 = vor.u32 %v11051_v56, %v9974_v27  ;;  %7038 = vmatpush.bf16.msrb.mxu1 %v11094_v19  ;;  %v10964_v27 = vld [vmem:[#allocation3 + $0x80] sm:$0xf0]  ;;  %7409 = vmatpush.bf16.msrb.mxu3 %v11037_v38 }
 0x36f   : > { %v5802_v34 = vadd.f32 %v5801_v25, %v5481_v26  ;;  %6302 = vmatmul.bf16.gmra.mxu0 %v9795_v13  ;;  %v10962_v25 = vld [vmem:[#allocation3 + $0x70] sm:$0xf0]  ;;  %7361 = vmatpush.bf16.msrb.mxu2 %v11028_v32 }
 0x370   : > { %6945 = vmatmul.bf16.vlgmr.msra.gmra.mxu3 %v9975_v52  ;;  %v5845_v60 = vpop.f32.mrf.mxu2  ;;  %v9815_v52 = vor.u32 %v10962_v25, %v9814_v4  ;;  %v11036_v25 = vld [vmem:[#allocation10 + $0x50] sm:$0xff] }
 0x371   : > { %v5846_v33 = vadd.f32 %v5845_v60, %v5797_v15  ;;  %v5803_v6 = vpop.f32.mrf.mxu1 }
 0x372   : > { %7039 = vmatpush.bf16.msrb.mxu1 %v11093_v54  ;;  %7410 = vmatpush.bf16.msrb.mxu3 %v11036_v25 }
 0x373   : > { %v12797_v63 = vadd.f32 %v5894_v3, %v5846_v33  ;;  %v5899_v48 = vpop.f32.mrf.mxu3 }
 0x374   : > { %v5482_v0 = vpop.f32.mrf.mxu0 }
 0x375   : > { %v5483_v16 = vadd.f32 %v5482_v0, %v12651_v17  ;;  %v10963_v0 = vld [vmem:[#allocation3 + $0x7c] sm:$0xf] }
 0x377   : > { %v5804_v44 = vadd.f32 %v5803_v6, %v5483_v16  ;;  %v9998_v16 = vld [vmem:[#allocation3 + $0x108] sm:$0xf] }
 0x378   : > { %v5847_v8 = vpop.f32.mrf.mxu2 }
 0x379   : > { %v5848_v42 = vadd.f32 %v5847_v8, %v5799_v46 }
 0x37a   : > { %v5806_v3 = vpop.f32.mrf.mxu1 }
 0x37b   : > { %v12800_v15 = vadd.f32 %v5896_v21, %v5848_v42  ;;  %v5901_v35 = vpop.f32.mrf.mxu3 }
 0x37c   : > { %v5485_v7 = vpop.f32.mrf.mxu0 }
 0x37d   : > { %v5486_v17 = vadd.f32 %v5485_v7, %v12662_v12  ;;  %6400 = vmatmul.bf16.gmra.mxu2 %v9803_v36  ;;  %6356 = vmatmul.bf16.gmra.mxu1 %v9811_v2  ;;  %v11085_v7 = vld [vmem:[#allocation10 + $0x118] sm:$0xff] }
 0x37e   : > { %6990 = vmatpush.bf16.msrb.mxu0 %v11085_v7  ;;  %v11027_v7 = vld [vmem:[#allocation10 + $0x8] sm:$0xff] }
 0x37f   : > { %v5807_v46 = vadd.f32 %v5806_v3, %v5486_v17  ;;  %6307 = vmatmul.bf16.gmra.mxu0 %v9807_v45  ;;  %v10965_v17 = vld [vmem:[#allocation3 + $0x88] sm:$0xf0]  ;;  %v9826_v45 = vld [vmem:[#allocation3 + $0x80] sm:$0xf]  ;;  %7362 = vmatpush.bf16.msrb.mxu2 %v11027_v7 }
 0x380   : > { %6950 = vmatmul.bf16.gmra.mxu3 %v9987_v14  ;;  %v5850_v61 = vpop.f32.mrf.mxu2  ;;  %v9827_v14 = vor.u32 %v10965_v17, %v9826_v45  ;;  %v11035_v17 = vld [vmem:[#allocation10 + $0x48] sm:$0xff] }
 0x381   : > { %v5851_v58 = vadd.f32 %v5850_v61, %v5802_v34  ;;  %v9820_v34 = vld [vmem:[#allocation3 + $0x84] sm:$0xf0]  ;;  %7411 = vmatpush.bf16.msrb.mxu3 %v11035_v17 }
 0x382   : > { %v5808_v50 = vpop.f32.mrf.mxu1  ;;  %v9823_v6 = vor.u32 %v10963_v0, %v9820_v34  ;;  %v10970_v0 = vld [vmem:[#allocation3 + $0xb0] sm:$0xf0] }
 0x383   : > { %v12803_v37 = vadd.f32 %v5899_v48, %v5851_v58  ;;  %v5904_v12 = vpop.f32.mrf.mxu3  ;;  %v9819_v48 = vor.u32 %v10964_v27, %v9818_v10 }
 0x384   : > { %v5487_v23 = vpop.f32.mrf.mxu0 }
 0x385   : > { %v5488_v21 = vadd.f32 %v5487_v23, %v12672_v62  ;;  %v10966_v23 = vld [vmem:[#allocation3 + $0x94] sm:$0xf] }
 0x387   : > { %v5809_v49 = vadd.f32 %v5808_v50, %v5488_v21  ;;  %v10010_v21 = vld [vmem:[#allocation3 + $0x120] sm:$0xf] }
 0x388   : > { %v5852_v26 = vpop.f32.mrf.mxu2 }
 0x389   : > { %v5853_v13 = vadd.f32 %v5852_v26, %v5804_v44  ;;  %v9999_v44 = vor.u32 %v11057_v28, %v9998_v16  ;;  %v11092_v28 = vld [vmem:[#allocation10 + $0x150] sm:$0xff] }
 0x38a   : > { %v5811_v33 = vpop.f32.mrf.mxu1  ;;  %7040 = vmatpush.bf16.msrb.mxu1 %v11092_v28 }
 0x38b   : > { %v12806_v56 = vadd.f32 %v5901_v35, %v5853_v13  ;;  %v5906_v43 = vpop.f32.mrf.mxu3 }
 0x38c   : > { %v5490_v60 = vpop.f32.mrf.mxu0 }
 0x38d   : > { %v5491_v62 = vadd.f32 %v5490_v60, %v12683_v41  ;;  %6405 = vmatmul.bf16.gmra.mxu2 %v9815_v52  ;;  %6361 = vmatmul.bf16.gmra.mxu1 %v9823_v6  ;;  %v11084_v60 = vld [vmem:[#allocation10 + $0x110] sm:$0xff] }
 0x38e   : > { %6991 = vmatpush.bf16.msrb.mxu0 %v11084_v60  ;;  %v11026_v60 = vld [vmem:[#allocation10] sm:$0xff] }
 0x38f   : > { %v5812_v9 = vadd.f32 %v5811_v33, %v5491_v62  ;;  %6312 = vmatmul.bf16.gmra.mxu0 %v9819_v48  ;;  %v10968_v62 = vld [vmem:[#allocation3 + $0xa0] sm:$0xf0]  ;;  %v9838_v48 = vld [vmem:[#allocation3 + $0x98] sm:$0xf]  ;;  %7363 = vmatpush.bf16.msrb.mxu2 %v11026_v60  ;;  %v11050_v60 = vld [vmem:[#allocation3 + $0xdc] sm:$0xf] }
 0x390   : > { %6955 = vmatmul.bf16.gmra.mxu3 %v9999_v44  ;;  %v5855_v8 = vpop.f32.mrf.mxu2  ;;  %v9839_v6 = vor.u32 %v10968_v62, %v9838_v48  ;;  %v9844_v44 = vld [vmem:[#allocation3 + $0xb4] sm:$0xf0] }
 0x391   : > { %v5856_v42 = vadd.f32 %v5855_v8, %v5807_v46  ;;  %v9832_v46 = vld [vmem:[#allocation3 + $0x9c] sm:$0xf0]  ;;  %v9842_v8 = vld [vmem:[#allocation3 + $0xa8] sm:$0xf] }
 0x392   : > { %v5813_v36 = vpop.f32.mrf.mxu1  ;;  %v9835_v50 = vor.u32 %v10966_v23, %v9832_v46  ;;  %v11091_v46 = vld [vmem:[#allocation10 + $0x148] sm:$0xff]  ;;  %v10973_v23 = vld [vmem:[#allocation3 + $0xc8] sm:$0xf0] }
 0x393   : > { %v12809_v47 = vadd.f32 %v5904_v12, %v5856_v42  ;;  %v5909_v41 = vpop.f32.mrf.mxu3  ;;  %v9831_v12 = vor.u32 %v10967_v53, %v9830_v55  ;;  %v9843_v42 = vor.u32 %v10970_v0, %v9842_v8  ;;  %7041 = vmatpush.bf16.msrb.mxu1 %v11091_v46 }
 0x394   : > { %v5492_v20 = vpop.f32.mrf.mxu0 }
 0x395   : > { %v5493_v35 = vadd.f32 %v5492_v20, %v12693_v5  ;;  %v10022_v20 = vld [vmem:[#allocation3 + $0x138] sm:$0xf] }
 0x397   : > { %v5814_v30 = vadd.f32 %v5813_v36, %v5493_v35 }
 0x398   : > { %v5857_v59 = vpop.f32.mrf.mxu2 }
 0x399   : > { %v5858_v3 = vadd.f32 %v5857_v59, %v5809_v49  ;;  %v10011_v49 = vor.u32 %v11060_v11, %v10010_v21  ;;  %v11083_v11 = vld [vmem:[#allocation10 + $0x108] sm:$0xff] }
 0x39a   : > { %v5816_v58 = vpop.f32.mrf.mxu1  ;;  %6992 = vmatpush.bf16.msrb.mxu0 %v11083_v11 }
 0x39b   : > { %v12812_v57 = vadd.f32 %v5906_v43, %v5858_v3  ;;  %v5911_v2 = vpop.f32.mrf.mxu3 }
 0x39c   : > { %v5495_v61 = vpop.f32.mrf.mxu0 }
 0x39d   : > { %v5496_v5 = vadd.f32 %v5495_v61, %v12704_v31  ;;  %6410 = vmatmul.bf16.gmra.mxu2 %v9827_v14  ;;  %6366 = vmatmul.bf16.gmra.mxu1 %v9835_v50 }
 0x39f   : > { %v5817_v19 = vadd.f32 %v5816_v58, %v5496_v5  ;;  %6317 = vmatmul.bf16.gmra.mxu0 %v9831_v12  ;;  %v10971_v5 = vld [vmem:[#allocation3 + $0xb8] sm:$0xf0]  ;;  %v9850_v12 = vld [vmem:[#allocation3 + $0xb0] sm:$0xf] }
 0x3a0   : > { %6960 = vmatmul.bf16.gmra.mxu3 %v10011_v49  ;;  %v5860_v26 = vpop.f32.mrf.mxu2  ;;  %v9851_v50 = vor.u32 %v10971_v5, %v9850_v12  ;;  %v9856_v49 = vld [vmem:[#allocation3 + $0xcc] sm:$0xf0] }
 0x3a1   : > { %v5861_v13 = vadd.f32 %v5860_v26, %v5812_v9  ;;  %v11063_v9 = vld [vmem:[#allocation3 + $0x140] sm:$0xf0]  ;;  %v9854_v26 = vld [vmem:[#allocation3 + $0xc0] sm:$0xf] }
 0x3a2   : > { %v5818_v52 = vpop.f32.mrf.mxu1 }
 0x3a3   : > { %v12815_v4 = vadd.f32 %v5909_v41, %v5861_v13  ;;  %v5914_v31 = vpop.f32.mrf.mxu3  ;;  %v10969_v41 = vld [vmem:[#allocation3 + $0xac] sm:$0xf] }
 0x3a4   : > { %v5497_v27 = vpop.f32.mrf.mxu0  ;;  %v9847_v36 = vor.u32 %v10969_v41, %v9844_v44  ;;  %v9866_v41 = vld [vmem:[#allocation3 + $0xd8] sm:$0xf] }
 0x3a5   : > { %v5498_v43 = vadd.f32 %v5497_v27, %v12722_v22  ;;  %v10034_v27 = vld [vmem:[#allocation3 + $0x150] sm:$0xf] }
 0x3a7   : > { %v5819_v34 = vadd.f32 %v5818_v52, %v5498_v43  ;;  %v11082_v43 = vld [vmem:[#allocation10 + $0x100] sm:$0xff] }
 0x3a8   : > { %v5862_v10 = vpop.f32.mrf.mxu2  ;;  %v11090_v52 = vld [vmem:[#allocation10 + $0x140] sm:$0xff]  ;;  %6993 = vmatpush.bf16.msrb.mxu0 %v11082_v43 }
 0x3a9   : > { %v5863_v33 = vadd.f32 %v5862_v10, %v5814_v30  ;;  %v10023_v30 = vor.u32 %v11063_v9, %v10022_v20  ;;  %7042 = vmatpush.bf16.msrb.mxu1 %v11090_v52  ;;  %v11052_v52 = vld [vmem:[#allocation3 + $0xe8] sm:$0xf0] }
 0x3aa   : > { %v5821_v38 = vpop.f32.mrf.mxu1 }
 0x3ab   : > { %v12818_v16 = vadd.f32 %v5911_v2, %v5863_v33  ;;  %v5916_v35 = vpop.f32.mrf.mxu3  ;;  %v11034_v33 = vld [vmem:[#allocation10 + $0x40] sm:$0xff] }
 0x3ac   : > { %v5500_v39 = vpop.f32.mrf.mxu0  ;;  %7412 = vmatpush.bf16.msrb.mxu3 %v11034_v33  ;;  %v10058_v33 = vld [vmem:[#allocation3 + $0x180] sm:$0xf] }
 0x3ad   : > { %v5501_v22 = vadd.f32 %v5500_v39, %v12736_v29  ;;  %6415 = vmatmul.bf16.gmra.mxu2 %v9839_v6  ;;  %6371 = vmatmul.bf16.gmra.mxu1 %v9847_v36  ;;  %v9868_v36 = vld [vmem:[#allocation3 + $0xe4] sm:$0xf0] }
 0x3af   : > { %v5822_v54 = vadd.f32 %v5821_v38, %v5501_v22  ;;  %6322 = vmatmul.bf16.gmra.mxu0 %v9843_v42  ;;  %v10974_v22 = vld [vmem:[#allocation3 + $0xd0] sm:$0xf0]  ;;  %v9862_v42 = vld [vmem:[#allocation3 + $0xc8] sm:$0xf] }
 0x3b0   : > { %6965 = vmatmul.bf16.gmra.mxu3 %v10023_v30  ;;  %v5865_v59 = vpop.f32.mrf.mxu2  ;;  %v11069_v30 = vld [vmem:[#allocation3 + $0x170] sm:$0xf0] }
 0x3b1   : > { %v5866_v3 = vadd.f32 %v5865_v59, %v5817_v19  ;;  %v11066_v19 = vld [vmem:[#allocation3 + $0x158] sm:$0xf0]  ;;  %v10976_v59 = vld [vmem:[#allocation3 + $0xe0] sm:$0xf0] }
 0x3b2   : > { %v5823_v2 = vpop.f32.mrf.mxu1  ;;  %v10035_v28 = vor.u32 %v11066_v19, %v10034_v27 }
 0x3b3   : > { %v12821_v45 = vadd.f32 %v5914_v31, %v5866_v3  ;;  %v5919_v61 = vpop.f32.mrf.mxu3  ;;  %v9855_v31 = vor.u32 %v10973_v23, %v9854_v26 }
 0x3b4   : > { %v5502_v29 = vpop.f32.mrf.mxu0 }
 0x3b5   : > { %v5503_v53 = vadd.f32 %v5502_v29, %v12747_v18  ;;  %v10972_v18 = vld [vmem:[#allocation3 + $0xc4] sm:$0xf]  ;;  %v10975_v29 = vld [vmem:[#allocation3 + $0xdc] sm:$0xf] }
 0x3b7   : > { %v5824_v14 = vadd.f32 %v5823_v2, %v5503_v53  ;;  %v10046_v53 = vld [vmem:[#allocation3 + $0x168] sm:$0xf]  ;;  %v9871_v2 = vor.u32 %v10975_v29, %v9868_v36  ;;  %v11055_v29 = vld [vmem:[#allocation3 + $0x100] sm:$0xf0] }
 0x3b8   : > { %v5867_v55 = vpop.f32.mrf.mxu2  ;;  %v10047_v46 = vor.u32 %v11069_v30, %v10046_v53  ;;  %v11128_v30 = vld [vmem:[#allocation10 + $0x1b0] sm:$0xff]  ;;  %v10168_v53 = vld [vmem:[#allocation3 + $0xcc] sm:$0xf0] }
 0x3b9   : > { %v5868_v58 = vadd.f32 %v5867_v55, %v5819_v34  ;;  %v9859_v34 = vor.u32 %v10972_v18, %v9856_v49  ;;  %v11145_v55 = vld [vmem:[#allocation10 + $0x238] sm:$0xff] }
 0x3ba   : > { %v5826_v13 = vpop.f32.mrf.mxu1  ;;  %7955 = vmatpush.bf16.msra.mxu3 %v11145_v55  ;;  %v11129_v18 = vld [vmem:[#allocation10 + $0x1b8] sm:$0xff]  ;;  %v11002_v55 = vld [vmem:[#allocation3 + $0xc4] sm:$0xf] }
 0x3bb   : > { %v12824_v21 = vadd.f32 %v5916_v35, %v5868_v58  ;;  %v9863_v35 = vor.u32 %v10974_v22, %v9862_v42  ;;  %7857 = vmatpush.bf16.msra.mxu1 %v11129_v18 }
 0x3bc   : > { %v5505_v32 = vpop.f32.mrf.mxu0 }
 0x3bd   : > { %v5506_v25 = vadd.f32 %v5505_v32, %v12758_v24  ;;  %6420 = vmatmul.bf16.gmra.mxu2 %v9851_v50  ;;  %6376 = vmatmul.bf16.gmra.mxu1 %v9859_v34  ;;  %v5921_v24 = vpop.f32.mrf.mxu3  ;;  %v10977_v32 = vld [vmem:[#allocation3 + $0xe8] sm:$0xf0] }
 0x3be   : > { %v11072_v34 = vld [vmem:[#allocation3 + $0x188] sm:$0xf0] }
 0x3bf   : > { %v5827_v10 = vadd.f32 %v5826_v13, %v5506_v25  ;;  %6327 = vmatmul.bf16.gmra.mxu0 %v9855_v31  ;;  %v11049_v25 = vld [vmem:[#allocation10 + $0xb8] sm:$0xff]  ;;  %v9874_v13 = vld [vmem:[#allocation3 + $0xe0] sm:$0xf]  ;;  %7858 = vmatpush.bf16.msra.mxu1 %v11128_v30 }
 0x3c0   : > { %6970 = vmatmul.bf16.gmra.mxu3 %v10035_v28  ;;  %v5870_v62 = vpop.f32.mrf.mxu2  ;;  %v9976_v31 = vld [vmem:[#allocation3 + $0xe4] sm:$0xf0]  ;;  %v9875_v43 = vor.u32 %v10977_v32, %v9874_v13  ;;  %7454 = vmatpush.bf16.msra.mxu0 %v11049_v25  ;;  %v11143_v32 = vld [vmem:[#allocation10 + $0x228] sm:$0xff] }
 0x3c1   : > { %v5871_v48 = vadd.f32 %v5870_v62, %v5822_v54  ;;  %v9982_v62 = vld [vmem:[#allocation3 + $0xe0] sm:$0xf] }
 0x3c2   : > { %v5828_v9 = vpop.f32.mrf.mxu1 }
 0x3c3   : > { %v12827_v0 = vadd.f32 %v5919_v61, %v5871_v48  ;;  %v9983_v48 = vor.u32 %v11052_v52, %v9982_v62  ;;  %v10000_v62 = vld [vmem:[#allocation3 + $0x114] sm:$0xf0] }
 0x3c4   : > { %v5507_v6 = vpop.f32.mrf.mxu0 }
 0x3c5   : > { %v5508_v44 = vadd.f32 %v5507_v6, %v12770_v1  ;;  %v5924_v54 = vpop.f32.mrf.mxu3  ;;  %v9867_v1 = vor.u32 %v10976_v59, %v9866_v41  ;;  %v10166_v59 = vld [vmem:[#allocation3 + $0xc0] sm:$0xf] }
 0x3c7   : > { %v5829_v39 = vadd.f32 %v5828_v9, %v5508_v44 }
 0x3c8   : > { %v5872_v8 = vpop.f32.mrf.mxu2 }
 0x3c9   : > { %v5873_v38 = vadd.f32 %v5872_v8, %v5824_v14  ;;  %v11137_v14 = vld [vmem:[#allocation10 + $0x1f8] sm:$0xff]  ;;  %v11144_v8 = vld [vmem:[#allocation10 + $0x230] sm:$0xff] }
 0x3ca   : > { %v5831_v3 = vpop.f32.mrf.mxu1  ;;  %7906 = vmatpush.bf16.msra.mxu2 %v11137_v14  ;;  %7956 = vmatpush.bf16.msra.mxu3 %v11144_v8 }
 0x3cb   : > { %v12830_v20 = vadd.f32 %v5921_v24, %v5873_v38  ;;  %v10059_v24 = vor.u32 %v11072_v34, %v10058_v33 }
 0x3cc   : > { %v5510_v7 = vpop.f32.mrf.mxu0 }
 0x3cd   : > { %v5511_v17 = vadd.f32 %v5510_v7, %v12791_v51  ;;  %6425 = vmatmul.bf16.gmra.mxu2 %v9863_v35  ;;  %6381 = vmatmul.bf16.gmra.mxu1 %v9871_v2  ;;  %v5926_v50 = vpop.f32.mrf.mxu3  ;;  %v11003_v35 = vld [vmem:[#allocation3 + $0xc8] sm:$0xf0] }
 0x3ce   : > { %7957 = vmatpush.bf16.msra.mxu3 %v11143_v32 }
 0x3cf   : > { %v5832_v11 = vadd.f32 %v5831_v3, %v5511_v17  ;;  %6332 = vmatmul.bf16.gmra.mxu0 %v9867_v1  ;;  %v9988_v17 = vld [vmem:[#allocation3 + $0xfc] sm:$0xf0]  ;;  %v10167_v1 = vor.u32 %v11003_v35, %v10166_v59  ;;  %v11005_v35 = vld [vmem:[#allocation3 + $0xdc] sm:$0xf] }
 0x3d0   : > { %6975 = vmatmul.bf16.gmra.mxu3 %v10047_v46  ;;  %v5875_v61 = vpop.f32.mrf.mxu2  ;;  %v11053_v46 = vld [vmem:[#allocation3 + $0xf4] sm:$0xf] }
 0x3d1   : > { %v5876_v5 = vadd.f32 %v5875_v61, %v5827_v10  ;;  %v9979_v10 = vor.u32 %v11050_v60, %v9976_v31  ;;  %v9994_v61 = vld [vmem:[#allocation3 + $0xf8] sm:$0xf] }
 0x3d2   : > { %v5833_v23 = vpop.f32.mrf.mxu1 }
 0x3d3   : > { %v12833_v58 = vadd.f32 %v5924_v54, %v5876_v5  ;;  %v11048_v54 = vld [vmem:[#allocation10 + $0xb0] sm:$0xff]  ;;  %v9995_v5 = vor.u32 %v11055_v29, %v9994_v61 }
 0x3d4   : > { %v5512_v51 = vpop.f32.mrf.mxu0  ;;  %7455 = vmatpush.bf16.msra.mxu0 %v11048_v54 }
 0x3d5   : > { %v5513_v12 = vadd.f32 %v5512_v51, %v12794_v40  ;;  %v5929_v6 = vpop.f32.mrf.mxu3  ;;  %v10171_v51 = vor.u32 %v11002_v55, %v10168_v53 }
 0x3d7   : > { %v5834_v49 = vadd.f32 %v5833_v23, %v5513_v12 }
 0x3d8   : > { %v5877_v19 = vpop.f32.mrf.mxu2 }
 0x3d9   : > { %v5878_v26 = vadd.f32 %v5877_v19, %v5829_v39  ;;  %v11136_v39 = vld [vmem:[#allocation10 + $0x1f0] sm:$0xff]  ;;  %v11135_v19 = vld [vmem:[#allocation10 + $0x1e8] sm:$0xff] }
 0x3da   : > { %v6347_v40 = vpop.f32.mrf.mxu1  ;;  %7907 = vmatpush.bf16.msra.mxu2 %v11136_v39  ;;  %v11056_v39 = vld [vmem:[#allocation3 + $0x10c] sm:$0xf] }
 0x3db   : > { %v12836_v27 = vadd.f32 %v5926_v50, %v5878_v26 }
 0x3dc   : > { %v6298_v28 = vpop.f32.mrf.mxu0 }
 0x3dd   : > { %6430 = vmatmul.bf16.gmra.mxu2 %v9875_v43  ;;  %7043 = vmatmul.bf16.vlgmr.msrb.gmra.mxu1 %v9983_v48  ;;  %v5931_v7 = vpop.f32.mrf.mxu3  ;;  %v6348_v12 = vadd.f32 %v6347_v40, %v6298_v28  ;;  %v10178_v28 = vld [vmem:[#allocation3 + $0xd8] sm:$0xf] }
 0x3de   : > { %7908 = vmatpush.bf16.msra.mxu2 %v11135_v19  ;;  %v11127_v40 = vld [vmem:[#allocation10 + $0x1a8] sm:$0xff]  ;;  %v10012_v19 = vld [vmem:[#allocation3 + $0x12c] sm:$0xf0] }
 0x3df   : > { %6994 = vmatmul.bf16.vlgmr.msrb.gmra.mxu0 %v9979_v10  ;;  %v11006_v10 = vld [vmem:[#allocation3 + $0xe0] sm:$0xf0]  ;;  %7859 = vmatpush.bf16.msra.mxu1 %v11127_v40  ;;  %v11008_v40 = vld [vmem:[#allocation3 + $0xf4] sm:$0xf] }
 0x3e0   : > { %6980 = vmatmul.bf16.gmra.mxu3 %v10059_v24  ;;  %v5880_v44 = vpop.f32.mrf.mxu2  ;;  %v10179_v24 = vor.u32 %v11006_v10, %v10178_v28 }
 0x3e1   : > { %v5881_v9 = vadd.f32 %v5880_v44, %v5832_v11  ;;  %v9991_v11 = vor.u32 %v11053_v46, %v9988_v17  ;;  %v10180_v44 = vld [vmem:[#allocation3 + $0xe4] sm:$0xf0]  ;;  %v11134_v17 = vld [vmem:[#allocation10 + $0x1e0] sm:$0xff] }
 0x3e2   : > { %v6349_v42 = vpop.f32.mrf.mxu1  ;;  %v10183_v30 = vor.u32 %v11005_v35, %v10180_v44  ;;  %7909 = vmatpush.bf16.msra.mxu2 %v11134_v17  ;;  %v11141_v44 = vld [vmem:[#allocation10 + $0x218] sm:$0xff] }
 0x3e3   : > { %v12838_v22 = vadd.f32 %v5929_v6, %v5881_v9  ;;  %v11058_v6 = vld [vmem:[#allocation3 + $0x118] sm:$0xf0]  ;;  %v10024_v17 = vld [vmem:[#allocation3 + $0x144] sm:$0xf0] }
 0x3e4   : > { %v6300_v38 = vpop.f32.mrf.mxu0 }
 0x3e5   : > { %v6350_v43 = vadd.f32 %v6349_v42, %v6300_v38  ;;  %v10003_v42 = vor.u32 %v11056_v39, %v10000_v62 }
 0x3e8   : > { %v5882_v41 = vpop.f32.mrf.mxu2 }
 0x3e9   : > { %v5883_v36 = vadd.f32 %v5882_v41, %v5834_v49  ;;  %v12845_v49 = vld [vmem:[%s13071_s5] ss:$0 sm:$0xff] }
 0x3ea   : > { %v6352_v14 = vpop.f32.mrf.mxu1  ;;  %v10006_v41 = vld [vmem:[#allocation3 + $0x110] sm:$0xf] }
 0x3eb   : > { %v12840_v3 = vadd.f32 %v5931_v7, %v5883_v36  ;;  %v10007_v36 = vor.u32 %v11058_v6, %v10006_v41  ;;  %v11133_v6 = vld [vmem:[#allocation10 + $0x1d8] sm:$0xff] }
 0x3ec   : > { %v6303_v2 = vpop.f32.mrf.mxu0  ;;  %7910 = vmatpush.bf16.msra.mxu2 %v11133_v6  ;;  %v10036_v6 = vld [vmem:[#allocation3 + $0x15c] sm:$0xf0] }
 0x3ed   : > { %7364 = vmatmul.bf16.vlgmr.msrb.gmra.mxu2 %v10167_v1  ;;  %7048 = vmatmul.bf16.gmra.mxu1 %v9995_v5  ;;  %v11142_v1 = vld [vmem:[#allocation10 + $0x220] sm:$0xff]  ;;  %v11009_v5 = vld [vmem:[#allocation3 + $0xf8] sm:$0xf0] }
 0x3ee   : > { %7958 = vmatpush.bf16.msra.mxu3 %v11142_v1 }
 0x3ef   : > { %6999 = vmatmul.bf16.gmra.mxu0 %v9991_v11 }
 0x3f0   : > { %7413 = vmatmul.bf16.vlgmr.msrb.gmra.mxu3 %v10171_v51  ;;  %v6396_v23 = vpop.f32.mrf.mxu2 }
 0x3f1   : > { %v6397_v50 = vadd.f32 %v6396_v23, %v6348_v12  ;;  %v11126_v12 = vld [vmem:[#allocation10 + $0x1a0] sm:$0xff] }
 0x3f2   : > { %v6354_v31 = vpop.f32.mrf.mxu1  ;;  %v11046_v23 = vld [vmem:[#allocation10 + $0xa0] sm:$0xff]  ;;  %7860 = vmatpush.bf16.msra.mxu1 %v11126_v12  ;;  %7959 = vmatpush.bf16.msra.mxu3 %v11141_v44  ;;  %v11011_v12 = vld [vmem:[#allocation3 + $0x10c] sm:$0xf] }
 0x3f3   : > { %v6436_v26 = vadd.f32 %v6397_v50, %v12797_v63  ;;  %v12848_v18 = vpop.f32.mrf.mxu3  ;;  %v11047_v63 = vld [vmem:[#allocation10 + $0xa8] sm:$0xff]  ;;  %v10190_v50 = vld [vmem:[#allocation3 + $0xf0] sm:$0xf] }
 0x3f4   : > { %v6305_v25 = vpop.f32.mrf.mxu0  ;;  %7456 = vmatpush.bf16.msra.mxu0 %v11047_v63 }
 0x3f5   : > { %v6455_v13 = vadd.f32 %v12845_v49, %v6436_v26  ;;  %v10191_v26 = vor.u32 %v11009_v5, %v10190_v50 }
 0x3f7   : > { %v6471_v52 = vmax.f32 %v6455_v13, 0.0  ;;  %v11061_v13 = vld [vmem:[#allocation3 + $0x130] sm:$0xf0] }
 0x3f8   : > { %v6398_v34 = vpop.f32.mrf.mxu2  ;;  %7457 = vmatpush.bf16.msra.mxu0 %v11046_v23 }
 0x3f9   : > { %6487 = vst [vmem:[%s12853_s11] sm:$0xff] %v6471_v52  ;;  %v6399_v60 = vadd.f32 %v6398_v34, %v6350_v43  ;;  %v10192_v43 = vld [vmem:[#allocation3 + $0xfc] sm:$0xf0] }
 0x3fa   : > { %v6357_v38 = vpop.f32.mrf.mxu1  ;;  %v10195_v10 = vor.u32 %v11008_v40, %v10192_v43  ;;  %v11140_v43 = vld [vmem:[#allocation10 + $0x210] sm:$0xff] }
 0x3fb   : > { %v6437_v33 = vadd.f32 %v6399_v60, %v12800_v15  ;;  %v12857_v48 = vpop.f32.mrf.mxu3  ;;  %v6353_v15 = vadd.f32 %v6352_v14, %v6303_v2  ;;  %v6355_v14 = vadd.f32 %v6354_v31, %v6305_v25  ;;  %v11059_v25 = vld [vmem:[#allocation3 + $0x124] sm:$0xf]  ;;  %v10018_v60 = vld [vmem:[#allocation3 + $0x128] sm:$0xf]  ;;  %7960 = vmatpush.bf16.msra.mxu3 %v11140_v43 }
 0x3fc   : > { %v6308_v9 = vpop.f32.mrf.mxu0  ;;  %v10015_v28 = vor.u32 %v11059_v25, %v10012_v19  ;;  %v10019_v63 = vor.u32 %v11061_v13, %v10018_v60  ;;  %v11132_v13 = vld [vmem:[#allocation10 + $0x1d0] sm:$0xff] }
 0x3fd   : > { %v6456_v8 = vadd.f32 %v12845_v49, %v6437_v33  ;;  %7369 = vmatmul.bf16.gmra.mxu2 %v10179_v24  ;;  %7053 = vmatmul.bf16.gmra.mxu1 %v10007_v36 }
 0x3fe   : > { %7911 = vmatpush.bf16.msra.mxu2 %v11132_v13  ;;  %v10048_v13 = vld [vmem:[#allocation3 + $0x174] sm:$0xf0] }
 0x3ff   : > { %v6472_v54 = vmax.f32 %v6456_v8, 0.0  ;;  %7004 = vmatmul.bf16.gmra.mxu0 %v10003_v42 }
 0x400   : > { %7418 = vmatmul.bf16.gmra.mxu3 %v10183_v30  ;;  %v6401_v7 = vpop.f32.mrf.mxu2  ;;  %v11012_v30 = vld [vmem:[#allocation3 + $0x110] sm:$0xf0] }
 0x401   : > { %6488 = vst [vmem:[%s12853_s11 + $0x8] sm:$0xff] %v6472_v54  ;;  %v6402_v59 = vadd.f32 %v6401_v7, %v6353_v15  ;;  %v11125_v54 = vld [vmem:[#allocation10 + $0x198] sm:$0xff] }
 0x402   : > { %v6359_v2 = vpop.f32.mrf.mxu1  ;;  %v11045_v7 = vld [vmem:[#allocation10 + $0x98] sm:$0xff]  ;;  %7861 = vmatpush.bf16.msra.mxu1 %v11125_v54  ;;  %v11014_v54 = vld [vmem:[#allocation3 + $0x124] sm:$0xf] }
 0x403   : > { %v6438_v29 = vadd.f32 %v6402_v59, %v12803_v37  ;;  %v12862_v53 = vpop.f32.mrf.mxu3  ;;  %v10202_v59 = vld [vmem:[#allocation3 + $0x108] sm:$0xf]  ;;  %7458 = vmatpush.bf16.msra.mxu0 %v11045_v7 }
 0x404   : > { %v6310_v46 = vpop.f32.mrf.mxu0 }
 0x405   : > { %v6457_v11 = vadd.f32 %v12845_v49, %v6438_v29  ;;  %v10203_v29 = vor.u32 %v11012_v30, %v10202_v59 }
 0x407   : > { %v6473_v61 = vmax.f32 %v6457_v11, 0.0  ;;  %v11064_v11 = vld [vmem:[#allocation3 + $0x148] sm:$0xf0] }
 0x408   : > { %v6403_v55 = vpop.f32.mrf.mxu2 }
 0x409   : > { %6489 = vst [vmem:[%s12853_s11 + $0x10] sm:$0xff] %v6473_v61  ;;  %v6404_v51 = vadd.f32 %v6403_v55, %v6355_v14  ;;  %v10204_v14 = vld [vmem:[#allocation3 + $0x114] sm:$0xf0] }
 0x40a   : > { %v6362_v34 = vpop.f32.mrf.mxu1  ;;  %v10207_v50 = vor.u32 %v11011_v12, %v10204_v14  ;;  %v11139_v14 = vld [vmem:[#allocation10 + $0x208] sm:$0xff] }
 0x40b   : > { %v6439_v37 = vadd.f32 %v6404_v51, %v12806_v56  ;;  %v12867_v32 = vpop.f32.mrf.mxu3  ;;  %v6358_v56 = vadd.f32 %v6357_v38, %v6308_v9  ;;  %v6360_v38 = vadd.f32 %v6359_v2, %v6310_v46  ;;  %v11062_v46 = vld [vmem:[#allocation3 + $0x13c] sm:$0xf]  ;;  %v10030_v51 = vld [vmem:[#allocation3 + $0x140] sm:$0xf]  ;;  %7961 = vmatpush.bf16.msra.mxu3 %v11139_v14 }
 0x40c   : > { %v6313_v52 = vpop.f32.mrf.mxu0  ;;  %v10027_v5 = vor.u32 %v11062_v46, %v10024_v17  ;;  %v10031_v23 = vor.u32 %v11064_v11, %v10030_v51  ;;  %v11131_v11 = vld [vmem:[#allocation10 + $0x1c8] sm:$0xff] }
 0x40d   : > { %v6458_v31 = vadd.f32 %v12845_v49, %v6439_v37  ;;  %7374 = vmatmul.bf16.gmra.mxu2 %v10191_v26  ;;  %7058 = vmatmul.bf16.gmra.mxu1 %v10019_v63 }
 0x40e   : > { %7912 = vmatpush.bf16.msra.mxu2 %v11131_v11  ;;  %v10060_v11 = vld [vmem:[#allocation3 + $0x18c] sm:$0xf0] }
 0x40f   : > { %v6474_v62 = vmax.f32 %v6458_v31, 0.0  ;;  %7009 = vmatmul.bf16.gmra.mxu0 %v10015_v28 }
 0x410   : > { %7423 = vmatmul.bf16.gmra.mxu3 %v10195_v10  ;;  %v6406_v33 = vpop.f32.mrf.mxu2  ;;  %v11015_v10 = vld [vmem:[#allocation3 + $0x128] sm:$0xf0] }
 0x411   : > { %6490 = vst [vmem:[%s12853_s11 + $0x18] sm:$0xff] %v6474_v62  ;;  %v6407_v24 = vadd.f32 %v6406_v33, %v6358_v56  ;;  %v11124_v62 = vld [vmem:[#allocation10 + $0x190] sm:$0xff] }
 0x412   : > { %v6364_v9 = vpop.f32.mrf.mxu1  ;;  %v11044_v33 = vld [vmem:[#allocation10 + $0x90] sm:$0xff]  ;;  %7862 = vmatpush.bf16.msra.mxu1 %v11124_v62  ;;  %v10054_v62 = vld [vmem:[#allocation3 + $0x170] sm:$0xf] }
 0x413   : > { %v6440_v39 = vadd.f32 %v6407_v24, %v12809_v47  ;;  %v12872_v8 = vpop.f32.mrf.mxu3  ;;  %v10214_v24 = vld [vmem:[#allocation3 + $0x120] sm:$0xf]  ;;  %7459 = vmatpush.bf16.msra.mxu0 %v11044_v33  ;;  %v11042_v33 = vld [vmem:[#allocation10 + $0x80] sm:$0xff] }
 0x414   : > { %v6315_v42 = vpop.f32.mrf.mxu0 }
 0x415   : > { %v6459_v41 = vadd.f32 %v12845_v49, %v6440_v39  ;;  %v10215_v39 = vor.u32 %v11015_v10, %v10214_v24  ;;  %v11122_v24 = vld [vmem:[#allocation10 + $0x180] sm:$0xff] }
 0x417   : > { %v6475_v35 = vmax.f32 %v6459_v41, 0.0  ;;  %v11067_v41 = vld [vmem:[#allocation3 + $0x160] sm:$0xf0] }
 0x418   : > { %v6408_v36 = vpop.f32.mrf.mxu2 }
 0x419   : > { %6491 = vst [vmem:[%s12853_s11 + $0x20] sm:$0xff] %v6475_v35  ;;  %v6409_v15 = vadd.f32 %v6408_v36, %v6360_v38  ;;  %v10216_v38 = vld [vmem:[#allocation3 + $0x12c] sm:$0xf0] }
 0x41a   : > { %v6367_v55 = vpop.f32.mrf.mxu1  ;;  %v10219_v59 = vor.u32 %v11014_v54, %v10216_v38 }
 0x41b   : > { %v6441_v47 = vadd.f32 %v6409_v15, %v12812_v57  ;;  %v12877_v1 = vpop.f32.mrf.mxu3  ;;  %v6363_v57 = vadd.f32 %v6362_v34, %v6313_v52  ;;  %v6365_v34 = vadd.f32 %v6364_v9, %v6315_v42  ;;  %v11065_v42 = vld [vmem:[#allocation3 + $0x154] sm:$0xf]  ;;  %v10042_v15 = vld [vmem:[#allocation3 + $0x158] sm:$0xf] }
 0x41c   : > { %v6318_v61 = vpop.f32.mrf.mxu0  ;;  %v10039_v30 = vor.u32 %v11065_v42, %v10036_v6  ;;  %v10043_v7 = vor.u32 %v11067_v41, %v10042_v15  ;;  %v11130_v42 = vld [vmem:[#allocation10 + $0x1c0] sm:$0xff] }
 0x41d   : > { %v6460_v2 = vadd.f32 %v12845_v49, %v6441_v47  ;;  %7379 = vmatmul.bf16.gmra.mxu2 %v10203_v29  ;;  %7063 = vmatmul.bf16.gmra.mxu1 %v10031_v23 }
 0x41e   : > { %7913 = vmatpush.bf16.msra.mxu2 %v11130_v42  ;;  %v10174_v42 = vld [vmem:[#allocation3 + $0xc8] sm:$0xf] }
 0x41f   : > { %v6476_v19 = vmax.f32 %v6460_v2, 0.0  ;;  %7014 = vmatmul.bf16.gmra.mxu0 %v10027_v5 }
 0x420   : > { %7428 = vmatmul.bf16.gmra.mxu3 %v10207_v50  ;;  %v6411_v37 = vpop.f32.mrf.mxu2  ;;  %v11018_v50 = vld [vmem:[#allocation3 + $0x140] sm:$0xf0] }
 0x421   : > { %6492 = vst [vmem:[%s12853_s11 + $0x28] sm:$0xff] %v6476_v19  ;;  %v6412_v26 = vadd.f32 %v6411_v37, %v6363_v57  ;;  %v11123_v19 = vld [vmem:[#allocation10 + $0x188] sm:$0xff] }
 0x422   : > { %v6369_v52 = vpop.f32.mrf.mxu1  ;;  %v11043_v37 = vld [vmem:[#allocation10 + $0x88] sm:$0xff]  ;;  %7863 = vmatpush.bf16.msra.mxu1 %v11123_v19  ;;  %v11020_v19 = vld [vmem:[#allocation3 + $0x154] sm:$0xf] }
 0x423   : > { %v6442_v25 = vadd.f32 %v6412_v26, %v12815_v4  ;;  %v12882_v31 = vpop.f32.mrf.mxu3  ;;  %v10226_v26 = vld [vmem:[#allocation3 + $0x138] sm:$0xf]  ;;  %7460 = vmatpush.bf16.msra.mxu0 %v11043_v37 }
 0x424   : > { %v6320_v28 = vpop.f32.mrf.mxu0 }
 0x425   : > { %v6461_v60 = vadd.f32 %v12845_v49, %v6442_v25  ;;  %v10227_v25 = vor.u32 %v11018_v50, %v10226_v26 }
 0x426   : > { %7864 = vmatpush.bf16.msra.mxu1 %v11122_v24  ;;  %v10250_v24 = vld [vmem:[#allocation3 + $0x168] sm:$0xf] }
 0x427   : > { %v6477_v40 = vmax.f32 %v6461_v60, 0.0  ;;  %v11070_v60 = vld [vmem:[#allocation3 + $0x178] sm:$0xf0]  ;;  %7461 = vmatpush.bf16.msra.mxu0 %v11042_v33 }
 0x428   : > { %v6413_v63 = vpop.f32.mrf.mxu2 }
 0x429   : > { %6493 = vst [vmem:[%s12853_s11 + $0x30] sm:$0xff] %v6477_v40  ;;  %v6414_v56 = vadd.f32 %v6413_v63, %v6365_v34  ;;  %v10228_v34 = vld [vmem:[#allocation3 + $0x144] sm:$0xf0] }
 0x42a   : > { %v6372_v36 = vpop.f32.mrf.mxu1 }
 0x42b   : > { %v6443_v4 = vadd.f32 %v6414_v56, %v12818_v16  ;;  %v12887_v44 = vpop.f32.mrf.mxu3  ;;  %v6368_v16 = vadd.f32 %v6367_v55, %v6318_v61  ;;  %v6370_v55 = vadd.f32 %v6369_v52, %v6320_v28  ;;  %v11068_v28 = vld [vmem:[#allocation3 + $0x16c] sm:$0xf]  ;;  %v11017_v52 = vld [vmem:[#allocation3 + $0x13c] sm:$0xf] }
 0x42c   : > { %v6323_v35 = vpop.f32.mrf.mxu0  ;;  %v10051_v56 = vor.u32 %v11068_v28, %v10048_v13  ;;  %v10231_v6 = vor.u32 %v11017_v52, %v10228_v34 }
 0x42d   : > { %v6462_v9 = vadd.f32 %v12845_v49, %v6443_v4  ;;  %7384 = vmatmul.bf16.gmra.mxu2 %v10215_v39  ;;  %7068 = vmatmul.bf16.gmra.mxu1 %v10043_v7  ;;  %v6373_v4 = vadd.f32 %v6372_v36, %v6323_v35 }
 0x42f   : > { %v6478_v17 = vmax.f32 %v6462_v9, 0.0  ;;  %7019 = vmatmul.bf16.gmra.mxu0 %v10039_v30  ;;  %v11138_v9 = vld [vmem:[#allocation10 + $0x200] sm:$0xff] }
 0x430   : > { %7433 = vmatmul.bf16.gmra.mxu3 %v10219_v59  ;;  %v6416_v47 = vpop.f32.mrf.mxu2 }
 0x431   : > { %6494 = vst [vmem:[%s12853_s11 + $0x38] sm:$0xff] %v6478_v17  ;;  %v6417_v29 = vadd.f32 %v6416_v47, %v6368_v16  ;;  %7962 = vmatpush.bf16.msra.mxu3 %v11138_v9  ;;  %v11021_v17 = vld [vmem:[#allocation3 + $0x158] sm:$0xf0] }
 0x432   : > { %v6374_v61 = vpop.f32.mrf.mxu1 }
 0x433   : > { %v6444_v46 = vadd.f32 %v6417_v29, %v12821_v45  ;;  %v12892_v2 = vpop.f32.mrf.mxu3  ;;  %v10238_v29 = vld [vmem:[#allocation3 + $0x150] sm:$0xf] }
 0x434   : > { %v6325_v5 = vpop.f32.mrf.mxu0 }
 0x435   : > { %v6463_v51 = vadd.f32 %v12845_v49, %v6444_v46  ;;  %v6375_v7 = vadd.f32 %v6374_v61, %v6325_v5 }
 0x437   : > { %v6479_v12 = vmax.f32 %v6463_v51, 0.0  ;;  %v11073_v51 = vld [vmem:[#allocation3 + $0x190] sm:$0xf0] }
 0x438   : > { %v6418_v23 = vpop.f32.mrf.mxu2 }
 0x439   : > { %6495 = vst [vmem:[%s12853_s11 + $0x40] sm:$0xff] %v6479_v12  ;;  %v6419_v57 = vadd.f32 %v6418_v23, %v6370_v55  ;;  %v10240_v55 = vld [vmem:[#allocation3 + $0x15c] sm:$0xf0]  ;;  %v11071_v23 = vld [vmem:[#allocation3 + $0x184] sm:$0xf] }
 0x43a   : > { %v6377_v10 = vpop.f32.mrf.mxu1  ;;  %v10063_v61 = vor.u32 %v11071_v23, %v10060_v11  ;;  %v10243_v26 = vor.u32 %v11020_v19, %v10240_v55 }
 0x43b   : > { %v6445_v45 = vadd.f32 %v6419_v57, %v12824_v21  ;;  %v12897_v43 = vpop.f32.mrf.mxu3  ;;  %v10055_v21 = vor.u32 %v11070_v60, %v10054_v62  ;;  %v10066_v57 = vld [vmem:[#allocation3 + $0x188] sm:$0xf] }
 0x43c   : > { %v6328_v40 = vpop.f32.mrf.mxu0  ;;  %v10067_v37 = vor.u32 %v11073_v51, %v10066_v57  ;;  %v10360_v57 = vld [vmem:[#allocation3 + $0xfc] sm:$0xf0] }
 0x43d   : > { %v6464_v63 = vadd.f32 %v12845_v49, %v6445_v45  ;;  %7389 = vmatmul.bf16.gmra.mxu2 %v10227_v25  ;;  %7073 = vmatmul.bf16.gmra.mxu1 %v10055_v21  ;;  %v6378_v13 = vadd.f32 %v6377_v10, %v6328_v40  ;;  %v11024_v40 = vld [vmem:[#allocation3 + $0x170] sm:$0xf0] }
 0x43e   : > { %v11004_v21 = vld [vmem:[#allocation3 + $0xd0] sm:$0xf0] }
 0x43f   : > { %v6480_v39 = vmax.f32 %v6464_v63, 0.0  ;;  %7024 = vmatmul.bf16.gmra.mxu0 %v10051_v56 }
 0x440   : > { %7438 = vmatmul.bf16.gmra.mxu3 %v10231_v6  ;;  %v6421_v41 = vpop.f32.mrf.mxu2 }
 0x441   : > { %6496 = vst [vmem:[%s12853_s11 + $0x48] sm:$0xff] %v6480_v39  ;;  %v6422_v38 = vadd.f32 %v6421_v41, %v6373_v4  ;;  %v10251_v39 = vor.u32 %v11024_v40, %v10250_v24  ;;  %v10252_v41 = vld [vmem:[#allocation3 + $0x174] sm:$0xf0] }
 0x442   : > { %v6379_v36 = vpop.f32.mrf.mxu1 }
 0x443   : > { %v6446_v30 = vadd.f32 %v6422_v38, %v12827_v0  ;;  %v12902_v15 = vpop.f32.mrf.mxu3  ;;  %v10239_v0 = vor.u32 %v11021_v17, %v10238_v29 }
 0x444   : > { %v6330_v54 = vpop.f32.mrf.mxu0 }
 0x445   : > { %v6465_v35 = vadd.f32 %v12845_v49, %v6446_v30  ;;  %v6380_v56 = vadd.f32 %v6379_v36, %v6330_v54  ;;  %v10358_v36 = vld [vmem:[#allocation3 + $0xf0] sm:$0xf] }
 0x447   : > { %v6481_v59 = vmax.f32 %v6465_v35, 0.0  ;;  %v10175_v35 = vor.u32 %v11004_v21, %v10174_v42 }
 0x448   : > { %v6423_v16 = vpop.f32.mrf.mxu2 }
 0x449   : > { %6497 = vst [vmem:[%s12853_s11 + $0x50] sm:$0xff] %v6481_v59  ;;  %v6424_v47 = vadd.f32 %v6423_v16, %v6375_v7  ;;  %v11023_v7 = vld [vmem:[#allocation3 + $0x16c] sm:$0xf] }
 0x44a   : > { %v6382_v5 = vpop.f32.mrf.mxu1  ;;  %v10255_v16 = vor.u32 %v11023_v7, %v10252_v41 }
 0x44b   : > { %v6447_v14 = vadd.f32 %v6424_v47, %v12830_v20  ;;  %v12907_v46 = vpop.f32.mrf.mxu3 }
 0x44c   : > { %v6333_v12 = vpop.f32.mrf.mxu0 }
 0x44d   : > { %v6466_v50 = vadd.f32 %v12845_v49, %v6447_v14  ;;  %7394 = vmatmul.bf16.gmra.mxu2 %v10239_v0  ;;  %7078 = vmatmul.bf16.gmra.mxu1 %v10067_v37  ;;  %v11098_v37 = vld [vmem:[#allocation3 + $0xf4] sm:$0xf] }
 0x44f   : > { %v6482_v45 = vmax.f32 %v6466_v50, 0.0  ;;  %7029 = vmatmul.bf16.gmra.mxu0 %v10063_v61 }
 0x450   : > { %7443 = vmatmul.bf16.gmra.mxu3 %v10243_v26  ;;  %v6426_v20 = vpop.f32.mrf.mxu2  ;;  %v11007_v26 = vld [vmem:[#allocation3 + $0xe8] sm:$0xf0] }
 0x451   : > { %6498 = vst [vmem:[%s12853_s11 + $0x58] sm:$0xff] %v6482_v45  ;;  %v6427_v25 = vadd.f32 %v6426_v20, %v6378_v13  ;;  %v10363_v45 = vor.u32 %v11098_v37, %v10360_v57  ;;  %v11102_v20 = vld [vmem:[#allocation3 + $0x110] sm:$0xf0] }
 0x452   : > { %v6384_v63 = vpop.f32.mrf.mxu1 }
 0x453   : > { %v6448_v60 = vadd.f32 %v6427_v25, %v12833_v58  ;;  %v12912_v34 = vpop.f32.mrf.mxu3  ;;  %v11099_v58 = vld [vmem:[#allocation3 + $0xf8] sm:$0xf0]  ;;  %v11100_v25 = vld [vmem:[#allocation3 + $0x100] sm:$0xf0] }
 0x454   : > { %v6335_v28 = vpop.f32.mrf.mxu0  ;;  %v10359_v59 = vor.u32 %v11099_v58, %v10358_v36 }
 0x455   : > { %v6467_v52 = vadd.f32 %v12845_v49, %v6448_v60 }
 0x457   : > { %v6483_v62 = vmax.f32 %v6467_v52, 0.0  ;;  %v10186_v52 = vld [vmem:[#allocation3 + $0xe0] sm:$0xf] }
 0x458   : > { %v6428_v33 = vpop.f32.mrf.mxu2 }
 0x459   : > { %6499 = vst [vmem:[%s12853_s11 + $0x60] sm:$0xff] %v6483_v62  ;;  %v6429_v10 = vadd.f32 %v6428_v33, %v6380_v56  ;;  %v10187_v56 = vor.u32 %v11007_v26, %v10186_v52  ;;  %v10370_v62 = vld [vmem:[#allocation3 + $0x108] sm:$0xf]  ;;  %v10366_v33 = vld [vmem:[#allocation3 + $0xf8] sm:$0xf] }
 0x45a   : > { %v7044_v54 = vpop.f32.mrf.mxu1  ;;  %v10371_v40 = vor.u32 %v11102_v20, %v10370_v62  ;;  %v11104_v20 = vld [vmem:[#allocation3 + $0x124] sm:$0xf]  ;;  %v10210_v62 = vld [vmem:[#allocation3 + $0x110] sm:$0xf] }
 0x45b   : > { %v6449_v6 = vadd.f32 %v6429_v10, %v12836_v27  ;;  %v12917_v4 = vpop.f32.mrf.mxu3  ;;  %v6383_v27 = vadd.f32 %v6382_v5, %v6333_v12  ;;  %v6385_v12 = vadd.f32 %v6384_v63, %v6335_v28  ;;  %v10367_v10 = vor.u32 %v11100_v25, %v10366_v33  ;;  %v11013_v25 = vld [vmem:[#allocation3 + $0x118] sm:$0xf0] }
 0x45c   : > { %v6995_v38 = vpop.f32.mrf.mxu0 }
 0x45d   : > { %v6468_v9 = vadd.f32 %v12845_v49, %v6449_v6  ;;  %v6996_v30 = vadd.f32 %v6995_v38, %v12848_v18  ;;  %7399 = vmatmul.bf16.gmra.mxu2 %v10251_v39  ;;  %7865 = vmatmul.bf16.vlgmr.msra.gmra.mxu1 %v10359_v59  ;;  %v11105_v59 = vld [vmem:[#allocation3 + $0x128] sm:$0xf0] }
 0x45f   : > { %v6484_v17 = vmax.f32 %v6468_v9, 0.0  ;;  %v7045_v47 = vadd.f32 %v7044_v54, %v6996_v30  ;;  %7462 = vmatmul.bf16.vlgmr.msra.gmra.mxu0 %v10175_v35  ;;  %v10372_v9 = vld [vmem:[#allocation3 + $0x114] sm:$0xf0]  ;;  %v11101_v54 = vld [vmem:[#allocation3 + $0x10c] sm:$0xf] }
 0x460   : > { %7448 = vmatmul.bf16.gmra.mxu3 %v10255_v16  ;;  %v6431_v29 = vpop.f32.mrf.mxu2  ;;  %v11010_v35 = vld [vmem:[#allocation3 + $0x100] sm:$0xf0]  ;;  %v10375_v7 = vor.u32 %v11101_v54, %v10372_v9  ;;  %v11103_v16 = vld [vmem:[#allocation3 + $0x118] sm:$0xf0]  ;;  %v10396_v54 = vld [vmem:[#allocation3 + $0x144] sm:$0xf0] }
 0x461   : > { %6500 = vst [vmem:[%s12853_s11 + $0x68] sm:$0xff] %v6484_v17  ;;  %v6432_v11 = vadd.f32 %v6431_v29, %v6383_v27 }
 0x462   : > { %v7046_v23 = vpop.f32.mrf.mxu1 }
 0x463   : > { %v6450_v14 = vadd.f32 %v6432_v11, %v12838_v22  ;;  %v12923_v18 = vpop.f32.mrf.mxu3 }
 0x464   : > { %v6997_v0 = vpop.f32.mrf.mxu0 }
 0x465   : > { %v6469_v51 = vadd.f32 %v12845_v49, %v6450_v14  ;;  %v6998_v55 = vadd.f32 %v6997_v0, %v12857_v48  ;;  %v10382_v14 = vld [vmem:[#allocation3 + $0x120] sm:$0xf]  ;;  %v10378_v0 = vld [vmem:[#allocation3 + $0x110] sm:$0xf] }
 0x467   : > { %v6485_v50 = vmax.f32 %v6469_v51, 0.0  ;;  %v7047_v5 = vadd.f32 %v7046_v23, %v6998_v55  ;;  %v10383_v51 = vor.u32 %v11105_v59, %v10382_v14  ;;  %v10379_v55 = vor.u32 %v11103_v16, %v10378_v0 }
 0x468   : > { %v6433_v61 = vpop.f32.mrf.mxu2 }
 0x469   : > { %6501 = vst [vmem:[%s12853_s11 + $0x70] sm:$0xff] %v6485_v50  ;;  %v6434_v19 = vadd.f32 %v6433_v61, %v6385_v12 }
 0x46a   : > { %v7049_v63 = vpop.f32.mrf.mxu1 }
 0x46b   : > { %v6451_v13 = vadd.f32 %v6434_v19, %v12840_v3  ;;  %v12929_v22 = vpop.f32.mrf.mxu3 }
 0x46c   : > { %v7000_v60 = vpop.f32.mrf.mxu0 }
 0x46d   : > { %v6470_v48 = vadd.f32 %v12845_v49, %v6451_v13  ;;  %v7001_v28 = vadd.f32 %v7000_v60, %v12862_v53  ;;  %7914 = vmatmul.bf16.vlgmr.msra.gmra.mxu2 %v10363_v45  ;;  %7870 = vmatmul.bf16.gmra.mxu1 %v10371_v40  ;;  %v10384_v13 = vld [vmem:[#allocation3 + $0x12c] sm:$0xf0] }
 0x46e   : > { %v10387_v52 = vor.u32 %v11104_v20, %v10384_v13  ;;  %v10408_v20 = vld [vmem:[#allocation3 + $0x15c] sm:$0xf0] }
 0x46f   : > { %v6486_v3 = vmax.f32 %v6470_v48, 0.0  ;;  %v7050_v24 = vadd.f32 %v7049_v63, %v7001_v28  ;;  %7467 = vmatmul.bf16.gmra.mxu0 %v10187_v56  ;;  %v11108_v48 = vld [vmem:[#allocation3 + $0x140] sm:$0xf0]  ;;  %v11106_v28 = vld [vmem:[#allocation3 + $0x130] sm:$0xf0] }
 0x470   : > { %7963 = vmatmul.bf16.vlgmr.msra.gmra.mxu3 %v10367_v10  ;;  %v7365_v21 = vpop.f32.mrf.mxu2  ;;  %v10394_v10 = vld [vmem:[#allocation3 + $0x138] sm:$0xf] }
 0x471   : > { %6502 = vst [vmem:[%s12853_s11 + $0x78] sm:$0xff] %v6486_v3  ;;  %v7366_v6 = vadd.f32 %v7365_v21, %v7045_v47  ;;  %v10198_v47 = vld [vmem:[#allocation3 + $0xf8] sm:$0xf]  ;;  %v10390_v3 = vld [vmem:[#allocation3 + $0x128] sm:$0xf] }
 0x472   : > { %v7051_v41 = vpop.f32.mrf.mxu1  ;;  %v10391_v21 = vor.u32 %v11106_v28, %v10390_v3 }
 0x473   : > { %v7414_v39 = vpop.f32.mrf.mxu3 }
 0x474   : > { %v12934_v58 = vadd.f32 %v7414_v39, %v7366_v6  ;;  %v7002_v49 = vpop.f32.mrf.mxu0 }
 0x475   : > { %v7003_v53 = vadd.f32 %v7002_v49, %v12867_v32  ;;  %v10199_v32 = vor.u32 %v11010_v35, %v10198_v47  ;;  %v11109_v47 = vld [vmem:[#allocation3 + $0x148] sm:$0xf0] }
 0x477   : > { %v7052_v38 = vadd.f32 %v7051_v41, %v7003_v53 }
 0x478   : > { %v7367_v42 = vpop.f32.mrf.mxu2 }
 0x479   : > { %v7368_v30 = vadd.f32 %v7367_v42, %v7047_v5 }
 0x47a   : > { %v7054_v11 = vpop.f32.mrf.mxu1 }
 0x47b   : > { %v7416_v36 = vpop.f32.mrf.mxu3 }
 0x47c   : > { %v12937_v27 = vadd.f32 %v7416_v36, %v7368_v30  ;;  %v7005_v17 = vpop.f32.mrf.mxu0  ;;  %v11107_v36 = vld [vmem:[#allocation3 + $0x13c] sm:$0xf] }
 0x47d   : > { %v7006_v29 = vadd.f32 %v7005_v17, %v12872_v8  ;;  %7919 = vmatmul.bf16.gmra.mxu2 %v10375_v7  ;;  %7875 = vmatmul.bf16.gmra.mxu1 %v10383_v51  ;;  %v11016_v7 = vld [vmem:[#allocation3 + $0x130] sm:$0xf0]  ;;  %v10399_v16 = vor.u32 %v11107_v36, %v10396_v54  ;;  %v11111_v17 = vld [vmem:[#allocation3 + $0x158] sm:$0xf0]  ;;  %v10406_v51 = vld [vmem:[#allocation3 + $0x150] sm:$0xf] }
 0x47e   : > { %v10420_v36 = vld [vmem:[#allocation3 + $0x174] sm:$0xf0] }
 0x47f   : > { %v7055_v23 = vadd.f32 %v7054_v11, %v7006_v29  ;;  %7472 = vmatmul.bf16.gmra.mxu0 %v10199_v32  ;;  %v10222_v32 = vld [vmem:[#allocation3 + $0x128] sm:$0xf] }
 0x480   : > { %7968 = vmatmul.bf16.gmra.mxu3 %v10379_v55  ;;  %v7370_v12 = vpop.f32.mrf.mxu2  ;;  %v10402_v55 = vld [vmem:[#allocation3 + $0x140] sm:$0xf] }
 0x481   : > { %v7371_v50 = vadd.f32 %v7370_v12, %v7050_v24  ;;  %v10395_v24 = vor.u32 %v11108_v48, %v10394_v10  ;;  %v10403_v12 = vor.u32 %v11109_v47, %v10402_v55 }
 0x482   : > { %v7056_v8 = vpop.f32.mrf.mxu1 }
 0x483   : > { %v7419_v5 = vpop.f32.mrf.mxu3 }
 0x484   : > { %v12940_v61 = vadd.f32 %v7419_v5, %v7371_v50  ;;  %v7007_v57 = vpop.f32.mrf.mxu0 }
 0x485   : > { %v7008_v19 = vadd.f32 %v7007_v57, %v12877_v1  ;;  %v10211_v1 = vor.u32 %v11013_v25, %v10210_v62  ;;  %v11112_v62 = vld [vmem:[#allocation3 + $0x160] sm:$0xf0] }
 0x487   : > { %v7057_v37 = vadd.f32 %v7056_v8, %v7008_v19 }
 0x488   : > { %v7372_v26 = vpop.f32.mrf.mxu2 }
 0x489   : > { %v7373_v45 = vadd.f32 %v7372_v26, %v7052_v38 }
 0x48a   : > { %v7059_v40 = vpop.f32.mrf.mxu1 }
 0x48b   : > { %v7421_v60 = vpop.f32.mrf.mxu3 }
 0x48c   : > { %v12943_v63 = vadd.f32 %v7421_v60, %v7373_v45  ;;  %v7010_v56 = vpop.f32.mrf.mxu0  ;;  %v11110_v60 = vld [vmem:[#allocation3 + $0x154] sm:$0xf] }
 0x48d   : > { %v7011_v33 = vadd.f32 %v7010_v56, %v12882_v31  ;;  %7924 = vmatmul.bf16.gmra.mxu2 %v10387_v52  ;;  %7880 = vmatmul.bf16.gmra.mxu1 %v10395_v24  ;;  %v11019_v52 = vld [vmem:[#allocation3 + $0x148] sm:$0xf0]  ;;  %v10411_v28 = vor.u32 %v11110_v60, %v10408_v20  ;;  %v11114_v56 = vld [vmem:[#allocation3 + $0x170] sm:$0xf0]  ;;  %v10418_v24 = vld [vmem:[#allocation3 + $0x168] sm:$0xf] }
 0x48e   : > { %v10432_v60 = vld [vmem:[#allocation3 + $0x18c] sm:$0xf0] }
 0x48f   : > { %v7060_v6 = vadd.f32 %v7059_v40, %v7011_v33  ;;  %7477 = vmatmul.bf16.gmra.mxu0 %v10211_v1  ;;  %v10234_v1 = vld [vmem:[#allocation3 + $0x140] sm:$0xf] }
 0x490   : > { %7973 = vmatmul.bf16.gmra.mxu3 %v10391_v21  ;;  %v7375_v39 = vpop.f32.mrf.mxu2  ;;  %v10414_v21 = vld [vmem:[#allocation3 + $0x158] sm:$0xf] }
 0x491   : > { %v7376_v49 = vadd.f32 %v7375_v39, %v7055_v23  ;;  %v10407_v23 = vor.u32 %v11111_v17, %v10406_v51  ;;  %v10415_v39 = vor.u32 %v11112_v62, %v10414_v21  ;;  %v11025_v62 = vld [vmem:[#allocation3 + $0x178] sm:$0xf0] }
 0x492   : > { %v7061_v31 = vpop.f32.mrf.mxu1 }
 0x493   : > { %v7424_v53 = vpop.f32.mrf.mxu3 }
 0x494   : > { %v12946_v41 = vadd.f32 %v7424_v53, %v7376_v49  ;;  %v7012_v38 = vpop.f32.mrf.mxu0 }
 0x495   : > { %v7013_v42 = vadd.f32 %v7012_v38, %v12887_v44  ;;  %v10223_v44 = vor.u32 %v11016_v7, %v10222_v32  ;;  %v11115_v32 = vld [vmem:[#allocation3 + $0x178] sm:$0xf0] }
 0x497   : > { %v7062_v9 = vadd.f32 %v7061_v31, %v7013_v42 }
 0x498   : > { %v7377_v30 = vpop.f32.mrf.mxu2 }
 0x499   : > { %v7378_v35 = vadd.f32 %v7377_v30, %v7057_v37 }
 0x49a   : > { %v7064_v0 = vpop.f32.mrf.mxu1 }
 0x49b   : > { %v7426_v59 = vpop.f32.mrf.mxu3 }
 0x49c   : > { %v12949_v29 = vadd.f32 %v7426_v59, %v7378_v35  ;;  %v7015_v11 = vpop.f32.mrf.mxu0  ;;  %v11113_v59 = vld [vmem:[#allocation3 + $0x16c] sm:$0xf] }
 0x49d   : > { %v7016_v14 = vadd.f32 %v7015_v11, %v12892_v2  ;;  %7929 = vmatmul.bf16.gmra.mxu2 %v10399_v16  ;;  %7885 = vmatmul.bf16.gmra.mxu1 %v10407_v23  ;;  %v11022_v16 = vld [vmem:[#allocation3 + $0x160] sm:$0xf0]  ;;  %v10423_v47 = vor.u32 %v11113_v59, %v10420_v36  ;;  %v11117_v11 = vld [vmem:[#allocation3 + $0x188] sm:$0xf0]  ;;  %v10430_v23 = vld [vmem:[#allocation3 + $0x180] sm:$0xf] }
 0x49f   : > { %v7065_v50 = vadd.f32 %v7064_v0, %v7016_v14  ;;  %7482 = vmatmul.bf16.gmra.mxu0 %v10223_v44  ;;  %v10246_v44 = vld [vmem:[#allocation3 + $0x158] sm:$0xf] }
 0x4a0   : > { %7978 = vmatmul.bf16.gmra.mxu3 %v10403_v12  ;;  %v7380_v5 = vpop.f32.mrf.mxu2  ;;  %v10426_v12 = vld [vmem:[#allocation3 + $0x170] sm:$0xf] }
 0x4a1   : > { %v7381_v57 = vadd.f32 %v7380_v5, %v7060_v6  ;;  %v10419_v6 = vor.u32 %v11114_v56, %v10418_v24  ;;  %v10427_v5 = vor.u32 %v11115_v32, %v10426_v12  ;;  %v11116_v56 = vld [vmem:[#allocation3 + $0x184] sm:$0xf]  ;;  %v10258_v24 = vld [vmem:[#allocation3 + $0x170] sm:$0xf]  ;;  %v11121_v32 = vld [vmem:[#allocation3 + $0x1a8] sm:$0xf0] }
 0x4a2   : > { %v7066_v2 = vpop.f32.mrf.mxu1 }
 0x4a3   : > { %v7429_v19 = vpop.f32.mrf.mxu3 }
 0x4a4   : > { %v12952_v8 = vadd.f32 %v7429_v19, %v7381_v57  ;;  %v7017_v37 = vpop.f32.mrf.mxu0 }
 0x4a5   : > { %v7018_v26 = vadd.f32 %v7017_v37, %v12897_v43  ;;  %v10235_v43 = vor.u32 %v11019_v52, %v10234_v1  ;;  %v10435_v1 = vor.u32 %v11116_v56, %v10432_v60 }
 0x4a7   : > { %v7067_v13 = vadd.f32 %v7066_v2, %v7018_v26 }
 0x4a8   : > { %v7382_v45 = vpop.f32.mrf.mxu2 }
 0x4a9   : > { %v7383_v25 = vadd.f32 %v7382_v45, %v7062_v9 }
 0x4aa   : > { %v7069_v3 = vpop.f32.mrf.mxu1 }
 0x4ab   : > { %v7431_v48 = vpop.f32.mrf.mxu3 }
 0x4ac   : > { %v12955_v33 = vadd.f32 %v7431_v48, %v7383_v25  ;;  %v7020_v40 = vpop.f32.mrf.mxu0  ;;  %v10442_v48 = vld [vmem:[#allocation3 + $0x198] sm:$0xf] }
 0x4ad   : > { %v7021_v10 = vadd.f32 %v7020_v40, %v12902_v15  ;;  %7934 = vmatmul.bf16.gmra.mxu2 %v10411_v28  ;;  %7890 = vmatmul.bf16.gmra.mxu1 %v10419_v6  ;;  %v11120_v28 = vld [vmem:[#allocation3 + $0x1a0] sm:$0xf0] }
 0x4ae   : > { %v10443_v21 = vor.u32 %v11120_v28, %v10442_v48 }
 0x4af   : > { %v7070_v49 = vadd.f32 %v7069_v3, %v7021_v10  ;;  %7487 = vmatmul.bf16.gmra.mxu0 %v10235_v43  ;;  %v11118_v10 = vld [vmem:[#allocation3 + $0x190] sm:$0xf0] }
 0x4b0   : > { %7983 = vmatmul.bf16.gmra.mxu3 %v10415_v39  ;;  %v7385_v53 = vpop.f32.mrf.mxu2  ;;  %v10259_v39 = vor.u32 %v11025_v62, %v10258_v24 }
 0x4b1   : > { %v7386_v38 = vadd.f32 %v7385_v53, %v7065_v50  ;;  %v10431_v50 = vor.u32 %v11117_v11, %v10430_v23  ;;  %v10450_v11 = vld [vmem:[#allocation3 + $0x1a0] sm:$0xf] }
 0x4b2   : > { %v7071_v15 = vpop.f32.mrf.mxu1 }
 0x4b3   : > { %v7434_v42 = vpop.f32.mrf.mxu3 }
 0x4b4   : > { %v12958_v31 = vadd.f32 %v7434_v42, %v7386_v38  ;;  %v7022_v9 = vpop.f32.mrf.mxu0 }
 0x4b5   : > { %v7023_v30 = vadd.f32 %v7022_v9, %v12907_v46  ;;  %v10247_v46 = vor.u32 %v11022_v16, %v10246_v44 }
 0x4b7   : > { %v7072_v54 = vadd.f32 %v7071_v15, %v7023_v30 }
 0x4b8   : > { %v7387_v35 = vpop.f32.mrf.mxu2 }
 0x4b9   : > { %v7388_v7 = vadd.f32 %v7387_v35, %v7067_v13 }
 0x4ba   : > { %v7074_v55 = vpop.f32.mrf.mxu1 }
 0x4bb   : > { %v7436_v17 = vpop.f32.mrf.mxu3 }
 0x4bc   : > { %v12961_v14 = vadd.f32 %v7436_v17, %v7388_v7  ;;  %v7025_v0 = vpop.f32.mrf.mxu0  ;;  %v11119_v7 = vld [vmem:[#allocation3 + $0x19c] sm:$0xf] }
 0x4bd   : > { %v7026_v51 = vadd.f32 %v7025_v0, %v12912_v34  ;;  %7939 = vmatmul.bf16.gmra.mxu2 %v10423_v47  ;;  %7895 = vmatmul.bf16.gmra.mxu1 %v10431_v50 }
 0x4bf   : > { %v7075_v57 = vadd.f32 %v7074_v55, %v7026_v51  ;;  %7492 = vmatmul.bf16.gmra.mxu0 %v10247_v46  ;;  %v10451_v55 = vor.u32 %v11121_v32, %v10450_v11 }
 0x4c0   : > { %7988 = vmatmul.bf16.gmra.mxu3 %v10427_v5  ;;  %v7390_v19 = vpop.f32.mrf.mxu2 }
 0x4c1   : > { %v7391_v37 = vadd.f32 %v7390_v19, %v7070_v49  ;;  %v10438_v49 = vld [vmem:[#allocation3 + $0x188] sm:$0xf] }
 0x4c2   : > { %v7076_v34 = vpop.f32.mrf.mxu1  ;;  %v10439_v53 = vor.u32 %v11118_v10, %v10438_v49 }
 0x4c3   : > { %v7439_v26 = vpop.f32.mrf.mxu3 }
 0x4c4   : > { %v12964_v2 = vadd.f32 %v7439_v26, %v7391_v37  ;;  %v7027_v13 = vpop.f32.mrf.mxu0 }
 0x4c5   : > { %v7028_v45 = vadd.f32 %v7027_v13, %v12917_v4 }
 0x4c7   : > { %v7077_v20 = vadd.f32 %v7076_v34, %v7028_v45 }
 0x4c8   : > { %v7392_v25 = vpop.f32.mrf.mxu2 }
 0x4c9   : > { %v7393_v52 = vadd.f32 %v7392_v25, %v7072_v54 }
 0x4ca   : > { %v7079_v4 = vpop.f32.mrf.mxu1 }
 0x4cb   : > { %v7441_v40 = vpop.f32.mrf.mxu3 }
 0x4cc   : > { %v12967_v3 = vadd.f32 %v7441_v40, %v7393_v52  ;;  %v7030_v43 = vpop.f32.mrf.mxu0  ;;  %v12983_v40 = vld [vmem:[%s13071_s5] ss:$0 sm:$0xff] }
 0x4cd   : > { %v7031_v6 = vadd.f32 %v7030_v43, %v12923_v18  ;;  %7944 = vmatmul.bf16.gmra.mxu2 %v10435_v1  ;;  %7900 = vmatmul.bf16.gmra.mxu1 %v10443_v21  ;;  %v10444_v18 = vld [vmem:[#allocation3 + $0x1a4] sm:$0xf0] }
 0x4ce   : > { %v10447_v47 = vor.u32 %v11119_v7, %v10444_v18 }
 0x4cf   : > { %v7080_v38 = vadd.f32 %v7079_v4, %v7031_v6  ;;  %7497 = vmatmul.bf16.gmra.mxu0 %v10259_v39 }
 0x4d0   : > { %7993 = vmatmul.bf16.gmra.mxu3 %v10439_v53  ;;  %v7395_v42 = vpop.f32.mrf.mxu2 }
 0x4d1   : > { %v7396_v9 = vadd.f32 %v7395_v42, %v7075_v57 }
 0x4d2   : > { %v7081_v36 = vpop.f32.mrf.mxu1 }
 0x4d3   : > { %v7444_v30 = vpop.f32.mrf.mxu3 }
 0x4d4   : > { %v12970_v15 = vadd.f32 %v7444_v30, %v7396_v9  ;;  %v7032_v54 = vpop.f32.mrf.mxu0 }
 0x4d5   : > { %v7033_v35 = vadd.f32 %v7032_v54, %v12929_v22 }
 0x4d7   : > { %v7082_v59 = vadd.f32 %v7081_v36, %v7033_v35 }
 0x4d8   : > { %v7397_v16 = vpop.f32.mrf.mxu2 }
 0x4d9   : > { %v7398_v17 = vadd.f32 %v7397_v16, %v7077_v20 }
 0x4da   : > { %v7866_v46 = vpop.f32.mrf.mxu1 }
 0x4db   : > { %v7446_v0 = vpop.f32.mrf.mxu3 }
 0x4dc   : > { %v12973_v44 = vadd.f32 %v7446_v0, %v7398_v17  ;;  %v7463_v51 = vpop.f32.mrf.mxu0 }
 0x4dd   : > { %7949 = vmatmul.bf16.gmra.mxu2 %v10447_v47  ;;  %v7464_v52 = vadd.f32 %v7463_v51, %v12934_v58 }
 0x4e0   : > { %7998 = vmatmul.bf16.gmra.mxu3 %v10451_v55  ;;  %v7400_v23 = vpop.f32.mrf.mxu2 }
 0x4e1   : > { %v7401_v12 = vadd.f32 %v7400_v23, %v7080_v38 }
 0x4e2   : > { %v7868_v57 = vpop.f32.mrf.mxu1 }
 0x4e3   : > { %v7449_v22 = vpop.f32.mrf.mxu3 }
 0x4e4   : > { %v12975_v50 = vadd.f32 %v7449_v22, %v7401_v12  ;;  %v7465_v5 = vpop.f32.mrf.mxu0 }
 0x4e5   : > { %v7466_v6 = vadd.f32 %v7465_v5, %v12937_v27 }
 0x4e8   : > { %v7402_v19 = vpop.f32.mrf.mxu2 }
 0x4e9   : > { %v7403_v37 = vadd.f32 %v7402_v19, %v7082_v59 }
 0x4ea   : > { %v7871_v34 = vpop.f32.mrf.mxu1 }
 0x4eb   : > { %v7451_v26 = vpop.f32.mrf.mxu3 }
 0x4ec   : > { %v12977_v13 = vadd.f32 %v7451_v26, %v7403_v37  ;;  %v7468_v45 = vpop.f32.mrf.mxu0 }
 0x4ed   : > { %v7469_v54 = vadd.f32 %v7468_v45, %v12940_v61 }
 0x4f0   : > { %v7915_v20 = vpop.f32.mrf.mxu2 }
 0x4f1   : > { %v7916_v25 = vadd.f32 %v7915_v20, %v7866_v46 }
 0x4f2   : > { %v7873_v56 = vpop.f32.mrf.mxu1 }
 0x4f3   : > { %v7964_v60 = vpop.f32.mrf.mxu3 }
 0x4f4   : > { %v7965_v48 = vadd.f32 %v7964_v60, %v7916_v25  ;;  %v7470_v28 = vpop.f32.mrf.mxu0 }
 0x4f5   : > { %v7471_v11 = vadd.f32 %v7470_v28, %v12943_v63 }
 0x4f6   : > { %v8004_v62 = vadd.f32 %v7965_v48, %v7464_v52 }
 0x4f8   : > { %v8020_v1 = vadd.f32 %v12983_v40, %v8004_v62  ;;  %v7917_v10 = vpop.f32.mrf.mxu2 }
 0x4f9   : > { %v7918_v43 = vadd.f32 %v7917_v10, %v7868_v57 }
 0x4fa   : > { %v8036_v24 = vmax.f32 %v8020_v1, 0.0  ;;  %v7876_v39 = vpop.f32.mrf.mxu1 }
 0x4fb   : > { %v7966_v21 = vpop.f32.mrf.mxu3 }
 0x4fc   : > { %10548 = vst [vmem:[%s12853_s11 + $0x80] sm:$0xff] %v8036_v24  ;;  %v7967_v58 = vadd.f32 %v7966_v21, %v7918_v43  ;;  %v7473_v4 = vpop.f32.mrf.mxu0 }
 0x4fd   : > { %v7474_v5 = vadd.f32 %v7473_v4, %v12946_v41 }
 0x4fe   : > { %v8005_v49 = vadd.f32 %v7967_v58, %v7466_v6 }
 0x500   : > { %v8021_v53 = vadd.f32 %v12983_v40, %v8005_v49  ;;  %v7920_v38 = vpop.f32.mrf.mxu2 }
 0x501   : > { %v7921_v42 = vadd.f32 %v7920_v38, %v7871_v34 }
 0x502   : > { %v8037_v9 = vmax.f32 %v8021_v53, 0.0  ;;  %v7878_v18 = vpop.f32.mrf.mxu1 }
 0x503   : > { %v7969_v30 = vpop.f32.mrf.mxu3 }
 0x504   : > { %10549 = vst [vmem:[%s12853_s11 + $0x88] sm:$0xff] %v8037_v9  ;;  %v7970_v35 = vadd.f32 %v7969_v30, %v7921_v42  ;;  %v7475_v36 = vpop.f32.mrf.mxu0 }
 0x505   : > { %v7476_v60 = vadd.f32 %v7475_v36, %v12949_v29 }
 0x506   : > { %v8006_v7 = vadd.f32 %v7970_v35, %v7469_v54 }
 0x508   : > { %v8022_v27 = vadd.f32 %v12983_v40, %v8006_v7  ;;  %v7922_v59 = vpop.f32.mrf.mxu2 }
 0x509   : > { %v7923_v16 = vadd.f32 %v7922_v59, %v7873_v56 }
 0x50a   : > { %v8038_v17 = vmax.f32 %v8022_v27, 0.0  ;;  %v7881_v55 = vpop.f32.mrf.mxu1 }
 0x50b   : > { %v7971_v47 = vpop.f32.mrf.mxu3 }
 0x50c   : > { %10550 = vst [vmem:[%s12853_s11 + $0x90] sm:$0xff] %v8038_v17  ;;  %v7972_v32 = vadd.f32 %v7971_v47, %v7923_v16  ;;  %v7478_v51 = vpop.f32.mrf.mxu0 }
 0x50d   : > { %v7479_v43 = vadd.f32 %v7478_v51, %v12952_v8 }
 0x50e   : > { %v8007_v0 = vadd.f32 %v7972_v32, %v7471_v11 }
 0x510   : > { %v8023_v61 = vadd.f32 %v12983_v40, %v8007_v0  ;;  %v7925_v46 = vpop.f32.mrf.mxu2 }
 0x511   : > { %v7926_v23 = vadd.f32 %v7925_v46, %v7876_v39 }
 0x512   : > { %v8039_v12 = vmax.f32 %v8023_v61, 0.0  ;;  %v7883_v20 = vpop.f32.mrf.mxu1 }
 0x513   : > { %v7974_v22 = vpop.f32.mrf.mxu3 }
 0x514   : > { %10551 = vst [vmem:[%s12853_s11 + $0x98] sm:$0xff] %v8039_v12  ;;  %v7975_v57 = vadd.f32 %v7974_v22, %v7926_v23  ;;  %v7480_v26 = vpop.f32.mrf.mxu0 }
 0x515   : > { %v7481_v53 = vadd.f32 %v7480_v26, %v12955_v33 }
 0x516   : > { %v8008_v19 = vadd.f32 %v7975_v57, %v7474_v5 }
 0x518   : > { %v8024_v37 = vadd.f32 %v12983_v40, %v8008_v19  ;;  %v7927_v63 = vpop.f32.mrf.mxu2 }
 0x519   : > { %v7928_v45 = vadd.f32 %v7927_v63, %v7878_v18 }
 0x51a   : > { %v8040_v34 = vmax.f32 %v8024_v37, 0.0  ;;  %v7886_v24 = vpop.f32.mrf.mxu1 }
 0x51b   : > { %v7976_v25 = vpop.f32.mrf.mxu3 }
 0x51c   : > { %10552 = vst [vmem:[%s12853_s11 + $0xa0] sm:$0xff] %v8040_v34  ;;  %v7977_v52 = vadd.f32 %v7976_v25, %v7928_v45  ;;  %v7483_v1 = vpop.f32.mrf.mxu0 }
 0x51d   : > { %v7484_v18 = vadd.f32 %v7483_v1, %v12958_v31 }
 0x51e   : > { %v8009_v48 = vadd.f32 %v7977_v52, %v7476_v60 }
 0x520   : > { %v8025_v28 = vadd.f32 %v12983_v40, %v8009_v48  ;;  %v7930_v41 = vpop.f32.mrf.mxu2 }
 0x521   : > { %v7931_v56 = vadd.f32 %v7930_v41, %v7881_v55 }
 0x522   : > { %v8041_v62 = vmax.f32 %v8025_v28, 0.0  ;;  %v7888_v9 = vpop.f32.mrf.mxu1 }
 0x523   : > { %v7979_v10 = vpop.f32.mrf.mxu3 }
 0x524   : > { %10553 = vst [vmem:[%s12853_s11 + $0xa8] sm:$0xff] %v8041_v62  ;;  %v7980_v21 = vadd.f32 %v7979_v10, %v7931_v56  ;;  %v7485_v42 = vpop.f32.mrf.mxu0 }
 0x525   : > { %v7486_v51 = vadd.f32 %v7485_v42, %v12961_v14 }
 0x526   : > { %v8010_v6 = vadd.f32 %v7980_v21, %v7479_v43 }
 0x528   : > { %v8026_v58 = vadd.f32 %v12983_v40, %v8010_v6  ;;  %v7932_v29 = vpop.f32.mrf.mxu2 }
 0x529   : > { %v7933_v4 = vadd.f32 %v7932_v29, %v7883_v20 }
 0x52a   : > { %v8042_v39 = vmax.f32 %v8026_v58, 0.0  ;;  %v7891_v17 = vpop.f32.mrf.mxu1 }
 0x52b   : > { %v7981_v49 = vpop.f32.mrf.mxu3 }
 0x52c   : > { %10554 = vst [vmem:[%s12853_s11 + $0xb0] sm:$0xff] %v8042_v39  ;;  %v7982_v38 = vadd.f32 %v7981_v49, %v7933_v4  ;;  %v7488_v16 = vpop.f32.mrf.mxu0 }
 0x52d   : > { %v7489_v19 = vadd.f32 %v7488_v16, %v12964_v2 }
 0x52e   : > { %v8011_v30 = vadd.f32 %v7982_v38, %v7481_v53 }
 0x530   : > { %v8027_v8 = vadd.f32 %v12983_v40, %v8011_v30  ;;  %v7935_v54 = vpop.f32.mrf.mxu2 }
 0x531   : > { %v7936_v35 = vadd.f32 %v7935_v54, %v7886_v24 }
 0x532   : > { %v8043_v36 = vmax.f32 %v8027_v8, 0.0  ;;  %v7893_v22 = vpop.f32.mrf.mxu1 }
 0x533   : > { %v7984_v7 = vpop.f32.mrf.mxu3 }
 0x534   : > { %10555 = vst [vmem:[%s12853_s11 + $0xb8] sm:$0xff] %v8043_v36  ;;  %v7985_v27 = vadd.f32 %v7984_v7, %v7936_v35  ;;  %v7490_v23 = vpop.f32.mrf.mxu0 }
 0x535   : > { %v7491_v60 = vadd.f32 %v7490_v23, %v12967_v3 }
 0x536   : > { %v8012_v59 = vadd.f32 %v7985_v27, %v7484_v18 }
 0x538   : > { %v8028_v33 = vadd.f32 %v12983_v40, %v8012_v59  ;;  %v7937_v47 = vpop.f32.mrf.mxu2 }
 0x539   : > { %v7938_v11 = vadd.f32 %v7937_v47, %v7888_v9 }
 0x53a   : > { %v8044_v32 = vmax.f32 %v8028_v33, 0.0  ;;  %v7896_v52 = vpop.f32.mrf.mxu1 }
 0x53b   : > { %v7986_v0 = vpop.f32.mrf.mxu3 }
 0x53c   : > { %10556 = vst [vmem:[%s12853_s11 + $0xc0] sm:$0xff] %v8044_v32  ;;  %v7987_v61 = vadd.f32 %v7986_v0, %v7938_v11  ;;  %v7493_v20 = vpop.f32.mrf.mxu0 }
 0x53d   : > { %v7494_v10 = vadd.f32 %v7493_v20, %v12970_v15 }
 0x53e   : > { %v8013_v55 = vadd.f32 %v7987_v61, %v7486_v51 }
 0x540   : > { %v8029_v46 = vadd.f32 %v12983_v40, %v8013_v55  ;;  %v7940_v31 = vpop.f32.mrf.mxu2 }
 0x541   : > { %v7941_v12 = vadd.f32 %v7940_v31, %v7891_v17 }
 0x542   : > { %v8045_v5 = vmax.f32 %v8029_v46, 0.0  ;;  %v7898_v21 = vpop.f32.mrf.mxu1 }
 0x543   : > { %v7989_v57 = vpop.f32.mrf.mxu3 }
 0x544   : > { %10557 = vst [vmem:[%s12853_s11 + $0xc8] sm:$0xff] %v8045_v5  ;;  %v7990_v37 = vadd.f32 %v7989_v57, %v7941_v12  ;;  %v7495_v24 = vpop.f32.mrf.mxu0 }
 0x545   : > { %v7496_v49 = vadd.f32 %v7495_v24, %v12973_v44 }
 0x546   : > { %v8014_v63 = vadd.f32 %v7990_v37, %v7489_v19 }
 0x548   : > { %v8030_v26 = vadd.f32 %v12983_v40, %v8014_v63  ;;  %v7942_v14 = vpop.f32.mrf.mxu2 }
 0x549   : > { %v7943_v45 = vadd.f32 %v7942_v14, %v7893_v22 }
 0x54a   : > { %v8046_v34 = vmax.f32 %v8030_v26, 0.0  ;;  %v7901_v38 = vpop.f32.mrf.mxu1 }
 0x54b   : > { %v7991_v25 = vpop.f32.mrf.mxu3 }
 0x54c   : > { %10558 = vst [vmem:[%s12853_s11 + $0xd0] sm:$0xff] %v8046_v34  ;;  %v7992_v48 = vadd.f32 %v7991_v25, %v7943_v45  ;;  %v7498_v15 = vpop.f32.mrf.mxu0 }
 0x54d   : > { %v7499_v36 = vadd.f32 %v7498_v15, %v12975_v50 }
 0x54e   : > { %v8015_v28 = vadd.f32 %v7992_v48, %v7491_v60 }
 0x550   : > { %v8031_v41 = vadd.f32 %v12983_v40, %v8015_v28  ;;  %v7945_v2 = vpop.f32.mrf.mxu2 }
 0x551   : > { %v7946_v56 = vadd.f32 %v7945_v2, %v7896_v52 }
 0x552   : > { %v8047_v62 = vmax.f32 %v8031_v41, 0.0  ;;  %v7903_v44 = vpop.f32.mrf.mxu1 }
 0x553   : > { %v7994_v1 = vpop.f32.mrf.mxu3 }
 0x554   : > { %10559 = vst [vmem:[%s12853_s11 + $0xd8] sm:$0xff] %v8047_v62  ;;  %v7995_v43 = vadd.f32 %v7994_v1, %v7946_v56  ;;  %v7500_v16 = vpop.f32.mrf.mxu0 }
 0x555   : > { %v7501_v50 = vadd.f32 %v7500_v16, %v12977_v13 }
 0x556   : > { %v8016_v6 = vadd.f32 %v7995_v43, %v7494_v10 }
 0x558   : > { %v8032_v3 = vadd.f32 %v12983_v40, %v8016_v6  ;;  %v7947_v58 = vpop.f32.mrf.mxu2 }
 0x559   : > { %v7948_v29 = vadd.f32 %v7947_v58, %v7898_v21 }
 0x55a   : > { %v8048_v4 = vmax.f32 %v8032_v3, 0.0 }
 0x55b   : > { %v7996_v39 = vpop.f32.mrf.mxu3 }
 0x55c   : > { %10560 = vst [vmem:[%s12853_s11 + $0xe0] sm:$0xff] %v8048_v4  ;;  %v7997_v53 = vadd.f32 %v7996_v39, %v7948_v29 }
 0x55e   : > { %v8017_v42 = vadd.f32 %v7997_v53, %v7496_v49 }
 0x560   : > { %v8033_v9 = vadd.f32 %v12983_v40, %v8017_v42  ;;  %v7950_v30 = vpop.f32.mrf.mxu2 }
 0x561   : > { %v7951_v8 = vadd.f32 %v7950_v30, %v7901_v38 }
 0x562   : > { %v8049_v54 = vmax.f32 %v8033_v9, 0.0 }
 0x563   : > { %v7999_v35 = vpop.f32.mrf.mxu3 }
 0x564   : > { %10561 = vst [vmem:[%s12853_s11 + $0xe8] sm:$0xff] %v8049_v54  ;;  %v8000_v7 = vadd.f32 %v7999_v35, %v7951_v8 }
 0x566   : > { %v8018_v18 = vadd.f32 %v8000_v7, %v7499_v36 }
 0x568   : > { %v8034_v27 = vadd.f32 %v12983_v40, %v8018_v18  ;;  %v7952_v59 = vpop.f32.mrf.mxu2 }
 0x569   : > { %v7953_v17 = vadd.f32 %v7952_v59, %v7903_v44 }
 0x56a   : > { %v8050_v33 = vmax.f32 %v8034_v27, 0.0 }
 0x56b   : > { %v8001_v47 = vpop.f32.mrf.mxu3 }
 0x56c   : > { %10562 = vst [vmem:[%s12853_s11 + $0xf0] sm:$0xff] %v8050_v33  ;;  %v8002_v11 = vadd.f32 %v8001_v47, %v7953_v17 }
 0x56e   : > { %v8019_v32 = vadd.f32 %v8002_v11, %v7501_v50 }
 0x570   : > { %v8035_v0 = vadd.f32 %v12983_v40, %v8019_v32 }
 0x572   : > { %v8051_v51 = vmax.f32 %v8035_v0, 0.0 }
 0x574   : > { %10563 = vst [vmem:[%s12853_s11 + $0xf8] sm:$0xff] %v8051_v51 }
 0x575   : > { %11383 = shalt.err (!%p11380_p10)
}
 0x576   : > { %s11441_s26 = smov 128   ;;  %s11442_s11 = smov 8  }
 0x577   : > { %11161 = dma.vmem_to_hbm [thread:$0]  (%p11563_p3), %s8083_s19, 4096, %s8085_s27, %s8070_s25, %s11441_s26, %s11441_s26, %s11442_s11  }
 0x578 PF: > { %s8099_s18 = sand.u32 1, %s11418_s21   ;;  %p13188_p12 = scmp.ge.s32.totalorder %s11430_s24, 2 }
 0x579   : > { %s8100_s7 = scalar_lea.sflag [#allocation6], %s8099_s18 }
 0x57a   : > { %p11178_p13 = pnand %p13188_p12, %p11513_p6 }
 0x57c   : > { %p11179_p0 = pneg %p11178_p13 }
 0x57e   : > { %11413 = dma.done.wait (%p11179_p0), %s8100_s7, 4096  }
 0x57f   : > { %11415 = vsyncadd (%p11179_p0), %s8100_s7, 4294963200  ;;  %p21_p5 = scmp.ge.s32.totalorder %s11550_s10, 4   ;;  %s13189_s21 = smov %s11422_s22 }
 0x580   : > { %s13190_s22 = smov %s11426_s23  ;;  %s13191_s23 = smov %s11559_s14 }
 0x581   : > { %s13192_s24 = smov %s11550_s10  ;;  %23 = sbr.rel (!%p21_p5) target bundleno = 7 (0x7), region = 118 }
 0x586   :  { %8106 = vsyncpa [#allocation5], 1 }
 0x587   :  { %8108 = vsyncpa [#allocation5 + $0x1], 1 }
 0x588   :  { %8109 = vsyncpa [#allocation8], 1 }
 0x589   :  { %8110 = vsyncpa [#allocation11], 1 }
 0x58a   :  { %8111 = vsyncpa [#allocation6], 1 }
 0x58b   :  { %8113 = vsyncpa [#allocation6 + $0x1], 1 }

</bundles_post_ra>
